<compile_context>
chip_gen: v7x
topology: tpu7x:2x2x1
jax: 0.10.0
libtpu: 0.0.40
codegen_flags: <defaults>
</compile_context>

<pallas_src>
import functools

import jax
import jax.numpy as jnp
import numpy as np
from jax.experimental import pallas as pl
from jax.experimental.pallas import tpu as pltpu

CIN = 896    # input channels (must equal 896 for the residual add, as in the module)
CMID = 128   # conv1 / conv1x7 / conv7x1 channels
CCAT = 256   # concat channels
COUT = 896   # "line" conv output channels
PAD = 3
K = 7
SCALE = 0.3
EPS = 1e-5


def _inception_b_kernel(x_ref, w1t_ref, s_ref, t_ref, w17_ref, b17_ref,
                        w71_ref, b71_ref, wl_ref, bl_ref, o_ref,
                        pad_w, pad_h, *, NB, H, W):
    HW = H * W
    M = NB * HW

    # Scratch persists across grid steps: re-zero only the PAD borders each step
    # (the interiors are fully overwritten below).
    pad_w[:, 0:PAD, :] = jnp.zeros((NB * H, PAD, CMID), jnp.float32)
    pad_w[:, PAD + W:2 * PAD + W, :] = jnp.zeros((NB * H, PAD, CMID), jnp.float32)
    pad_h[:, 0:PAD, :, :] = jnp.zeros((NB, PAD, W, CMID), jnp.float32)
    pad_h[:, PAD + H:2 * PAD + H, :, :] = jnp.zeros((NB, PAD, W, CMID), jnp.float32)

    # ---- conv1: 1x1 conv + folded (eval-mode) BN + ReLU, channels-first per image ----
    # c1_cf[b] = relu(s * (w1^T @ x_cf[b]) + t)  : (128, HW).  Shared by both branches.
    c1_cf = []
    for b in range(NB):
        xb = x_ref[b]                                                    # (896, HW) f32
        c1b = jnp.dot(w1t_ref[...], xb.astype(jnp.bfloat16),
                      preferred_element_type=jnp.float32)                # (128, HW) f32
        c1b = jnp.maximum(c1b * s_ref[...] + t_ref[...], 0.0)
        c1_cf.append(c1b)
        # Relayout only the small 128-channel map to pixel-major rows for the spatial convs.
        rows = jnp.transpose(c1b, (1, 0)).reshape(H, W, CMID)            # (H, W, 128)
        pad_w[b * H:(b + 1) * H, PAD:PAD + W, :] = rows

    # ---- conv1x7 (along W) + ReLU: 7 accumulating bf16 dots over shifted windows ----
    c2_1 = None
    for k in range(K):
        lhs = pad_w[:, k:k + W, :].reshape(M, CMID).astype(jnp.bfloat16)
        term = jnp.dot(lhs, w17_ref[k], preferred_element_type=jnp.float32)
        c2_1 = term if c2_1 is None else c2_1 + term
    c2_1 = jnp.maximum(c2_1 + b17_ref[...], 0.0)                         # (M, 128) f32

    # ---- conv7x1 (along H) + ReLU ----
    pad_h[:, PAD:PAD + H, :, :] = c2_1.reshape(NB, H, W, CMID)
    c2_2 = None
    for k in range(K):
        lhs = pad_h[:, k:k + H, :, :].reshape(M, CMID).astype(jnp.bfloat16)
        term = jnp.dot(lhs, w71_ref[k], preferred_element_type=jnp.float32)
        c2_2 = term if c2_2 is None else c2_2 + term
    c2_2 = jnp.maximum(c2_2 + b71_ref[...], 0.0)                         # (M, 128) f32

    # ---- "line" 1x1 conv over concat([c1, c2_2]) + scaled residual + ReLU -------------
    # Channels-first: line_cf = wl^T[:, :128] @ c1_cf + wl^T[:, 128:] @ c2_2_cf + bl.
    wl1 = wl_ref[:, 0:CMID]                                              # (896, 128) bf16
    wl2 = wl_ref[:, CMID:CCAT]                                           # (896, 128) bf16
    for b in range(NB):
        part1 = jnp.dot(wl1, c1_cf[b].astype(jnp.bfloat16),
                        preferred_element_type=jnp.float32)              # (896, HW)
        c2b = c2_2[b * HW:(b + 1) * HW, :].astype(jnp.bfloat16)          # (HW, 128)
        part2 = jax.lax.dot_general(                                     # contract lane dims
            wl2, c2b, dimension_numbers=(((1,), (1,)), ((), ())),
            preferred_element_type=jnp.float32)                          # (896, HW)
        line = part1 + part2 + bl_ref[...]
        o_ref[b] = jnp.maximum(SCALE * x_ref[b] + line, 0.0).astype(o_ref.dtype)


def inception_resnet_b(x_nchw, params, *, nb=None, out_dtype=jnp.float32):
    """x_nchw: (N, 896, H, W) float32.  Returns (N, 896, H, W) in `out_dtype`."""
    w1, s, t, w17, b17, w71, b71, wl, bl = params
    N, C, H, W = x_nchw.shape
    assert C == CIN and CIN == COUT, "residual add requires 896 in/out channels"
    HW = H * W
    if nb is None:
        # >= 2 grid steps keeps both v7x TensorCores busy; on single-TC v5e/v6e a larger
        # nb (up to N) amortizes per-step overhead -- override via `nb`.
        nb = N // 2 if (N % 2 == 0 and N >= 2) else N
    assert N % nb == 0, "batch must be divisible by the per-step block size"

    # Free (layout-preserving) reshape NCHW -> (N, C, H*W): no HBM transpose pass.
    x = x_nchw.reshape(N, CIN, HW).astype(jnp.float32)

    # Weights pre-transposed for channels-first matmuls, shipped in bf16.
    w1t = jnp.transpose(w1).astype(jnp.bfloat16)        # (128, 896)
    w17_bf = w17.astype(jnp.bfloat16)                    # (7, 128, 128)  (kw, in, out)
    w71_bf = w71.astype(jnp.bfloat16)                    # (7, 128, 128)  (kh, in, out)
    wl_cf = jnp.transpose(wl).astype(jnp.bfloat16)       # (896, 256)

    kern = functools.partial(_inception_b_kernel, NB=nb, H=H, W=W)
    const = dict(pipeline_mode=pl.Buffered(1))           # single-buffer constant operands
    out = pl.pallas_call(
        kern,
        out_shape=jax.ShapeDtypeStruct((N, COUT, HW), out_dtype),
        grid_spec=pltpu.PrefetchScalarGridSpec(
            num_scalar_prefetch=0,
            grid=(N // nb,),
            in_specs=[
                pl.BlockSpec((nb, CIN, HW), lambda n: (n, 0, 0)),
                pl.BlockSpec((CMID, CIN), lambda n: (0, 0), **const),
                pl.BlockSpec((CMID, 1), lambda n: (0, 0), **const),
                pl.BlockSpec((CMID, 1), lambda n: (0, 0), **const),
                pl.BlockSpec((K, CMID, CMID), lambda n: (0, 0, 0), **const),
                pl.BlockSpec((1, CMID), lambda n: (0, 0), **const),
                pl.BlockSpec((K, CMID, CMID), lambda n: (0, 0, 0), **const),
                pl.BlockSpec((1, CMID), lambda n: (0, 0), **const),
                pl.BlockSpec((COUT, CCAT), lambda n: (0, 0), **const),
                pl.BlockSpec((COUT, 1), lambda n: (0, 0), **const),
            ],
            out_specs=pl.BlockSpec((nb, COUT, HW), lambda n: (n, 0, 0)),
            scratch_shapes=[
                pltpu.VMEM((nb * H, W + 2 * PAD, CMID), jnp.float32),   # pad along W
                pltpu.VMEM((nb, H + 2 * PAD, W, CMID), jnp.float32),    # pad along H
            ],
        ),
        compiler_params=pltpu.CompilerParams(
            dimension_semantics=("parallel",),
            vmem_limit_bytes=32 * 1024 * 1024,
        ),
    )(x, w1t, s.reshape(CMID, 1), t.reshape(CMID, 1), w17_bf,
      b17.reshape(1, CMID), w71_bf, b71.reshape(1, CMID), wl_cf,
      bl.reshape(COUT, 1))
    return out.reshape(N, COUT, H, W)


def init_params(key):
    ks = jax.random.split(key, 12)
    w1 = jax.random.normal(ks[0], (CIN, CMID), jnp.float32) * 0.02     # conv1 1x1 (in, out)
    b1 = jax.random.normal(ks[1], (CMID,), jnp.float32) * 0.02
    gamma = jax.random.uniform(ks[2], (CMID,), jnp.float32, 0.5, 1.5)  # BN weight
    beta = jax.random.normal(ks[3], (CMID,), jnp.float32) * 0.1        # BN bias
    rmean = jax.random.normal(ks[4], (CMID,), jnp.float32) * 0.1       # BN running_mean
    rvar = jax.random.uniform(ks[5], (CMID,), jnp.float32, 0.5, 1.5)   # BN running_var
    w17 = jax.random.normal(ks[6], (K, CMID, CMID), jnp.float32) * 0.02  # (kw, in, out)
    b17 = jax.random.normal(ks[7], (CMID,), jnp.float32) * 0.02
    w71 = jax.random.normal(ks[8], (K, CMID, CMID), jnp.float32) * 0.02  # (kh, in, out)
    b71 = jax.random.normal(ks[9], (CMID,), jnp.float32) * 0.02
    wl = jax.random.normal(ks[10], (CCAT, COUT), jnp.float32) * 0.02    # line 1x1 (in, out)
    bl = jax.random.normal(ks[11], (COUT,), jnp.float32) * 0.02

    # Fold conv1 bias + eval-mode BatchNorm into per-channel (scale, bias).
    s = gamma / jnp.sqrt(rvar + EPS)
    t = (b1 - rmean) * s + beta
    kernel_params = (w1, s, t, w17, b17, w71, b71, wl, bl)
    raw_params = (w1, b1, gamma, beta, rmean, rvar, w17, b17, w71, b71, wl, bl)
    return kernel_params, raw_params


def reference(x_nchw, raw_params):
    """Pure-JAX reference mirroring the PyTorch forward (eval-mode BN)."""
    w1, b1, gamma, beta, rmean, rvar, w17, b17, w71, b71, wl, bl = raw_params
    hi = jax.lax.Precision.HIGHEST
    x = jnp.transpose(x_nchw, (0, 2, 3, 1)).astype(jnp.float32)
    c1 = jnp.einsum('nhwc,cd->nhwd', x, w1, precision=hi) + b1
    c1 = jnp.maximum((c1 - rmean) / jnp.sqrt(rvar + EPS) * gamma + beta, 0.0)
    c2_1 = jax.lax.conv_general_dilated(
        c1, w17[None], (1, 1), ((0, 0), (PAD, PAD)),
        dimension_numbers=('NHWC', 'HWIO', 'NHWC'), precision=hi) + b17
    c2_1 = jnp.maximum(c2_1, 0.0)
    c2_2 = jax.lax.conv_general_dilated(
        c2_1, w71[:, None], (1, 1), ((PAD, PAD), (0, 0)),
        dimension_numbers=('NHWC', 'HWIO', 'NHWC'), precision=hi) + b71
    c2_2 = jnp.maximum(c2_2, 0.0)
    cat = jnp.concatenate([c1, c2_2], axis=-1)
    line = jnp.einsum('nhwc,cd->nhwd', cat, wl, precision=hi) + bl
    out = jnp.maximum(SCALE * x + line, 0.0)
    return jnp.transpose(out, (0, 3, 1, 2))


if __name__ == "__main__":
    key = jax.random.PRNGKey(0)
    kx, kp = jax.random.split(key)
    N, H, W = 4, 16, 8
    x = jax.random.normal(kx, (N, CIN, H, W), jnp.float32)

    kernel_params, raw_params = init_params(kp)

    out = jax.block_until_ready(inception_resnet_b(x, kernel_params))
    assert out.shape == (N, COUT, H, W) and out.dtype == jnp.float32

    ref = jax.block_until_ready(reference(x, raw_params))
    np.testing.assert_allclose(np.asarray(out), np.asarray(ref), rtol=2e-2, atol=2e-2)

    print("KERNEL_OK")
</pallas_src>

<mosaic_0001>
module attributes {stable_mosaic.version = 11 : i64} {
  func.func @_inception_b_kernel(%arg0: i32, %arg1: memref<2x896x128xf32, #tpu.memory_space<vmem>>, %arg2: memref<128x896xbf16, #tpu.memory_space<vmem>>, %arg3: memref<128x1xf32, #tpu.memory_space<vmem>>, %arg4: memref<128x1xf32, #tpu.memory_space<vmem>>, %arg5: memref<7x128x128xbf16, #tpu.memory_space<vmem>>, %arg6: memref<1x128xf32, #tpu.memory_space<vmem>>, %arg7: memref<7x128x128xbf16, #tpu.memory_space<vmem>>, %arg8: memref<1x128xf32, #tpu.memory_space<vmem>>, %arg9: memref<896x256xbf16, #tpu.memory_space<vmem>>, %arg10: memref<896x1xf32, #tpu.memory_space<vmem>>, %arg11: memref<2x896x128xf32, #tpu.memory_space<vmem>>, %arg12: memref<32x14x128xf32, #tpu.memory_space<vmem>>, %arg13: memref<2x22x8x128xf32, #tpu.memory_space<vmem>>) attributes {dimension_semantics = [#tpu.dimension_semantics<parallel>], iteration_bounds = array<i64: 2>, scalar_prefetch = 0 : i64, scratch_operands = 2 : i64, tpu.core_type = #tpu.core_type<tc>, window_params = [{transform_indices = @transform_0, window_bounds = array<i64: 2, 896, 128>}, {pipeline_mode = #tpu.pipeline_mode<synchronous>, transform_indices = @transform_1, window_bounds = array<i64: 128, 896>}, {pipeline_mode = #tpu.pipeline_mode<synchronous>, transform_indices = @transform_2, window_bounds = array<i64: 128, 1>}, {pipeline_mode = #tpu.pipeline_mode<synchronous>, transform_indices = @transform_3, window_bounds = array<i64: 128, 1>}, {pipeline_mode = #tpu.pipeline_mode<synchronous>, transform_indices = @transform_4, window_bounds = array<i64: 7, 128, 128>}, {pipeline_mode = #tpu.pipeline_mode<synchronous>, transform_indices = @transform_5, window_bounds = array<i64: 1, 128>}, {pipeline_mode = #tpu.pipeline_mode<synchronous>, transform_indices = @transform_6, window_bounds = array<i64: 7, 128, 128>}, {pipeline_mode = #tpu.pipeline_mode<synchronous>, transform_indices = @transform_7, window_bounds = array<i64: 1, 128>}, {pipeline_mode = #tpu.pipeline_mode<synchronous>, transform_indices = @transform_8, window_bounds = array<i64: 896, 256>}, {pipeline_mode = #tpu.pipeline_mode<synchronous>, transform_indices = @transform_9, window_bounds = array<i64: 896, 1>}, {transform_indices = @transform_10, window_bounds = array<i64: 2, 896, 128>}]} {
    %cst = arith.constant 0.000000e+00 : f32
    %0 = vector.broadcast %cst : f32 to vector<32x3x128xf32>
    %c0 = arith.constant 0 : index
    %c0_0 = arith.constant 0 : index
    %c0_1 = arith.constant 0 : index
    %1 = vector.load %arg12[%c0, %c0_0, %c0_1] : memref<32x14x128xf32, #tpu.memory_space<vmem>>, vector<32x3x128xf32>
    tpu.vector_store %arg12[%c0, %c0_0, %c0_1], %0 {strides = array<i32>} : memref<32x14x128xf32, #tpu.memory_space<vmem>>, vector<32x3x128xf32>,
    %cst_2 = arith.constant 0.000000e+00 : f32
    %2 = vector.broadcast %cst_2 : f32 to vector<32x3x128xf32>
    %c0_3 = arith.constant 0 : index
    %c11 = arith.constant 11 : index
    %c0_4 = arith.constant 0 : index
    %3 = vector.load %arg12[%c0_3, %c11, %c0_4] : memref<32x14x128xf32, #tpu.memory_space<vmem>>, vector<32x3x128xf32>
    tpu.vector_store %arg12[%c0_3, %c11, %c0_4], %2 {strides = array<i32>} : memref<32x14x128xf32, #tpu.memory_space<vmem>>, vector<32x3x128xf32>,
    %cst_5 = arith.constant 0.000000e+00 : f32
    %4 = vector.broadcast %cst_5 : f32 to vector<2x3x8x128xf32>
    %c0_6 = arith.constant 0 : index
    %c0_7 = arith.constant 0 : index
    %c0_8 = arith.constant 0 : index
    %c0_9 = arith.constant 0 : index
    %5 = vector.load %arg13[%c0_6, %c0_7, %c0_8, %c0_9] : memref<2x22x8x128xf32, #tpu.memory_space<vmem>>, vector<2x3x8x128xf32>
    tpu.vector_store %arg13[%c0_6, %c0_7, %c0_8, %c0_9], %4 {strides = array<i32>} : memref<2x22x8x128xf32, #tpu.memory_space<vmem>>, vector<2x3x8x128xf32>,
    %cst_10 = arith.constant 0.000000e+00 : f32
    %6 = vector.broadcast %cst_10 : f32 to vector<2x3x8x128xf32>
    %c0_11 = arith.constant 0 : index
    %c19 = arith.constant 19 : index
    %c0_12 = arith.constant 0 : index
    %c0_13 = arith.constant 0 : index
    %7 = vector.load %arg13[%c0_11, %c19, %c0_12, %c0_13] : memref<2x22x8x128xf32, #tpu.memory_space<vmem>>, vector<2x3x8x128xf32>
    tpu.vector_store %arg13[%c0_11, %c19, %c0_12, %c0_13], %6 {strides = array<i32>} : memref<2x22x8x128xf32, #tpu.memory_space<vmem>>, vector<2x3x8x128xf32>,
    %c0_14 = arith.constant 0 : index
    %c0_15 = arith.constant 0 : index
    %c0_16 = arith.constant 0 : index
    %8 = vector.load %arg1[%c0_14, %c0_15, %c0_16] : memref<2x896x128xf32, #tpu.memory_space<vmem>>, vector<1x896x128xf32>
    %9 = vector.shape_cast %8 : vector<1x896x128xf32> to vector<896x128xf32>
    %c0_17 = arith.constant 0 : index
    %c0_18 = arith.constant 0 : index
    %10 = vector.load %arg2[%c0_17, %c0_18] : memref<128x896xbf16, #tpu.memory_space<vmem>>, vector<128x896xbf16>
    %11 = arith.truncf %9 : vector<896x128xf32> to vector<896x128xbf16>
    %cst_19 = arith.constant dense<0.000000e+00> : vector<128x128xf32>
    %12 = tpu.matmul %10, %11, %cst_19 {dimension_numbers = #tpu.dot_dimension_numbers<[1], [0], [0], [1], [0, 0, 1, 1], [], []>} : vector<128x896xbf16>, vector<896x128xbf16>, vector<128x128xf32> -> vector<128x128xf32>
    %c0_20 = arith.constant 0 : index
    %c0_21 = arith.constant 0 : index
    %13 = vector.load %arg3[%c0_20, %c0_21] : memref<128x1xf32, #tpu.memory_space<vmem>>, vector<128x1xf32>
    %14 = vector.broadcast %13 : vector<128x1xf32> to vector<128x128xf32>
    %15 = arith.mulf %12, %14 : vector<128x128xf32>
    %c0_22 = arith.constant 0 : index
    %c0_23 = arith.constant 0 : index
    %16 = vector.load %arg4[%c0_22, %c0_23] : memref<128x1xf32, #tpu.memory_space<vmem>>, vector<128x1xf32>
    %17 = vector.broadcast %16 : vector<128x1xf32> to vector<128x128xf32>
    %18 = arith.addf %15, %17 : vector<128x128xf32>
    %cst_24 = arith.constant 0.000000e+00 : f32
    %19 = vector.broadcast %cst_24 : f32 to vector<128x128xf32>
    %20 = arith.maximumf %18, %19 : vector<128x128xf32>
    %21 = tpu.transpose %20, [1, 0] : vector<128x128xf32> -> vector<128x128xf32>
    %22 = vector.shape_cast %21 : vector<128x128xf32> to vector<16x8x128xf32>
    %c0_25 = arith.constant 0 : index
    %c3 = arith.constant 3 : index
    %c0_26 = arith.constant 0 : index
    %23 = vector.load %arg12[%c0_25, %c3, %c0_26] : memref<32x14x128xf32, #tpu.memory_space<vmem>>, vector<16x8x128xf32>
    tpu.vector_store %arg12[%c0_25, %c3, %c0_26], %22 {strides = array<i32>} : memref<32x14x128xf32, #tpu.memory_space<vmem>>, vector<16x8x128xf32>,
    %c1 = arith.constant 1 : index
    %c0_27 = arith.constant 0 : index
    %c0_28 = arith.constant 0 : index
    %24 = vector.load %arg1[%c1, %c0_27, %c0_28] : memref<2x896x128xf32, #tpu.memory_space<vmem>>, vector<1x896x128xf32>
    %25 = vector.shape_cast %24 : vector<1x896x128xf32> to vector<896x128xf32>
    %c0_29 = arith.constant 0 : index
    %c0_30 = arith.constant 0 : index
    %26 = vector.load %arg2[%c0_29, %c0_30] : memref<128x896xbf16, #tpu.memory_space<vmem>>, vector<128x896xbf16>
    %27 = arith.truncf %25 : vector<896x128xf32> to vector<896x128xbf16>
    %cst_31 = arith.constant dense<0.000000e+00> : vector<128x128xf32>
    %28 = tpu.matmul %26, %27, %cst_31 {dimension_numbers = #tpu.dot_dimension_numbers<[1], [0], [0], [1], [0, 0, 1, 1], [], []>} : vector<128x896xbf16>, vector<896x128xbf16>, vector<128x128xf32> -> vector<128x128xf32>
    %c0_32 = arith.constant 0 : index
    %c0_33 = arith.constant 0 : index
    %29 = vector.load %arg3[%c0_32, %c0_33] : memref<128x1xf32, #tpu.memory_space<vmem>>, vector<128x1xf32>
    %30 = vector.broadcast %29 : vector<128x1xf32> to vector<128x128xf32>
    %31 = arith.mulf %28, %30 : vector<128x128xf32>
    %c0_34 = arith.constant 0 : index
    %c0_35 = arith.constant 0 : index
    %32 = vector.load %arg4[%c0_34, %c0_35] : memref<128x1xf32, #tpu.memory_space<vmem>>, vector<128x1xf32>
    %33 = vector.broadcast %32 : vector<128x1xf32> to vector<128x128xf32>
    %34 = arith.addf %31, %33 : vector<128x128xf32>
    %cst_36 = arith.constant 0.000000e+00 : f32
    %35 = vector.broadcast %cst_36 : f32 to vector<128x128xf32>
    %36 = arith.maximumf %34, %35 : vector<128x128xf32>
    %37 = tpu.transpose %36, [1, 0] : vector<128x128xf32> -> vector<128x128xf32>
    %38 = vector.shape_cast %37 : vector<128x128xf32> to vector<16x8x128xf32>
    %c16 = arith.constant 16 : index
    %c3_37 = arith.constant 3 : index
    %c0_38 = arith.constant 0 : index
    %39 = vector.load %arg12[%c16, %c3_37, %c0_38] : memref<32x14x128xf32, #tpu.memory_space<vmem>>, vector<16x8x128xf32>
    tpu.vector_store %arg12[%c16, %c3_37, %c0_38], %38 {strides = array<i32>} : memref<32x14x128xf32, #tpu.memory_space<vmem>>, vector<16x8x128xf32>,
    %c0_39 = arith.constant 0 : index
    %c0_40 = arith.constant 0 : index
    %c0_41 = arith.constant 0 : index
    %40 = vector.load %arg12[%c0_39, %c0_40, %c0_41] : memref<32x14x128xf32, #tpu.memory_space<vmem>>, vector<32x8x128xf32>
    %41 = vector.shape_cast %40 : vector<32x8x128xf32> to vector<256x128xf32>
    %42 = arith.truncf %41 : vector<256x128xf32> to vector<256x128xbf16>
    %c0_42 = arith.constant 0 : index
    %c0_43 = arith.constant 0 : index
    %c0_44 = arith.constant 0 : index
    %43 = vector.load %arg5[%c0_42, %c0_43, %c0_44] : memref<7x128x128xbf16, #tpu.memory_space<vmem>>, vector<1x128x128xbf16>
    %44 = vector.shape_cast %43 : vector<1x128x128xbf16> to vector<128x128xbf16>
    %cst_45 = arith.constant dense<0.000000e+00> : vector<256x128xf32>
    %45 = tpu.matmul %42, %44, %cst_45 {dimension_numbers = #tpu.dot_dimension_numbers<[1], [0], [0], [1], [0, 0, 1, 1], [], []>} : vector<256x128xbf16>, vector<128x128xbf16>, vector<256x128xf32> -> vector<256x128xf32>
    %c0_46 = arith.constant 0 : index
    %c1_47 = arith.constant 1 : index
    %c0_48 = arith.constant 0 : index
    %46 = vector.load %arg12[%c0_46, %c1_47, %c0_48] : memref<32x14x128xf32, #tpu.memory_space<vmem>>, vector<32x8x128xf32>
    %47 = vector.shape_cast %46 : vector<32x8x128xf32> to vector<256x128xf32>
    %48 = arith.truncf %47 : vector<256x128xf32> to vector<256x128xbf16>
    %c1_49 = arith.constant 1 : index
    %c0_50 = arith.constant 0 : index
    %c0_51 = arith.constant 0 : index
    %49 = vector.load %arg5[%c1_49, %c0_50, %c0_51] : memref<7x128x128xbf16, #tpu.memory_space<vmem>>, vector<1x128x128xbf16>
    %50 = vector.shape_cast %49 : vector<1x128x128xbf16> to vector<128x128xbf16>
    %cst_52 = arith.constant dense<0.000000e+00> : vector<256x128xf32>
    %51 = tpu.matmul %48, %50, %cst_52 {dimension_numbers = #tpu.dot_dimension_numbers<[1], [0], [0], [1], [0, 0, 1, 1], [], []>} : vector<256x128xbf16>, vector<128x128xbf16>, vector<256x128xf32> -> vector<256x128xf32>
    %52 = arith.addf %45, %51 : vector<256x128xf32>
    %c0_53 = arith.constant 0 : index
    %c2 = arith.constant 2 : index
    %c0_54 = arith.constant 0 : index
    %53 = vector.load %arg12[%c0_53, %c2, %c0_54] : memref<32x14x128xf32, #tpu.memory_space<vmem>>, vector<32x8x128xf32>
    %54 = vector.shape_cast %53 : vector<32x8x128xf32> to vector<256x128xf32>
    %55 = arith.truncf %54 : vector<256x128xf32> to vector<256x128xbf16>
    %c2_55 = arith.constant 2 : index
    %c0_56 = arith.constant 0 : index
    %c0_57 = arith.constant 0 : index
    %56 = vector.load %arg5[%c2_55, %c0_56, %c0_57] : memref<7x128x128xbf16, #tpu.memory_space<vmem>>, vector<1x128x128xbf16>
    %57 = vector.shape_cast %56 : vector<1x128x128xbf16> to vector<128x128xbf16>
    %cst_58 = arith.constant dense<0.000000e+00> : vector<256x128xf32>
    %58 = tpu.matmul %55, %57, %cst_58 {dimension_numbers = #tpu.dot_dimension_numbers<[1], [0], [0], [1], [0, 0, 1, 1], [], []>} : vector<256x128xbf16>, vector<128x128xbf16>, vector<256x128xf32> -> vector<256x128xf32>
    %59 = arith.addf %52, %58 : vector<256x128xf32>
    %c0_59 = arith.constant 0 : index
    %c3_60 = arith.constant 3 : index
    %c0_61 = arith.constant 0 : index
    %60 = vector.load %arg12[%c0_59, %c3_60, %c0_61] : memref<32x14x128xf32, #tpu.memory_space<vmem>>, vector<32x8x128xf32>
    %61 = vector.shape_cast %60 : vector<32x8x128xf32> to vector<256x128xf32>
    %62 = arith.truncf %61 : vector<256x128xf32> to vector<256x128xbf16>
    %c3_62 = arith.constant 3 : index
    %c0_63 = arith.constant 0 : index
    %c0_64 = arith.constant 0 : index
    %63 = vector.load %arg5[%c3_62, %c0_63, %c0_64] : memref<7x128x128xbf16, #tpu.memory_space<vmem>>, vector<1x128x128xbf16>
    %64 = vector.shape_cast %63 : vector<1x128x128xbf16> to vector<128x128xbf16>
    %cst_65 = arith.constant dense<0.000000e+00> : vector<256x128xf32>
    %65 = tpu.matmul %62, %64, %cst_65 {dimension_numbers = #tpu.dot_dimension_numbers<[1], [0], [0], [1], [0, 0, 1, 1], [], []>} : vector<256x128xbf16>, vector<128x128xbf16>, vector<256x128xf32> -> vector<256x128xf32>
    %66 = arith.addf %59, %65 : vector<256x128xf32>
    %c0_66 = arith.constant 0 : index
    %c4 = arith.constant 4 : index
    %c0_67 = arith.constant 0 : index
    %67 = vector.load %arg12[%c0_66, %c4, %c0_67] : memref<32x14x128xf32, #tpu.memory_space<vmem>>, vector<32x8x128xf32>
    %68 = vector.shape_cast %67 : vector<32x8x128xf32> to vector<256x128xf32>
    %69 = arith.truncf %68 : vector<256x128xf32> to vector<256x128xbf16>
    %c4_68 = arith.constant 4 : index
    %c0_69 = arith.constant 0 : index
    %c0_70 = arith.constant 0 : index
    %70 = vector.load %arg5[%c4_68, %c0_69, %c0_70] : memref<7x128x128xbf16, #tpu.memory_space<vmem>>, vector<1x128x128xbf16>
    %71 = vector.shape_cast %70 : vector<1x128x128xbf16> to vector<128x128xbf16>
    %cst_71 = arith.constant dense<0.000000e+00> : vector<256x128xf32>
    %72 = tpu.matmul %69, %71, %cst_71 {dimension_numbers = #tpu.dot_dimension_numbers<[1], [0], [0], [1], [0, 0, 1, 1], [], []>} : vector<256x128xbf16>, vector<128x128xbf16>, vector<256x128xf32> -> vector<256x128xf32>
    %73 = arith.addf %66, %72 : vector<256x128xf32>
    %c0_72 = arith.constant 0 : index
    %c5 = arith.constant 5 : index
    %c0_73 = arith.constant 0 : index
    %74 = vector.load %arg12[%c0_72, %c5, %c0_73] : memref<32x14x128xf32, #tpu.memory_space<vmem>>, vector<32x8x128xf32>
    %75 = vector.shape_cast %74 : vector<32x8x128xf32> to vector<256x128xf32>
    %76 = arith.truncf %75 : vector<256x128xf32> to vector<256x128xbf16>
    %c5_74 = arith.constant 5 : index
    %c0_75 = arith.constant 0 : index
    %c0_76 = arith.constant 0 : index
    %77 = vector.load %arg5[%c5_74, %c0_75, %c0_76] : memref<7x128x128xbf16, #tpu.memory_space<vmem>>, vector<1x128x128xbf16>
    %78 = vector.shape_cast %77 : vector<1x128x128xbf16> to vector<128x128xbf16>
    %cst_77 = arith.constant dense<0.000000e+00> : vector<256x128xf32>
    %79 = tpu.matmul %76, %78, %cst_77 {dimension_numbers = #tpu.dot_dimension_numbers<[1], [0], [0], [1], [0, 0, 1, 1], [], []>} : vector<256x128xbf16>, vector<128x128xbf16>, vector<256x128xf32> -> vector<256x128xf32>
    %80 = arith.addf %73, %79 : vector<256x128xf32>
    %c0_78 = arith.constant 0 : index
    %c6 = arith.constant 6 : index
    %c0_79 = arith.constant 0 : index
    %81 = vector.load %arg12[%c0_78, %c6, %c0_79] : memref<32x14x128xf32, #tpu.memory_space<vmem>>, vector<32x8x128xf32>
    %82 = vector.shape_cast %81 : vector<32x8x128xf32> to vector<256x128xf32>
    %83 = arith.truncf %82 : vector<256x128xf32> to vector<256x128xbf16>
    %c6_80 = arith.constant 6 : index
    %c0_81 = arith.constant 0 : index
    %c0_82 = arith.constant 0 : index
    %84 = vector.load %arg5[%c6_80, %c0_81, %c0_82] : memref<7x128x128xbf16, #tpu.memory_space<vmem>>, vector<1x128x128xbf16>
    %85 = vector.shape_cast %84 : vector<1x128x128xbf16> to vector<128x128xbf16>
    %cst_83 = arith.constant dense<0.000000e+00> : vector<256x128xf32>
    %86 = tpu.matmul %83, %85, %cst_83 {dimension_numbers = #tpu.dot_dimension_numbers<[1], [0], [0], [1], [0, 0, 1, 1], [], []>} : vector<256x128xbf16>, vector<128x128xbf16>, vector<256x128xf32> -> vector<256x128xf32>
    %87 = arith.addf %80, %86 : vector<256x128xf32>
    %c0_84 = arith.constant 0 : index
    %c0_85 = arith.constant 0 : index
    %88 = vector.load %arg6[%c0_84, %c0_85] : memref<1x128xf32, #tpu.memory_space<vmem>>, vector<1x128xf32>
    %89 = vector.broadcast %88 : vector<1x128xf32> to vector<256x128xf32>
    %90 = arith.addf %87, %89 : vector<256x128xf32>
    %cst_86 = arith.constant 0.000000e+00 : f32
    %91 = vector.broadcast %cst_86 : f32 to vector<256x128xf32>
    %92 = arith.maximumf %90, %91 : vector<256x128xf32>
    %93 = vector.shape_cast %92 : vector<256x128xf32> to vector<2x16x8x128xf32>
    %c0_87 = arith.constant 0 : index
    %c3_88 = arith.constant 3 : index
    %c0_89 = arith.constant 0 : index
    %c0_90 = arith.constant 0 : index
    %94 = vector.load %arg13[%c0_87, %c3_88, %c0_89, %c0_90] : memref<2x22x8x128xf32, #tpu.memory_space<vmem>>, vector<2x16x8x128xf32>
    tpu.vector_store %arg13[%c0_87, %c3_88, %c0_89, %c0_90], %93 {strides = array<i32>} : memref<2x22x8x128xf32, #tpu.memory_space<vmem>>, vector<2x16x8x128xf32>,
    %c0_91 = arith.constant 0 : index
    %c0_92 = arith.constant 0 : index
    %c0_93 = arith.constant 0 : index
    %c0_94 = arith.constant 0 : index
    %95 = vector.load %arg13[%c0_91, %c0_92, %c0_93, %c0_94] : memref<2x22x8x128xf32, #tpu.memory_space<vmem>>, vector<2x16x8x128xf32>
    %96 = vector.shape_cast %95 : vector<2x16x8x128xf32> to vector<256x128xf32>
    %97 = arith.truncf %96 : vector<256x128xf32> to vector<256x128xbf16>
    %c0_95 = arith.constant 0 : index
    %c0_96 = arith.constant 0 : index
    %c0_97 = arith.constant 0 : index
    %98 = vector.load %arg7[%c0_95, %c0_96, %c0_97] : memref<7x128x128xbf16, #tpu.memory_space<vmem>>, vector<1x128x128xbf16>
    %99 = vector.shape_cast %98 : vector<1x128x128xbf16> to vector<128x128xbf16>
    %cst_98 = arith.constant dense<0.000000e+00> : vector<256x128xf32>
    %100 = tpu.matmul %97, %99, %cst_98 {dimension_numbers = #tpu.dot_dimension_numbers<[1], [0], [0], [1], [0, 0, 1, 1], [], []>} : vector<256x128xbf16>, vector<128x128xbf16>, vector<256x128xf32> -> vector<256x128xf32>
    %c0_99 = arith.constant 0 : index
    %c1_100 = arith.constant 1 : index
    %c0_101 = arith.constant 0 : index
    %c0_102 = arith.constant 0 : index
    %101 = vector.load %arg13[%c0_99, %c1_100, %c0_101, %c0_102] : memref<2x22x8x128xf32, #tpu.memory_space<vmem>>, vector<2x16x8x128xf32>
    %102 = vector.shape_cast %101 : vector<2x16x8x128xf32> to vector<256x128xf32>
    %103 = arith.truncf %102 : vector<256x128xf32> to vector<256x128xbf16>
    %c1_103 = arith.constant 1 : index
    %c0_104 = arith.constant 0 : index
    %c0_105 = arith.constant 0 : index
    %104 = vector.load %arg7[%c1_103, %c0_104, %c0_105] : memref<7x128x128xbf16, #tpu.memory_space<vmem>>, vector<1x128x128xbf16>
    %105 = vector.shape_cast %104 : vector<1x128x128xbf16> to vector<128x128xbf16>
    %cst_106 = arith.constant dense<0.000000e+00> : vector<256x128xf32>
    %106 = tpu.matmul %103, %105, %cst_106 {dimension_numbers = #tpu.dot_dimension_numbers<[1], [0], [0], [1], [0, 0, 1, 1], [], []>} : vector<256x128xbf16>, vector<128x128xbf16>, vector<256x128xf32> -> vector<256x128xf32>
    %107 = arith.addf %100, %106 : vector<256x128xf32>
    %c0_107 = arith.constant 0 : index
    %c2_108 = arith.constant 2 : index
    %c0_109 = arith.constant 0 : index
    %c0_110 = arith.constant 0 : index
    %108 = vector.load %arg13[%c0_107, %c2_108, %c0_109, %c0_110] : memref<2x22x8x128xf32, #tpu.memory_space<vmem>>, vector<2x16x8x128xf32>
    %109 = vector.shape_cast %108 : vector<2x16x8x128xf32> to vector<256x128xf32>
    %110 = arith.truncf %109 : vector<256x128xf32> to vector<256x128xbf16>
    %c2_111 = arith.constant 2 : index
    %c0_112 = arith.constant 0 : index
    %c0_113 = arith.constant 0 : index
    %111 = vector.load %arg7[%c2_111, %c0_112, %c0_113] : memref<7x128x128xbf16, #tpu.memory_space<vmem>>, vector<1x128x128xbf16>
    %112 = vector.shape_cast %111 : vector<1x128x128xbf16> to vector<128x128xbf16>
    %cst_114 = arith.constant dense<0.000000e+00> : vector<256x128xf32>
    %113 = tpu.matmul %110, %112, %cst_114 {dimension_numbers = #tpu.dot_dimension_numbers<[1], [0], [0], [1], [0, 0, 1, 1], [], []>} : vector<256x128xbf16>, vector<128x128xbf16>, vector<256x128xf32> -> vector<256x128xf32>
    %114 = arith.addf %107, %113 : vector<256x128xf32>
    %c0_115 = arith.constant 0 : index
    %c3_116 = arith.constant 3 : index
    %c0_117 = arith.constant 0 : index
    %c0_118 = arith.constant 0 : index
    %115 = vector.load %arg13[%c0_115, %c3_116, %c0_117, %c0_118] : memref<2x22x8x128xf32, #tpu.memory_space<vmem>>, vector<2x16x8x128xf32>
    %116 = vector.shape_cast %115 : vector<2x16x8x128xf32> to vector<256x128xf32>
    %117 = arith.truncf %116 : vector<256x128xf32> to vector<256x128xbf16>
    %c3_119 = arith.constant 3 : index
    %c0_120 = arith.constant 0 : index
    %c0_121 = arith.constant 0 : index
    %118 = vector.load %arg7[%c3_119, %c0_120, %c0_121] : memref<7x128x128xbf16, #tpu.memory_space<vmem>>, vector<1x128x128xbf16>
    %119 = vector.shape_cast %118 : vector<1x128x128xbf16> to vector<128x128xbf16>
    %cst_122 = arith.constant dense<0.000000e+00> : vector<256x128xf32>
    %120 = tpu.matmul %117, %119, %cst_122 {dimension_numbers = #tpu.dot_dimension_numbers<[1], [0], [0], [1], [0, 0, 1, 1], [], []>} : vector<256x128xbf16>, vector<128x128xbf16>, vector<256x128xf32> -> vector<256x128xf32>
    %121 = arith.addf %114, %120 : vector<256x128xf32>
    %c0_123 = arith.constant 0 : index
    %c4_124 = arith.constant 4 : index
    %c0_125 = arith.constant 0 : index
    %c0_126 = arith.constant 0 : index
    %122 = vector.load %arg13[%c0_123, %c4_124, %c0_125, %c0_126] : memref<2x22x8x128xf32, #tpu.memory_space<vmem>>, vector<2x16x8x128xf32>
    %123 = vector.shape_cast %122 : vector<2x16x8x128xf32> to vector<256x128xf32>
    %124 = arith.truncf %123 : vector<256x128xf32> to vector<256x128xbf16>
    %c4_127 = arith.constant 4 : index
    %c0_128 = arith.constant 0 : index
    %c0_129 = arith.constant 0 : index
    %125 = vector.load %arg7[%c4_127, %c0_128, %c0_129] : memref<7x128x128xbf16, #tpu.memory_space<vmem>>, vector<1x128x128xbf16>
    %126 = vector.shape_cast %125 : vector<1x128x128xbf16> to vector<128x128xbf16>
    %cst_130 = arith.constant dense<0.000000e+00> : vector<256x128xf32>
    %127 = tpu.matmul %124, %126, %cst_130 {dimension_numbers = #tpu.dot_dimension_numbers<[1], [0], [0], [1], [0, 0, 1, 1], [], []>} : vector<256x128xbf16>, vector<128x128xbf16>, vector<256x128xf32> -> vector<256x128xf32>
    %128 = arith.addf %121, %127 : vector<256x128xf32>
    %c0_131 = arith.constant 0 : index
    %c5_132 = arith.constant 5 : index
    %c0_133 = arith.constant 0 : index
    %c0_134 = arith.constant 0 : index
    %129 = vector.load %arg13[%c0_131, %c5_132, %c0_133, %c0_134] : memref<2x22x8x128xf32, #tpu.memory_space<vmem>>, vector<2x16x8x128xf32>
    %130 = vector.shape_cast %129 : vector<2x16x8x128xf32> to vector<256x128xf32>
    %131 = arith.truncf %130 : vector<256x128xf32> to vector<256x128xbf16>
    %c5_135 = arith.constant 5 : index
    %c0_136 = arith.constant 0 : index
    %c0_137 = arith.constant 0 : index
    %132 = vector.load %arg7[%c5_135, %c0_136, %c0_137] : memref<7x128x128xbf16, #tpu.memory_space<vmem>>, vector<1x128x128xbf16>
    %133 = vector.shape_cast %132 : vector<1x128x128xbf16> to vector<128x128xbf16>
    %cst_138 = arith.constant dense<0.000000e+00> : vector<256x128xf32>
    %134 = tpu.matmul %131, %133, %cst_138 {dimension_numbers = #tpu.dot_dimension_numbers<[1], [0], [0], [1], [0, 0, 1, 1], [], []>} : vector<256x128xbf16>, vector<128x128xbf16>, vector<256x128xf32> -> vector<256x128xf32>
    %135 = arith.addf %128, %134 : vector<256x128xf32>
    %c0_139 = arith.constant 0 : index
    %c6_140 = arith.constant 6 : index
    %c0_141 = arith.constant 0 : index
    %c0_142 = arith.constant 0 : index
    %136 = vector.load %arg13[%c0_139, %c6_140, %c0_141, %c0_142] : memref<2x22x8x128xf32, #tpu.memory_space<vmem>>, vector<2x16x8x128xf32>
    %137 = vector.shape_cast %136 : vector<2x16x8x128xf32> to vector<256x128xf32>
    %138 = arith.truncf %137 : vector<256x128xf32> to vector<256x128xbf16>
    %c6_143 = arith.constant 6 : index
    %c0_144 = arith.constant 0 : index
    %c0_145 = arith.constant 0 : index
    %139 = vector.load %arg7[%c6_143, %c0_144, %c0_145] : memref<7x128x128xbf16, #tpu.memory_space<vmem>>, vector<1x128x128xbf16>
    %140 = vector.shape_cast %139 : vector<1x128x128xbf16> to vector<128x128xbf16>
    %cst_146 = arith.constant dense<0.000000e+00> : vector<256x128xf32>
    %141 = tpu.matmul %138, %140, %cst_146 {dimension_numbers = #tpu.dot_dimension_numbers<[1], [0], [0], [1], [0, 0, 1, 1], [], []>} : vector<256x128xbf16>, vector<128x128xbf16>, vector<256x128xf32> -> vector<256x128xf32>
    %142 = arith.addf %135, %141 : vector<256x128xf32>
    %c0_147 = arith.constant 0 : index
    %c0_148 = arith.constant 0 : index
    %143 = vector.load %arg8[%c0_147, %c0_148] : memref<1x128xf32, #tpu.memory_space<vmem>>, vector<1x128xf32>
    %144 = vector.broadcast %143 : vector<1x128xf32> to vector<256x128xf32>
    %145 = arith.addf %142, %144 : vector<256x128xf32>
    %cst_149 = arith.constant 0.000000e+00 : f32
    %146 = vector.broadcast %cst_149 : f32 to vector<256x128xf32>
    %147 = arith.maximumf %145, %146 : vector<256x128xf32>
    %c0_150 = arith.constant 0 : index
    %c0_151 = arith.constant 0 : index
    %148 = vector.load %arg9[%c0_150, %c0_151] : memref<896x256xbf16, #tpu.memory_space<vmem>>, vector<896x128xbf16>
    %c0_152 = arith.constant 0 : index
    %c128 = arith.constant 128 : index
    %149 = vector.load %arg9[%c0_152, %c128] : memref<896x256xbf16, #tpu.memory_space<vmem>>, vector<896x128xbf16>
    %150 = arith.truncf %20 : vector<128x128xf32> to vector<128x128xbf16>
    %cst_153 = arith.constant dense<0.000000e+00> : vector<896x128xf32>
    %151 = tpu.matmul %148, %150, %cst_153 {dimension_numbers = #tpu.dot_dimension_numbers<[1], [0], [0], [1], [0, 0, 1, 1], [], []>} : vector<896x128xbf16>, vector<128x128xbf16>, vector<896x128xf32> -> vector<896x128xf32>
    %152 = vector.extract_strided_slice %147 {offsets = [0, 0], sizes = [128, 128], strides = [1, 1]} : vector<256x128xf32> to vector<128x128xf32>
    %153 = arith.truncf %152 : vector<128x128xf32> to vector<128x128xbf16>
    %cst_154 = arith.constant dense<0.000000e+00> : vector<896x128xf32>
    %154 = tpu.matmul %149, %153, %cst_154 {dimension_numbers = #tpu.dot_dimension_numbers<[1], [1], [0], [0], [0, 0, 1, 0], [], []>} : vector<896x128xbf16>, vector<128x128xbf16>, vector<896x128xf32> -> vector<896x128xf32>
    %155 = arith.addf %151, %154 : vector<896x128xf32>
    %c0_155 = arith.constant 0 : index
    %c0_156 = arith.constant 0 : index
    %156 = vector.load %arg10[%c0_155, %c0_156] : memref<896x1xf32, #tpu.memory_space<vmem>>, vector<896x1xf32>
    %157 = vector.broadcast %156 : vector<896x1xf32> to vector<896x128xf32>
    %158 = arith.addf %155, %157 : vector<896x128xf32>
    %c0_157 = arith.constant 0 : index
    %c0_158 = arith.constant 0 : index
    %c0_159 = arith.constant 0 : index
    %159 = vector.load %arg1[%c0_157, %c0_158, %c0_159] : memref<2x896x128xf32, #tpu.memory_space<vmem>>, vector<1x896x128xf32>
    %160 = vector.shape_cast %159 : vector<1x896x128xf32> to vector<896x128xf32>
    %cst_160 = arith.constant 3.000000e-01 : f32
    %161 = vector.broadcast %cst_160 : f32 to vector<896x128xf32>
    %162 = arith.mulf %161, %160 : vector<896x128xf32>
    %163 = arith.addf %162, %158 : vector<896x128xf32>
    %cst_161 = arith.constant 0.000000e+00 : f32
    %164 = vector.broadcast %cst_161 : f32 to vector<896x128xf32>
    %165 = arith.maximumf %163, %164 : vector<896x128xf32>
    %c0_162 = arith.constant 0 : index
    %c0_163 = arith.constant 0 : index
    %c0_164 = arith.constant 0 : index
    %166 = vector.load %arg11[%c0_162, %c0_163, %c0_164] : memref<2x896x128xf32, #tpu.memory_space<vmem>>, vector<1x896x128xf32>
    %167 = vector.shape_cast %166 : vector<1x896x128xf32> to vector<896x128xf32>
    %168 = vector.shape_cast %165 : vector<896x128xf32> to vector<1x896x128xf32>
    tpu.vector_store %arg11[%c0_162, %c0_163, %c0_164], %168 {strides = array<i32>} : memref<2x896x128xf32, #tpu.memory_space<vmem>>, vector<1x896x128xf32>,
    %169 = arith.truncf %36 : vector<128x128xf32> to vector<128x128xbf16>
    %cst_165 = arith.constant dense<0.000000e+00> : vector<896x128xf32>
    %170 = tpu.matmul %148, %169, %cst_165 {dimension_numbers = #tpu.dot_dimension_numbers<[1], [0], [0], [1], [0, 0, 1, 1], [], []>} : vector<896x128xbf16>, vector<128x128xbf16>, vector<896x128xf32> -> vector<896x128xf32>
    %171 = vector.extract_strided_slice %147 {offsets = [128, 0], sizes = [128, 128], strides = [1, 1]} : vector<256x128xf32> to vector<128x128xf32>
    %172 = arith.truncf %171 : vector<128x128xf32> to vector<128x128xbf16>
    %cst_166 = arith.constant dense<0.000000e+00> : vector<896x128xf32>
    %173 = tpu.matmul %149, %172, %cst_166 {dimension_numbers = #tpu.dot_dimension_numbers<[1], [1], [0], [0], [0, 0, 1, 0], [], []>} : vector<896x128xbf16>, vector<128x128xbf16>, vector<896x128xf32> -> vector<896x128xf32>
    %174 = arith.addf %170, %173 : vector<896x128xf32>
    %c0_167 = arith.constant 0 : index
    %c0_168 = arith.constant 0 : index
    %175 = vector.load %arg10[%c0_167, %c0_168] : memref<896x1xf32, #tpu.memory_space<vmem>>, vector<896x1xf32>
    %176 = vector.broadcast %175 : vector<896x1xf32> to vector<896x128xf32>
    %177 = arith.addf %174, %176 : vector<896x128xf32>
    %c1_169 = arith.constant 1 : index
    %c0_170 = arith.constant 0 : index
    %c0_171 = arith.constant 0 : index
    %178 = vector.load %arg1[%c1_169, %c0_170, %c0_171] : memref<2x896x128xf32, #tpu.memory_space<vmem>>, vector<1x896x128xf32>
    %179 = vector.shape_cast %178 : vector<1x896x128xf32> to vector<896x128xf32>
    %cst_172 = arith.constant 3.000000e-01 : f32
    %180 = vector.broadcast %cst_172 : f32 to vector<896x128xf32>
    %181 = arith.mulf %180, %179 : vector<896x128xf32>
    %182 = arith.addf %181, %177 : vector<896x128xf32>
    %cst_173 = arith.constant 0.000000e+00 : f32
    %183 = vector.broadcast %cst_173 : f32 to vector<896x128xf32>
    %184 = arith.maximumf %182, %183 : vector<896x128xf32>
    %c1_174 = arith.constant 1 : index
    %c0_175 = arith.constant 0 : index
    %c0_176 = arith.constant 0 : index
    %185 = vector.load %arg11[%c1_174, %c0_175, %c0_176] : memref<2x896x128xf32, #tpu.memory_space<vmem>>, vector<1x896x128xf32>
    %186 = vector.shape_cast %185 : vector<1x896x128xf32> to vector<896x128xf32>
    %187 = vector.shape_cast %184 : vector<896x128xf32> to vector<1x896x128xf32>
    tpu.vector_store %arg11[%c1_174, %c0_175, %c0_176], %187 {strides = array<i32>} : memref<2x896x128xf32, #tpu.memory_space<vmem>>, vector<1x896x128xf32>,
    return
  }
  func.func @transform_0(%arg0: i32) -> (i32, i32, i32) {
    %c0_i32 = arith.constant 0 : i32
    %c0_i32_0 = arith.constant 0 : i32
    %c0_i32_1 = arith.constant 0 : i32
    return %arg0, %c0_i32, %c0_i32_0 : i32, i32, i32
  }
  func.func @transform_1(%arg0: i32) -> (i32, i32) {
    %c0_i32 = arith.constant 0 : i32
    %c0_i32_0 = arith.constant 0 : i32
    %c0_i32_1 = arith.constant 0 : i32
    return %c0_i32, %c0_i32_0 : i32, i32
  }
  func.func @transform_2(%arg0: i32) -> (i32, i32) {
    %c0_i32 = arith.constant 0 : i32
    %c0_i32_0 = arith.constant 0 : i32
    %c0_i32_1 = arith.constant 0 : i32
    return %c0_i32, %c0_i32_0 : i32, i32
  }
  func.func @transform_3(%arg0: i32) -> (i32, i32) {
    %c0_i32 = arith.constant 0 : i32
    %c0_i32_0 = arith.constant 0 : i32
    %c0_i32_1 = arith.constant 0 : i32
    return %c0_i32, %c0_i32_0 : i32, i32
  }
  func.func @transform_4(%arg0: i32) -> (i32, i32, i32) {
    %c0_i32 = arith.constant 0 : i32
    %c0_i32_0 = arith.constant 0 : i32
    %c0_i32_1 = arith.constant 0 : i32
    %c0_i32_2 = arith.constant 0 : i32
    return %c0_i32, %c0_i32_0, %c0_i32_1 : i32, i32, i32
  }
  func.func @transform_5(%arg0: i32) -> (i32, i32) {
    %c0_i32 = arith.constant 0 : i32
    %c0_i32_0 = arith.constant 0 : i32
    %c0_i32_1 = arith.constant 0 : i32
    return %c0_i32, %c0_i32_0 : i32, i32
  }
  func.func @transform_6(%arg0: i32) -> (i32, i32, i32) {
    %c0_i32 = arith.constant 0 : i32
    %c0_i32_0 = arith.constant 0 : i32
    %c0_i32_1 = arith.constant 0 : i32
    %c0_i32_2 = arith.constant 0 : i32
    return %c0_i32, %c0_i32_0, %c0_i32_1 : i32, i32, i32
  }
  func.func @transform_7(%arg0: i32) -> (i32, i32) {
    %c0_i32 = arith.constant 0 : i32
    %c0_i32_0 = arith.constant 0 : i32
    %c0_i32_1 = arith.constant 0 : i32
    return %c0_i32, %c0_i32_0 : i32, i32
  }
  func.func @transform_8(%arg0: i32) -> (i32, i32) {
    %c0_i32 = arith.constant 0 : i32
    %c0_i32_0 = arith.constant 0 : i32
    %c0_i32_1 = arith.constant 0 : i32
    return %c0_i32, %c0_i32_0 : i32, i32
  }
  func.func @transform_9(%arg0: i32) -> (i32, i32) {
    %c0_i32 = arith.constant 0 : i32
    %c0_i32_0 = arith.constant 0 : i32
    %c0_i32_1 = arith.constant 0 : i32
    return %c0_i32, %c0_i32_0 : i32, i32
  }
  func.func @transform_10(%arg0: i32) -> (i32, i32, i32) {
    %c0_i32 = arith.constant 0 : i32
    %c0_i32_0 = arith.constant 0 : i32
    %c0_i32_1 = arith.constant 0 : i32
    return %arg0, %c0_i32, %c0_i32_0 : i32, i32, i32
  }
}

</mosaic_0001>

<bundles_post_ra>
// kernel: tpu_custom_call.1
= control target key start
LH: loop header
LB: loop body
LE: loop exit
PB: predicated region body
PF: predicated region fallthrough
CT: control target
= control target key end

     0   :  { %s21404_s0 = inlined_call_operand.hbm [shape: f32[4,896,128], index: 0, kind: input, shape index: {}]   ;;  %s21405_s1 = inlined_call_operand.hbm [shape: bf16[128,896], index: 1, kind: input, shape index: {}]   ;;  %s21406_s2 = inlined_call_operand.vmem [shape: f32[128,1], index: 2, kind: input, shape index: {}]   ;;  %s21407_s3 = inlined_call_operand.vmem [shape: f32[128,1], index: 3, kind: input, shape index: {}]   ;;  %s21408_s4 = inlined_call_operand.hbm [shape: bf16[7,128,128], index: 4, kind: input, shape index: {}]   ;;  %s21409_s5 = inlined_call_operand.hbm [shape: f32[1,128], index: 5, kind: input, shape index: {}]   ;;  %s21410_s6 = inlined_call_operand.hbm [shape: bf16[7,128,128], index: 6, kind: input, shape index: {}]   ;;  %s21411_s7 = inlined_call_operand.hbm [shape: f32[1,128], index: 7, kind: input, shape index: {}]   ;;  %s21412_s8 = inlined_call_operand.hbm [shape: bf16[896,256], index: 8, kind: input, shape index: {}]   ;;  %s21413_s9 = inlined_call_operand.vmem [shape: f32[896,1], index: 9, kind: input, shape index: {}]   ;;  %s21414_s10 = inlined_call_operand.hbm [shape: f32[4,896,128], index: 10, kind: output, shape index: {}]  }
   0x1   :  { %21431 = sst [smem:[#allocation174_spill]] %s21405_s1 }
   0x2   :  { %21432 = sst [smem:[#allocation175_spill]] %s21408_s4 }
   0x3   :  { %21433 = sst [smem:[#allocation176_spill]] %s21413_s9 }
   0x4   :  { %21434 = sst [smem:[#allocation177_spill]] %s21414_s10 }
   0x5   :  { %15 = vsyncpa [#allocation5], 0 }
   0x6   :  { %17 = vsyncpa [#allocation5 + $0x1], 0 }
   0x7   :  { %18 = vsyncpa [#allocation8], 0 }
   0x8   :  { %19 = vsyncpa [#allocation11], 0 }
   0x9   :  { %20 = vsyncpa [#allocation14], 0 }
   0xa   :  { %21 = vsyncpa [#allocation6], 0 }
   0xb   :  { %23 = vsyncpa [#allocation6 + $0x1], 0  ;;  %s17344_s13 = smov 0   ;;  %s17346_s14 = smov 0  }
   0xc   :  { %s17348_s15 = smov 0   ;;  %s17350_s16 = smov 0  }
   0xd LB: > { %s17270_s17 = smov [#allocation7]   ;;  %s17365_s19 = sadd.s32 4294967295, %s17268_s16   ;;  %s17268_s16 = sphi %s17350_s16, %s21803_s16   ;;  %s17264_s15 = sphi %s17348_s15, %s21802_s15   ;;  %s17260_s14 = sphi %s17346_s14, %s21801_s14   ;;  %s17256_s13 = sphi %s17344_s13, %s21800_s13  }
   0xe   : > { %s287_s18 = sshll.u32 %s17270_s17, 4  ;;  %p12957_p0 = scmp.ge.s32.totalorder %s17268_s16, 1  ;;  %s17370_s18 = int_to_ptr.vmem [resolvable:$true] %s287_s18 }
   0xf   : > { %p21417_p1 = scmp.eq.s32.totalorder %s17365_s19, 0  ;;  %p275_p2 = scmp.lt.s32.totalorder %s17268_s16, 3 }
  0x10   : > { %s17271_s21 = smov [#allocation10]   ;;  %s17272_s24 = smov [#allocation13]  }
  0x11   : > { %p17372_p3 = pnand %p12957_p0, %p275_p2  ;;  %s320_s22 = sshll.u32 %s17271_s21, 4  ;;  %s17385_s22 = int_to_ptr.vmem [resolvable:$true] %s320_s22 }
  0x12   : > { %s344_s25 = sshll.u32 %s17272_s24, 4  ;;  %s21437_s1 = sld [smem:[#allocation174_spill]]  ;;  %s17387_s25 = int_to_ptr.vmem [resolvable:$true] %s344_s25 }
  0x13   : > { %s21435_s20 = scalar_select %p17372_p3, 1, 0 }
  0x14   : > { %p16550_p5 = pneg %p17372_p3 }
  0x16   : > { %p17381_p6 = pnand %p16550_p5, %p21417_p1 }
  0x18   : > { %s16992_s28 = scalar_lea.hbm %s21437_s1, 7168  ;;  %p17397_p8 = pneg %p17381_p6 }
  0x19   : > { %p16993_p7 = scmp.ne.s32.totalorder %s21437_s1, %s16992_s28  ;;  %p16999_p11 = scmp.lt.u32.totalorder %s16992_s28, %s21437_s1 }
  0x1b   : > { %p16995_p9 = pnand %p17397_p8, %p16993_p7 }
  0x1d   : > { %p16996_p10 = pneg %p16995_p9 }
  0x1f   : > { %p17001_p12 = pnand %p16999_p11, %p16996_p10 }
  0x21   : > { %17004 = shalt.err (!%p17001_p12)
}
  0x22   : > { %s17005_s21 = scalar_lea.vmem %s17370_s18, 7168  ;;  %p17013_p5 = scmp.lt.s32.totalorder %s17370_s18, %s17370_s18 }
  0x23   : > { %p17006_p13 = scmp.ne.s32.totalorder %s17370_s18, %s17005_s21  ;;  %p17014_p4 = scmp.lt.s32.totalorder %s17005_s21, %s17005_s21 }
  0x25   : > { %p17008_p0 = pnand %p17006_p13, %p17397_p8  ;;  %p17015_p7 = por %p17014_p4, %p17013_p5 }
  0x27   : > { %p17009_p2 = pneg %p17008_p0 }
  0x29   : > { %p17016_p9 = pnand %p17015_p7, %p17009_p2 }
  0x2b   : > { %17019 = shalt.err (!%p17016_p9)
}
  0x2c   : > { %s17273_s24 = smov 448   ;;  %s17274_s26 = smov 28  }
  0x2d   : > { %16553 = dma.hbm_to_vmem [thread:$0]  (!%p17381_p6), %s21437_s1, 7168, %s17370_s18, [#allocation8], %s17273_s24, %s17273_s24, %s17274_s26  }
  0x2e   : > { %s17020_s12 = scalar_lea.hbm %s21409_s5, 16 }
  0x2f   : > { %p17021_p4 = scmp.ne.s32.totalorder %s21409_s5, %s17020_s12  ;;  %p17027_p12 = scmp.lt.u32.totalorder %s17020_s12, %s21409_s5 }
  0x31   : > { %p17023_p10 = pnand %p17021_p4, %p17397_p8 }
  0x33   : > { %p17024_p11 = pneg %p17023_p10 }
  0x35   : > { %p17029_p13 = pnand %p17027_p12, %p17024_p11 }
  0x37   : > { %17032 = shalt.err (!%p17029_p13)
}
  0x38   : > { %s17033_s18 = scalar_lea.vmem %s17385_s22, 16  ;;  %s17040_s10 = scalar_lea.vmem %s17385_s22, 32 }
  0x39   : > { %p17034_p0 = scmp.ne.s32.totalorder %s17385_s22, %s17033_s18  ;;  %p17041_p7 = scmp.lt.s32.totalorder %s17385_s22, %s17385_s22 }
  0x3a   : > { %p17042_p9 = scmp.lt.s32.totalorder %s17040_s10, %s17033_s18 }
  0x3b   : > { %p17036_p2 = pnand %p17034_p0, %p17397_p8 }
  0x3c   : > { %p17043_p4 = por %p17042_p9, %p17041_p7 }
  0x3d   : > { %p17037_p5 = pneg %p17036_p2 }
  0x3f   : > { %p17044_p10 = pnand %p17043_p4, %p17037_p5 }
  0x41   : > { %17047 = shalt.err (!%p17044_p10)
}
  0x42   : > { %16559 = dma.hbm_to_vmem [thread:$0]  (!%p17381_p6), %s21409_s5, 16, %s17385_s22, [#allocation11]  }
  0x43   : > { %s17048_s28 = scalar_lea.hbm %s21411_s7, 16 }
  0x44   : > { %p17049_p11 = scmp.ne.s32.totalorder %s21411_s7, %s17048_s28  ;;  %p17055_p0 = scmp.lt.u32.totalorder %s17048_s28, %s21411_s7 }
  0x46   : > { %p17051_p12 = pnand %p17049_p11, %p17397_p8 }
  0x48   : > { %p17052_p13 = pneg %p17051_p12 }
  0x4a   : > { %p17057_p2 = pnand %p17055_p0, %p17052_p13 }
  0x4c   : > { %17060 = shalt.err (!%p17057_p2)
}
  0x4d   : > { %s17061_s22 = scalar_lea.vmem %s17387_s25, 16  ;;  %s17068_s21 = scalar_lea.vmem %s17387_s25, 32 }
  0x4e   : > { %p17062_p5 = scmp.ne.s32.totalorder %s17387_s25, %s17061_s22  ;;  %p17069_p4 = scmp.lt.s32.totalorder %s17387_s25, %s17387_s25 }
  0x4f   : > { %p17070_p10 = scmp.lt.s32.totalorder %s17068_s21, %s17061_s22 }
  0x50   : > { %p17064_p7 = pnand %p17062_p5, %p17397_p8 }
  0x51   : > { %p17071_p11 = por %p17070_p10, %p17069_p4 }
  0x52   : > { %p17065_p9 = pneg %p17064_p7 }
  0x54   : > { %p17072_p12 = pnand %p17071_p11, %p17065_p9 }
  0x56   : > { %17075 = shalt.err (!%p17072_p12)
}
  0x57   : > { %16565 = dma.hbm_to_vmem [thread:$0]  (!%p17381_p6), %s21411_s7, 16, %s17387_s25, [#allocation14]  }
  0x58   : > { %s17275_s9 = smov [#allocation9]   ;;  %s21439_s4 = sld [smem:[#allocation175_spill]] }
  0x59   : > { %s306_s24 = sshll.u32 %s17275_s9, 4  ;;  %s307_s24 = int_to_ptr.vmem [resolvable:$true] %s306_s24 }
  0x5e   : > { %s17076_s28 = scalar_lea.hbm %s21439_s4, 7168 }
  0x5f   : > { %p17077_p13 = scmp.ne.s32.totalorder %s21439_s4, %s17076_s28  ;;  %p17083_p5 = scmp.lt.u32.totalorder %s17076_s28, %s21439_s4 }
  0x61   : > { %p17079_p0 = pnand %p17077_p13, %p17397_p8 }
  0x63   : > { %p17080_p2 = pneg %p17079_p0 }
  0x65   : > { %p17085_p7 = pnand %p17083_p5, %p17080_p2 }
  0x67   : > { %17088 = shalt.err (!%p17085_p7)
}
  0x68   : > { %s17089_s25 = scalar_lea.vmem %s307_s24, 7168  ;;  %p17097_p11 = scmp.lt.s32.totalorder %s307_s24, %s307_s24 }
  0x69   : > { %p17090_p9 = scmp.ne.s32.totalorder %s307_s24, %s17089_s25  ;;  %p17098_p12 = scmp.lt.s32.totalorder %s17089_s25, %s17089_s25 }
  0x6b   : > { %p17092_p4 = pnand %p17090_p9, %p17397_p8  ;;  %p17099_p1 = por %p17098_p12, %p17097_p11 }
  0x6d   : > { %p17093_p10 = pneg %p17092_p4 }
  0x6f   : > { %p17100_p3 = pnand %p17099_p1, %p17093_p10 }
  0x71   : > { %17103 = shalt.err (!%p17100_p3)
}
  0x72   : > { %s17276_s22 = smov 64   ;;  %s17277_s21 = smov 4  }
  0x73   : > { %16556 = dma.hbm_to_vmem [thread:$0]  (!%p17381_p6), %s21439_s4, 7168, %s307_s24, [#allocation8], %s17276_s22, %s17276_s22, %s17277_s21  }
  0x74   : > { %s17278_s9 = smov [#allocation12]   ;;  %s17279_s27 = smov [#allocation15]  }
  0x75   : > { %s330_s26 = sshll.u32 %s17278_s9, 4  ;;  %s354_s28 = sshll.u32 %s17279_s27, 4  ;;  %s331_s26 = int_to_ptr.vmem [resolvable:$true] %s330_s26  ;;  %s17484_s28 = int_to_ptr.vmem [resolvable:$true] %s354_s28 }
  0x76   : > { %s17104_s12 = scalar_lea.hbm %s21410_s6, 7168 }
  0x77   : > { %p17105_p1 = scmp.ne.s32.totalorder %s21410_s6, %s17104_s12  ;;  %p17111_p0 = scmp.lt.u32.totalorder %s17104_s12, %s21410_s6 }
  0x79   : > { %p17107_p3 = pnand %p17105_p1, %p17397_p8 }
  0x7b   : > { %p17108_p13 = pneg %p17107_p3 }
  0x7d   : > { %p17113_p2 = pnand %p17111_p0, %p17108_p13 }
  0x7f   : > { %17116 = shalt.err (!%p17113_p2)
}
  0x80   : > { %s17117_s10 = scalar_lea.vmem %s331_s26, 7168  ;;  %p17125_p4 = scmp.lt.s32.totalorder %s331_s26, %s331_s26 }
  0x81   : > { %p17118_p5 = scmp.ne.s32.totalorder %s331_s26, %s17117_s10  ;;  %p17126_p10 = scmp.lt.s32.totalorder %s17117_s10, %s17117_s10 }
  0x83   : > { %p17120_p7 = pnand %p17118_p5, %p17397_p8  ;;  %p17127_p11 = por %p17126_p10, %p17125_p4 }
  0x85   : > { %p17121_p9 = pneg %p17120_p7 }
  0x87   : > { %p17128_p12 = pnand %p17127_p11, %p17121_p9 }
  0x89   : > { %17131 = shalt.err (!%p17128_p12)
}
  0x8a   : > { %16562 = dma.hbm_to_vmem [thread:$0]  (!%p17381_p6), %s21410_s6, 7168, %s331_s26, [#allocation11], %s17276_s22, %s17276_s22, %s17277_s21  }
  0x8b   : > { %s17132_s12 = scalar_lea.hbm %s21412_s8, 14336 }
  0x8c   : > { %p17133_p1 = scmp.ne.s32.totalorder %s21412_s8, %s17132_s12  ;;  %p17139_p0 = scmp.lt.u32.totalorder %s17132_s12, %s21412_s8 }
  0x8e   : > { %p17135_p3 = pnand %p17133_p1, %p17397_p8 }
  0x90   : > { %p17136_p13 = pneg %p17135_p3 }
  0x92   : > { %p17141_p2 = pnand %p17139_p0, %p17136_p13 }
  0x94   : > { %17144 = shalt.err (!%p17141_p2)
}
  0x95   : > { %s17145_s22 = scalar_lea.vmem %s17484_s28, 14336  ;;  %p17153_p4 = scmp.lt.s32.totalorder %s17484_s28, %s17484_s28 }
  0x96   : > { %p17146_p5 = scmp.ne.s32.totalorder %s17484_s28, %s17145_s22  ;;  %p17154_p10 = scmp.lt.s32.totalorder %s17145_s22, %s17145_s22 }
  0x98   : > { %p17148_p7 = pnand %p17146_p5, %p17397_p8  ;;  %p17155_p11 = por %p17154_p10, %p17153_p4 }
  0x9a   : > { %p17149_p9 = pneg %p17148_p7 }
  0x9c   : > { %p17156_p12 = pnand %p17155_p11, %p17149_p9 }
  0x9e   : > { %17159 = shalt.err (!%p17156_p12)
}
  0x9f   : > { %s21419_s21 = smov 128   ;;  %s21420_s11 = smov 8  }
  0xa0   : > { %16568 = dma.hbm_to_vmem [thread:$0]  (!%p17381_p6), %s21412_s8, 14336, %s17484_s28, [#allocation14], %s21419_s21, %s21419_s21, %s21420_s11  }
  0xa1   : > { %s12956_s9 = sadd.s32 4294967294, %s17268_s16   ;;  %s17532_s27 = sadd.s32 1, %s17268_s16  }
  0xa2   : > { %s33_s29 = ssub.s32 %s17268_s16, %s17532_s27  ;;  %s36_s30 = sadd.s32 1, %s17264_s15 }
  0xa3   : > { %p34_p8 = scmp.eq.s32.totalorder %s33_s29, 0  ;;  %p43_p1 = scmp.ne.s32.totalorder %s17264_s15, %s17260_s14 }
  0xa4   : > { %p44_p3 = scmp.eq.s32.totalorder %s17268_s16, 0  ;;  %p49_p13 = scmp.ne.s32.totalorder %s17260_s14, %s17256_s13 }
  0xa5   : > { %s17543_s23 = scalar_select %p34_p8, %s17264_s15, %s36_s30  }
  0xa6   : > { %p45_p0 = por %p44_p3, %p43_p1  ;;  %p21440_p2 = scmp.eq.s32.totalorder %s17365_s19, 0 }
  0xa7   : > { %p262_p6 = scmp.eq.s32.totalorder %s17365_s19, 1  ;;  %p268_p7 = scmp.eq.s32.totalorder %s12956_s9, 1 }
  0xa8   : > { %p17547_p5 = por %p21440_p2, %p49_p13  ;;  %p16583_p9 = scmp.lt.s32.totalorder %s17268_s16, 2 }
  0xa9   : > { %s371_s28 = sand.u32 1, %s17264_s15   ;;  %p17554_p4 = por %p262_p6, %p43_p1 }
  0xaa   : > { %p17558_p10 = por %p268_p7, %p49_p13  ;;  %s16518_s18 = smul.u32 1792, %s371_s28 }
  0xab   : > { %s21442_s17 = scalar_select %p17554_p4, 1, 0 }
  0xac   : > { %s21443_s25 = scalar_select %p17558_p10, 1, 0 }
  0xad   : > { %s16519_s24 = smul.u32 28672, %s17268_s16  ;;  %p17563_p11 = pnand %p16583_p9, %p45_p0 }
  0xae   : > { %s375_s29 = scalar_lea.vmem [#allocation4], %s16518_s18  ;;  %s17574_s21 = scalar_lea.sflag [#allocation5], %s371_s28 }
  0xaf   : > { %s17570_s9 = scalar_lea.hbm %s21404_s0, %s16519_s24  ;;  %s383_s30 = sshll.u32 %s375_s29, 4  ;;  %s17572_s30 = int_to_ptr.vmem [resolvable:$true] %s383_s30 }
  0xb0   : > { %s17160_s11 = scalar_lea.hbm %s17570_s9, 28672  ;;  %p17162_p8 = pneg %p17563_p11 }
  0xb1   : > { %p17161_p12 = scmp.ne.s32.totalorder %s17570_s9, %s17160_s11  ;;  %s17165_s10 = scalar_lea.hbm %s21404_s0, 57344 }
  0xb2   : > { %p17166_p13 = scmp.lt.u32.totalorder %s17570_s9, %s21404_s0  ;;  %p17167_p0 = scmp.lt.u32.totalorder %s17165_s10, %s17160_s11 }
  0xb3   : > { %p17163_p1 = pnand %p17162_p8, %p17161_p12  ;;  %p17169_p6 = scmp.lt.u32.totalorder %s17160_s11, %s17570_s9 }
  0xb4   : > { %p17168_p2 = por %p17167_p0, %p17166_p13 }
  0xb5   : > { %p17164_p3 = pneg %p17163_p1 }
  0xb6   : > { %p17170_p7 = por %p17169_p6, %p17168_p2 }
  0xb8   : > { %p17171_p9 = pnand %p17170_p7, %p17164_p3 }
  0xba   : > { %17174 = shalt.err (!%p17171_p9)
}
  0xbb   : > { %s17175_s28 = scalar_lea.vmem %s17572_s30, 28672  ;;  %s17282_s18 = smov [#allocation4]  }
  0xbc   : > { %p17176_p12 = scmp.ne.s32.totalorder %s17572_s30, %s17175_s28  ;;  %s17180_s29 = sshll.u32 %s17282_s18, 4  ;;  %s17181_s29 = int_to_ptr.vmem [resolvable:$false] %s17180_s29 }
  0xbd   : > { %s17182_s1 = scalar_lea.vmem %s17181_s29, 57344  ;;  %p17183_p4 = scmp.lt.s32.totalorder %s17572_s30, %s17181_s29 }
  0xbe   : > { %p17178_p1 = pnand %p17176_p12, %p17162_p8  ;;  %p17184_p13 = scmp.lt.s32.totalorder %s17182_s1, %s17175_s28 }
  0xc0   : > { %p17179_p10 = pneg %p17178_p1  ;;  %p17185_p0 = por %p17184_p13, %p17183_p4 }
  0xc2   : > { %p17186_p2 = pnand %p17185_p0, %p17179_p10 }
  0xc4   : > { %17189 = shalt.err (!%p17186_p2)
}
  0xc5   : > { %s21445_s4 = smov 8   ;;  %s21446_s11 = smov 128  }
  0xc6   : > { %16572 = dma.hbm_to_vmem [thread:$0]  (!%p17563_p11), %s17570_s9, 28672, %s17572_s30, %s17574_s21, %s21446_s11, %s21446_s11, %s21445_s4  }
  0xc7   : > { %p21447_p8 = scmp.ne.s32.totalorder %s21435_s20, 0 }
  0xc9   : > { %395 = sbr.rel (%p21447_p8) target bundleno = 2807 (0xaf7), region = 60 }
  0xd0   : > { %s17608_s24 = sand.u32 1, %s17260_s14  }
  0xd1   : > { %s16520_s26 = smul.u32 1792, %s17608_s24  ;;  %s398_s10 = scalar_lea.sflag [#allocation5], %s17608_s24 }
  0xd3   : > { %s17614_s22 = scalar_lea.vmem [#allocation4], %s16520_s26 }
  0xd4   : > { %17235 = dma.done.wait (%p17547_p5), %s398_s10, 28672  }
  0xd5   : > { %17237 = vsyncadd (%p17547_p5), %s398_s10, 4294938624  ;;  %p21448_p4 = scmp.eq.s32.totalorder %s17365_s19, 0 }
  0xd7   : > { %17239 = dma.done.wait (%p21448_p4), [#allocation8], 14336   ;;  %p21449_p10 = pmov %p21448_p4 }
  0xd8   : > { %p21450_p11 = pmov %p21448_p4 }
  0xd9   : > { %17241 = vsyncadd (%p21449_p10), [#allocation8], 4294952960 }
  0xda   : > { %17243 = dma.done.wait (%p21450_p11), [#allocation11], 7184   ;;  %p21451_p3 = pmov %p21448_p4 }
  0xdc   : > { %17245 = vsyncadd (%p21451_p3), [#allocation11], 4294960112  ;;  %p21452_p6 = pmov %p21451_p3 }
  0xdd   : > { %p21453_p7 = pmov %p21451_p3 }
  0xde   : > { %17247 = dma.done.wait (%p21452_p6), [#allocation14], 14352  }
  0xdf   : > { %17249 = vsyncadd (%p21453_p7), [#allocation14], 4294952944  ;;  %v17283_v0 = vmov 0   ;;  %v558_v1 = vld [vmem:[%s17614_s22 + $0x80] sm:$0xff]  ;;  %v559_v2 = vld [vmem:[%s17614_s22 + $0x88] sm:$0xff]  ;;  %s21456_s18 = sld [smem:[#allocation176_spill]] }
  0xe0   : > { %16640 = vset.pattern.permute.xlu0 %v17283_v0  ;;  %16641 = vset.pattern.permute.xlu1 %v17283_v0  ;;  %v590_v3 = vld [vmem:[%s17614_s22 + $0x180] sm:$0xff]  ;;  %v726_v4 = vpack.c.bf16 %v559_v2, %v558_v1  ;;  %v591_v5 = vld [vmem:[%s17614_s22 + $0x188] sm:$0xff]  ;;  %v560_v12 = vld [vmem:[%s17614_s22 + $0x90] sm:$0xff]  ;;  %s20113_s21 = scalar_lea.vmem [#allocation16], %s16520_s26  ;;  %s16521_s26 = smul.u32 28672, %s17365_s19 }
  0xe1   : > { %v542_v6 = vld [vmem:[%s17614_s22] sm:$0xff]  ;;  %v543_v7 = vld [vmem:[%s17614_s22 + $0x8] sm:$0xff]  ;;  %v742_v8 = vpack.c.bf16 %v591_v5, %v590_v3  ;;  %v561_v14 = vld [vmem:[%s17614_s22 + $0x98] sm:$0xff]  ;;  %s21796_s30 = sld [smem:[#allocation177_spill]]  ;;  %s12812_s19 = scalar_lea.sflag [#allocation6], %s17608_s24 }
  0xe2   : > { %v718_v9 = vpack.c.bf16 %v543_v7, %v542_v6  ;;  %v574_v10 = vld [vmem:[%s17614_s22 + $0x100] sm:$0xff]  ;;  %v575_v11 = vld [vmem:[%s17614_s22 + $0x108] sm:$0xff]  ;;  %13654 = vmatprep.subr.bf16.mxu0 %v726_v4  ;;  %v592_v15 = vld [vmem:[%s17614_s22 + $0x190] sm:$0xff]  ;;  %v727_v17 = vpack.c.bf16 %v561_v14, %v560_v12  ;;  %p21797_p9 = scmp.ne.s32.totalorder %s21442_s17, 0  ;;  %s17286_s1 = smov [#allocation16]  }
  0xe3   : > { %v734_v13 = vpack.c.bf16 %v575_v11, %v574_v10  ;;  %v593_v16 = vld [vmem:[%s17614_s22 + $0x198] sm:$0xff]  ;;  %13718 = vmatprep.subr.bf16.mxu1 %v742_v8  ;;  %v544_v19 = vld [vmem:[%s17614_s22 + $0x10] sm:$0xff]  ;;  %v562_v24 = vld [vmem:[%s17614_s22 + $0xa0] sm:$0xff]  ;;  %s17194_s4 = sshll.u32 %s17286_s1, 4  ;;  %s17195_s4 = int_to_ptr.vmem [resolvable:$false] %s17194_s4 }
  0xe4   : > { %13655 = vmatpush3.bf16.msra.mxu0 %v718_v9  ;;  %v743_v18 = vpack.c.bf16 %v593_v16, %v592_v15  ;;  %v545_v20 = vld [vmem:[%s17614_s22 + $0x18] sm:$0xff]  ;;  %v576_v21 = vld [vmem:[%s17614_s22 + $0x110] sm:$0xff]  ;;  %v563_v25 = vld [vmem:[%s17614_s22 + $0xa8] sm:$0xff]  ;;  %s17196_s11 = scalar_lea.vmem %s17195_s4, 57344 }
  0xe5   : > { %13719 = vmatpush3.bf16.msra.mxu1 %v734_v13  ;;  %v719_v22 = vpack.c.bf16 %v545_v20, %v544_v19  ;;  %v577_v23 = vld [vmem:[%s17614_s22 + $0x118] sm:$0xff]  ;;  %13656 = vmatprep.subr.bf16.mxu0 %v727_v17  ;;  %v728_v27 = vpack.c.bf16 %v563_v25, %v562_v24  ;;  %v594_v28 = vld [vmem:[%s17614_s22 + $0x1a0] sm:$0xff]  ;;  %v595_v29 = vld [vmem:[%s17614_s22 + $0x1a8] sm:$0xff] }
  0xe6   : > { %13720 = vmatprep.subr.bf16.mxu1 %v743_v18  ;;  %v735_v26 = vpack.c.bf16 %v577_v23, %v576_v21  ;;  %v546_v30 = vld [vmem:[%s17614_s22 + $0x20] sm:$0xff]  ;;  %v744_v31 = vpack.c.bf16 %v595_v29, %v594_v28  ;;  %v547_v32 = vld [vmem:[%s17614_s22 + $0x28] sm:$0xff]  ;;  %v564_v36 = vld [vmem:[%s17614_s22 + $0xb0] sm:$0xff] }
  0xe7   : > { %v578_v33 = vld [vmem:[%s17614_s22 + $0x120] sm:$0xff]  ;;  %v579_v34 = vld [vmem:[%s17614_s22 + $0x128] sm:$0xff]  ;;  %v720_v35 = vpack.c.bf16 %v547_v32, %v546_v30  ;;  %v565_v37 = vld [vmem:[%s17614_s22 + $0xb8] sm:$0xff]  ;;  %s21355_s28 = scalar_lea.hbm %s21796_s30, %s16521_s26 }
  0xe8   : > { %13657 = vmatpush3.bf16.msra.mxu0 %v719_v22  ;;  %v596_v38 = vld [vmem:[%s17614_s22 + $0x1b0] sm:$0xff]  ;;  %v736_v39 = vpack.c.bf16 %v579_v34, %v578_v33  ;;  %v729_v40 = vpack.c.bf16 %v565_v37, %v564_v36  ;;  %v597_v41 = vld [vmem:[%s17614_s22 + $0x1b8] sm:$0xff]  ;;  %v566_v47 = vld [vmem:[%s17614_s22 + $0xc0] sm:$0xff] }
  0xe9   : > { %13721 = vmatpush3.bf16.msra.mxu1 %v735_v26  ;;  %13658 = vmatprep.subr.bf16.mxu0 %v728_v27  ;;  %v548_v42 = vld [vmem:[%s17614_s22 + $0x30] sm:$0xff]  ;;  %v549_v43 = vld [vmem:[%s17614_s22 + $0x38] sm:$0xff]  ;;  %v745_v44 = vpack.c.bf16 %v597_v41, %v596_v38  ;;  %v567_v48 = vld [vmem:[%s17614_s22 + $0xc8] sm:$0xff] }
  0xea   : > { %13722 = vmatprep.subr.bf16.mxu1 %v744_v31  ;;  %v580_v45 = vld [vmem:[%s17614_s22 + $0x130] sm:$0xff]  ;;  %v581_v46 = vld [vmem:[%s17614_s22 + $0x138] sm:$0xff]  ;;  %v598_v49 = vld [vmem:[%s17614_s22 + $0x1c0] sm:$0xff]  ;;  %v721_v51 = vpack.c.bf16 %v549_v43, %v548_v42  ;;  %v730_v53 = vpack.c.bf16 %v567_v48, %v566_v47 }
  0xeb   : > { %v599_v50 = vld [vmem:[%s17614_s22 + $0x1c8] sm:$0xff]  ;;  %v737_v52 = vpack.c.bf16 %v581_v46, %v580_v45  ;;  %v550_v54 = vld [vmem:[%s17614_s22 + $0x40] sm:$0xff]  ;;  %v568_v59 = vld [vmem:[%s17614_s22 + $0xd0] sm:$0xff] }
  0xec   : > { %13659 = vmatpush3.bf16.msra.mxu0 %v720_v35  ;;  %v551_v55 = vld [vmem:[%s17614_s22 + $0x48] sm:$0xff]  ;;  %v582_v56 = vld [vmem:[%s17614_s22 + $0x140] sm:$0xff]  ;;  %v746_v57 = vpack.c.bf16 %v599_v50, %v598_v49  ;;  %v569_v60 = vld [vmem:[%s17614_s22 + $0xd8] sm:$0xff] }
  0xed   : > { %13723 = vmatpush3.bf16.msra.mxu1 %v736_v39  ;;  %13660 = vmatprep.subr.bf16.mxu0 %v729_v40  ;;  %v583_v58 = vld [vmem:[%s17614_s22 + $0x148] sm:$0xff]  ;;  %v600_v61 = vld [vmem:[%s17614_s22 + $0x1d0] sm:$0xff]  ;;  %v601_v62 = vld [vmem:[%s17614_s22 + $0x1d8] sm:$0xff]  ;;  %v722_v63 = vpack.c.bf16 %v551_v55, %v550_v54  ;;  %v731_v2 = vpack.c.bf16 %v569_v60, %v568_v59 }
  0xee   : > { %13724 = vmatprep.subr.bf16.mxu1 %v745_v44  ;;  %v552_v0 = vld [vmem:[%s17614_s22 + $0x50] sm:$0xff]  ;;  %v738_v1 = vpack.c.bf16 %v583_v58, %v582_v56  ;;  %v553_v3 = vld [vmem:[%s17614_s22 + $0x58] sm:$0xff]  ;;  %v747_v6 = vpack.c.bf16 %v601_v62, %v600_v61  ;;  %v570_v7 = vld [vmem:[%s17614_s22 + $0xe0] sm:$0xff] }
  0xef   : > { %v584_v4 = vld [vmem:[%s17614_s22 + $0x150] sm:$0xff]  ;;  %v585_v5 = vld [vmem:[%s17614_s22 + $0x158] sm:$0xff]  ;;  %v571_v8 = vld [vmem:[%s17614_s22 + $0xe8] sm:$0xff]  ;;  %v723_v13 = vpack.c.bf16 %v553_v3, %v552_v0 }
  0xf0   : > { %13661 = vmatpush3.bf16.msra.mxu0 %v721_v51  ;;  %v602_v9 = vld [vmem:[%s17614_s22 + $0x1e0] sm:$0xff]  ;;  %v603_v10 = vld [vmem:[%s17614_s22 + $0x1e8] sm:$0xff]  ;;  %v572_v16 = vld [vmem:[%s17614_s22 + $0xf0] sm:$0xff]  ;;  %v739_v18 = vpack.c.bf16 %v585_v5, %v584_v4  ;;  %v732_v19 = vpack.c.bf16 %v571_v8, %v570_v7 }
  0xf1   : > { %13725 = vmatpush3.bf16.msra.mxu1 %v737_v52  ;;  %13662 = vmatprep.subr.bf16.mxu0 %v730_v53  ;;  %v554_v11 = vld [vmem:[%s17614_s22 + $0x60] sm:$0xff]  ;;  %v555_v12 = vld [vmem:[%s17614_s22 + $0x68] sm:$0xff]  ;;  %v573_v17 = vld [vmem:[%s17614_s22 + $0xf8] sm:$0xff]  ;;  %v748_v21 = vpack.c.bf16 %v603_v10, %v602_v9 }
  0xf2   : > { %13726 = vmatprep.subr.bf16.mxu1 %v746_v57  ;;  %v586_v14 = vld [vmem:[%s17614_s22 + $0x160] sm:$0xff]  ;;  %v587_v15 = vld [vmem:[%s17614_s22 + $0x168] sm:$0xff]  ;;  %v604_v20 = vld [vmem:[%s17614_s22 + $0x1f0] sm:$0xff]  ;;  %v724_v26 = vpack.c.bf16 %v555_v12, %v554_v11  ;;  %v733_v31 = vpack.c.bf16 %v573_v17, %v572_v16 }
  0xf3   : > { %v605_v22 = vld [vmem:[%s17614_s22 + $0x1f8] sm:$0xff]  ;;  %v17692_v23 = vld [vmem:[#allocation7 + $0x4] ss:$28 sps:$4 sm:$0xff]   ;;  %v556_v24 = vld [vmem:[%s17614_s22 + $0x70] sm:$0xff]  ;;  %v740_v30 = vpack.c.bf16 %v587_v15, %v586_v14 }
  0xf4   : > { %13663 = vmatpush3.bf16.msra.mxu0 %v722_v63  ;;  %v16647_v25 = vld [vmem:[#allocation7 + $0xc] ss:$28 sps:$4 sm:$0xff]   ;;  %v557_v27 = vld [vmem:[%s17614_s22 + $0x78] sm:$0xff]  ;;  %v588_v28 = vld [vmem:[%s17614_s22 + $0x170] sm:$0xff]  ;;  %1094 = vmatprep.mubr.bf16.mxu0 %v17692_v23  ;;  %v749_v33 = vpack.c.bf16 %v605_v22, %v604_v20 }
  0xf5   : > { %13727 = vmatpush3.bf16.msra.mxu1 %v738_v1  ;;  %13664 = vmatprep.subr.bf16.mxu0 %v731_v2  ;;  %v589_v29 = vld [vmem:[%s17614_s22 + $0x178] sm:$0xff]  ;;  %v622_v32 = vld [vmem:[%s17614_s22 + $0x280] sm:$0xff]  ;;  %v623_v34 = vld [vmem:[%s17614_s22 + $0x288] sm:$0xff]  ;;  %v725_v35 = vpack.c.bf16 %v557_v27, %v556_v24 }
  0xf6   : > { %13728 = vmatprep.subr.bf16.mxu1 %v747_v6  ;;  %1191 = vmatprep.mubr.bf16.mxu1 %v16647_v25  ;;  %v606_v36 = vld [vmem:[%s17614_s22 + $0x200] sm:$0xff]  ;;  %v741_v37 = vpack.c.bf16 %v589_v29, %v588_v28  ;;  %v758_v39 = vpack.c.bf16 %v623_v34, %v622_v32  ;;  %v607_v40 = vld [vmem:[%s17614_s22 + $0x208] sm:$0xff]  ;;  %v17705_v42 = vld [vmem:[#allocation7 + $0x3c] ss:$28 sps:$4 sm:$0xff]  }
  0xf7   : > { %v17702_v38 = vld [vmem:[#allocation7] ss:$28 sps:$4 sm:$0xff]   ;;  %v16645_v41 = vld [vmem:[#allocation7 + $0x8] ss:$28 sps:$4 sm:$0xff]   ;;  %v624_v43 = vld [vmem:[%s17614_s22 + $0x290] sm:$0xff]  ;;  %v750_v45 = vpack.c.bf16 %v607_v40, %v606_v36 }
  0xf8   : > { %13665 = vmatpush3.bf16.msra.mxu0 %v723_v13  ;;  %v625_v44 = vld [vmem:[%s17614_s22 + $0x298] sm:$0xff]  ;;  %v16650_v46 = vld [vmem:[#allocation7 + $0x44] ss:$28 sps:$4 sm:$0xff]   ;;  %v608_v47 = vld [vmem:[%s17614_s22 + $0x210] sm:$0xff] }
  0xf9   : > { %13729 = vmatpush3.bf16.msra.mxu1 %v739_v18  ;;  %13666 = vmatprep.subr.bf16.mxu0 %v732_v19  ;;  %v609_v48 = vld [vmem:[%s17614_s22 + $0x218] sm:$0xff]  ;;  %v626_v49 = vld [vmem:[%s17614_s22 + $0x2a0] sm:$0xff]  ;;  %v759_v50 = vpack.c.bf16 %v625_v44, %v624_v43  ;;  %v627_v51 = vld [vmem:[%s17614_s22 + $0x2a8] sm:$0xff] }
  0xfa   : > { %13730 = vmatprep.subr.bf16.mxu1 %v748_v21  ;;  %v751_v52 = vpack.c.bf16 %v609_v48, %v608_v47  ;;  %v610_v53 = vld [vmem:[%s17614_s22 + $0x220] sm:$0xff]  ;;  %v17716_v54 = vld [vmem:[#allocation7 + $0x38] ss:$28 sps:$4 sm:$0xff]   ;;  %v760_v55 = vpack.c.bf16 %v627_v51, %v626_v49  ;;  %v611_v56 = vld [vmem:[%s17614_s22 + $0x228] sm:$0xff] }
  0xfb   : > { %v638_v57 = vld [vmem:[%s17614_s22 + $0x300] sm:$0xff]  ;;  %v639_v58 = vld [vmem:[%s17614_s22 + $0x308] sm:$0xff]  ;;  %v628_v59 = vld [vmem:[%s17614_s22 + $0x2b0] sm:$0xff]  ;;  %v752_v1 = vpack.c.bf16 %v611_v56, %v610_v53 }
  0xfc   : > { %13667 = vmatpush3.bf16.msra.mxu0 %v724_v26  ;;  %v766_v60 = vpack.c.bf16 %v639_v58, %v638_v57  ;;  %v629_v61 = vld [vmem:[%s17614_s22 + $0x2b8] sm:$0xff]  ;;  %v17723_v63 = vld [vmem:[#allocation7 + $0x74] ss:$28 sps:$4 sm:$0xff]   ;;  %v630_v4 = vld [vmem:[%s17614_s22 + $0x2c0] sm:$0xff] }
  0xfd   : > { %13731 = vmatpush3.bf16.msra.mxu1 %v740_v30  ;;  %13668 = vmatprep.subr.bf16.mxu0 %v733_v31  ;;  %v16653_v62 = vld [vmem:[#allocation7 + $0x40] ss:$28 sps:$4 sm:$0xff]   ;;  %v612_v2 = vld [vmem:[%s17614_s22 + $0x230] sm:$0xff]  ;;  %v761_v5 = vpack.c.bf16 %v629_v61, %v628_v59  ;;  %v631_v8 = vld [vmem:[%s17614_s22 + $0x2c8] sm:$0xff] }
  0xfe   : > { %13732 = vmatprep.subr.bf16.mxu1 %v749_v33  ;;  %v16656_v0 = vld [vmem:[#allocation7 + $0x7c] ss:$28 sps:$4 sm:$0xff]   ;;  %v640_v6 = vld [vmem:[%s17614_s22 + $0x310] sm:$0xff]  ;;  %v614_v12 = vld [vmem:[%s17614_s22 + $0x240] sm:$0xff]  ;;  %v762_v15 = vpack.c.bf16 %v631_v8, %v630_v4 }
  0xff   : > { %v613_v3 = vld [vmem:[%s17614_s22 + $0x238] sm:$0xff]  ;;  %v17733_v10 = vld [vmem:[#allocation7 + $0x70] ss:$28 sps:$4 sm:$0xff]   ;;  %v642_v17 = vld [vmem:[%s17614_s22 + $0x320] sm:$0xff] }
 0x100   : > { %13669 = vmatpush3.bf16.msra.mxu0 %v725_v35  ;;  %v641_v7 = vld [vmem:[%s17614_s22 + $0x318] sm:$0xff]  ;;  %v753_v11 = vpack.c.bf16 %v613_v3, %v612_v2  ;;  %v615_v13 = vld [vmem:[%s17614_s22 + $0x248] sm:$0xff]  ;;  %v632_v16 = vld [vmem:[%s17614_s22 + $0x2d0] sm:$0xff] }
 0x101   : > { %13733 = vmatpush3.bf16.msra.mxu1 %v741_v37  ;;  %13782 = vmatprep.subr.bf16.mxu0 %v758_v39  ;;  %v767_v9 = vpack.c.bf16 %v641_v7, %v640_v6  ;;  %v16659_v14 = vld [vmem:[#allocation7 + $0x78] ss:$28 sps:$4 sm:$0xff]   ;;  %v643_v18 = vld [vmem:[%s17614_s22 + $0x328] sm:$0xff]  ;;  %v754_v26 = vpack.c.bf16 %v615_v13, %v614_v12  ;;  %v634_v31 = vld [vmem:[%s17614_s22 + $0x2e0] sm:$0xff] }
 0x102   : > { %14662 = vmatprep.subr.bf16.mxu1 %v766_v60  ;;  %v633_v19 = vld [vmem:[%s17614_s22 + $0x2d8] sm:$0xff]  ;;  %v768_v20 = vpack.c.bf16 %v643_v18, %v642_v17  ;;  %v644_v21 = vld [vmem:[%s17614_s22 + $0x330] sm:$0xff]  ;;  %v17743_v24 = vld [vmem:[#allocation7 + $0xac] ss:$28 sps:$4 sm:$0xff]  }
 0x103   : > { %1095 = vmatmul.mubr.bf16.vlgmr.msra.gmra.mrb[0].mxu0 %v17702_v38  ;;  %v645_v22 = vld [vmem:[%s17614_s22 + $0x338] sm:$0xff]  ;;  %v16662_v25 = vld [vmem:[#allocation7 + $0xb4] ss:$28 sps:$4 sm:$0xff]   ;;  %v763_v27 = vpack.c.bf16 %v633_v19, %v632_v16  ;;  %v635_v32 = vld [vmem:[%s17614_s22 + $0x2e8] sm:$0xff] }
 0x104   : > { %1192 = vmatmul.mubr.bf16.vlgmr.msra.gmra.mrb[0].mxu1 %v16645_v41  ;;  %13783 = vmatpush3.bf16.msra.mxu0 %v750_v45  ;;  %v616_v28 = vld [vmem:[%s17614_s22 + $0x250] sm:$0xff]  ;;  %v617_v29 = vld [vmem:[%s17614_s22 + $0x258] sm:$0xff]  ;;  %v769_v30 = vpack.c.bf16 %v645_v22, %v644_v21  ;;  %v646_v33 = vld [vmem:[%s17614_s22 + $0x340] sm:$0xff]  ;;  %v764_v40 = vpack.c.bf16 %v635_v32, %v634_v31 }
 0x105   : > { %1102 = vmatprep.mubr.bf16.mxu0 %v17705_v42  ;;  %1199 = vmatprep.mubr.bf16.mxu1 %v16650_v46  ;;  %v647_v34 = vld [vmem:[%s17614_s22 + $0x348] sm:$0xff]  ;;  %v755_v37 = vpack.c.bf16 %v617_v29, %v616_v28  ;;  %v618_v39 = vld [vmem:[%s17614_s22 + $0x260] sm:$0xff]  ;;  %v648_v44 = vld [vmem:[%s17614_s22 + $0x350] sm:$0xff] }
 0x106   : > { %13784 = vmatprep.subr.bf16.mxu0 %v759_v50  ;;  %14663 = vmatpush3.bf16.msra.mxu1 %v766_v60  ;;  %v770_v35 = vpack.c.bf16 %v647_v34, %v646_v33  ;;  %v17753_v36 = vld [vmem:[#allocation7 + $0xa8] ss:$28 sps:$4 sm:$0xff]   ;;  %v16665_v43 = vld [vmem:[#allocation7 + $0xb0] ss:$28 sps:$4 sm:$0xff]   ;;  %v649_v45 = vld [vmem:[%s17614_s22 + $0x358] sm:$0xff] }
 0x107   : > { %14664 = vmatprep.subr.bf16.mxu1 %v767_v9  ;;  %v619_v41 = vld [vmem:[%s17614_s22 + $0x268] sm:$0xff]  ;;  %v17759_v46 = vld [vmem:[#allocation7 + $0xe4] ss:$28 sps:$4 sm:$0xff]   ;;  %v636_v47 = vld [vmem:[%s17614_s22 + $0x2f0] sm:$0xff]  ;;  %v771_v53 = vpack.c.bf16 %v649_v45, %v648_v44 }
 0x108   : > { %13785 = vmatpush3.bf16.msra.mxu0 %v751_v52  ;;  %v637_v48 = vld [vmem:[%s17614_s22 + $0x2f8] sm:$0xff]  ;;  %v16668_v49 = vld [vmem:[#allocation7 + $0xec] ss:$28 sps:$4 sm:$0xff]   ;;  %v756_v50 = vpack.c.bf16 %v619_v41, %v618_v39  ;;  %v650_v51 = vld [vmem:[%s17614_s22 + $0x360] sm:$0xff] }
 0x109   : > { %13786 = vmatprep.subr.bf16.mxu0 %v760_v55  ;;  %v651_v52 = vld [vmem:[%s17614_s22 + $0x368] sm:$0xff]  ;;  %v765_v55 = vpack.c.bf16 %v637_v48, %v636_v47  ;;  %v620_v56 = vld [vmem:[%s17614_s22 + $0x270] sm:$0xff]  ;;  %v621_v57 = vld [vmem:[%s17614_s22 + $0x278] sm:$0xff] }
 0x10a   : > { %14665 = vmatpush3.bf16.msra.mxu1 %v767_v9  ;;  %v772_v58 = vpack.c.bf16 %v651_v52, %v650_v51  ;;  %v757_v59 = vpack.c.bf16 %v621_v57, %v620_v56  ;;  %v652_v60 = vld [vmem:[%s17614_s22 + $0x370] sm:$0xff]  ;;  %v653_v61 = vld [vmem:[%s17614_s22 + $0x378] sm:$0xff]  ;;  %v16671_v2 = vld [vmem:[#allocation7 + $0xe8] ss:$28 sps:$4 sm:$0xff]  }
 0x10b   : > { %1103 = vmatmul.mubr.bf16.gmra.mrb[4].mxu0 %v17716_v54  ;;  %14666 = vmatprep.subr.bf16.mxu1 %v768_v20  ;;  %v17775_v3 = vld [vmem:[#allocation7 + $0x11c] ss:$28 sps:$4 sm:$0xff]   ;;  %v773_v6 = vpack.c.bf16 %v653_v61, %v652_v60  ;;  %v13047_v7 = vld [vmem:[%s17614_s22 + $0x400] sm:$0xff]  ;;  %v13048_v8 = vld [vmem:[%s17614_s22 + $0x408] sm:$0xff] }
 0x10c   : > { %1200 = vmatmul.mubr.bf16.gmra.mrb[4].mxu1 %v16653_v62  ;;  %1110 = vmatprep.mubr.bf16.mxu0 %v17723_v63  ;;  %v13079_v62 = vld [vmem:[%s17614_s22 + $0x500] sm:$0xff]  ;;  %v1923_v9 = vpack.c.bf16 %v13048_v8, %v13047_v7  ;;  %v17783_v13 = vld [vmem:[#allocation7 + $0x154] ss:$28 sps:$4 sm:$0xff]   ;;  %v16684_v17 = vld [vmem:[#allocation7 + $0x18c] ss:$28 sps:$4 sm:$0xff]  }
 0x10d   : > { %1207 = vmatprep.mubr.bf16.mxu1 %v16656_v0  ;;  %13787 = vmatpush3.bf16.msra.mxu0 %v752_v1  ;;  %v17772_v0 = vld [vmem:[#allocation7 + $0xe0] ss:$28 sps:$4 sm:$0xff]   ;;  %v13080_v1 = vld [vmem:[%s17614_s22 + $0x508] sm:$0xff]  ;;  %v16683_v16 = vld [vmem:[#allocation7 + $0x158] ss:$28 sps:$4 sm:$0xff]  }
 0x10e   : > { %13788 = vmatprep.subr.bf16.mxu0 %v761_v5  ;;  %14667 = vmatpush3.bf16.msra.mxu1 %v768_v20  ;;  %v1939_v4 = vpack.c.bf16 %v13080_v1, %v13079_v62  ;;  %v16674_v5 = vld [vmem:[#allocation7 + $0x124] ss:$28 sps:$4 sm:$0xff]   ;;  %v16686_v18 = vld [vmem:[#allocation7 + $0x194] ss:$28 sps:$4 sm:$0xff]   ;;  %v17813_v29 = vld [vmem:[%s21407_s3 + $0x8] sm:$0xff] }
 0x10f   : > { %14668 = vmatprep.subr.bf16.mxu1 %v769_v30  ;;  %v16677_v12 = vld [vmem:[#allocation7 + $0x120] ss:$28 sps:$4 sm:$0xff]   ;;  %v16688_v20 = vld [vmem:[#allocation7 + $0x188] ss:$28 sps:$4 sm:$0xff]   ;;  %v16689_v22 = vld [vmem:[#allocation7 + $0x190] ss:$28 sps:$4 sm:$0xff]  }
 0x110   : > { %v17790_v19 = vld [vmem:[%s21406_s2] sm:$0xff]  ;;  %v17808_v28 = vld [vmem:[%s21406_s2 + $0x10] sm:$0xff]  ;;  %v13064_v33 = vld [vmem:[%s17614_s22 + $0x488] sm:$0xff] }
 0x111   : > { %13789 = vmatpush3.bf16.msra.mxu0 %v753_v11  ;;  %v17781_v11 = vld [vmem:[#allocation7 + $0x118] ss:$28 sps:$4 sm:$0xff]   ;;  %1468 = vperm.xlu0 %16640, %v17790_v19   ;;  %v17796_v21 = vld [vmem:[%s21407_s3] sm:$0xff]  ;;  %v16690_v32 = vld [vmem:[#allocation7 + $0x10] ss:$28 sps:$4 sm:$0xff]  }
 0x112   : > { %13790 = vmatprep.subr.bf16.mxu0 %v762_v15  ;;  %14669 = vmatpush3.bf16.msra.mxu1 %v769_v30  ;;  %v16682_v15 = vld [vmem:[#allocation7 + $0x150] ss:$28 sps:$4 sm:$0xff]   ;;  %v13031_v30 = vld [vmem:[%s17614_s22 + $0x380] sm:$0xff]  ;;  %v17825_v39 = vld [vmem:[%s21406_s2 + $0x18] sm:$0xff] }
 0x113   : > { %1111 = vmatmul.mubr.bf16.gmra.mrb[8].mxu0 %v17733_v10  ;;  %14670 = vmatprep.subr.bf16.mxu1 %v770_v35  ;;  %v13063_v31 = vld [vmem:[%s17614_s22 + $0x480] sm:$0xff]  ;;  %v16694_v34 = vld [vmem:[#allocation7 + $0x50] ss:$28 sps:$4 sm:$0xff]   ;;  %v13034_v47 = vld [vmem:[%s17614_s22 + $0x398] sm:$0xff] }
 0x114   : > { %1208 = vmatmul.mubr.bf16.gmra.mrb[8].mxu1 %v16659_v14  ;;  %1118 = vmatprep.mubr.bf16.mxu0 %v17743_v24  ;;  %v16680_v14 = vld [vmem:[#allocation7 + $0x15c] ss:$28 sps:$4 sm:$0xff]   ;;  %v16695_v41 = vld [vmem:[#allocation7 + $0x4c] ss:$28 sps:$4 sm:$0xff]   ;;  %v1931_v44 = vpack.c.bf16 %v13064_v33, %v13063_v31  ;;  %v13033_v45 = vld [vmem:[%s17614_s22 + $0x390] sm:$0xff] }
 0x115   : > { %1215 = vmatprep.mubr.bf16.mxu1 %v16662_v25  ;;  %13791 = vmatpush3.bf16.msra.mxu0 %v754_v26  ;;  %v16692_v25 = vld [vmem:[#allocation7 + $0x14] ss:$28 sps:$4 sm:$0xff]   ;;  %v17802_v26 = vld [vmem:[%s21406_s2 + $0x8] sm:$0xff]  ;;  %v13066_v52 = vld [vmem:[%s17614_s22 + $0x498] sm:$0xff] }
 0x116   : > { %13792 = vmatprep.subr.bf16.mxu0 %v763_v27  ;;  %14671 = vmatpush3.bf16.msra.mxu1 %v770_v35  ;;  %v16693_v27 = vld [vmem:[#allocation7 + $0x18] ss:$28 sps:$4 sm:$0xff]   ;;  %v13032_v35 = vld [vmem:[%s17614_s22 + $0x388] sm:$0xff]  ;;  %v13083_v56 = vld [vmem:[%s17614_s22 + $0x520] sm:$0xff] }
 0x117   : > { %14672 = vmatprep.subr.bf16.mxu1 %v771_v53  ;;  %1580 = vperm.xlu1 %16641, %v17796_v21   ;;  %v13081_v48 = vld [vmem:[%s17614_s22 + $0x510] sm:$0xff]  ;;  %v1915_v51 = vpack.c.bf16 %v13032_v35, %v13031_v30  ;;  %v13084_v57 = vld [vmem:[%s17614_s22 + $0x528] sm:$0xff]  ;;  %v13035_v61 = vld [vmem:[%s17614_s22 + $0x3a0] sm:$0xff] }
 0x118   : > { %1473 = vperm.xlu0 %16640, %v17802_v26   ;;  %v17849_v1 = vld [vmem:[%s21406_s2 + $0x20] sm:$0xff]  ;;  %v13037_v31 = vld [vmem:[%s17614_s22 + $0x3b0] sm:$0xff]  ;;  %v13056_v35 = vld [vmem:[%s17614_s22 + $0x448] sm:$0xff] }
 0x119   : > { %13793 = vmatpush3.bf16.msra.mxu0 %v755_v37  ;;  %v13049_v37 = vld [vmem:[%s17614_s22 + $0x410] sm:$0xff]  ;;  %v16699_v7 = vld [vmem:[#allocation7 + $0xc0] ss:$28 sps:$4 sm:$0xff]  }
 0x11a   : > { %13794 = vmatprep.subr.bf16.mxu0 %v764_v40  ;;  %14673 = vmatpush3.bf16.msra.mxu1 %v771_v53  ;;  %v13050_v40 = vld [vmem:[%s17614_s22 + $0x418] sm:$0xff]  ;;  %v13055_v33 = vld [vmem:[%s17614_s22 + $0x440] sm:$0xff] }
 0x11b   : > { %1119 = vmatmul.mubr.bf16.gmra.mrb[12].mxu0 %v17753_v36  ;;  %14674 = vmatprep.subr.bf16.mxu1 %v772_v58  ;;  %v1924_v53 = vpack.c.bf16 %v13050_v40, %v13049_v37  ;;  %v13069_v40 = vld [vmem:[%s17614_s22 + $0x4b0] sm:$0xff] }
 0x11c   : > { %1216 = vmatmul.mubr.bf16.gmra.mrb[12].mxu1 %v16665_v43  ;;  %1126 = vmatprep.mubr.bf16.mxu0 %v17759_v46  ;;  %v17831_v43 = vld [vmem:[%s21407_s3 + $0x10] sm:$0xff] }
 0x11d   : > { %1223 = vmatprep.mubr.bf16.mxu1 %v16668_v49  ;;  %13795 = vmatpush3.bf16.msra.mxu0 %v756_v50  ;;  %v13082_v49 = vld [vmem:[%s17614_s22 + $0x518] sm:$0xff]  ;;  %v13065_v50 = vld [vmem:[%s17614_s22 + $0x490] sm:$0xff] }
 0x11e   : > { %13796 = vmatprep.subr.bf16.mxu0 %v765_v55  ;;  %14675 = vmatpush3.bf16.msra.mxu1 %v772_v58  ;;  %v16697_v55 = vld [vmem:[#allocation7 + $0x88] ss:$28 sps:$4 sm:$0xff]   ;;  %v1940_v60 = vpack.c.bf16 %v13082_v49, %v13081_v48  ;;  %v1932_v62 = vpack.c.bf16 %v13066_v52, %v13065_v50  ;;  %v16703_v49 = vld [vmem:[#allocation7 + $0x80] ss:$28 sps:$4 sm:$0xff]   ;;  %v17887_v50 = vld [vmem:[%s21406_s2 + $0x30] sm:$0xff]  ;;  %v1927_v52 = vpack.c.bf16 %v13056_v35, %v13055_v33 }
 0x11f   : > { %14676 = vmatprep.subr.bf16.mxu1 %v773_v6  ;;  %1478 = vperm.xlu1 %16641, %v17808_v28   ;;  %v13051_v58 = vld [vmem:[%s17614_s22 + $0x420] sm:$0xff]  ;;  %v17917_v35 = vld [vmem:[%s21406_s2 + $0x38] sm:$0xff] }
 0x120   : > { %1585 = vperm.xlu0 %16640, %v17813_v29   ;;  %v13043_v33 = vld [vmem:[%s17614_s22 + $0x3e0] sm:$0xff] }
 0x121   : > { %13797 = vmatpush3.bf16.msra.mxu0 %v757_v59  ;;  %v13052_v59 = vld [vmem:[%s17614_s22 + $0x428] sm:$0xff] }
 0x122   : > { %13926 = vmatprep.subr.bf16.mxu0 %v1939_v4  ;;  %14677 = vmatpush3.bf16.msra.mxu1 %v773_v6  ;;  %v16698_v4 = vld [vmem:[#allocation7 + $0x48] ss:$28 sps:$4 sm:$0xff]   ;;  %v17854_v6 = vld [vmem:[%s21407_s3 + $0x18] sm:$0xff]  ;;  %v1925_v8 = vpack.c.bf16 %v13052_v59, %v13051_v58 }
 0x123   : > { %1127 = vmatmul.mubr.bf16.gmra.mrb[16].mxu0 %v17772_v0  ;;  %13862 = vmatprep.subr.bf16.mxu1 %v1923_v9  ;;  %v13036_v9 = vld [vmem:[%s17614_s22 + $0x3a8] sm:$0xff]  ;;  %v13058_v58 = vld [vmem:[%s17614_s22 + $0x458] sm:$0xff] }
 0x124   : > { %1224 = vmatmul.mubr.bf16.gmra.mrb[16].mxu1 %v16671_v2  ;;  %1134 = vmatprep.mubr.bf16.mxu0 %v17775_v3  ;;  %v1916_v2 = vpack.c.bf16 %v13034_v47, %v13033_v45  ;;  %v13088_v45 = vld [vmem:[%s17614_s22 + $0x548] sm:$0xff]  ;;  %v17882_v47 = vld [vmem:[%s21407_s3 + $0x20] sm:$0xff] }
 0x125   : > { %1231 = vmatprep.mubr.bf16.mxu1 %v16674_v5  ;;  %1483 = vperm.xlu1 %16641, %v17825_v39   ;;  %v1941_v5 = vpack.c.bf16 %v13084_v57, %v13083_v56  ;;  %v13057_v56 = vld [vmem:[%s17614_s22 + $0x450] sm:$0xff] }
 0x126   : > { %1590 = vperm.xlu0 %16640, %v17831_v43  }
 0x129   : > { %1488 = vperm.xlu1 %16641, %v17849_v1  }
 0x12a   : > { %1595 = vperm.xlu0 %16640, %v17854_v6  }
 0x12b   : > { %1135 = vmatmul.mubr.bf16.gmra.mrb[20].mxu0 %v17781_v11 }
 0x12c   : > { %1232 = vmatmul.mubr.bf16.gmra.mrb[20].mxu1 %v16677_v12  ;;  %1142 = vmatprep.mubr.bf16.mxu0 %v17783_v13  ;;  %v13053_v12 = vld [vmem:[%s17614_s22 + $0x430] sm:$0xff] }
 0x12d   : > { %1239 = vmatprep.mubr.bf16.mxu1 %v16680_v14  ;;  %v13054_v14 = vld [vmem:[%s17614_s22 + $0x438] sm:$0xff] }
 0x12e   : > { %v1926_v30 = vpack.c.bf16 %v13054_v14, %v13053_v12  ;;  %1600 = vperm.xlu0 %16640, %v17882_v47   ;;  %v1928_v12 = vpack.c.bf16 %v13058_v58, %v13057_v56  ;;  %v13059_v14 = vld [vmem:[%s17614_s22 + $0x460] sm:$0xff]  ;;  %v13045_v58 = vld [vmem:[%s17614_s22 + $0x3f0] sm:$0xff] }
 0x133   : > { %1143 = vmatmul.mubr.bf16.gmra.mrb[24].mxu0 %v16682_v15  ;;  %v16700_v15 = vld [vmem:[#allocation7 + $0x84] ss:$28 sps:$4 sm:$0xff]  }
 0x134   : > { %1240 = vmatmul.mubr.bf16.gmra.mrb[24].mxu1 %v16683_v16  ;;  %1150 = vmatprep.mubr.bf16.mxu0 %v16684_v17  ;;  %v13067_v16 = vld [vmem:[%s17614_s22 + $0x4a0] sm:$0xff]  ;;  %v13068_v17 = vld [vmem:[%s17614_s22 + $0x4a8] sm:$0xff] }
 0x135   : > { %1247 = vmatprep.mubr.bf16.mxu1 %v16686_v18  ;;  %v13085_v18 = vld [vmem:[%s17614_s22 + $0x530] sm:$0xff] }
 0x13b   : > { %1151 = vmatmul.mubr.bf16.gmra.mrb[28].mxu0 %v16688_v20  ;;  %v13086_v20 = vld [vmem:[%s17614_s22 + $0x538] sm:$0xff] }
 0x13c   : > { %1248 = vmatmul.mubr.bf16.gmra.mrb[28].mxu1 %v16689_v22  ;;  %1288 = vmatprep.mubr.bf16.mxu0 %v16692_v25  ;;  %v17868_v22 = vld [vmem:[%s21406_s2 + $0x28] sm:$0xff]  ;;  %v1917_v25 = vpack.c.bf16 %v13036_v9, %v13035_v61  ;;  %v1942_v37 = vpack.c.bf16 %v13086_v20, %v13085_v18  ;;  %v13073_v18 = vld [vmem:[%s17614_s22 + $0x4d0] sm:$0xff]  ;;  %v13074_v20 = vld [vmem:[%s17614_s22 + $0x4d8] sm:$0xff] }
 0x13d   : > { %14678 = vmatprep.mubr.bf16.mxu1 %v16693_v27  ;;  %v16702_v27 = vld [vmem:[#allocation7 + $0xf8] ss:$28 sps:$4 sm:$0xff]   ;;  %1493 = vperm.xlu1 %16641, %v17868_v22   ;;  %v13072_v61 = vld [vmem:[%s17614_s22 + $0x4c8] sm:$0xff] }
 0x13e   : > { %v16707_v9 = vld [vmem:[#allocation7 + $0x168] ss:$28 sps:$4 sm:$0xff]  }
 0x141   : > { %1498 = vperm.xlu1 %16641, %v17887_v50  }
 0x143   : > { %1289 = vmatmul.mubr.bf16.vlgmr.msra.gmra.mrb[32].mxu0 %v16690_v32  ;;  %v13038_v32 = vld [vmem:[%s17614_s22 + $0x3b8] sm:$0xff] }
 0x144   : > { %14679 = vmatmul.mubr.bf16.vlgmr.msra.gmra.mrb[32].mxu1 %v16694_v34  ;;  %13927 = vmatpush3.bf16.msra.mxu0 %v1931_v44  ;;  %v1933_v34 = vpack.c.bf16 %v13068_v17, %v13067_v16  ;;  %v13087_v44 = vld [vmem:[%s17614_s22 + $0x540] sm:$0xff]  ;;  %v1918_v48 = vpack.c.bf16 %v13038_v32, %v13037_v31  ;;  %v13060_v16 = vld [vmem:[%s17614_s22 + $0x468] sm:$0xff]  ;;  %v16708_v32 = vld [vmem:[#allocation7 + $0xb8] ss:$28 sps:$4 sm:$0xff]  }
 0x145   : > { %13863 = vmatpush3.bf16.msra.mxu1 %v1915_v51  ;;  %1296 = vmatprep.mubr.bf16.mxu0 %v16695_v41  ;;  %v13070_v41 = vld [vmem:[%s17614_s22 + $0x4b8] sm:$0xff]  ;;  %v16704_v51 = vld [vmem:[#allocation7 + $0x130] ss:$28 sps:$4 sm:$0xff]   ;;  %v1943_v59 = vpack.c.bf16 %v13088_v45, %v13087_v44 }
 0x146   : > { %13864 = vmatprep.subr.bf16.mxu1 %v1924_v53  ;;  %14682 = vmatprep.mubr.bf16.mxu1 %v16697_v55  ;;  %v13039_v53 = vld [vmem:[%s17614_s22 + $0x3c0] sm:$0xff]  ;;  %v13040_v55 = vld [vmem:[%s17614_s22 + $0x3c8] sm:$0xff]  ;;  %v1934_v57 = vpack.c.bf16 %v13070_v41, %v13069_v40  ;;  %v1929_v40 = vpack.c.bf16 %v13060_v16, %v13059_v14  ;;  %v13061_v41 = vld [vmem:[%s17614_s22 + $0x470] sm:$0xff] }
 0x147   : > { %13928 = vmatprep.subr.bf16.mxu0 %v1940_v60  ;;  %v13071_v60 = vld [vmem:[%s17614_s22 + $0x4c0] sm:$0xff]  ;;  %v13062_v44 = vld [vmem:[%s17614_s22 + $0x478] sm:$0xff]  ;;  %v16710_v45 = vld [vmem:[#allocation7 + $0xf4] ss:$28 sps:$4 sm:$0xff]   ;;  %1503 = vperm.xlu1 %16641, %v17917_v35  }
 0x148   : > { %13929 = vmatpush3.bf16.msra.mxu0 %v1932_v62  ;;  %v16705_v62 = vld [vmem:[#allocation7 + $0xbc] ss:$28 sps:$4 sm:$0xff]   ;;  %v16713_v14 = vld [vmem:[#allocation7 + $0x12c] ss:$28 sps:$4 sm:$0xff]  }
 0x149   : > { %13865 = vmatpush3.bf16.msra.mxu1 %v1916_v2  ;;  %13930 = vmatprep.subr.bf16.mxu0 %v1941_v5  ;;  %v13089_v2 = vld [vmem:[%s17614_s22 + $0x550] sm:$0xff]  ;;  %v1919_v5 = vpack.c.bf16 %v13040_v55, %v13039_v53  ;;  %v13094_v55 = vld [vmem:[%s17614_s22 + $0x578] sm:$0xff] }
 0x14a   : > { %13866 = vmatprep.subr.bf16.mxu1 %v1925_v8  ;;  %v13042_v8 = vld [vmem:[%s17614_s22 + $0x3d8] sm:$0xff]  ;;  %v13093_v53 = vld [vmem:[%s17614_s22 + $0x570] sm:$0xff] }
 0x14b   : > { %1297 = vmatmul.mubr.bf16.gmra.mrb[36].mxu0 %v16698_v4  ;;  %v13090_v4 = vld [vmem:[%s17614_s22 + $0x558] sm:$0xff] }
 0x14c   : > { %14683 = vmatmul.mubr.bf16.gmra.mrb[36].mxu1 %v16699_v7  ;;  %1304 = vmatprep.mubr.bf16.mxu0 %v16700_v15  ;;  %v13041_v7 = vld [vmem:[%s17614_s22 + $0x3d0] sm:$0xff]  ;;  %v1935_v15 = vpack.c.bf16 %v13072_v61, %v13071_v60  ;;  %v1944_v17 = vpack.c.bf16 %v13090_v4, %v13089_v2  ;;  %v13078_v2 = vld [vmem:[%s17614_s22 + $0x4f8] sm:$0xff]  ;;  %v13111_v4 = vld [vmem:[%s17614_s22 + $0x600] sm:$0xff] }
 0x14d   : > { %13867 = vmatpush3.bf16.msra.mxu1 %v1917_v25  ;;  %14686 = vmatprep.mubr.bf16.mxu1 %v16702_v27  ;;  %v13091_v25 = vld [vmem:[%s17614_s22 + $0x560] sm:$0xff]  ;;  %v13092_v27 = vld [vmem:[%s17614_s22 + $0x568] sm:$0xff]  ;;  %v1920_v31 = vpack.c.bf16 %v13042_v8, %v13041_v7  ;;  %v13077_v61 = vld [vmem:[%s17614_s22 + $0x4f0] sm:$0xff] }
 0x14e   : > { %13868 = vmatprep.subr.bf16.mxu1 %v1926_v30  ;;  %13931 = vmatpush3.bf16.msra.mxu0 %v1933_v34  ;;  %v17910_v30 = vld [vmem:[%s21407_s3 + $0x28] sm:$0xff]  ;;  %v17936_v7 = vld [vmem:[%s21407_s3 + $0x30] sm:$0xff] }
 0x14f   : > { %13932 = vmatprep.subr.bf16.mxu0 %v1942_v37  ;;  %v13044_v34 = vld [vmem:[%s17614_s22 + $0x3e8] sm:$0xff]  ;;  %v16709_v37 = vld [vmem:[#allocation7 + $0x1a0] ss:$28 sps:$4 sm:$0xff]   ;;  %1605 = vperm.xlu0 %16640, %v17910_v30  }
 0x150   : > { %v1921_v56 = vpack.c.bf16 %v13044_v34, %v13043_v33 }
 0x151   : > { %13869 = vmatpush3.bf16.msra.mxu1 %v1918_v48  ;;  %v1936_v48 = vpack.c.bf16 %v13074_v20, %v13073_v18  ;;  %v13096_v18 = vld [vmem:[%s17614_s22 + $0x588] sm:$0xff]  ;;  %v13127_v20 = vld [vmem:[%s17614_s22 + $0x680] sm:$0xff] }
 0x152   : > { %13870 = vmatprep.subr.bf16.mxu1 %v1927_v52  ;;  %13933 = vmatpush3.bf16.msra.mxu0 %v1934_v57  ;;  %v13076_v52 = vld [vmem:[%s17614_s22 + $0x4e8] sm:$0xff]  ;;  %v1930_v57 = vpack.c.bf16 %v13062_v44, %v13061_v41  ;;  %v13098_v41 = vld [vmem:[%s17614_s22 + $0x598] sm:$0xff]  ;;  %v17971_v44 = vld [vmem:[%s21407_s3 + $0x40] sm:$0xff] }
 0x153   : > { %1305 = vmatmul.mubr.bf16.gmra.mrb[40].mxu0 %v16703_v49  ;;  %13934 = vmatprep.subr.bf16.mxu0 %v1943_v59  ;;  %v1945_v49 = vpack.c.bf16 %v13092_v27, %v13091_v25  ;;  %v13046_v59 = vld [vmem:[%s17614_s22 + $0x3f8] sm:$0xff]  ;;  %v13113_v27 = vld [vmem:[%s17614_s22 + $0x610] sm:$0xff] }
 0x154   : > { %14687 = vmatmul.mubr.bf16.gmra.mrb[40].mxu1 %v16704_v51  ;;  %1312 = vmatprep.mubr.bf16.mxu0 %v16705_v62  ;;  %v13075_v51 = vld [vmem:[%s17614_s22 + $0x4e0] sm:$0xff]  ;;  %v1946_v62 = vpack.c.bf16 %v13094_v55, %v13093_v53  ;;  %v1922_v8 = vpack.c.bf16 %v13046_v59, %v13045_v58  ;;  %v17953_v25 = vld [vmem:[%s21407_s3 + $0x38] sm:$0xff] }
 0x155   : > { %13871 = vmatpush3.bf16.msra.mxu1 %v1919_v5  ;;  %14690 = vmatprep.mubr.bf16.mxu1 %v16707_v9  ;;  %v1937_v60 = vpack.c.bf16 %v13076_v52, %v13075_v51  ;;  %v13112_v5 = vld [vmem:[%s17614_s22 + $0x608] sm:$0xff]  ;;  %v16716_v51 = vld [vmem:[#allocation7 + $0x164] ss:$28 sps:$4 sm:$0xff]   ;;  %v17997_v58 = vld [vmem:[%s21406_s2 + $0x58] sm:$0xff] }
 0x156   : > { %13872 = vmatprep.subr.bf16.mxu1 %v1928_v12  ;;  %13935 = vmatpush3.bf16.msra.mxu0 %v1935_v15  ;;  %v16712_v9 = vld [vmem:[#allocation7 + $0xf0] ss:$28 sps:$4 sm:$0xff]   ;;  %v17942_v12 = vld [vmem:[%s21406_s2 + $0x40] sm:$0xff]  ;;  %v1938_v15 = vpack.c.bf16 %v13078_v2, %v13077_v61  ;;  %v1955_v16 = vpack.c.bf16 %v13112_v5, %v13111_v4 }
 0x157   : > { %13936 = vmatprep.subr.bf16.mxu0 %v1944_v17  ;;  %v13095_v17 = vld [vmem:[%s17614_s22 + $0x580] sm:$0xff]  ;;  %1610 = vperm.xlu0 %16640, %v17936_v7   ;;  %v17986_v52 = vld [vmem:[%s21407_s3 + $0x48] sm:$0xff]  ;;  %v13101_v5 = vld [vmem:[%s17614_s22 + $0x5b0] sm:$0xff] }
 0x158   : > { %1508 = vperm.xlu1 %16641, %v17942_v12   ;;  %v1947_v33 = vpack.c.bf16 %v13096_v18, %v13095_v17  ;;  %v13099_v55 = vld [vmem:[%s17614_s22 + $0x5a0] sm:$0xff]  ;;  %v13104_v17 = vld [vmem:[%s17614_s22 + $0x5c8] sm:$0xff] }
 0x159   : > { %13873 = vmatpush3.bf16.msra.mxu1 %v1920_v31  ;;  %v13114_v31 = vld [vmem:[%s17614_s22 + $0x618] sm:$0xff]  ;;  %v18038_v18 = vld [vmem:[%s21407_s3 + $0x60] sm:$0xff] }
 0x15a   : > { %13874 = vmatprep.subr.bf16.mxu1 %v1929_v40  ;;  %13937 = vmatpush3.bf16.msra.mxu0 %v1936_v48  ;;  %v1956_v40 = vpack.c.bf16 %v13114_v31, %v13113_v27  ;;  %v16715_v48 = vld [vmem:[#allocation7 + $0x128] ss:$28 sps:$4 sm:$0xff]   ;;  %v18012_v4 = vld [vmem:[#allocation7 + $0x160] ss:$28 sps:$4 sm:$0xff]   ;;  %v18047_v27 = vld [vmem:[%s21406_s2 + $0x70] sm:$0xff] }
 0x15b   : > { %1313 = vmatmul.mubr.bf16.gmra.mrb[44].mxu0 %v16708_v32  ;;  %13938 = vmatprep.subr.bf16.mxu0 %v1945_v49  ;;  %v17960_v32 = vld [vmem:[%s21406_s2 + $0x48] sm:$0xff]  ;;  %v13121_v31 = vld [vmem:[%s17614_s22 + $0x650] sm:$0xff] }
 0x15c   : > { %14691 = vmatmul.mubr.bf16.gmra.mrb[44].mxu1 %v16709_v37  ;;  %1320 = vmatprep.mubr.bf16.mxu0 %v16710_v45  ;;  %v13097_v37 = vld [vmem:[%s17614_s22 + $0x590] sm:$0xff]  ;;  %v13116_v49 = vld [vmem:[%s17614_s22 + $0x628] sm:$0xff] }
 0x15d   : > { %13875 = vmatpush3.bf16.msra.mxu1 %v1921_v56  ;;  %2291 = vmatprep.mubr.bf16.mxu1 %v17692_v23  ;;  %v13128_v23 = vld [vmem:[%s17614_s22 + $0x688] sm:$0xff]  ;;  %v17976_v45 = vld [vmem:[%s21406_s2 + $0x50] sm:$0xff]  ;;  %v1948_v53 = vpack.c.bf16 %v13098_v41, %v13097_v37  ;;  %v13106_v41 = vld [vmem:[%s17614_s22 + $0x5d8] sm:$0xff] }
 0x15e   : > { %13876 = vmatprep.subr.bf16.mxu1 %v1930_v57  ;;  %13939 = vmatpush3.bf16.msra.mxu0 %v1937_v60  ;;  %v17962_v34 = vpack.c.bf16 %v13128_v23, %v13127_v20  ;;  %v13117_v56 = vld [vmem:[%s17614_s22 + $0x630] sm:$0xff]  ;;  %v13118_v57 = vld [vmem:[%s17614_s22 + $0x638] sm:$0xff] }
 0x15f   : > { %13940 = vmatprep.subr.bf16.mxu0 %v1946_v62  ;;  %1615 = vperm.xlu0 %16640, %v17953_v25   ;;  %v18003_v60 = vld [vmem:[%s21407_s3 + $0x50] sm:$0xff]  ;;  %v18009_v62 = vld [vmem:[%s21406_s2 + $0x60] sm:$0xff]  ;;  %v1958_v2 = vpack.c.bf16 %v13118_v57, %v13117_v56 }
 0x160   : > { %1513 = vperm.xlu1 %16641, %v17960_v32   ;;  %v18052_v37 = vld [vmem:[#allocation7 + $0x198] ss:$28 sps:$4 sm:$0xff]  }
 0x161   : > { %13877 = vmatpush3.bf16.msra.mxu1 %v1922_v8  ;;  %v13102_v8 = vld [vmem:[%s17614_s22 + $0x5b8] sm:$0xff] }
 0x162   : > { %13941 = vmatpush3.bf16.msra.mxu0 %v1938_v15  ;;  %13990 = vmatprep.subr.bf16.mxu1 %v1955_v16  ;;  %v13120_v15 = vld [vmem:[%s17614_s22 + $0x648] sm:$0xff]  ;;  %v13103_v16 = vld [vmem:[%s17614_s22 + $0x5c0] sm:$0xff]  ;;  %v1950_v20 = vpack.c.bf16 %v13102_v8, %v13101_v5  ;;  %v18087_v5 = vld [vmem:[%s21407_s3 + $0x78] sm:$0xff] }
 0x163   : > { %1321 = vmatmul.mubr.bf16.gmra.mrb[48].mxu0 %v16712_v9  ;;  %14694 = vmatprep.subr.bf16.mxu0 %v17962_v34  ;;  %v18017_v9 = vld [vmem:[#allocation7 + $0x19c] ss:$28 sps:$4 sm:$0xff]   ;;  %v13125_v8 = vld [vmem:[%s17614_s22 + $0x670] sm:$0xff] }
 0x164   : > { %2292 = vmatmul.mubr.bf16.vlgmr.msra.gmra.mrb[48].mxu1 %v17702_v38  ;;  %1328 = vmatprep.mubr.bf16.mxu0 %v16713_v14  ;;  %v13115_v38 = vld [vmem:[%s17614_s22 + $0x620] sm:$0xff] }
 0x165   : > { %2299 = vmatprep.mubr.bf16.mxu1 %v17705_v42  ;;  %13991 = vmatpush3.bf16.msra.mxu1 %v1947_v33  ;;  %v13100_v42 = vld [vmem:[%s17614_s22 + $0x5a8] sm:$0xff]  ;;  %v1957_v59 = vpack.c.bf16 %v13116_v49, %v13115_v38  ;;  %v13119_v14 = vld [vmem:[%s17614_s22 + $0x640] sm:$0xff]  ;;  %v13122_v33 = vld [vmem:[%s17614_s22 + $0x658] sm:$0xff] }
 0x166   : > { %1620 = vperm.xlu0 %16640, %v17971_v44   ;;  %13992 = vmatprep.subr.bf16.mxu1 %v1956_v40  ;;  %v1949_v61 = vpack.c.bf16 %v13100_v42, %v13099_v55  ;;  %v1959_v23 = vpack.c.bf16 %v13120_v15, %v13119_v14  ;;  %v13105_v40 = vld [vmem:[%s17614_s22 + $0x5d0] sm:$0xff]  ;;  %v13123_v38 = vld [vmem:[%s17614_s22 + $0x660] sm:$0xff]  ;;  %v13124_v49 = vld [vmem:[%s17614_s22 + $0x668] sm:$0xff] }
 0x167   : > { %1518 = vperm.xlu1 %16641, %v17976_v45   ;;  %v13108_v55 = vld [vmem:[%s17614_s22 + $0x5e8] sm:$0xff]  ;;  %v18076_v42 = vld [vmem:[%s21407_s3 + $0x70] sm:$0xff]  ;;  %v1952_v56 = vpack.c.bf16 %v13106_v41, %v13105_v40  ;;  %v1961_v57 = vpack.c.bf16 %v13124_v49, %v13123_v38  ;;  %v13126_v14 = vld [vmem:[%s17614_s22 + $0x678] sm:$0xff] }
 0x168   : > { %v13109_v15 = vld [vmem:[%s17614_s22 + $0x5f0] sm:$0xff]  ;;  %v16974_v40 = vld [vmem:[#allocation7 + $0x44] ss:$28 sps:$4 sm:$0xff]   ;;  %v13134_v38 = vld [vmem:[%s17614_s22 + $0x6b8] sm:$0xff] }
 0x169   : > { %13993 = vmatpush3.bf16.msra.mxu1 %v1948_v53  ;;  %v13107_v53 = vld [vmem:[%s17614_s22 + $0x5e0] sm:$0xff]  ;;  %v16722_v49 = vld [vmem:[#allocation7 + $0x7c] ss:$28 sps:$4 sm:$0xff]  }
 0x16a   : > { %1625 = vperm.xlu0 %16640, %v17986_v52   ;;  %13994 = vmatprep.subr.bf16.mxu1 %v1957_v59  ;;  %v16972_v59 = vld [vmem:[#allocation7 + $0xc] ss:$28 sps:$4 sm:$0xff]  }
 0x16b   : > { %1329 = vmatmul.mubr.bf16.gmra.mrb[52].mxu0 %v16715_v48  ;;  %1523 = vperm.xlu1 %16641, %v17997_v58   ;;  %v1951_v48 = vpack.c.bf16 %v13104_v17, %v13103_v16  ;;  %v13110_v16 = vld [vmem:[%s17614_s22 + $0x5f8] sm:$0xff]  ;;  %v13132_v17 = vld [vmem:[%s17614_s22 + $0x6a8] sm:$0xff] }
 0x16c   : > { %2300 = vmatmul.mubr.bf16.gmra.mrb[52].mxu1 %v17716_v54  ;;  %1336 = vmatprep.mubr.bf16.mxu0 %v16716_v51  ;;  %v18022_v54 = vld [vmem:[%s21407_s3 + $0x58] sm:$0xff] }
 0x16d   : > { %2307 = vmatprep.mubr.bf16.mxu1 %v17723_v63  ;;  %13995 = vmatpush3.bf16.msra.mxu1 %v1949_v61  ;;  %v18030_v63 = vld [vmem:[%s21406_s2 + $0x68] sm:$0xff]  ;;  %v18069_v51 = vld [vmem:[%s21406_s2 + $0x78] sm:$0xff]  ;;  %v13129_v61 = vld [vmem:[%s17614_s22 + $0x690] sm:$0xff] }
 0x16e   : > { %1630 = vperm.xlu0 %16640, %v18003_v60   ;;  %13996 = vmatprep.subr.bf16.mxu1 %v1958_v2  ;;  %v13130_v2 = vld [vmem:[%s17614_s22 + $0x698] sm:$0xff] }
 0x16f   : > { %1528 = vperm.xlu1 %16641, %v18009_v62  }
 0x171   : > { %13997 = vmatpush3.bf16.msra.mxu1 %v1950_v20  ;;  %v1964_v20 = vpack.c.bf16 %v13130_v2, %v13129_v61  ;;  %v16728_v61 = vld [vmem:[#allocation7 + $0xec] ss:$28 sps:$4 sm:$0xff]  }
 0x172   : > { %1635 = vperm.xlu0 %16640, %v18022_v54   ;;  %13998 = vmatprep.subr.bf16.mxu1 %v1959_v23  ;;  %v1962_v23 = vpack.c.bf16 %v13126_v14, %v13125_v8  ;;  %v16979_v8 = vld [vmem:[#allocation7 + $0x14] ss:$28 sps:$4 sm:$0xff]   ;;  %v16730_v14 = vld [vmem:[#allocation7 + $0xe8] ss:$28 sps:$4 sm:$0xff]  }
 0x173   : > { %1337 = vmatmul.mubr.bf16.gmra.mrb[56].mxu0 %v18012_v4  ;;  %1533 = vperm.xlu1 %16641, %v18030_v63  }
 0x174   : > { %2308 = vmatmul.mubr.bf16.gmra.mrb[56].mxu1 %v17733_v10  ;;  %1344 = vmatprep.mubr.bf16.mxu0 %v18017_v9  ;;  %v18060_v10 = vld [vmem:[%s21407_s3 + $0x68] sm:$0xff] }
 0x175   : > { %2315 = vmatprep.mubr.bf16.mxu1 %v17743_v24  ;;  %v1960_v24 = vpack.c.bf16 %v13122_v33, %v13121_v31  ;;  %13999 = vmatpush3.bf16.msra.mxu1 %v1951_v48  ;;  %v16973_v31 = vld [vmem:[#allocation7 + $0x8] ss:$28 sps:$4 sm:$0xff]   ;;  %v1954_v33 = vpack.c.bf16 %v13110_v16, %v13109_v15  ;;  %v13133_v48 = vld [vmem:[%s17614_s22 + $0x6b0] sm:$0xff] }
 0x176   : > { %1640 = vperm.xlu0 %16640, %v18038_v18   ;;  %v16744_v15 = vld [vmem:[#allocation7 + $0xf8] ss:$28 sps:$4 sm:$0xff]  }
 0x177   : > { %1538 = vperm.xlu1 %16641, %v18047_v27   ;;  %14000 = vmatprep.subr.bf16.mxu1 %v1960_v24  ;;  %v13138_v24 = vld [vmem:[%s17614_s22 + $0x6d8] sm:$0xff] }
 0x179   : > { %14001 = vmatpush3.bf16.msra.mxu1 %v1952_v56  ;;  %v13140_v56 = vld [vmem:[%s17614_s22 + $0x6e8] sm:$0xff] }
 0x17a   : > { %1645 = vperm.xlu0 %16640, %v18060_v10   ;;  %14002 = vmatprep.subr.bf16.mxu1 %v1961_v57  ;;  %v16977_v57 = vld [vmem:[#allocation7 + $0x18c] ss:$28 sps:$4 sm:$0xff]  }
 0x17b   : > { %1345 = vmatmul.mubr.bf16.gmra.mrb[60].mxu0 %v18052_v37  ;;  %1543 = vperm.xlu1 %16641, %v18069_v51  }
 0x17c   : > { %2316 = vmatmul.mubr.bf16.gmra.mrb[60].mxu1 %v17753_v36  ;;  %2388 = vmatprep.mubr.bf16.mxu0 %v16972_v59  ;;  %v1953_v36 = vpack.c.bf16 %v13108_v55, %v13107_v53  ;;  %v16725_v53 = vld [vmem:[#allocation7 + $0xb4] ss:$28 sps:$4 sm:$0xff]   ;;  %v13142_v59 = vld [vmem:[%s17614_s22 + $0x6f8] sm:$0xff] }
 0x17d   : > { %2323 = vmatprep.mubr.bf16.mxu1 %v17759_v46  ;;  %v13131_v46 = vld [vmem:[%s17614_s22 + $0x6a0] sm:$0xff] }
 0x17e   : > { %1650 = vperm.xlu0 %16640, %v18076_v42   ;;  %14003 = vmatpush3.bf16.msra.mxu1 %v1953_v36  ;;  %v1965_v41 = vpack.c.bf16 %v13132_v17, %v13131_v46  ;;  %v16731_v36 = vld [vmem:[#allocation7 + $0x124] ss:$28 sps:$4 sm:$0xff]  }
 0x17f   : > { %1655 = vperm.xlu1 %16641, %v18087_v5   ;;  %14004 = vmatprep.subr.bf16.mxu1 %v1962_v23  ;;  %v16746_v46 = vld [vmem:[#allocation7 + $0x168] ss:$28 sps:$4 sm:$0xff]   ;;  %v16747_v17 = vld [vmem:[#allocation7 + $0x1a0] ss:$28 sps:$4 sm:$0xff]  }
 0x182   : > { %2665 = vperm.xlu0 %16640, %v17790_v19   ;;  %14005 = vmatpush3.bf16.msra.mxu1 %v1954_v33  ;;  %v13136_v19 = vld [vmem:[%s17614_s22 + $0x6c8] sm:$0xff] }
 0x183   : > { %2389 = vmatmul.mubr.bf16.vlgmr.msra.gmra.mrb[64].mxu0 %v16973_v31  ;;  %2670 = vperm.xlu1 %16641, %v17802_v26   ;;  %v16724_v26 = vld [vmem:[#allocation7 + $0x78] ss:$28 sps:$4 sm:$0xff]  }
 0x184   : > { %2324 = vmatmul.mubr.bf16.gmra.mrb[64].mxu1 %v17772_v0  ;;  %14695 = vmatpush3.bf16.msra.mxu0 %v17962_v34  ;;  %v13135_v0 = vld [vmem:[%s17614_s22 + $0x6c0] sm:$0xff] }
 0x185   : > { %2331 = vmatprep.mubr.bf16.mxu1 %v17775_v3  ;;  %2396 = vmatprep.mubr.bf16.mxu0 %v16974_v40  ;;  %v1966_v3 = vpack.c.bf16 %v13134_v38, %v13133_v48  ;;  %v16975_v34 = vld [vmem:[#allocation7 + $0x40] ss:$28 sps:$4 sm:$0xff]   ;;  %v1967_v55 = vpack.c.bf16 %v13136_v19, %v13135_v0 }
 0x186   : > { %14696 = vmatprep.subr.bf16.mxu0 %v1964_v20  ;;  %2777 = vperm.xlu0 %16640, %v17796_v21   ;;  %v13137_v21 = vld [vmem:[%s17614_s22 + $0x6d0] sm:$0xff] }
 0x187   : > { %2675 = vperm.xlu1 %16641, %v17808_v28   ;;  %v13139_v28 = vld [vmem:[%s17614_s22 + $0x6e0] sm:$0xff] }
 0x188   : > { %14697 = vmatpush3.bf16.msra.mxu0 %v1964_v20  ;;  %v1969_v2 = vpack.c.bf16 %v13140_v56, %v13139_v28 }
 0x189   : > { %14698 = vmatprep.subr.bf16.mxu0 %v1965_v41 }
 0x18a   : > { %2782 = vperm.xlu0 %16640, %v17813_v29   ;;  %v16727_v29 = vld [vmem:[#allocation7 + $0xb0] ss:$28 sps:$4 sm:$0xff]  }
 0x18b   : > { %2397 = vmatmul.mubr.bf16.gmra.mrb[68].mxu0 %v16975_v34  ;;  %2680 = vperm.xlu1 %16641, %v17825_v39   ;;  %v13141_v39 = vld [vmem:[%s17614_s22 + $0x6f0] sm:$0xff] }
 0x18c   : > { %2332 = vmatmul.mubr.bf16.gmra.mrb[68].mxu1 %v17781_v11  ;;  %2404 = vmatprep.mubr.bf16.mxu0 %v16722_v49  ;;  %v1968_v11 = vpack.c.bf16 %v13138_v24, %v13137_v21 }
 0x18d   : > { %2339 = vmatprep.mubr.bf16.mxu1 %v17783_v13  ;;  %14699 = vmatpush3.bf16.msra.mxu0 %v1965_v41  ;;  %v16976_v13 = vld [vmem:[#allocation7 + $0x150] ss:$28 sps:$4 sm:$0xff]  }
 0x18e   : > { %14700 = vmatprep.subr.bf16.mxu0 %v1966_v3  ;;  %2787 = vperm.xlu0 %16640, %v17831_v43   ;;  %v1970_v43 = vpack.c.bf16 %v13142_v59, %v13141_v39 }
 0x18f   : > { %2685 = vperm.xlu1 %16641, %v17849_v1   ;;  %v16978_v1 = vld [vmem:[#allocation7 + $0x188] ss:$28 sps:$4 sm:$0xff]  }
 0x191   : > { %14701 = vmatpush3.bf16.msra.mxu0 %v1966_v3 }
 0x192   : > { %14702 = vmatprep.subr.bf16.mxu0 %v1967_v55  ;;  %2792 = vperm.xlu0 %16640, %v17854_v6   ;;  %v16980_v6 = vld [vmem:[#allocation7 + $0x10] ss:$28 sps:$4 sm:$0xff]  }
 0x193   : > { %2405 = vmatmul.mubr.bf16.gmra.mrb[72].mxu0 %v16724_v26  ;;  %2690 = vperm.xlu1 %16641, %v17868_v22   ;;  %v16981_v22 = vld [vmem:[#allocation7 + $0x4c] ss:$28 sps:$4 sm:$0xff]  }
 0x194   : > { %2340 = vmatmul.mubr.bf16.gmra.mrb[72].mxu1 %v16976_v13  ;;  %2412 = vmatprep.mubr.bf16.mxu0 %v16725_v53 }
 0x195   : > { %2347 = vmatprep.mubr.bf16.mxu1 %v16977_v57  ;;  %14703 = vmatpush3.bf16.msra.mxu0 %v1967_v55 }
 0x196   : > { %14704 = vmatprep.subr.bf16.mxu0 %v1968_v11  ;;  %2797 = vperm.xlu0 %16640, %v17882_v47   ;;  %v16733_v47 = vld [vmem:[#allocation7 + $0x120] ss:$28 sps:$4 sm:$0xff]   ;;  %v18153_v20 = vpop.permute.xlu1 %1580 }
 0x197   : > { %2695 = vperm.xlu1 %16641, %v17887_v50   ;;  %v16734_v50 = vld [vmem:[#allocation7 + $0x15c] ss:$28 sps:$4 sm:$0xff]  }
 0x199   : > { %14705 = vmatpush3.bf16.msra.mxu0 %v1968_v11 }
 0x19a   : > { %14706 = vmatprep.subr.bf16.mxu0 %v1969_v2  ;;  %2802 = vperm.xlu0 %16640, %v17910_v30   ;;  %v16982_v30 = vld [vmem:[#allocation7 + $0x48] ss:$28 sps:$4 sm:$0xff]  }
 0x19b   : > { %2413 = vmatmul.mubr.bf16.gmra.mrb[76].mxu0 %v16727_v29  ;;  %2700 = vperm.xlu1 %16641, %v17917_v35   ;;  %v16983_v35 = vld [vmem:[#allocation7 + $0x84] ss:$28 sps:$4 sm:$0xff]  }
 0x19c   : > { %2348 = vmatmul.mubr.bf16.gmra.mrb[76].mxu1 %v16978_v1  ;;  %2420 = vmatprep.mubr.bf16.mxu0 %v16728_v61 }
 0x19d   : > { %2485 = vmatprep.mubr.bf16.mxu1 %v16979_v8  ;;  %14707 = vmatpush3.bf16.msra.mxu0 %v1969_v2 }
 0x19e   : > { %14708 = vmatprep.subr.bf16.mxu0 %v1970_v43  ;;  %2807 = vperm.xlu0 %16640, %v17936_v7   ;;  %v16736_v7 = vld [vmem:[#allocation7 + $0x158] ss:$28 sps:$4 sm:$0xff]   ;;  %v18162_v21 = vpop.permute.xlu1 %1478 }
 0x19f   : > { %2705 = vperm.xlu1 %16641, %v17942_v12   ;;  %v16737_v12 = vld [vmem:[#allocation7 + $0x194] ss:$28 sps:$4 sm:$0xff]  }
 0x1a1   : > { %14709 = vmatpush3.bf16.msra.mxu0 %v1970_v43 }
 0x1a2   : > { %2812 = vperm.xlu0 %16640, %v17953_v25   ;;  %v16984_v25 = vld [vmem:[#allocation7 + $0x80] ss:$28 sps:$4 sm:$0xff]  }
 0x1a3   : > { %2421 = vmatmul.mubr.bf16.gmra.mrb[80].mxu0 %v16730_v14  ;;  %2710 = vperm.xlu1 %16641, %v17960_v32   ;;  %v16985_v32 = vld [vmem:[#allocation7 + $0xbc] ss:$28 sps:$4 sm:$0xff]  }
 0x1a4   : > { %2486 = vmatmul.mubr.bf16.vlgmr.msra.gmra.mrb[80].mxu1 %v16980_v6  ;;  %2428 = vmatprep.mubr.bf16.mxu0 %v16731_v36  ;;  %v18170_v1 = vpop.permute.xlu1 %1483 }
 0x1a5   : > { %2493 = vmatprep.mubr.bf16.mxu1 %v16981_v22 }
 0x1a6   : > { %2817 = vperm.xlu0 %16640, %v17971_v44   ;;  %v16739_v44 = vld [vmem:[#allocation7 + $0x190] ss:$28 sps:$4 sm:$0xff]  }
 0x1a7   : > { %2715 = vperm.xlu1 %16641, %v17976_v45   ;;  %v16740_v45 = vld [vmem:[#allocation7 + $0x18] ss:$28 sps:$4 sm:$0xff]  }
 0x1aa   : > { %2822 = vperm.xlu0 %16640, %v17986_v52   ;;  %v16986_v52 = vld [vmem:[#allocation7 + $0xb8] ss:$28 sps:$4 sm:$0xff]  }
 0x1ab   : > { %2429 = vmatmul.mubr.bf16.gmra.mrb[84].mxu0 %v16733_v47  ;;  %2720 = vperm.xlu1 %16641, %v17997_v58   ;;  %v16987_v58 = vld [vmem:[#allocation7 + $0xf4] ss:$28 sps:$4 sm:$0xff]  }
 0x1ac   : > { %2494 = vmatmul.mubr.bf16.gmra.mrb[84].mxu1 %v16982_v30  ;;  %2436 = vmatprep.mubr.bf16.mxu0 %v16734_v50 }
 0x1ad   : > { %2501 = vmatprep.mubr.bf16.mxu1 %v16983_v35 }
 0x1ae   : > { %2827 = vperm.xlu0 %16640, %v18003_v60   ;;  %v16741_v60 = vld [vmem:[#allocation7 + $0x50] ss:$28 sps:$4 sm:$0xff]  }
 0x1af   : > { %2725 = vperm.xlu1 %16641, %v18009_v62   ;;  %v16742_v62 = vld [vmem:[#allocation7 + $0x88] ss:$28 sps:$4 sm:$0xff]  }
 0x1b2   : > { %2832 = vperm.xlu0 %16640, %v18022_v54   ;;  %v16988_v54 = vld [vmem:[#allocation7 + $0xf0] ss:$28 sps:$4 sm:$0xff]  }
 0x1b3   : > { %2437 = vmatmul.mubr.bf16.gmra.mrb[88].mxu0 %v16736_v7  ;;  %2730 = vperm.xlu1 %16641, %v18030_v63   ;;  %v18145_v63 = vpop.permute.xlu0 %1468 }
 0x1b4   : > { %2502 = vmatmul.mubr.bf16.gmra.mrb[88].mxu1 %v16984_v25  ;;  %2444 = vmatprep.mubr.bf16.mxu0 %v16737_v12 }
 0x1b5   : > { %2509 = vmatprep.mubr.bf16.mxu1 %v16985_v32 }
 0x1b6   : > { %2837 = vperm.xlu0 %16640, %v18038_v18   ;;  %v16989_v18 = vld [vmem:[#allocation7 + $0x12c] ss:$28 sps:$4 sm:$0xff]  }
 0x1b7   : > { %2735 = vperm.xlu1 %16641, %v18047_v27   ;;  %v16743_v27 = vld [vmem:[#allocation7 + $0xc0] ss:$28 sps:$4 sm:$0xff]   ;;  %v18147_v16 = vpop.permute.xlu0 %1473 }
 0x1ba   : > { %2842 = vperm.xlu0 %16640, %v18060_v10   ;;  %v16990_v10 = vld [vmem:[#allocation7 + $0x128] ss:$28 sps:$4 sm:$0xff]  }
 0x1bb   : > { %2445 = vmatmul.mubr.bf16.gmra.mrb[92].mxu0 %v16739_v44  ;;  %2740 = vperm.xlu1 %16641, %v18069_v51   ;;  %v16991_v51 = vld [vmem:[#allocation7 + $0x164] ss:$28 sps:$4 sm:$0xff]  }
 0x1bc   : > { %2510 = vmatmul.mubr.bf16.gmra.mrb[92].mxu1 %v16986_v52  ;;  %14710 = vmatprep.mubr.bf16.mxu0 %v16740_v45  ;;  %v18178_v52 = vpop.permute.xlu1 %1488 }
 0x1bd   : > { %2517 = vmatprep.mubr.bf16.mxu1 %v16987_v58 }
 0x1be   : > { %2847 = vperm.xlu0 %16640, %v18076_v42   ;;  %v16745_v42 = vld [vmem:[#allocation7 + $0x130] ss:$28 sps:$4 sm:$0xff]  }
 0x1bf   : > { %2852 = vperm.xlu1 %16641, %v18087_v5   ;;  %v18149_v5 = vpop.permute.xlu0 %1585 }
 0x1c3   : > { %14711 = vmatmul.mubr.bf16.vlgmr.msra.gmra.mrb[96].mxu0 %v16741_v60  ;;  %v18155_v31 = vpop.permute.xlu0 %1590 }
 0x1c4   : > { %2518 = vmatmul.mubr.bf16.gmra.mrb[96].mxu1 %v16988_v54  ;;  %14714 = vmatprep.mubr.bf16.mxu0 %v16742_v62 }
 0x1c5   : > { %2525 = vmatprep.mubr.bf16.mxu1 %v16989_v18 }
 0x1c7   : > { %v18164_v53 = vpop.permute.xlu0 %1595 }
 0x1cb   : > { %14715 = vmatmul.mubr.bf16.gmra.mrb[100].mxu0 %v16743_v27  ;;  %v18172_v14 = vpop.permute.xlu0 %1600 }
 0x1cc   : > { %2526 = vmatmul.mubr.bf16.gmra.mrb[100].mxu1 %v16990_v10  ;;  %14718 = vmatprep.mubr.bf16.mxu0 %v16744_v15 }
 0x1cd   : > { %2533 = vmatprep.mubr.bf16.mxu1 %v16991_v51 }
 0x1cf   : > { %v18180_v60 = vpop.permute.xlu0 %1605 }
 0x1d3   : > { %14719 = vmatmul.mubr.bf16.gmra.mrb[104].mxu0 %v16745_v42 }
 0x1d4   : > { %2534 = vmatmul.mubr.bf16.gmra.mrb[104].mxu1 %v18012_v4  ;;  %14722 = vmatprep.mubr.bf16.mxu0 %v16746_v46 }
 0x1d5   : > { %2541 = vmatprep.mubr.bf16.mxu1 %v18017_v9 }
 0x1d6   : > { %v13670_v23 = vpop.f32.mrb[0].mxu0 }
 0x1d7   : > { %v13734_v33 = vpop.f32.mrb[0].mxu1  ;;  %v13671_v40 = vpop.f32.mrb[1].mxu0 }
 0x1d8   : > { %v13672_v41 = vadd.f32 %v13671_v40, %v13670_v23  ;;  %v13735_v48 = vpop.f32.mrb[1].mxu1  ;;  %v13673_v38 = vpop.f32.mrb[2].mxu0 }
 0x1d9   : > { %v13736_v49 = vadd.f32 %v13735_v48, %v13734_v33  ;;  %v13737_v0 = vpop.f32.mrb[2].mxu1  ;;  %v13674_v19 = vpop.f32.mrb[3].mxu0 }
 0x1da   : > { %v13675_v3 = vadd.f32 %v13674_v19, %v13673_v38  ;;  %v13738_v34 = vpop.f32.mrb[3].mxu1  ;;  %v18184_v40 = vpop.permute.xlu1 %1493 }
 0x1db   : > { %v18157_v4 = vadd.f32 %v13736_v49, %v13672_v41  ;;  %v13739_v26 = vadd.f32 %v13738_v34, %v13737_v0  ;;  %14723 = vmatmul.mubr.bf16.gmra.mrb[108].mxu0 %v16747_v17  ;;  %v18188_v38 = vpop.permute.xlu0 %1610 }
 0x1dc   : > { %2542 = vmatmul.mubr.bf16.gmra.mrb[108].mxu1 %v18052_v37 }
 0x1dd   : > { %v18160_v9 = vadd.f32 %v13739_v26, %v13675_v3 }
 0x1de   : > { %v13676_v24 = vpop.f32.mrb[4].mxu0 }
 0x1df   : > { %v13740_v55 = vpop.f32.mrb[4].mxu1  ;;  %v13677_v28 = vpop.f32.mrb[5].mxu0 }
 0x1e0   : > { %v13678_v56 = vadd.f32 %v13677_v28, %v13676_v24  ;;  %v13741_v11 = vpop.f32.mrb[5].mxu1  ;;  %v13679_v13 = vpop.f32.mrb[6].mxu0 }
 0x1e1   : > { %v13742_v57 = vadd.f32 %v13741_v11, %v13740_v55  ;;  %v13743_v29 = vpop.f32.mrb[6].mxu1  ;;  %v13680_v39 = vpop.f32.mrb[7].mxu0 }
 0x1e2   : > { %v13681_v59 = vadd.f32 %v13680_v39, %v13679_v13  ;;  %v13744_v61 = vpop.f32.mrb[7].mxu1  ;;  %v18196_v39 = vpop.permute.xlu0 %1615 }
 0x1e3   : > { %v18166_v2 = vadd.f32 %v13742_v57, %v13678_v56  ;;  %v13745_v37 = vadd.f32 %v13744_v61, %v13743_v29  ;;  %v18192_v57 = vpop.permute.xlu1 %1498 }
 0x1e5   : > { %v18168_v43 = vadd.f32 %v13745_v37, %v13681_v59 }
 0x1e6   : > { %v13682_v8 = vpop.f32.mrb[8].mxu0 }
 0x1e7   : > { %v13746_v36 = vpop.f32.mrb[8].mxu1  ;;  %v13683_v6 = vpop.f32.mrb[9].mxu0 }
 0x1e8   : > { %v13684_v22 = vadd.f32 %v13683_v6, %v13682_v8  ;;  %v13747_v47 = vpop.f32.mrb[9].mxu1  ;;  %v13685_v50 = vpop.f32.mrb[10].mxu0 }
 0x1e9   : > { %v13748_v30 = vadd.f32 %v13747_v47, %v13746_v36  ;;  %v13749_v35 = vpop.f32.mrb[10].mxu1  ;;  %v13686_v7 = vpop.f32.mrb[11].mxu0 }
 0x1ea   : > { %v13687_v12 = vadd.f32 %v13686_v7, %v13685_v50  ;;  %v13750_v25 = vpop.f32.mrb[11].mxu1 }
 0x1eb   : > { %v18174_v32 = vadd.f32 %v13748_v30, %v13684_v22  ;;  %v13751_v44 = vadd.f32 %v13750_v25, %v13749_v35  ;;  %v18200_v25 = vpop.permute.xlu1 %1503 }
 0x1ed   : > { %v18176_v45 = vadd.f32 %v13751_v44, %v13687_v12 }
 0x1ee   : > { %v13688_v58 = vpop.f32.mrb[12].mxu0 }
 0x1ef   : > { %v13752_v62 = vpop.f32.mrb[12].mxu1  ;;  %v13689_v54 = vpop.f32.mrb[13].mxu0 }
 0x1f0   : > { %v13690_v18 = vadd.f32 %v13689_v54, %v13688_v58  ;;  %v13753_v27 = vpop.f32.mrb[13].mxu1  ;;  %v13691_v15 = vpop.f32.mrb[14].mxu0 }
 0x1f1   : > { %v13754_v10 = vadd.f32 %v13753_v27, %v13752_v62  ;;  %v13755_v51 = vpop.f32.mrb[14].mxu1  ;;  %v13692_v42 = vpop.f32.mrb[15].mxu0 }
 0x1f2   : > { %v13693_v46 = vadd.f32 %v13692_v42, %v13691_v15  ;;  %v13756_v17 = vpop.f32.mrb[15].mxu1  ;;  %v18204_v58 = vpop.permute.xlu0 %1620 }
 0x1f3   : > { %v18182_v23 = vadd.f32 %v13754_v10, %v13690_v18  ;;  %v13757_v33 = vadd.f32 %v13756_v17, %v13755_v51 }
 0x1f5   : > { %v18186_v41 = vadd.f32 %v13757_v33, %v13693_v46 }
 0x1f6   : > { %v13694_v48 = vpop.f32.mrb[16].mxu0 }
 0x1f7   : > { %v13758_v49 = vpop.f32.mrb[16].mxu1  ;;  %v13695_v0 = vpop.f32.mrb[17].mxu0 }
 0x1f8   : > { %v13696_v19 = vadd.f32 %v13695_v0, %v13694_v48  ;;  %v13759_v3 = vpop.f32.mrb[17].mxu1  ;;  %v13697_v34 = vpop.f32.mrb[18].mxu0 }
 0x1f9   : > { %v13760_v26 = vadd.f32 %v13759_v3, %v13758_v49  ;;  %v13761_v24 = vpop.f32.mrb[18].mxu1  ;;  %v13698_v55 = vpop.f32.mrb[19].mxu0 }
 0x1fa   : > { %v13699_v28 = vadd.f32 %v13698_v55, %v13697_v34  ;;  %v13762_v56 = vpop.f32.mrb[19].mxu1  ;;  %v18208_v0 = vpop.permute.xlu1 %1508 }
 0x1fb   : > { %v18190_v11 = vadd.f32 %v13760_v26, %v13696_v19  ;;  %v13763_v13 = vadd.f32 %v13762_v56, %v13761_v24  ;;  %v18212_v3 = vpop.permute.xlu0 %1625 }
 0x1fd   : > { %v18194_v29 = vadd.f32 %v13763_v13, %v13699_v28 }
 0x1fe   : > { %v13700_v59 = vpop.f32.mrb[20].mxu0 }
 0x1ff   : > { %v13764_v61 = vpop.f32.mrb[20].mxu1  ;;  %v13701_v37 = vpop.f32.mrb[21].mxu0 }
 0x200   : > { %v13702_v8 = vadd.f32 %v13701_v37, %v13700_v59  ;;  %v13765_v36 = vpop.f32.mrb[21].mxu1  ;;  %v13703_v6 = vpop.f32.mrb[22].mxu0 }
 0x201   : > { %v13766_v22 = vadd.f32 %v13765_v36, %v13764_v61  ;;  %v13767_v47 = vpop.f32.mrb[22].mxu1  ;;  %v13704_v50 = vpop.f32.mrb[23].mxu0 }
 0x202   : > { %v13705_v30 = vadd.f32 %v13704_v50, %v13703_v6  ;;  %v13768_v35 = vpop.f32.mrb[23].mxu1  ;;  %v18220_v50 = vpop.permute.xlu1 %1513 }
 0x203   : > { %v18198_v7 = vadd.f32 %v13766_v22, %v13702_v8  ;;  %v13769_v12 = vadd.f32 %v13768_v35, %v13767_v47  ;;  %v18216_v22 = vpop.permute.xlu0 %1630 }
 0x205   : > { %v18202_v44 = vadd.f32 %v13769_v12, %v13705_v30 }
 0x206   : > { %v13706_v62 = vpop.f32.mrb[24].mxu0 }
 0x207   : > { %v13770_v54 = vpop.f32.mrb[24].mxu1  ;;  %v13707_v18 = vpop.f32.mrb[25].mxu0 }
 0x208   : > { %v13708_v27 = vadd.f32 %v13707_v18, %v13706_v62  ;;  %v13771_v15 = vpop.f32.mrb[25].mxu1  ;;  %v13709_v10 = vpop.f32.mrb[26].mxu0 }
 0x209   : > { %v13772_v51 = vadd.f32 %v13771_v15, %v13770_v54  ;;  %v13773_v42 = vpop.f32.mrb[26].mxu1  ;;  %v13710_v46 = vpop.f32.mrb[27].mxu0 }
 0x20a   : > { %v13711_v17 = vadd.f32 %v13710_v46, %v13709_v10  ;;  %v13774_v33 = vpop.f32.mrb[27].mxu1  ;;  %v18222_v10 = vpop.permute.xlu0 %1635 }
 0x20b   : > { %v18206_v48 = vadd.f32 %v13772_v51, %v13708_v27  ;;  %v13775_v49 = vadd.f32 %v13774_v33, %v13773_v42 }
 0x20d   : > { %v18210_v19 = vadd.f32 %v13775_v49, %v13711_v17  ;;  %v18226_v49 = vpop.permute.xlu1 %1518 }
 0x20e   : > { %v13712_v34 = vpop.f32.mrb[28].mxu0 }
 0x20f   : > { %v13776_v26 = vpop.f32.mrb[28].mxu1  ;;  %v13713_v24 = vpop.f32.mrb[29].mxu0 }
 0x210   : > { %v13714_v55 = vadd.f32 %v13713_v24, %v13712_v34  ;;  %v13777_v28 = vpop.f32.mrb[29].mxu1  ;;  %v13715_v56 = vpop.f32.mrb[30].mxu0 }
 0x211   : > { %v13778_v13 = vadd.f32 %v13777_v28, %v13776_v26  ;;  %v13779_v59 = vpop.f32.mrb[30].mxu1  ;;  %v13716_v61 = vpop.f32.mrb[31].mxu0 }
 0x212   : > { %v13717_v37 = vadd.f32 %v13716_v61, %v13715_v56  ;;  %v13780_v8 = vpop.f32.mrb[31].mxu1  ;;  %v18231_v56 = vpop.permute.xlu0 %1640 }
 0x213   : > { %v18214_v36 = vadd.f32 %v13778_v13, %v13714_v55  ;;  %v13781_v6 = vadd.f32 %v13780_v8, %v13779_v59 }
 0x215   : > { %v18218_v47 = vadd.f32 %v13781_v6, %v13717_v37 }
 0x216   : > { %v13798_v30 = vpop.f32.mrb[32].mxu0 }
 0x217   : > { %v13799_v35 = vpop.f32.mrb[33].mxu0  ;;  %v14680_v12 = vpop.f32.mrb[32].mxu1 }
 0x218   : > { %v13800_v62 = vadd.f32 %v13799_v35, %v13798_v30  ;;  %v13801_v54 = vpop.f32.mrb[34].mxu0  ;;  %v1387_v18 = vpop.f32.mrb[33].mxu1 }
 0x219   : > { %v13802_v27 = vpop.f32.mrb[35].mxu0  ;;  %v14681_v15 = vpop.f32.mrb[34].mxu1 }
 0x21a   : > { %v13803_v51 = vadd.f32 %v13802_v27, %v13801_v54  ;;  %v1291_v42 = vadd.f32 %v13800_v62, %v18157_v4  ;;  %v1390_v46 = vpop.f32.mrb[35].mxu1  ;;  %v18237_v54 = vpop.permute.xlu1 %1523 }
 0x21c   : > { %v1388_v17 = vadd.f32 %v1387_v18, %v1291_v42  ;;  %v1294_v33 = vadd.f32 %v13803_v51, %v18160_v9  ;;  %v18240_v51 = vpop.permute.xlu0 %1645 }
 0x21e   : > { %v1546_v34 = vmul.f32 %v18145_v63, %v1388_v17  ;;  %v1391_v26 = vadd.f32 %v1390_v46, %v1294_v33  ;;  %v13804_v24 = vpop.f32.mrb[36].mxu0 }
 0x21f   : > { %v13805_v55 = vpop.f32.mrb[37].mxu0  ;;  %v18229_v28 = vpop.f32.mrb[36].mxu1 }
 0x220   : > { %v1547_v13 = vmul.f32 %v18147_v16, %v1391_v26  ;;  %v13806_v59 = vadd.f32 %v13805_v55, %v13804_v24  ;;  %v13807_v61 = vpop.f32.mrb[38].mxu0  ;;  %v1658_v4 = vadd.f32 %v18153_v20, %v1546_v34  ;;  %v1403_v8 = vpop.f32.mrb[37].mxu1 }
 0x221   : > { %v13808_v37 = vpop.f32.mrb[39].mxu0  ;;  %v14685_v35 = vpop.f32.mrb[38].mxu1 }
 0x222   : > { %v1659_v9 = vadd.f32 %v18149_v5, %v1547_v13  ;;  %v1299_v6 = vadd.f32 %v13806_v59, %v18166_v2  ;;  %v13809_v63 = vadd.f32 %v13808_v37, %v13807_v61  ;;  %v1674_v30 = vmax.f32 %v1658_v4, 0.0  ;;  %v1406_v62 = vpop.f32.mrb[39].mxu1  ;;  %v18249_v55 = vpop.permute.xlu1 %1528 }
 0x223   : > { %v18255_v37 = vpop.permute.xlu0 %1650 }
 0x224   : > { %v1675_v18 = vmax.f32 %v1659_v9, 0.0  ;;  %v1396_v27 = vadd.f32 %v14680_v12, %v1299_v6  ;;  %v1302_v16 = vadd.f32 %v13809_v63, %v18168_v43  ;;  %1690 = vxpose.xlu0.b32.start [1/16] %v1674_v30, 128 }
 0x226   : > { %v1548_v20 = vmul.f32 %v18162_v21, %v1396_v27  ;;  %v1399_v42 = vadd.f32 %v14681_v15, %v1302_v16  ;;  %v13810_v46 = vpop.f32.mrb[40].mxu0  ;;  %v18243_v5 = vpack.c.bf16 %v1675_v18, %v1674_v30 }
 0x227   : > { %v13811_v2 = vpop.f32.mrb[41].mxu0  ;;  %v18245_v17 = vpop.f32.mrb[40].mxu1 }
 0x228   : > { %v1549_v33 = vmul.f32 %v18170_v1, %v1399_v42  ;;  %v13812_v34 = vadd.f32 %v13811_v2, %v13810_v46  ;;  %v13813_v26 = vpop.f32.mrb[42].mxu0  ;;  %1691 = vxpose.xlu0.b32.cont [2/16] %v1675_v18, 128  ;;  %v1660_v12 = vadd.f32 %v18155_v31, %v1548_v20  ;;  %v1419_v24 = vpop.f32.mrb[41].mxu1 }
 0x229   : > { %v13814_v43 = vpop.f32.mrb[43].mxu0  ;;  %v18253_v61 = vpop.f32.mrb[42].mxu1 }
 0x22a   : > { %v13815_v13 = vadd.f32 %v13814_v43, %v13813_v26  ;;  %v1307_v21 = vadd.f32 %v13812_v34, %v18174_v32  ;;  %v1676_v15 = vmax.f32 %v1660_v12, 0.0  ;;  %v1661_v59 = vadd.f32 %v18164_v53, %v1549_v33  ;;  %v1422_v4 = vpop.f32.mrb[43].mxu1  ;;  %v18263_v53 = vpop.permute.xlu1 %1533 }
 0x22c   : > { %v1404_v1 = vadd.f32 %v1403_v8, %v1307_v21  ;;  %1692 = vxpose.xlu0.b32.cont [3/16] %v1676_v15, 128  ;;  %v1310_v9 = vadd.f32 %v13815_v13, %v18176_v45  ;;  %v1677_v31 = vmax.f32 %v1661_v59, 0.0 }
 0x22e   : > { %v1550_v6 = vmul.f32 %v18178_v52, %v1404_v1  ;;  %v1407_v63 = vadd.f32 %v1406_v62, %v1310_v9  ;;  %v13816_v30 = vpop.f32.mrb[44].mxu0  ;;  %v18259_v18 = vpack.c.bf16 %v1677_v31, %v1676_v15  ;;  %v18269_v52 = vpop.permute.xlu0 %2665 }
 0x22f   : > { %v13817_v32 = vpop.f32.mrb[45].mxu0  ;;  %v18261_v27 = vpop.f32.mrb[44].mxu1 }
 0x230   : > { %v1662_v16 = vadd.f32 %v18172_v14, %v1550_v6  ;;  %v1551_v20 = vmul.f32 %v18184_v40, %v1407_v63  ;;  %v13818_v8 = vadd.f32 %v13817_v32, %v13816_v30  ;;  %v13819_v42 = vpop.f32.mrb[46].mxu0  ;;  %1693 = vxpose.xlu0.b32.cont [4/16] %v1677_v31, 128  ;;  %v18267_v46 = vpop.f32.mrb[45].mxu1 }
 0x231   : > { %v13820_v45 = vpop.f32.mrb[47].mxu0  ;;  %v18273_v26 = vpop.f32.mrb[46].mxu1 }
 0x232   : > { %v1678_v62 = vmax.f32 %v1662_v16, 0.0  ;;  %v1663_v2 = vadd.f32 %v18180_v60, %v1551_v20  ;;  %v1315_v33 = vadd.f32 %v13818_v8, %v18182_v23  ;;  %v13821_v34 = vadd.f32 %v13820_v45, %v13819_v42  ;;  %v18275_v12 = vpop.f32.mrb[47].mxu1  ;;  %v18279_v13 = vpop.permute.xlu1 %1538 }
 0x233   : > { %v18284_v9 = vpop.permute.xlu0 %2777 }
 0x234   : > { %v1679_v14 = vmax.f32 %v1663_v2, 0.0  ;;  %v1412_v40 = vadd.f32 %v18229_v28, %v1315_v33  ;;  %v1318_v43 = vadd.f32 %v13821_v34, %v18186_v41  ;;  %1694 = vxpose.xlu0.b32.cont [5/16] %v1678_v62, 128 }
 0x236   : > { %v1552_v21 = vmul.f32 %v18192_v57, %v1412_v40  ;;  %v1415_v15 = vadd.f32 %v14685_v35, %v1318_v43  ;;  %v13822_v59 = vpop.f32.mrb[48].mxu0  ;;  %v18282_v60 = vpack.c.bf16 %v1679_v14, %v1678_v62  ;;  %v18292_v45 = vpop.permute.xlu1 %1543 }
 0x237   : > { %v13823_v23 = vpop.f32.mrb[49].mxu0  ;;  %v13878_v1 = vpop.f32.mrb[48].mxu1 }
 0x238   : > { %v1553_v31 = vmul.f32 %v18200_v25, %v1415_v15  ;;  %v13824_v6 = vadd.f32 %v13823_v23, %v13822_v59  ;;  %v13825_v63 = vpop.f32.mrb[50].mxu0  ;;  %1695 = vxpose.xlu0.b32.cont [6/16] %v1679_v14, 128  ;;  %v1664_v41 = vadd.f32 %v18188_v38, %v1552_v21  ;;  %v13879_v30 = vpop.f32.mrb[49].mxu1 }
 0x239   : > { %v13826_v28 = vpop.f32.mrb[51].mxu0  ;;  %v13881_v20 = vpop.f32.mrb[50].mxu1  ;;  %v18290_v8 = vadd.f32 %v13879_v30, %v13878_v1 }
 0x23a   : > { %v13827_v32 = vadd.f32 %v13826_v28, %v13825_v63  ;;  %v1323_v57 = vadd.f32 %v13824_v6, %v18190_v11  ;;  %v1680_v35 = vmax.f32 %v1664_v41, 0.0  ;;  %v1665_v16 = vadd.f32 %v18196_v39, %v1553_v31  ;;  %v13882_v42 = vpop.f32.mrb[51].mxu1  ;;  %v18297_v33 = vpop.permute.xlu0 %2782 }
 0x23b   : > { %v18295_v38 = vadd.f32 %v13882_v42, %v13881_v20  ;;  %v18304_v1 = vpop.permute.xlu1 %1655 }
 0x23c   : > { %v1420_v25 = vadd.f32 %v1419_v24, %v1323_v57  ;;  %1696 = vxpose.xlu0.b32.cont [7/16] %v1680_v35, 128  ;;  %v1326_v62 = vadd.f32 %v13827_v32, %v18194_v29  ;;  %v1681_v2 = vmax.f32 %v1665_v16, 0.0 }
 0x23e   : > { %v1554_v11 = vmul.f32 %v18208_v0, %v1420_v25  ;;  %v1423_v34 = vadd.f32 %v1422_v4, %v1326_v62  ;;  %v13828_v14 = vpop.f32.mrb[52].mxu0  ;;  %v18300_v39 = vpack.c.bf16 %v1681_v2, %v1680_v35 }
 0x23f   : > { %v13829_v40 = vpop.f32.mrb[53].mxu0  ;;  %v13884_v43 = vpop.f32.mrb[52].mxu1 }
 0x240   : > { %v1666_v21 = vadd.f32 %v18204_v58, %v1554_v11  ;;  %v1555_v24 = vmul.f32 %v18220_v50, %v1423_v34  ;;  %v13830_v15 = vadd.f32 %v13829_v40, %v13828_v14  ;;  %v13831_v59 = vpop.f32.mrb[54].mxu0  ;;  %1697 = vxpose.xlu0.b32.cont [8/16] %v1681_v2, 128  ;;  %v13885_v23 = vpop.f32.mrb[53].mxu1 }
 0x241   : > { %v13832_v29 = vpop.f32.mrb[55].mxu0  ;;  %v13887_v63 = vpop.f32.mrb[54].mxu1  ;;  %v18308_v41 = vadd.f32 %v13885_v23, %v13884_v43 }
 0x242   : > { %v1682_v31 = vmax.f32 %v1666_v21, 0.0  ;;  %v1667_v0 = vadd.f32 %v18212_v3, %v1555_v24  ;;  %v1331_v4 = vadd.f32 %v13830_v15, %v18198_v7  ;;  %v13833_v6 = vadd.f32 %v13832_v29, %v13831_v59  ;;  %v13888_v28 = vpop.f32.mrb[55].mxu1  ;;  %v18310_v58 = vpop.permute.xlu0 %2787 }
 0x243   : > { %v18314_v57 = vadd.f32 %v13888_v28, %v13887_v63  ;;  %v18320_v25 = vpop.permute.xlu1 %2670 }
 0x244   : > { %v1683_v50 = vmax.f32 %v1667_v0, 0.0  ;;  %v1428_v30 = vadd.f32 %v18245_v17, %v1331_v4  ;;  %v1334_v32 = vadd.f32 %v13833_v6, %v18202_v44  ;;  %1698 = vxpose.xlu0.b32.cont [9/16] %v1682_v31, 128 }
 0x246   : > { %v1556_v35 = vmul.f32 %v18226_v49, %v1428_v30  ;;  %v1431_v3 = vadd.f32 %v18253_v61, %v1334_v32  ;;  %v13834_v7 = vpop.f32.mrb[56].mxu0  ;;  %v18318_v16 = vpack.c.bf16 %v1683_v50, %v1682_v31  ;;  %v18324_v14 = vpop.permute.xlu0 %2792 }
 0x247   : > { %v13835_v20 = vpop.f32.mrb[57].mxu0  ;;  %v13890_v42 = vpop.f32.mrb[56].mxu1 }
 0x248   : > { %v1557_v62 = vmul.f32 %v18237_v54, %v1431_v3  ;;  %v13836_v2 = vadd.f32 %v13835_v20, %v13834_v7  ;;  %v13837_v17 = vpop.f32.mrb[58].mxu0  ;;  %1699 = vxpose.xlu0.b32.cont [10/16] %v1683_v50, 128  ;;  %v1668_v44 = vadd.f32 %v18216_v22, %v1556_v35  ;;  %v13891_v34 = vpop.f32.mrb[57].mxu1 }
 0x249   : > { %v13838_v11 = vpop.f32.mrb[59].mxu0  ;;  %v13893_v21 = vpop.f32.mrb[58].mxu1  ;;  %v18328_v24 = vadd.f32 %v13891_v34, %v13890_v42 }
 0x24a   : > { %v1339_v49 = vadd.f32 %v13836_v2, %v18206_v48  ;;  %v13839_v61 = vadd.f32 %v13838_v11, %v13837_v17  ;;  %v1684_v40 = vmax.f32 %v1668_v44, 0.0  ;;  %v1669_v43 = vadd.f32 %v18222_v10, %v1557_v62  ;;  %v13894_v15 = vpop.f32.mrb[59].mxu1  ;;  %v18334_v23 = vpop.permute.xlu1 %2675 }
 0x24b   : > { %v18332_v29 = vadd.f32 %v13894_v15, %v13893_v21  ;;  %v18340_v63 = vpop.permute.xlu0 %2797 }
 0x24c   : > { %v1436_v54 = vadd.f32 %v18267_v46, %v1339_v49  ;;  %v1342_v59 = vadd.f32 %v13839_v61, %v18210_v19  ;;  %1700 = vxpose.xlu0.b32.cont [11/16] %v1684_v40, 128  ;;  %v1685_v22 = vmax.f32 %v1669_v43, 0.0 }
 0x24e   : > { %v1558_v48 = vmul.f32 %v18249_v55, %v1436_v54  ;;  %v1439_v31 = vadd.f32 %v18275_v12, %v1342_v59  ;;  %v13840_v0 = vpop.f32.mrb[60].mxu0  ;;  %v18338_v10 = vpack.c.bf16 %v1685_v22, %v1684_v40  ;;  %v18352_v17 = vpop.permute.xlu1 %2680 }
 0x24f   : > { %v13841_v4 = vpop.f32.mrb[61].mxu0  ;;  %v13896_v6 = vpop.f32.mrb[60].mxu1 }
 0x250   : > { %v1670_v46 = vadd.f32 %v18231_v56, %v1558_v48  ;;  %v1559_v19 = vmul.f32 %v18263_v53, %v1439_v31  ;;  %v13842_v28 = vadd.f32 %v13841_v4, %v13840_v0  ;;  %v13843_v50 = vpop.f32.mrb[62].mxu0  ;;  %1701 = vxpose.xlu0.b32.cont [12/16] %v1685_v22, 128  ;;  %v13897_v32 = vpop.f32.mrb[61].mxu1 }
 0x251   : > { %v13844_v30 = vpop.f32.mrb[63].mxu0  ;;  %v13899_v7 = vpop.f32.mrb[62].mxu1  ;;  %v18346_v20 = vadd.f32 %v13897_v32, %v13896_v6 }
 0x252   : > { %v1686_v35 = vmax.f32 %v1670_v46, 0.0  ;;  %v1671_v55 = vadd.f32 %v18240_v51, %v1559_v19  ;;  %v1347_v12 = vadd.f32 %v13842_v28, %v18214_v36  ;;  %v13845_v3 = vadd.f32 %v13844_v30, %v13843_v50  ;;  %v13900_v42 = vpop.f32.mrb[63].mxu1  ;;  %v18354_v44 = vpop.permute.xlu0 %2802 }
 0x253   : > { %v18350_v2 = vadd.f32 %v13900_v42, %v13899_v7  ;;  %v18373_v4 = vpop.permute.xlu1 %2685 }
 0x254   : > { %v1687_v62 = vmax.f32 %v1671_v55, 0.0  ;;  %v1444_v56 = vadd.f32 %v18261_v27, %v1347_v12  ;;  %v1350_v53 = vadd.f32 %v13845_v3, %v18218_v47  ;;  %1702 = vxpose.xlu0.b32.cont [13/16] %v1686_v35, 128 }
 0x256   : > { %v1560_v51 = vmul.f32 %v18279_v13, %v1444_v56  ;;  %v1447_v36 = vadd.f32 %v18273_v26, %v1350_v53  ;;  %v13942_v11 = vpop.f32.mrb[64].mxu0  ;;  %v18358_v34 = vpack.c.bf16 %v1687_v62, %v1686_v35  ;;  %v18375_v6 = vpop.permute.xlu0 %2807 }
 0x257   : > { %v13943_v49 = vpop.f32.mrb[65].mxu0  ;;  %v13902_v61 = vpop.f32.mrb[64].mxu1 }
 0x258   : > { %21454 = vst [vmem:[#allocation22_spill] sm:$0xff] %v18358_v34  ;;  %v1561_v27 = vmul.f32 %v18292_v45, %v1447_v36  ;;  %v13944_v40 = vadd.f32 %v13943_v49, %v13942_v11  ;;  %v13945_v47 = vpop.f32.mrb[66].mxu0  ;;  %1703 = vxpose.xlu0.b32.cont [14/16] %v1687_v62, 128  ;;  %v1672_v43 = vadd.f32 %v18255_v37, %v1560_v51  ;;  %v13903_v21 = vpop.f32.mrb[65].mxu1 }
 0x259   : > { %v13946_v15 = vpop.f32.mrb[67].mxu0  ;;  %v18362_v54 = vadd.f32 %v13903_v21, %v13902_v61  ;;  %v13905_v59 = vpop.f32.mrb[66].mxu1 }
 0x25a   : > { %v18365_v13 = vadd.f32 %v13944_v40, %v18290_v8  ;;  %v13947_v26 = vadd.f32 %v13946_v15, %v13945_v47  ;;  %v1688_v22 = vmax.f32 %v1672_v43, 0.0  ;;  %v1673_v48 = vadd.f32 %v18304_v1, %v1561_v27  ;;  %v13906_v31 = vpop.f32.mrb[67].mxu1  ;;  %v18389_v62 = vpop.permute.xlu1 %2690 }
 0x25b   : > { %v18368_v0 = vadd.f32 %v13906_v31, %v13905_v59  ;;  %v18391_v56 = vpop.permute.xlu0 %2812 }
 0x25c   : > { %v18371_v45 = vadd.f32 %v13947_v26, %v18295_v38  ;;  %1704 = vxpose.xlu0.b32.cont [15/16] %v1688_v22, 128  ;;  %v1689_v37 = vmax.f32 %v1673_v48, 0.0 }
 0x25e   : > { %v13948_v46 = vpop.f32.mrb[68].mxu0  ;;  %v18377_v19 = vpack.c.bf16 %v1689_v37, %v1688_v22  ;;  %v18403_v59 = vpop.permute.xlu1 %2695 }
 0x25f   : > { %v13949_v8 = vpop.f32.mrb[69].mxu0  ;;  %v13908_v28 = vpop.f32.mrb[68].mxu1 }
 0x260   : > { %21455 = vst [vmem:[#allocation23_spill] sm:$0xff] %v18377_v19  ;;  %v13950_v50 = vadd.f32 %v13949_v8, %v13948_v46  ;;  %v13951_v30 = vpop.f32.mrb[70].mxu0  ;;  %1705 = vxpose.xlu0.b32.end [16/16] %v1689_v37, 128  ;;  %v13909_v1 = vpop.f32.mrb[69].mxu1 }
 0x261   : > { %v13952_v32 = vpop.f32.mrb[71].mxu0  ;;  %v18379_v35 = vadd.f32 %v13909_v1, %v13908_v28  ;;  %v13911_v38 = vpop.f32.mrb[70].mxu1 }
 0x262   : > { %v18382_v55 = vadd.f32 %v13950_v50, %v18308_v41  ;;  %v13953_v12 = vadd.f32 %v13952_v32, %v13951_v30  ;;  %v13912_v3 = vpop.f32.mrb[71].mxu1  ;;  %v18405_v26 = vpop.permute.xlu0 %2817  ;;  %v16748_v30 = vld [vmem:[#allocation9 + $0x40] sm:$0xff]  }
 0x263   : > { %v18384_v7 = vadd.f32 %v13912_v3, %v13911_v38  ;;  %14726 = vmatprep.subr.bf16.mxu0 %v16748_v30  ;;  %v18417_v3 = vpop.permute.xlu1 %2700 }
 0x264   : > { %v18387_v42 = vadd.f32 %v13953_v12, %v18314_v57  ;;  %14727 = vmatpush3.bf16.msra.mxu0 %v16748_v30 }
 0x266   : > { %v13954_v53 = vpop.f32.mrb[72].mxu0 }
 0x267   : > { %v13955_v51 = vpop.f32.mrb[73].mxu0  ;;  %v13914_v36 = vpop.f32.mrb[72].mxu1 }
 0x268   : > { %v13956_v11 = vadd.f32 %v13955_v51, %v13954_v53  ;;  %v13957_v49 = vpop.f32.mrb[74].mxu0  ;;  %v13915_v61 = vpop.f32.mrb[73].mxu1  ;;  %v16749_v53 = vld [vmem:[#allocation9 + $0x48] sm:$0xff]  }
 0x269   : > { %v13958_v27 = vpop.f32.mrb[75].mxu0  ;;  %v18393_v41 = vadd.f32 %v13915_v61, %v13914_v36  ;;  %v13917_v40 = vpop.f32.mrb[74].mxu1  ;;  %14728 = vmatprep.subr.bf16.mxu0 %v16749_v53 }
 0x26a   : > { %v18396_v47 = vadd.f32 %v13956_v11, %v18328_v24  ;;  %v13959_v43 = vadd.f32 %v13958_v27, %v13957_v49  ;;  %v13918_v57 = vpop.f32.mrb[75].mxu1  ;;  %v18419_v51 = vpop.permute.xlu0 %2822  ;;  %14729 = vmatpush3.bf16.msra.mxu0 %v16749_v53 }
 0x26b   : > { %v18398_v21 = vadd.f32 %v13918_v57, %v13917_v40 }
 0x26c   : > { %v18401_v15 = vadd.f32 %v13959_v43, %v18332_v29 }
 0x26e   : > { %v13960_v22 = vpop.f32.mrb[76].mxu0  ;;  %v18435_v30 = vpop.permute.xlu0 %2827 }
 0x26f   : > { %v13961_v48 = vpop.f32.mrb[77].mxu0  ;;  %v13920_v31 = vpop.f32.mrb[76].mxu1 }
 0x270   : > { %v13962_v37 = vadd.f32 %v13961_v48, %v13960_v22  ;;  %v13963_v46 = vpop.f32.mrb[78].mxu0  ;;  %v13921_v8 = vpop.f32.mrb[77].mxu1 }
 0x271   : > { %v13964_v28 = vpop.f32.mrb[79].mxu0  ;;  %v18407_v24 = vadd.f32 %v13921_v8, %v13920_v31  ;;  %v13923_v50 = vpop.f32.mrb[78].mxu1  ;;  %v16750_v31 = vld [vmem:[#allocation9 + $0x50] sm:$0xff]  }
 0x272   : > { %v18410_v1 = vadd.f32 %v13962_v37, %v18346_v20  ;;  %v13965_v29 = vadd.f32 %v13964_v28, %v13963_v46  ;;  %v13924_v32 = vpop.f32.mrb[79].mxu1  ;;  %14730 = vmatprep.subr.bf16.mxu0 %v16750_v31  ;;  %v18430_v28 = vpop.permute.xlu1 %2705 }
 0x273   : > { %v18412_v38 = vadd.f32 %v13924_v32, %v13923_v50  ;;  %14731 = vmatpush3.bf16.msra.mxu0 %v16750_v31 }
 0x274   : > { %v18415_v12 = vadd.f32 %v13965_v29, %v18350_v2  ;;  %v16751_v29 = vld [vmem:[#allocation9 + $0x58] sm:$0xff]  }
 0x275   : > { %14732 = vmatprep.subr.bf16.mxu0 %v16751_v29 }
 0x276   : > { %v13966_v36 = vpop.f32.mrb[80].mxu0 }
 0x277   : > { %v14006_v11 = vpop.f32.mrb[80].mxu1  ;;  %v13967_v49 = vpop.f32.mrb[81].mxu0  ;;  %14733 = vmatpush3.bf16.msra.mxu0 %v16751_v29  ;;  %v16753_v29 = vld [vmem:[#allocation9 + $0x68] sm:$0xff]  }
 0x278   : > { %v13968_v20 = vadd.f32 %v13967_v49, %v13966_v36  ;;  %v14007_v61 = vpop.f32.mrb[81].mxu1  ;;  %v13969_v27 = vpop.f32.mrb[82].mxu0 }
 0x279   : > { %v14008_v40 = vadd.f32 %v14007_v61, %v14006_v11  ;;  %v14009_v43 = vpop.f32.mrb[82].mxu1  ;;  %v13970_v57 = vpop.f32.mrb[83].mxu0 }
 0x27a   : > { %v18422_v2 = vadd.f32 %v13968_v20, %v18362_v54  ;;  %v13971_v22 = vadd.f32 %v13970_v57, %v13969_v27  ;;  %v14010_v48 = vpop.f32.mrb[83].mxu1 }
 0x27b   : > { %v14011_v37 = vadd.f32 %v14010_v48, %v14009_v43  ;;  %v18425_v46 = vadd.f32 %v14008_v40, %v18365_v13  ;;  %v18448_v40 = vld [vmem:[#allocation9 + $0x60] sm:$0xff]   ;;  %v21422_v43 = vmov 0.0   ;;  %v18525_v48 = vpop.permute.xlu1 %2710 }
 0x27c   : > { %v18428_v8 = vadd.f32 %v13971_v22, %v18368_v0  ;;  %465 = vst [vmem:[#allocation2] sm:$0x7] %v21422_v43  ;;  %466 = vst [vmem:[#allocation2 + $0x10] sm:$0x7] %v21422_v43  ;;  %14734 = vmatprep.subr.bf16.mxu0 %v18448_v40 }
 0x27d   : > { %v18433_v50 = vadd.f32 %v14011_v37, %v18371_v45  ;;  %467 = vst [vmem:[#allocation2 + $0x20] sm:$0x7] %v21422_v43  ;;  %468 = vst [vmem:[#allocation2 + $0x30] sm:$0x7] %v21422_v43  ;;  %14735 = vmatpush3.bf16.msra.mxu0 %v18448_v40  ;;  %v18531_v37 = vpop.permute.xlu0 %2832  ;;  %v16754_v40 = vld [vmem:[#allocation9 + $0x70] sm:$0xff]  }
 0x27e   : > { %v13972_v54 = vpop.f32.mrb[84].mxu0  ;;  %469 = vst [vmem:[#allocation2 + $0x40] sm:$0x7] %v21422_v43  ;;  %470 = vst [vmem:[#allocation2 + $0x50] sm:$0x7] %v21422_v43  ;;  %14736 = vmatprep.subr.bf16.mxu0 %v16753_v29 }
 0x27f   : > { %v14012_v32 = vpop.f32.mrb[84].mxu1  ;;  %v13973_v53 = vpop.f32.mrb[85].mxu0  ;;  %471 = vst [vmem:[#allocation2 + $0x60] sm:$0x7] %v21422_v43  ;;  %472 = vst [vmem:[#allocation2 + $0x70] sm:$0x7] %v21422_v43 }
 0x280   : > { %v13974_v36 = vadd.f32 %v13973_v53, %v13972_v54  ;;  %v14013_v11 = vpop.f32.mrb[85].mxu1  ;;  %v13975_v13 = vpop.f32.mrb[86].mxu0  ;;  %473 = vst [vmem:[#allocation2 + $0x80] sm:$0x7] %v21422_v43  ;;  %474 = vst [vmem:[#allocation2 + $0x90] sm:$0x7] %v21422_v43 }
 0x281   : > { %v18437_v49 = vadd.f32 %v14013_v11, %v14012_v32  ;;  %v18439_v0 = vpop.f32.mrb[86].mxu1  ;;  %v13976_v20 = vpop.f32.mrb[87].mxu0  ;;  %475 = vst [vmem:[#allocation2 + $0xa0] sm:$0x7] %v21422_v43  ;;  %476 = vst [vmem:[#allocation2 + $0xb0] sm:$0x7] %v21422_v43  ;;  %14737 = vmatpush3.bf16.msra.mxu0 %v16753_v29 }
 0x282   : > { %v18442_v45 = vadd.f32 %v13974_v36, %v18379_v35  ;;  %v18444_v61 = vadd.f32 %v13976_v20, %v13975_v13  ;;  %v18446_v27 = vpop.f32.mrb[87].mxu1  ;;  %477 = vst [vmem:[#allocation2 + $0xc0] sm:$0x7] %v21422_v43  ;;  %478 = vst [vmem:[#allocation2 + $0xd0] sm:$0x7] %v21422_v43  ;;  %14738 = vmatprep.subr.bf16.mxu0 %v16754_v40  ;;  %v18553_v29 = vpop.permute.xlu0 %2837 }
 0x283   : > { %479 = vst [vmem:[#allocation2 + $0xe0] sm:$0x7] %v21422_v43  ;;  %480 = vst [vmem:[#allocation2 + $0xf0] sm:$0x7] %v21422_v43  ;;  %v14017_v35 = vadd.f32 %v18446_v27, %v18439_v0  ;;  %v18518_v57 = vadd.f32 %v18437_v49, %v18382_v55  ;;  %v9144_v55 = vld [vmem:[%s21456_s18] sm:$0xff]  ;;  %v9146_v27 = vld [vmem:[%s21456_s18 + $0x10] sm:$0xff] }
 0x284   : > { %481 = vst [vmem:[#allocation2 + $0x100] sm:$0x7] %v21422_v43  ;;  %482 = vst [vmem:[#allocation2 + $0x110] sm:$0x7] %v21422_v43  ;;  %v18522_v22 = vadd.f32 %v18444_v61, %v18384_v7 }
 0x285   : > { %483 = vst [vmem:[#allocation2 + $0x120] sm:$0x7] %v21422_v43  ;;  %484 = vst [vmem:[#allocation2 + $0x130] sm:$0x7] %v21422_v43  ;;  %v18528_v31 = vadd.f32 %v14017_v35, %v18387_v42  ;;  %14739 = vmatpush3.bf16.msra.mxu0 %v16754_v40 }
 0x286   : > { %485 = vst [vmem:[#allocation2 + $0x140] sm:$0x7] %v21422_v43  ;;  %486 = vst [vmem:[#allocation2 + $0x150] sm:$0x7] %v21422_v43  ;;  %v13978_v54 = vpop.f32.mrb[88].mxu0 }
 0x287   : > { %487 = vst [vmem:[#allocation2 + $0x160] sm:$0x7] %v21422_v43  ;;  %488 = vst [vmem:[#allocation2 + $0x170] sm:$0x7] %v21422_v43  ;;  %v14018_v32 = vpop.f32.mrb[88].mxu1  ;;  %v13979_v7 = vpop.f32.mrb[89].mxu0 }
 0x288   : > { %489 = vst [vmem:[#allocation2 + $0x180] sm:$0x7] %v21422_v43  ;;  %490 = vst [vmem:[#allocation2 + $0x190] sm:$0x7] %v21422_v43  ;;  %v13980_v53 = vadd.f32 %v13979_v7, %v13978_v54  ;;  %v14019_v36 = vpop.f32.mrb[89].mxu1  ;;  %v13981_v11 = vpop.f32.mrb[90].mxu0 }
 0x289   : > { %491 = vst [vmem:[#allocation2 + $0x1a0] sm:$0x7] %v21422_v43  ;;  %492 = vst [vmem:[#allocation2 + $0x1b0] sm:$0x7] %v21422_v43  ;;  %v14020_v13 = vadd.f32 %v14019_v36, %v14018_v32  ;;  %v14021_v49 = vpop.f32.mrb[90].mxu1  ;;  %v13982_v42 = vpop.f32.mrb[91].mxu0  ;;  %9258 = vperm.xlu0 %16640, %v9144_v55  }
 0x28a   : > { %493 = vst [vmem:[#allocation2 + $0x1c0] sm:$0x7] %v21422_v43  ;;  %494 = vst [vmem:[#allocation2 + $0x1d0] sm:$0x7] %v21422_v43  ;;  %v18537_v0 = vadd.f32 %v13980_v53, %v18393_v41  ;;  %v13983_v20 = vadd.f32 %v13982_v42, %v13981_v11  ;;  %v14022_v61 = vpop.f32.mrb[91].mxu1  ;;  %v18548_v55 = vpop.permute.xlu1 %2715  ;;  %v9148_v53 = vld [vmem:[%s21456_s18 + $0x20] sm:$0xff] }
 0x28b   : > { %495 = vst [vmem:[#allocation2 + $0x1e0] sm:$0x7] %v21422_v43  ;;  %496 = vst [vmem:[#allocation2 + $0x1f0] sm:$0x7] %v21422_v43  ;;  %v14023_v35 = vadd.f32 %v14022_v61, %v14021_v49  ;;  %v18543_v54 = vadd.f32 %v14020_v13, %v18396_v47  ;;  %v16755_v47 = vld [vmem:[#allocation9 + $0x78] sm:$0xff]  }
 0x28c   : > { %497 = vst [vmem:[#allocation2 + $0xb] sm:$0x7] %v21422_v43  ;;  %498 = vst [vmem:[#allocation2 + $0x1b] sm:$0x7] %v21422_v43  ;;  %v18546_v32 = vadd.f32 %v13983_v20, %v18398_v21  ;;  %14740 = vmatprep.subr.bf16.mxu0 %v16755_v47 }
 0x28d   : > { %499 = vst [vmem:[#allocation2 + $0x2b] sm:$0x7] %v21422_v43  ;;  %500 = vst [vmem:[#allocation2 + $0x3b] sm:$0x7] %v21422_v43  ;;  %9268 = vperm.xlu0 %16640, %v9146_v27   ;;  %v18551_v41 = vadd.f32 %v14023_v35, %v18401_v15  ;;  %14741 = vmatpush3.bf16.msra.mxu0 %v16755_v47  ;;  %v9150_v35 = vld [vmem:[%s21456_s18 + $0x30] sm:$0xff]  ;;  %v18571_v47 = vpop.permute.xlu0 %2842 }
 0x28e   : > { %501 = vst [vmem:[#allocation2 + $0x4b] sm:$0x7] %v21422_v43  ;;  %502 = vst [vmem:[#allocation2 + $0x5b] sm:$0x7] %v21422_v43  ;;  %v13984_v7 = vpop.f32.mrb[92].mxu0 }
 0x28f   : > { %503 = vst [vmem:[#allocation2 + $0x6b] sm:$0x7] %v21422_v43  ;;  %504 = vst [vmem:[#allocation2 + $0x7b] sm:$0x7] %v21422_v43  ;;  %v14024_v36 = vpop.f32.mrb[92].mxu1  ;;  %v13985_v11 = vpop.f32.mrb[93].mxu0 }
 0x290   : > { %505 = vst [vmem:[#allocation2 + $0x8b] sm:$0x7] %v21422_v43  ;;  %506 = vst [vmem:[#allocation2 + $0x9b] sm:$0x7] %v21422_v43  ;;  %v13986_v21 = vadd.f32 %v13985_v11, %v13984_v7  ;;  %v14025_v13 = vpop.f32.mrb[93].mxu1  ;;  %v13987_v49 = vpop.f32.mrb[94].mxu0 }
 0x291   : > { %507 = vst [vmem:[#allocation2 + $0xab] sm:$0x7] %v21422_v43  ;;  %508 = vst [vmem:[#allocation2 + $0xbb] sm:$0x7] %v21422_v43  ;;  %v14026_v42 = vadd.f32 %v14025_v13, %v14024_v36  ;;  %v14027_v20 = vpop.f32.mrb[94].mxu1  ;;  %v13988_v61 = vpop.f32.mrb[95].mxu0  ;;  %9278 = vperm.xlu0 %16640, %v9148_v53  }
 0x292   : > { %509 = vst [vmem:[#allocation2 + $0xcb] sm:$0x7] %v21422_v43  ;;  %510 = vst [vmem:[#allocation2 + $0xdb] sm:$0x7] %v21422_v43  ;;  %v18559_v15 = vadd.f32 %v13986_v21, %v18407_v24  ;;  %v13989_v27 = vadd.f32 %v13988_v61, %v13987_v49  ;;  %v14028_v40 = vpop.f32.mrb[95].mxu1  ;;  %v18568_v36 = vpop.permute.xlu1 %2720  ;;  %v9152_v21 = vld [vmem:[%s21456_s18 + $0x40] sm:$0xff] }
 0x293   : > { %511 = vst [vmem:[#allocation2 + $0xeb] sm:$0x7] %v21422_v43  ;;  %512 = vst [vmem:[#allocation2 + $0xfb] sm:$0x7] %v21422_v43  ;;  %v2512_v7 = vadd.f32 %v14026_v42, %v18410_v1 }
 0x294   : > { %513 = vst [vmem:[#allocation2 + $0x10b] sm:$0x7] %v21422_v43  ;;  %514 = vst [vmem:[#allocation2 + $0x11b] sm:$0x7] %v21422_v43  ;;  %v18566_v11 = vadd.f32 %v13989_v27, %v18412_v38 }
 0x295   : > { %515 = vst [vmem:[#allocation2 + $0x12b] sm:$0x7] %v21422_v43  ;;  %516 = vst [vmem:[#allocation2 + $0x13b] sm:$0x7] %v21422_v43  ;;  %9288 = vperm.xlu0 %16640, %v9150_v35  }
 0x296   : > { %517 = vst [vmem:[#allocation2 + $0x14b] sm:$0x7] %v21422_v43  ;;  %518 = vst [vmem:[#allocation2 + $0x15b] sm:$0x7] %v21422_v43  ;;  %v14712_v24 = vpop.f32.mrb[96].mxu0 }
 0x297   : > { %519 = vst [vmem:[#allocation2 + $0x16b] sm:$0x7] %v21422_v43  ;;  %520 = vst [vmem:[#allocation2 + $0x17b] sm:$0x7] %v21422_v43  ;;  %v14030_v13 = vpop.f32.mrb[96].mxu1  ;;  %v2593_v49 = vadd.f32 %v14712_v24, %v18518_v57  ;;  %v9154_v57 = vld [vmem:[%s21456_s18 + $0x50] sm:$0xff] }
 0x298   : > { %521 = vst [vmem:[#allocation2 + $0x18b] sm:$0x7] %v21422_v43  ;;  %522 = vst [vmem:[#allocation2 + $0x19b] sm:$0x7] %v21422_v43  ;;  %v14031_v1 = vpop.f32.mrb[97].mxu1 }
 0x299   : > { %523 = vst [vmem:[#allocation2 + $0x1ab] sm:$0x7] %v21422_v43  ;;  %524 = vst [vmem:[#allocation2 + $0x1bb] sm:$0x7] %v21422_v43  ;;  %v2745_v61 = vmul.f32 %v18334_v23, %v2593_v49  ;;  %v14032_v27 = vadd.f32 %v14031_v1, %v14030_v13  ;;  %9298 = vperm.xlu0 %16640, %v9152_v21  }
 0x29a   : > { %525 = vst [vmem:[#allocation2 + $0x1cb] sm:$0x7] %v21422_v43  ;;  %526 = vst [vmem:[#allocation2 + $0x1db] sm:$0x7] %v21422_v43 }
 0x29b   : > { %527 = vst [vmem:[#allocation2 + $0x1eb] sm:$0x7] %v21422_v43  ;;  %528 = vst [vmem:[#allocation2 + $0x1fb] sm:$0x7] %v21422_v43  ;;  %v14029_v43 = vadd.f32 %v14028_v40, %v14027_v20  ;;  %v2584_v20 = vpop.f32.mrb[97].mxu0  ;;  %v14033_v40 = vpop.f32.mrb[98].mxu1  ;;  %v2520_v13 = vadd.f32 %v14032_v27, %v18422_v2 }
 0x29c   : > { %v2585_v38 = vadd.f32 %v2584_v20, %v18425_v46  ;;  %v14713_v42 = vpop.f32.mrb[98].mxu0  ;;  %v14034_v19 = vpop.f32.mrb[99].mxu1  ;;  %v18586_v46 = vadd.f32 %v18310_v58, %v2745_v61 }
 0x29d   : > { %v2515_v53 = vadd.f32 %v14029_v43, %v18415_v12  ;;  %v2596_v12 = vadd.f32 %v14713_v42, %v18528_v31  ;;  %v2587_v43 = vpop.f32.mrb[99].mxu0  ;;  %v14035_v24 = vadd.f32 %v14034_v19, %v14033_v40  ;;  %9308 = vperm.xlu0 %16640, %v9154_v57   ;;  %v18600_v58 = vpop.permute.xlu0 %2847 }
 0x29e   : > { %v2743_v35 = vmul.f32 %v18269_v52, %v2585_v38  ;;  %v2588_v34 = vadd.f32 %v2587_v43, %v18433_v50  ;;  %v18592_v52 = vpop.permute.xlu1 %2725  ;;  %v14716_v19 = vpop.f32.mrb[100].mxu0 }
 0x29f   : > { %v2746_v23 = vmul.f32 %v18352_v17, %v2596_v12  ;;  %v18598_v49 = vadd.f32 %v14035_v24, %v18428_v8  ;;  %v2609_v2 = vadd.f32 %v14716_v19, %v2512_v7  ;;  %v2600_v1 = vpop.f32.mrb[101].mxu0 }
 0x2a0   : > { %v2744_v31 = vmul.f32 %v18320_v25, %v2588_v34  ;;  %v2855_v21 = vadd.f32 %v18284_v9, %v2743_v35  ;;  %v9156_v25 = vld [vmem:[%s21456_s18 + $0x60] sm:$0xff]  ;;  %v2873_v9 = vmax.f32 %v18586_v46, 0.0  ;;  %v2601_v42 = vadd.f32 %v2600_v1, %v18543_v54  ;;  %v14717_v61 = vpop.f32.mrb[102].mxu0  ;;  %v9158_v54 = vld [vmem:[%s21456_s18 + $0x70] sm:$0xff] }
 0x2a1   : > { %v18595_v50 = vadd.f32 %v18324_v14, %v2746_v23  ;;  %v14036_v14 = vpop.f32.mrb[100].mxu1  ;;  %v2612_v12 = vadd.f32 %v14717_v61, %v2515_v53  ;;  %v2603_v43 = vpop.f32.mrb[103].mxu0  ;;  %9318 = vperm.xlu0 %16640, %v9156_v25  }
 0x2a2   : > { %v2856_v17 = vadd.f32 %v18297_v33, %v2744_v31  ;;  %v2871_v20 = vmax.f32 %v2855_v21, 0.0  ;;  %v14037_v8 = vpop.f32.mrb[101].mxu1  ;;  %v2749_v33 = vmul.f32 %v18403_v59, %v2609_v2  ;;  %v2747_v7 = vmul.f32 %v18373_v4, %v2601_v42 }
 0x2a3   : > { %v2874_v34 = vmax.f32 %v18595_v50, 0.0  ;;  %v14038_v27 = vadd.f32 %v14037_v8, %v14036_v14  ;;  %v14039_v40 = vpop.f32.mrb[102].mxu1  ;;  %v2604_v46 = vadd.f32 %v2603_v43, %v18551_v41  ;;  %v2750_v53 = vmul.f32 %v18417_v3, %v2612_v12 }
 0x2a4   : > { %v2872_v38 = vmax.f32 %v2856_v17, 0.0  ;;  %2887 = vxpose.xlu1.b32.start [1/16] %v2871_v20, 128  ;;  %v14040_v57 = vpop.f32.mrb[103].mxu1  ;;  %v18622_v59 = vadd.f32 %v18375_v6, %v2749_v33  ;;  %v18627_v21 = vadd.f32 %v18340_v63, %v2747_v7  ;;  %v1706_v41 = vpop.trf.xlu0  ;;  %v9160_v63 = vld [vmem:[%s21456_s18 + $0x80] sm:$0xff] }
 0x2a5   : > { %v18612_v35 = vpack.c.bf16 %v2874_v34, %v2873_v9  ;;  %v14041_v24 = vadd.f32 %v14040_v57, %v14039_v40  ;;  %v2528_v31 = vadd.f32 %v14038_v27, %v18442_v45  ;;  %v2748_v4 = vmul.f32 %v18389_v62, %v2604_v46  ;;  %9328 = vperm.xlu0 %16640, %v9158_v54   ;;  %v18634_v6 = vpop.permute.xlu1 %2730 }
 0x2a6   : > { %v18619_v23 = vpack.c.bf16 %v2872_v38, %v2871_v20  ;;  %v18631_v17 = vadd.f32 %v18391_v56, %v2750_v53  ;;  %1722 = vst [vmem:[#allocation2 + $0x3] sm:$0xff] %v1706_v41  ;;  %v14720_v45 = vpop.f32.mrb[104].mxu0  ;;  %v2877_v62 = vmax.f32 %v18622_v59, 0.0 }
 0x2a7   : > { %v2531_v19 = vadd.f32 %v14041_v24, %v18522_v22  ;;  %v18637_v3 = vadd.f32 %v18354_v44, %v2748_v4  ;;  %v14042_v56 = vpop.f32.mrb[104].mxu1  ;;  %v2625_v25 = vadd.f32 %v14720_v45, %v2528_v31  ;;  %v2616_v14 = vpop.f32.mrb[105].mxu0  ;;  %v2875_v22 = vmax.f32 %v18627_v21, 0.0 }
 0x2a8   : > { %2888 = vxpose.xlu1.b32.cont [2/16] %v2872_v38, 128  ;;  %v2878_v20 = vmax.f32 %v18631_v17, 0.0  ;;  %v14043_v1 = vpop.f32.mrb[105].mxu1  ;;  %v2617_v38 = vadd.f32 %v2616_v14, %v2520_v13  ;;  %v14721_v44 = vpop.f32.mrb[106].mxu0 }
 0x2a9   : > { %v2876_v2 = vmax.f32 %v18637_v3, 0.0  ;;  %v2753_v8 = vmul.f32 %v18548_v55, %v2625_v25  ;;  %v14044_v42 = vadd.f32 %v14043_v1, %v14042_v56  ;;  %v14045_v61 = vpop.f32.mrb[106].mxu1  ;;  %v2628_v33 = vadd.f32 %v14721_v44, %v2531_v19  ;;  %v2619_v27 = vpop.f32.mrb[107].mxu0  ;;  %9338 = vperm.xlu0 %16640, %v9160_v63   ;;  %v9162_v55 = vld [vmem:[%s21456_s18 + $0x90] sm:$0xff] }
 0x2aa   : > { %v18651_v40 = vpack.c.bf16 %v2878_v20, %v2877_v62  ;;  %v2751_v12 = vmul.f32 %v18430_v28, %v2617_v38  ;;  %v14046_v43 = vpop.f32.mrb[107].mxu1  ;;  %v2620_v13 = vadd.f32 %v2619_v27, %v18598_v49  ;;  %v2736_v24 = vpop.permute.xlu1 %2735 }
 0x2ab   : > { %v18660_v7 = vpack.c.bf16 %v2876_v2, %v2875_v22  ;;  %v18663_v57 = vadd.f32 %v18435_v30, %v2753_v8  ;;  %v2754_v46 = vmul.f32 %v18568_v36, %v2628_v33  ;;  %v14047_v54 = vadd.f32 %v14046_v43, %v14045_v61 }
 0x2ac   : > { %2889 = vxpose.xlu1.b32.cont [3/16] %v2873_v9, 128  ;;  %v1707_v9 = vpop.trf.xlu0  ;;  %v2536_v28 = vadd.f32 %v14044_v42, %v18537_v0  ;;  %v18668_v49 = vadd.f32 %v18405_v26, %v2751_v12  ;;  %v2752_v53 = vmul.f32 %v18525_v48, %v2620_v13  ;;  %v9164_v26 = vld [vmem:[%s21456_s18 + $0xa0] sm:$0xff] }
 0x2ad   : > { %1723 = vst [vmem:[#allocation2 + $0x13] sm:$0xff] %v1707_v9  ;;  %v18674_v31 = vadd.f32 %v18531_v37, %v2754_v46  ;;  %9348 = vperm.xlu0 %16640, %v9162_v55   ;;  %v2539_v30 = vadd.f32 %v14047_v54, %v18546_v32  ;;  %v2881_v48 = vmax.f32 %v18663_v57, 0.0  ;;  %v16756_v37 = vld [vmem:[#allocation9] sm:$0xff]  }
 0x2ae   : > { %v18678_v36 = vadd.f32 %v18419_v51, %v2752_v53  ;;  %v14724_v0 = vpop.f32.mrb[108].mxu0  ;;  %v2879_v41 = vmax.f32 %v18668_v49, 0.0  ;;  %v3000_v63 = vld [vmem:[#allocation2 + $0x1] sm:$0xff]  ;;  %14774 = vmatprep.subr.bf16.mxu0 %v16756_v37 }
 0x2af   : > { %v2882_v50 = vmax.f32 %v18674_v31, 0.0  ;;  %v2632_v4 = vpop.f32.mrb[109].mxu0  ;;  %v9176_v49 = vld [vmem:[%s21456_s18 + $0x100] sm:$0xff] }
 0x2b0   : > { %2890 = vxpose.xlu1.b32.cont [4/16] %v2874_v34, 128  ;;  %v1708_v21 = vpop.trf.xlu0  ;;  %v14048_v34 = vpop.f32.mrb[108].mxu1  ;;  %v2880_v32 = vmax.f32 %v18678_v36, 0.0  ;;  %v2633_v19 = vadd.f32 %v2632_v4, %v2536_v28  ;;  %v9178_v36 = vld [vmem:[%s21456_s18 + $0x110] sm:$0xff]  ;;  %v9180_v57 = vld [vmem:[%s21456_s18 + $0x120] sm:$0xff] }
 0x2b1   : > { %1724 = vst [vmem:[#allocation2 + $0x23] sm:$0xff] %v1708_v21  ;;  %v14049_v51 = vpop.f32.mrb[109].mxu1  ;;  %v14725_v45 = vpop.f32.mrb[110].mxu0  ;;  %9358 = vperm.xlu0 %16640, %v9164_v26   ;;  %v18691_v1 = vpack.c.bf16 %v2882_v50, %v2881_v48 }
 0x2b2   : > { %v14050_v56 = vadd.f32 %v14049_v51, %v14048_v34  ;;  %v14051_v25 = vpop.f32.mrb[110].mxu1  ;;  %v2635_v14 = vpop.f32.mrb[111].mxu0  ;;  %v2755_v38 = vmul.f32 %v18592_v52, %v2633_v19  ;;  %v18701_v33 = vpack.c.bf16 %v2880_v32, %v2879_v41  ;;  %v9172_v51 = vld [vmem:[%s21456_s18 + $0xe0] sm:$0xff] }
 0x2b3   : > { %v14052_v44 = vpop.f32.mrb[111].mxu1  ;;  %v2636_v8 = vadd.f32 %v2635_v14, %v2539_v30  ;;  %v2741_v52 = vpop.permute.xlu1 %2740  ;;  %v16759_v14 = vld [vmem:[#allocation9 + $0x18] sm:$0xff]  }
 0x2b4   : > { %2891 = vxpose.xlu1.b32.cont [5/16] %v2875_v22, 128  ;;  %v9166_v22 = vld [vmem:[%s21456_s18 + $0xb0] sm:$0xff]  ;;  %v1709_v42 = vpop.trf.xlu0  ;;  %v2544_v27 = vadd.f32 %v14050_v56, %v18559_v15  ;;  %v14053_v12 = vadd.f32 %v14052_v44, %v14051_v25  ;;  %v18705_v13 = vadd.f32 %v18553_v29, %v2755_v38  ;;  %v9168_v15 = vld [vmem:[%s21456_s18 + $0xc0] sm:$0xff] }
 0x2b5   : > { %v3001_v61 = vld [vmem:[#allocation2 + $0x11] sm:$0xff]  ;;  %1725 = vst [vmem:[#allocation2 + $0x33] sm:$0xff] %v1709_v42  ;;  %v2756_v55 = vmul.f32 %v18634_v6, %v2636_v8  ;;  %9368 = vperm.xlu0 %16640, %v9166_v22   ;;  %v16760_v22 = vld [vmem:[#allocation9 + $0x20] sm:$0xff]  }
 0x2b6   : > { %v3032_v43 = vpack.c.bf16 %v3001_v61, %v3000_v63  ;;  %v2641_v9 = vadd.f32 %v14724_v0, %v2544_v27  ;;  %v2547_v46 = vadd.f32 %v14053_v12, %v18566_v11  ;;  %v2883_v6 = vmax.f32 %v18705_v13, 0.0  ;;  %v9182_v61 = vld [vmem:[%s21456_s18 + $0x130] sm:$0xff]  ;;  %v9184_v12 = vld [vmem:[%s21456_s18 + $0x140] sm:$0xff] }
 0x2b7   : > { %v18712_v54 = vadd.f32 %v18571_v47, %v2756_v55  ;;  %v2853_v30 = vpop.permute.xlu1 %2852  ;;  %v9186_v55 = vld [vmem:[%s21456_s18 + $0x150] sm:$0xff] }
 0x2b8   : > { %2892 = vxpose.xlu1.b32.cont [6/16] %v2876_v2, 128  ;;  %14742 = vmatprep.mubr.bf16.mxu0 %v3032_v43  ;;  %v1710_v28 = vpop.trf.xlu0  ;;  %v2757_v29 = vmul.f32 %v2736_v24, %v2641_v9  ;;  %v2644_v53 = vadd.f32 %v14725_v45, %v2547_v46  ;;  %v3002_v11 = vld [vmem:[#allocation2 + $0x21] sm:$0xff]  ;;  %v9170_v24 = vld [vmem:[%s21456_s18 + $0xd0] sm:$0xff] }
 0x2b9   : > { %1726 = vst [vmem:[#allocation2 + $0x43] sm:$0xff] %v1710_v28  ;;  %v2884_v3 = vmax.f32 %v18712_v54, 0.0  ;;  %9378 = vperm.xlu0 %16640, %v9168_v15   ;;  %v16758_v45 = vld [vmem:[#allocation9 + $0x10] sm:$0xff]   ;;  %v9188_v15 = vld [vmem:[%s21456_s18 + $0x160] sm:$0xff] }
 0x2ba   : > { %v2758_v2 = vmul.f32 %v2741_v52, %v2644_v53  ;;  %v18722_v47 = vadd.f32 %v18600_v58, %v2757_v29  ;;  %v16761_v52 = vld [vmem:[#allocation9 + $0x28] sm:$0xff]   ;;  %v16762_v29 = vld [vmem:[#allocation9 + $0x30] sm:$0xff]  }
 0x2bb   : > { %v18729_v21 = vpack.c.bf16 %v2884_v3, %v2883_v6 }
 0x2bc   : > { %2893 = vxpose.xlu1.b32.cont [7/16] %v2877_v62, 128  ;;  %v1711_v0 = vpop.trf.xlu0  ;;  %v3003_v26 = vld [vmem:[#allocation2 + $0x31] sm:$0xff]  ;;  %v18731_v34 = vadd.f32 %v2853_v30, %v2758_v2  ;;  %v16757_v62 = vld [vmem:[#allocation9 + $0x8] sm:$0xff]   ;;  %v2885_v58 = vmax.f32 %v18722_v47, 0.0  ;;  %v9192_v47 = vld [vmem:[%s21456_s18 + $0x180] sm:$0xff] }
 0x2bd   : > { %1727 = vst [vmem:[#allocation2 + $0x53] sm:$0xff] %v1711_v0  ;;  %v3033_v59 = vpack.c.bf16 %v3003_v26, %v3002_v11  ;;  %9388 = vperm.xlu0 %16640, %v9170_v24   ;;  %v16763_v30 = vld [vmem:[#allocation9 + $0x38] sm:$0xff]   ;;  %v9194_v0 = vld [vmem:[%s21456_s18 + $0x190] sm:$0xff] }
 0x2be   : > { %v2886_v4 = vmax.f32 %v18731_v34, 0.0 }
 0x2bf   : > { %14743 = vmatmul.mubr.bf16.vlgmr.msra.gmra.mrb[112].mxu0 %v3033_v59  ;;  %v9196_v59 = vld [vmem:[%s21456_s18 + $0x1a0] sm:$0xff] }
 0x2c0   : > { %2894 = vxpose.xlu1.b32.cont [8/16] %v2878_v20, 128  ;;  %v1712_v19 = vpop.trf.xlu0  ;;  %14775 = vmatpush3.bf16.msra.mxu0 %v16756_v37  ;;  %v18742_v63 = vpack.c.bf16 %v2886_v4, %v2885_v58  ;;  %v3004_v17 = vld [vmem:[#allocation2 + $0x41] sm:$0xff]  ;;  %v9174_v20 = vld [vmem:[%s21456_s18 + $0xf0] sm:$0xff] }
 0x2c1   : > { %1728 = vst [vmem:[#allocation2 + $0x63] sm:$0xff] %v1712_v19  ;;  %14776 = vmatprep.subr.bf16.mxu0 %v16757_v62  ;;  %9398 = vperm.xlu0 %16640, %v9172_v51   ;;  %v9145_v51 = vld [vmem:[%s21456_s18 + $0x8] sm:$0xff]  ;;  %v9202_v19 = vld [vmem:[%s21456_s18 + $0x1d0] sm:$0xff] }
 0x2c4   : > { %2895 = vxpose.xlu1.b32.cont [9/16] %v2879_v41, 128  ;;  %v1713_v56 = vpop.trf.xlu0  ;;  %v3005_v25 = vld [vmem:[#allocation2 + $0x51] sm:$0xff]  ;;  %14777 = vmatpush3.bf16.msra.mxu0 %v16757_v62  ;;  %v18792_v62 = vld [vmem:[#allocation9 + $0x80] sm:$0xff]  }
 0x2c5   : > { %1729 = vst [vmem:[#allocation2 + $0x73] sm:$0xff] %v1713_v56  ;;  %v3034_v37 = vpack.c.bf16 %v3005_v25, %v3004_v17  ;;  %14778 = vmatprep.subr.bf16.mxu0 %v16758_v45  ;;  %9408 = vperm.xlu0 %16640, %v9174_v20   ;;  %v9204_v17 = vld [vmem:[%s21456_s18 + $0x1e0] sm:$0xff]  ;;  %v9149_v20 = vld [vmem:[%s21456_s18 + $0x28] sm:$0xff]  ;;  %v9206_v56 = vld [vmem:[%s21456_s18 + $0x1f0] sm:$0xff] }
 0x2c6   : > { %v9151_v25 = vld [vmem:[%s21456_s18 + $0x38] sm:$0xff] }
 0x2c7   : > { %14746 = vmatprep.mubr.bf16.mxu0 %v3034_v37  ;;  %v9208_v37 = vld [vmem:[%s21456_s18 + $0x200] sm:$0xff] }
 0x2c8   : > { %2896 = vxpose.xlu1.b32.cont [10/16] %v2880_v32, 128  ;;  %v1714_v41 = vpop.trf.xlu0  ;;  %14779 = vmatpush3.bf16.msra.mxu0 %v16758_v45  ;;  %v3006_v38 = vld [vmem:[#allocation2 + $0x61] sm:$0xff]  ;;  %v9147_v45 = vld [vmem:[%s21456_s18 + $0x18] sm:$0xff] }
 0x2c9   : > { %1730 = vst [vmem:[#allocation2 + $0x83] sm:$0xff] %v1714_v41  ;;  %9418 = vperm.xlu0 %16640, %v9176_v49   ;;  %14780 = vmatprep.subr.bf16.mxu0 %v16759_v14  ;;  %v9153_v49 = vld [vmem:[%s21456_s18 + $0x48] sm:$0xff] }
 0x2cc   : > { %2897 = vxpose.xlu1.b32.cont [11/16] %v2881_v48, 128  ;;  %v1715_v32 = vpop.trf.xlu0  ;;  %v3007_v44 = vld [vmem:[#allocation2 + $0x71] sm:$0xff]  ;;  %14781 = vmatpush3.bf16.msra.mxu0 %v16759_v14 }
 0x2cd   : > { %1731 = vst [vmem:[#allocation2 + $0x93] sm:$0xff] %v1715_v32  ;;  %v3035_v8 = vpack.c.bf16 %v3007_v44, %v3006_v38  ;;  %9428 = vperm.xlu0 %16640, %v9178_v36   ;;  %14782 = vmatprep.subr.bf16.mxu0 %v16760_v22  ;;  %v9210_v14 = vld [vmem:[%s21456_s18 + $0x210] sm:$0xff]  ;;  %v9155_v38 = vld [vmem:[%s21456_s18 + $0x58] sm:$0xff]  ;;  %v9212_v32 = vld [vmem:[%s21456_s18 + $0x220] sm:$0xff] }
 0x2ce   : > { %v9157_v44 = vld [vmem:[%s21456_s18 + $0x68] sm:$0xff] }
 0x2cf   : > { %14747 = vmatmul.mubr.bf16.gmra.mrb[116].mxu0 %v3035_v8 }
 0x2d0   : > { %2898 = vxpose.xlu1.b32.cont [12/16] %v2882_v50, 128  ;;  %v1716_v48 = vpop.trf.xlu0  ;;  %v3008_v42 = vld [vmem:[#allocation2 + $0x81] sm:$0xff]  ;;  %14783 = vmatpush3.bf16.msra.mxu0 %v16760_v22 }
 0x2d1   : > { %1732 = vst [vmem:[#allocation2 + $0xa3] sm:$0xff] %v1716_v48  ;;  %9438 = vperm.xlu0 %16640, %v9180_v57   ;;  %14784 = vmatprep.subr.bf16.mxu0 %v16761_v52  ;;  %v9214_v57 = vld [vmem:[%s21456_s18 + $0x230] sm:$0xff]  ;;  %v9159_v48 = vld [vmem:[%s21456_s18 + $0x78] sm:$0xff] }
 0x2d4   : > { %2899 = vxpose.xlu1.b32.cont [13/16] %v2883_v6, 128  ;;  %v1717_v27 = vpop.trf.xlu0  ;;  %v3009_v31 = vld [vmem:[#allocation2 + $0x91] sm:$0xff]  ;;  %14785 = vmatpush3.bf16.msra.mxu0 %v16761_v52  ;;  %v9165_v52 = vld [vmem:[%s21456_s18 + $0xa8] sm:$0xff] }
 0x2d5   : > { %1733 = vst [vmem:[#allocation2 + $0xb3] sm:$0xff] %v1717_v27  ;;  %v3036_v50 = vpack.c.bf16 %v3009_v31, %v3008_v42  ;;  %9448 = vperm.xlu0 %16640, %v9182_v61   ;;  %14786 = vmatprep.subr.bf16.mxu0 %v16762_v29  ;;  %v9190_v6 = vld [vmem:[%s21456_s18 + $0x170] sm:$0xff]  ;;  %v9216_v42 = vld [vmem:[%s21456_s18 + $0x240] sm:$0xff]  ;;  %v9161_v61 = vld [vmem:[%s21456_s18 + $0x88] sm:$0xff] }
 0x2d6   : > { %v9218_v31 = vld [vmem:[%s21456_s18 + $0x250] sm:$0xff] }
 0x2d7   : > { %14750 = vmatprep.mubr.bf16.mxu0 %v3036_v50  ;;  %v9163_v50 = vld [vmem:[%s21456_s18 + $0x98] sm:$0xff] }
 0x2d8   : > { %2900 = vxpose.xlu1.b32.cont [14/16] %v2884_v3, 128  ;;  %v1718_v43 = vpop.trf.xlu0  ;;  %v3010_v13 = vld [vmem:[#allocation2 + $0xa1] sm:$0xff]  ;;  %14787 = vmatpush3.bf16.msra.mxu0 %v16762_v29 }
 0x2d9   : > { %1734 = vst [vmem:[#allocation2 + $0xc3] sm:$0xff] %v1718_v43  ;;  %9458 = vperm.xlu0 %16640, %v9184_v12   ;;  %14788 = vmatprep.subr.bf16.mxu0 %v16763_v30  ;;  %v9220_v43 = vld [vmem:[%s21456_s18 + $0x260] sm:$0xff]  ;;  %v9169_v29 = vld [vmem:[%s21456_s18 + $0xc8] sm:$0xff] }
 0x2dc   : > { %2901 = vxpose.xlu1.b32.cont [15/16] %v2885_v58, 128  ;;  %v1719_v9 = vpop.trf.xlu0  ;;  %v3011_v46 = vld [vmem:[#allocation2 + $0xb1] sm:$0xff]  ;;  %14789 = vmatpush3.bf16.msra.mxu0 %v16763_v30 }
 0x2dd   : > { %1735 = vst [vmem:[#allocation2 + $0xd3] sm:$0xff] %v1719_v9  ;;  %v3037_v54 = vpack.c.bf16 %v3011_v46, %v3010_v13  ;;  %9468 = vperm.xlu0 %16640, %v9186_v55   ;;  %14822 = vmatprep.subr.bf16.mxu0 %v18792_v62  ;;  %v9198_v58 = vld [vmem:[%s21456_s18 + $0x1b0] sm:$0xff]  ;;  %v9167_v46 = vld [vmem:[%s21456_s18 + $0xb8] sm:$0xff] }
 0x2de   : > { %v9222_v9 = vld [vmem:[%s21456_s18 + $0x270] sm:$0xff] }
 0x2df   : > { %14751 = vmatmul.mubr.bf16.gmra.mrb[120].mxu0 %v3037_v54 }
 0x2e0   : > { %2902 = vxpose.xlu1.b32.end [16/16] %v2886_v4, 128  ;;  %v1720_v28 = vpop.trf.xlu0  ;;  %v3012_v53 = vld [vmem:[#allocation2 + $0xc1] sm:$0xff] }
 0x2e1   : > { %1736 = vst [vmem:[#allocation2 + $0xe3] sm:$0xff] %v1720_v28  ;;  %9478 = vperm.xlu0 %16640, %v9188_v15   ;;  %v9200_v4 = vld [vmem:[%s21456_s18 + $0x1c0] sm:$0xff] }
 0x2e2   : > { %v9224_v28 = vld [vmem:[%s21456_s18 + $0x280] sm:$0xff] }
 0x2e4   : > { %v1721_v3 = vpop.trf.xlu0  ;;  %v3013_v11 = vld [vmem:[#allocation2 + $0xd1] sm:$0xff] }
 0x2e5   : > { %1737 = vst [vmem:[#allocation2 + $0xf3] sm:$0xff] %v1721_v3  ;;  %v3038_v2 = vpack.c.bf16 %v3013_v11, %v3012_v53  ;;  %9488 = vperm.xlu0 %16640, %v9190_v6   ;;  %v9226_v3 = vld [vmem:[%s21456_s18 + $0x290] sm:$0xff]  ;;  %v9171_v11 = vld [vmem:[%s21456_s18 + $0xd8] sm:$0xff] }
 0x2e7   : > { %14754 = vmatprep.mubr.bf16.mxu0 %v3038_v2 }
 0x2e8   : > { %v3014_v24 = vld [vmem:[#allocation2 + $0xe1] sm:$0xff] }
 0x2e9   : > { %9498 = vperm.xlu0 %16640, %v9192_v47  }
 0x2ec   : > { %v3015_v26 = vld [vmem:[#allocation2 + $0xf1] sm:$0xff] }
 0x2ed   : > { %v3039_v34 = vpack.c.bf16 %v3015_v26, %v3014_v24  ;;  %9508 = vperm.xlu0 %16640, %v9194_v0   ;;  %v9228_v26 = vld [vmem:[%s21456_s18 + $0x2a0] sm:$0xff] }
 0x2ef   : > { %14755 = vmatmul.mubr.bf16.gmra.mrb[124].mxu0 %v3039_v34  ;;  %v9173_v34 = vld [vmem:[%s21456_s18 + $0xe8] sm:$0xff] }
 0x2f1   : > { %9518 = vperm.xlu0 %16640, %v9196_v59  }
 0x2f5   : > { %9528 = vperm.xlu0 %16640, %v9198_v58  }
 0x2f9   : > { %9538 = vperm.xlu0 %16640, %v9200_v4   ;;  %v9230_v4 = vld [vmem:[%s21456_s18 + $0x2b0] sm:$0xff] }
 0x2fd   : > { %9548 = vperm.xlu0 %16640, %v9202_v19  }
 0x2fe   : > { %9263 = vperm.xlu1 %16641, %v9145_v51   ;;  %v9175_v51 = vld [vmem:[%s21456_s18 + $0xf8] sm:$0xff] }
 0x301   : > { %9558 = vperm.xlu0 %16640, %v9204_v17  }
 0x302   : > { %9273 = vperm.xlu1 %16641, %v9147_v45  }
 0x305   : > { %9568 = vperm.xlu0 %16640, %v9206_v56  }
 0x306   : > { %9283 = vperm.xlu1 %16641, %v9149_v20  }
 0x308   : > { %v18828_v41 = vpop.permute.xlu0 %9258 }
 0x309   : > { %9578 = vperm.xlu0 %16640, %v9208_v37   ;;  %v9177_v37 = vld [vmem:[%s21456_s18 + $0x108] sm:$0xff] }
 0x30a   : > { %9293 = vperm.xlu1 %16641, %v9151_v25   ;;  %v9232_v25 = vld [vmem:[%s21456_s18 + $0x2c0] sm:$0xff] }
 0x30c   : > { %v18836_v36 = vpop.permute.xlu0 %9268 }
 0x30d   : > { %9588 = vperm.xlu0 %16640, %v9210_v14  }
 0x30e   : > { %9303 = vperm.xlu1 %16641, %v9153_v49  }
 0x310   : > { %v18844_v8 = vpop.permute.xlu0 %9278 }
 0x311   : > { %21457 = vst [vmem:[#allocation24_spill] sm:$0xff] %v18844_v8  ;;  %9598 = vperm.xlu0 %16640, %v9212_v32   ;;  %v9179_v32 = vld [vmem:[%s21456_s18 + $0x118] sm:$0xff] }
 0x312   : > { %9313 = vperm.xlu1 %16641, %v9155_v38   ;;  %v9234_v38 = vld [vmem:[%s21456_s18 + $0x2d0] sm:$0xff] }
 0x314   : > { %v18852_v22 = vpop.permute.xlu0 %9288 }
 0x315   : > { %21458 = vst [vmem:[#allocation25_spill] sm:$0xff] %v18852_v22  ;;  %9608 = vperm.xlu0 %16640, %v9214_v57  }
 0x316   : > { %9323 = vperm.xlu1 %16641, %v9157_v44  }
 0x318   : > { %v18860_v27 = vpop.permute.xlu0 %9298 }
 0x319   : > { %21459 = vst [vmem:[#allocation26_spill] sm:$0xff] %v18860_v27  ;;  %9618 = vperm.xlu0 %16640, %v9216_v42  }
 0x31a   : > { %9333 = vperm.xlu1 %16641, %v9159_v48  }
 0x31c   : > { %v18868_v12 = vpop.permute.xlu0 %9308 }
 0x31d   : > { %21460 = vst [vmem:[#allocation27_spill] sm:$0xff] %v18868_v12  ;;  %9628 = vperm.xlu0 %16640, %v9218_v31   ;;  %v9236_v31 = vld [vmem:[%s21456_s18 + $0x2e0] sm:$0xff] }
 0x31e   : > { %9343 = vperm.xlu1 %16641, %v9161_v61  }
 0x320   : > { %v18876_v55 = vpop.permute.xlu0 %9318 }
 0x321   : > { %21461 = vst [vmem:[#allocation28_spill] sm:$0xff] %v18876_v55  ;;  %9638 = vperm.xlu0 %16640, %v9220_v43  }
 0x322   : > { %9353 = vperm.xlu1 %16641, %v9163_v50   ;;  %v9181_v50 = vld [vmem:[%s21456_s18 + $0x128] sm:$0xff] }
 0x324   : > { %v2903_v13 = vpop.trf.xlu1  ;;  %v18884_v15 = vpop.permute.xlu0 %9328 }
 0x325   : > { %2920 = vst [vmem:[#allocation2 + $0x103] sm:$0xff] %v2903_v13  ;;  %21462 = vst [vmem:[#allocation29_spill] sm:$0xff] %v18884_v15  ;;  %9648 = vperm.xlu0 %16640, %v9222_v9   ;;  %v9238_v13 = vld [vmem:[%s21456_s18 + $0x2f0] sm:$0xff]  ;;  %v9183_v9 = vld [vmem:[%s21456_s18 + $0x138] sm:$0xff] }
 0x326   : > { %9363 = vperm.xlu1 %16641, %v9165_v52  }
 0x328   : > { %v2904_v54 = vpop.trf.xlu1  ;;  %v18892_v6 = vpop.permute.xlu0 %9338 }
 0x329   : > { %2921 = vst [vmem:[#allocation2 + $0x113] sm:$0xff] %v2904_v54  ;;  %21463 = vst [vmem:[#allocation30_spill] sm:$0xff] %v18892_v6  ;;  %9658 = vperm.xlu0 %16640, %v9224_v28  }
 0x32a   : > { %9373 = vperm.xlu1 %16641, %v9167_v46  }
 0x32c   : > { %v2905_v53 = vpop.trf.xlu1  ;;  %v18900_v47 = vpop.permute.xlu0 %9348  ;;  %v3016_v30 = vld [vmem:[#allocation2 + $0x101] sm:$0xff] }
 0x32d   : > { %2922 = vst [vmem:[#allocation2 + $0x123] sm:$0xff] %v2905_v53  ;;  %21464 = vst [vmem:[#allocation31_spill] sm:$0xff] %v18900_v47  ;;  %9668 = vperm.xlu0 %16640, %v9226_v3   ;;  %v9240_v3 = vld [vmem:[%s21456_s18 + $0x300] sm:$0xff] }
 0x32e   : > { %9383 = vperm.xlu1 %16641, %v9169_v29  }
 0x330   : > { %v2906_v2 = vpop.trf.xlu1  ;;  %v3017_v24 = vld [vmem:[#allocation2 + $0x111] sm:$0xff]  ;;  %v18908_v58 = vpop.permute.xlu0 %9358 }
 0x331   : > { %2923 = vst [vmem:[#allocation2 + $0x133] sm:$0xff] %v2906_v2  ;;  %v3040_v0 = vpack.c.bf16 %v3017_v24, %v3016_v30  ;;  %21465 = vst [vmem:[#allocation32_spill] sm:$0xff] %v18908_v58  ;;  %9678 = vperm.xlu0 %16640, %v9228_v26   ;;  %v9242_v24 = vld [vmem:[%s21456_s18 + $0x310] sm:$0xff] }
 0x332   : > { %9393 = vperm.xlu1 %16641, %v9171_v11   ;;  %v9185_v11 = vld [vmem:[%s21456_s18 + $0x148] sm:$0xff] }
 0x333   : > { %14758 = vmatprep.mubr.bf16.mxu0 %v3040_v0  ;;  %v9187_v0 = vld [vmem:[%s21456_s18 + $0x158] sm:$0xff] }
 0x334   : > { %v2907_v59 = vpop.trf.xlu1  ;;  %v18916_v45 = vpop.permute.xlu0 %9368  ;;  %v3018_v17 = vld [vmem:[#allocation2 + $0x121] sm:$0xff] }
 0x335   : > { %2924 = vst [vmem:[#allocation2 + $0x143] sm:$0xff] %v2907_v59  ;;  %21466 = vst [vmem:[#allocation33_spill] sm:$0xff] %v18916_v45  ;;  %9688 = vperm.xlu0 %16640, %v9230_v4  }
 0x336   : > { %9403 = vperm.xlu1 %16641, %v9173_v34  }
 0x338   : > { %v2908_v19 = vpop.trf.xlu1  ;;  %v3019_v20 = vld [vmem:[#allocation2 + $0x131] sm:$0xff]  ;;  %v18924_v14 = vpop.permute.xlu0 %9378 }
 0x339   : > { %2925 = vst [vmem:[#allocation2 + $0x153] sm:$0xff] %v2908_v19  ;;  %v3041_v56 = vpack.c.bf16 %v3019_v20, %v3018_v17  ;;  %21467 = vst [vmem:[#allocation34_spill] sm:$0xff] %v18924_v14  ;;  %9698 = vperm.xlu0 %16640, %v9232_v25   ;;  %v9244_v19 = vld [vmem:[%s21456_s18 + $0x320] sm:$0xff]  ;;  %v9189_v17 = vld [vmem:[%s21456_s18 + $0x168] sm:$0xff] }
 0x33a   : > { %9413 = vperm.xlu1 %16641, %v9175_v51   ;;  %v9246_v25 = vld [vmem:[%s21456_s18 + $0x330] sm:$0xff] }
 0x33b   : > { %14759 = vmatmul.mubr.bf16.gmra.mrb[128].mxu0 %v3041_v56 }
 0x33c   : > { %v2909_v49 = vpop.trf.xlu1  ;;  %v18932_v57 = vpop.permute.xlu0 %9388  ;;  %v3020_v48 = vld [vmem:[#allocation2 + $0x141] sm:$0xff] }
 0x33d   : > { %2926 = vst [vmem:[#allocation2 + $0x163] sm:$0xff] %v2909_v49  ;;  %21468 = vst [vmem:[#allocation35_spill] sm:$0xff] %v18932_v57  ;;  %9708 = vperm.xlu0 %16640, %v9234_v38  }
 0x33e   : > { %9423 = vperm.xlu1 %16641, %v9177_v37   ;;  %v9191_v37 = vld [vmem:[%s21456_s18 + $0x178] sm:$0xff] }
 0x340   : > { %v2910_v44 = vpop.trf.xlu1  ;;  %v3021_v42 = vld [vmem:[#allocation2 + $0x151] sm:$0xff]  ;;  %v18940_v52 = vpop.permute.xlu0 %9398 }
 0x341   : > { %2927 = vst [vmem:[#allocation2 + $0x173] sm:$0xff] %v2910_v44  ;;  %v3042_v61 = vpack.c.bf16 %v3021_v42, %v3020_v48  ;;  %21469 = vst [vmem:[#allocation36_spill] sm:$0xff] %v18940_v52  ;;  %9718 = vperm.xlu0 %16640, %v9236_v31   ;;  %v9248_v42 = vld [vmem:[%s21456_s18 + $0x340] sm:$0xff] }
 0x342   : > { %9433 = vperm.xlu1 %16641, %v9179_v32   ;;  %v19532_v52 = vld [vmem:[#allocation9 + $0x180] sm:$0xff]  }
 0x343   : > { %14762 = vmatprep.mubr.bf16.mxu0 %v3042_v61  ;;  %v9193_v61 = vld [vmem:[%s21456_s18 + $0x188] sm:$0xff] }
 0x344   : > { %v2911_v43 = vpop.trf.xlu1  ;;  %v18948_v54 = vpop.permute.xlu0 %9408  ;;  %v3022_v28 = vld [vmem:[#allocation2 + $0x161] sm:$0xff] }
 0x345   : > { %2928 = vst [vmem:[#allocation2 + $0x183] sm:$0xff] %v2911_v43  ;;  %21470 = vst [vmem:[#allocation37_spill] sm:$0xff] %v18948_v54  ;;  %9728 = vperm.xlu0 %16640, %v9238_v13   ;;  %v9250_v43 = vld [vmem:[%s21456_s18 + $0x350] sm:$0xff]  ;;  %v9195_v13 = vld [vmem:[%s21456_s18 + $0x198] sm:$0xff] }
 0x346   : > { %9443 = vperm.xlu1 %16641, %v9181_v50  }
 0x348   : > { %v2912_v46 = vpop.trf.xlu1  ;;  %v3023_v29 = vld [vmem:[#allocation2 + $0x171] sm:$0xff]  ;;  %v18956_v30 = vpop.permute.xlu0 %9418 }
 0x349   : > { %2929 = vst [vmem:[#allocation2 + $0x193] sm:$0xff] %v2912_v46  ;;  %v3043_v53 = vpack.c.bf16 %v3023_v29, %v3022_v28  ;;  %21471 = vst [vmem:[#allocation38_spill] sm:$0xff] %v18956_v30  ;;  %9738 = vperm.xlu0 %16640, %v9240_v3   ;;  %v9252_v3 = vld [vmem:[%s21456_s18 + $0x360] sm:$0xff]  ;;  %v11515_v30 = vld [vmem:[%s21456_s18 + $0x188] sm:$0xff] }
 0x34a   : > { %9453 = vperm.xlu1 %16641, %v9183_v9  }
 0x34b   : > { %14763 = vmatmul.mubr.bf16.gmra.mrb[132].mxu0 %v3043_v53 }
 0x34c   : > { %v2913_v2 = vpop.trf.xlu1  ;;  %v18964_v34 = vpop.permute.xlu0 %9428  ;;  %v3024_v59 = vld [vmem:[#allocation2 + $0x181] sm:$0xff] }
 0x34d   : > { %2930 = vst [vmem:[#allocation2 + $0x1a3] sm:$0xff] %v2913_v2  ;;  %21472 = vst [vmem:[#allocation39_spill] sm:$0xff] %v18964_v34  ;;  %9748 = vperm.xlu0 %16640, %v9242_v24   ;;  %v9254_v24 = vld [vmem:[%s21456_s18 + $0x370] sm:$0xff] }
 0x34e   : > { %9463 = vperm.xlu1 %16641, %v9185_v11   ;;  %v9197_v11 = vld [vmem:[%s21456_s18 + $0x1a8] sm:$0xff] }
 0x350   : > { %v2914_v26 = vpop.trf.xlu1  ;;  %v3025_v4 = vld [vmem:[#allocation2 + $0x191] sm:$0xff]  ;;  %v18972_v56 = vpop.permute.xlu0 %9438 }
 0x351   : > { %2931 = vst [vmem:[#allocation2 + $0x1b3] sm:$0xff] %v2914_v26  ;;  %v3044_v51 = vpack.c.bf16 %v3025_v4, %v3024_v59  ;;  %21473 = vst [vmem:[#allocation40_spill] sm:$0xff] %v18972_v56  ;;  %9758 = vperm.xlu0 %16640, %v9244_v19   ;;  %v2936_v26 = vld [vmem:[#allocation2] sm:$0xff]  ;;  %v2937_v59 = vld [vmem:[#allocation2 + $0x10] sm:$0xff] }
 0x352   : > { %9473 = vperm.xlu1 %16641, %v9187_v0   ;;  %v9199_v0 = vld [vmem:[%s21456_s18 + $0x1b8] sm:$0xff]  ;;  %v11510_v56 = vld [vmem:[%s21456_s18 + $0x160] sm:$0xff] }
 0x353   : > { %14766 = vmatprep.mubr.bf16.mxu0 %v3044_v51 }
 0x354   : > { %v2915_v20 = vpop.trf.xlu1  ;;  %v18980_v38 = vpop.permute.xlu0 %9448  ;;  %v3026_v32 = vld [vmem:[#allocation2 + $0x1a1] sm:$0xff] }
 0x355   : > { %2932 = vst [vmem:[#allocation2 + $0x1c3] sm:$0xff] %v2915_v20  ;;  %21474 = vst [vmem:[#allocation41_spill] sm:$0xff] %v18980_v38  ;;  %9768 = vperm.xlu0 %16640, %v9246_v25   ;;  %v2968_v20 = vpack.c.bf16 %v2937_v59, %v2936_v26  ;;  %v11466_v25 = vld [vmem:[%s21456_s18] sm:$0xff]  ;;  %v2943_v26 = vld [vmem:[#allocation2 + $0x70] sm:$0xff] }
 0x356   : > { %9483 = vperm.xlu1 %16641, %v9189_v17   ;;  %v9207_v59 = vld [vmem:[%s21456_s18 + $0x1f8] sm:$0xff] }
 0x358   : > { %v2916_v49 = vpop.trf.xlu1  ;;  %v3027_v44 = vld [vmem:[#allocation2 + $0x1b1] sm:$0xff]  ;;  %v18988_v50 = vpop.permute.xlu0 %9458 }
 0x359   : > { %2933 = vst [vmem:[#allocation2 + $0x1d3] sm:$0xff] %v2916_v49  ;;  %v3045_v48 = vpack.c.bf16 %v3027_v44, %v3026_v32  ;;  %21475 = vst [vmem:[#allocation42_spill] sm:$0xff] %v18988_v50  ;;  %9778 = vperm.xlu0 %16640, %v9248_v42   ;;  %v11468_v32 = vld [vmem:[%s21456_s18 + $0x10] sm:$0xff]  ;;  %v2938_v44 = vld [vmem:[#allocation2 + $0x20] sm:$0xff] }
 0x35a   : > { %9493 = vperm.xlu1 %16641, %v9191_v37   ;;  %v9201_v37 = vld [vmem:[%s21456_s18 + $0x1c8] sm:$0xff]  ;;  %v9203_v42 = vld [vmem:[%s21456_s18 + $0x1d8] sm:$0xff]  ;;  %v11506_v50 = vld [vmem:[%s21456_s18 + $0x140] sm:$0xff] }
 0x35b   : > { %14767 = vmatmul.mubr.bf16.gmra.mrb[136].mxu0 %v3045_v48  ;;  %v2939_v48 = vld [vmem:[#allocation2 + $0x30] sm:$0xff] }
 0x35c   : > { %v2917_v31 = vpop.trf.xlu1  ;;  %v18996_v46 = vpop.permute.xlu0 %9468  ;;  %v3028_v28 = vld [vmem:[#allocation2 + $0x1c1] sm:$0xff] }
 0x35d   : > { %2934 = vst [vmem:[#allocation2 + $0x1e3] sm:$0xff] %v2917_v31  ;;  %21476 = vst [vmem:[#allocation43_spill] sm:$0xff] %v18996_v46  ;;  %9788 = vperm.xlu0 %16640, %v9250_v43   ;;  %v2941_v31 = vld [vmem:[#allocation2 + $0x50] sm:$0xff]  ;;  %v9241_v46 = vld [vmem:[%s21456_s18 + $0x308] sm:$0xff] }
 0x35e   : > { %9503 = vperm.xlu1 %16641, %v9193_v61   ;;  %v2940_v61 = vld [vmem:[#allocation2 + $0x40] sm:$0xff] }
 0x360   : > { %v2918_v9 = vpop.trf.xlu1  ;;  %v3029_v29 = vld [vmem:[#allocation2 + $0x1d1] sm:$0xff]  ;;  %v19004_v2 = vpop.permute.xlu0 %9478 }
 0x361   : > { %2935 = vst [vmem:[#allocation2 + $0x1f3] sm:$0xff] %v2918_v9  ;;  %v3046_v53 = vpack.c.bf16 %v3029_v29, %v3028_v28  ;;  %21477 = vst [vmem:[#allocation44_spill] sm:$0xff] %v19004_v2  ;;  %9798 = vperm.xlu0 %16640, %v9252_v3   ;;  %v16765_v9 = vld [vmem:[#allocation9 + $0x88] sm:$0xff]   ;;  %v2970_v28 = vpack.c.bf16 %v2941_v31, %v2940_v61  ;;  %v11470_v29 = vld [vmem:[%s21456_s18 + $0x20] sm:$0xff] }
 0x362   : > { %9513 = vperm.xlu1 %16641, %v9195_v13   ;;  %v2969_v13 = vpack.c.bf16 %v2939_v48, %v2938_v44  ;;  %v11476_v61 = vld [vmem:[%s21456_s18 + $0x50] sm:$0xff]  ;;  %v2946_v31 = vld [vmem:[#allocation2 + $0xa0] sm:$0xff]  ;;  %v9237_v2 = vld [vmem:[%s21456_s18 + $0x2e8] sm:$0xff] }
 0x363   : > { %14770 = vmatprep.mubr.bf16.mxu0 %v3046_v53  ;;  %v9205_v53 = vld [vmem:[%s21456_s18 + $0x1e8] sm:$0xff] }
 0x364   : > { %v19012_v4 = vpop.permute.xlu0 %9488  ;;  %v3030_v51 = vld [vmem:[#allocation2 + $0x1e1] sm:$0xff] }
 0x365   : > { %21478 = vst [vmem:[#allocation45_spill] sm:$0xff] %v19012_v4  ;;  %9808 = vperm.xlu0 %16640, %v9254_v24   ;;  %v11472_v24 = vld [vmem:[%s21456_s18 + $0x30] sm:$0xff] }
 0x366   : > { %9523 = vperm.xlu1 %16641, %v9197_v11   ;;  %v16766_v11 = vld [vmem:[#allocation9 + $0x90] sm:$0xff]  }
 0x368   : > { %v3031_v19 = vld [vmem:[#allocation2 + $0x1f1] sm:$0xff]  ;;  %v19020_v49 = vpop.permute.xlu0 %9498 }
 0x369   : > { %v3047_v17 = vpack.c.bf16 %v3031_v19, %v3030_v51  ;;  %21479 = vst [vmem:[#allocation46_spill] sm:$0xff] %v19020_v49  ;;  %11580 = vperm.xlu0 %16640, %v11466_v25   ;;  %v2944_v51 = vld [vmem:[#allocation2 + $0x80] sm:$0xff]  ;;  %v2945_v19 = vld [vmem:[#allocation2 + $0x90] sm:$0xff] }
 0x36a   : > { %9533 = vperm.xlu1 %16641, %v9199_v0   ;;  %v2942_v0 = vld [vmem:[#allocation2 + $0x60] sm:$0xff]  ;;  %v2972_v25 = vpack.c.bf16 %v2945_v19, %v2944_v51  ;;  %v9213_v51 = vld [vmem:[%s21456_s18 + $0x228] sm:$0xff] }
 0x36b   : > { %14771 = vmatmul.mubr.bf16.gmra.mrb[140].mxu0 %v3047_v17 }
 0x36c   : > { %14790 = vmatprep.mubr.bf16.mxu0 %v2968_v20  ;;  %v19028_v43 = vpop.permute.xlu0 %9508  ;;  %v16767_v20 = vld [vmem:[#allocation9 + $0x98] sm:$0xff]  }
 0x36d   : > { %21480 = vst [vmem:[#allocation47_spill] sm:$0xff] %v19028_v43  ;;  %11590 = vperm.xlu0 %16640, %v11468_v32   ;;  %v9209_v32 = vld [vmem:[%s21456_s18 + $0x208] sm:$0xff] }
 0x36e   : > { %9543 = vperm.xlu1 %16641, %v9201_v37   ;;  %v11474_v37 = vld [vmem:[%s21456_s18 + $0x40] sm:$0xff] }
 0x370   : > { %v19036_v3 = vpop.permute.xlu0 %9518 }
 0x371   : > { %21481 = vst [vmem:[#allocation48_spill] sm:$0xff] %v19036_v3  ;;  %11600 = vperm.xlu0 %16640, %v11470_v29   ;;  %v2949_v29 = vld [vmem:[#allocation2 + $0xd0] sm:$0xff] }
 0x372   : > { %9553 = vperm.xlu1 %16641, %v9203_v42   ;;  %v16768_v42 = vld [vmem:[#allocation9 + $0xa0] sm:$0xff]  }
 0x373   : > { %14791 = vmatmul.mubr.bf16.vlgmr.msra.gmra.mrb[112].mxu0 %v2969_v13  ;;  %v2947_v13 = vld [vmem:[#allocation2 + $0xb0] sm:$0xff] }
 0x374   : > { %14794 = vmatprep.mubr.bf16.mxu0 %v2970_v28  ;;  %14823 = vmatpush3.bf16.msra.mxu0 %v18792_v62  ;;  %v19045_v17 = vpop.permute.xlu0 %9528  ;;  %v2971_v62 = vpack.c.bf16 %v2943_v26, %v2942_v0  ;;  %v2948_v28 = vld [vmem:[#allocation2 + $0xc0] sm:$0xff] }
 0x375   : > { %14824 = vmatprep.subr.bf16.mxu0 %v16765_v9  ;;  %21482 = vst [vmem:[#allocation49_spill] sm:$0xff] %v19045_v17  ;;  %11610 = vperm.xlu0 %16640, %v11472_v24   ;;  %v16769_v24 = vld [vmem:[#allocation9 + $0xa8] sm:$0xff]   ;;  %v2974_v0 = vpack.c.bf16 %v2949_v29, %v2948_v28  ;;  %v11478_v26 = vld [vmem:[%s21456_s18 + $0x60] sm:$0xff]  ;;  %v16771_v28 = vld [vmem:[#allocation9 + $0xb8] sm:$0xff]  }
 0x376   : > { %9563 = vperm.xlu1 %16641, %v9205_v53  }
 0x378   : > { %14825 = vmatpush3.bf16.msra.mxu0 %v16765_v9  ;;  %v19053_v44 = vpop.permute.xlu0 %9538  ;;  %v9211_v9 = vld [vmem:[%s21456_s18 + $0x218] sm:$0xff] }
 0x379   : > { %14826 = vmatprep.subr.bf16.mxu0 %v16766_v11  ;;  %21483 = vst [vmem:[#allocation50_spill] sm:$0xff] %v19053_v44  ;;  %11620 = vperm.xlu0 %16640, %v11474_v37   ;;  %v2951_v37 = vld [vmem:[#allocation2 + $0xf0] sm:$0xff] }
 0x37a   : > { %9573 = vperm.xlu1 %16641, %v9207_v59  }
 0x37b   : > { %14795 = vmatmul.mubr.bf16.gmra.mrb[116].mxu0 %v2971_v62  ;;  %v16770_v62 = vld [vmem:[#allocation9 + $0xb0] sm:$0xff]  }
 0x37c   : > { %14798 = vmatprep.mubr.bf16.mxu0 %v2972_v25  ;;  %14827 = vmatpush3.bf16.msra.mxu0 %v16766_v11  ;;  %v2973_v11 = vpack.c.bf16 %v2947_v13, %v2946_v31  ;;  %v19068_v59 = vpop.permute.xlu0 %9548  ;;  %v2950_v25 = vld [vmem:[#allocation2 + $0xe0] sm:$0xff] }
 0x37d   : > { %v19055_v48 = vpop.permute.xlu1 %9263  ;;  %14828 = vmatprep.subr.bf16.mxu0 %v16767_v20  ;;  %11630 = vperm.xlu0 %16640, %v11476_v61   ;;  %21484 = vst [vmem:[#allocation51_spill] sm:$0xff] %v19068_v59  ;;  %v2953_v61 = vld [vmem:[#allocation2 + $0x110] sm:$0xff]  ;;  %v2975_v13 = vpack.c.bf16 %v2951_v37, %v2950_v25  ;;  %v9219_v37 = vld [vmem:[%s21456_s18 + $0x258] sm:$0xff]  ;;  %v9229_v59 = vld [vmem:[%s21456_s18 + $0x2a8] sm:$0xff] }
 0x37e   : > { %9583 = vperm.xlu1 %16641, %v9209_v32   ;;  %v9215_v32 = vld [vmem:[%s21456_s18 + $0x238] sm:$0xff] }
 0x380   : > { %14829 = vmatpush3.bf16.msra.mxu0 %v16767_v20  ;;  %v11480_v20 = vld [vmem:[%s21456_s18 + $0x70] sm:$0xff]  ;;  %v19081_v31 = vpop.permute.xlu0 %9558 }
 0x381   : > { %v19063_v53 = vpop.permute.xlu1 %9273  ;;  %14830 = vmatprep.subr.bf16.mxu0 %v16768_v42  ;;  %11640 = vperm.xlu0 %16640, %v11478_v26   ;;  %21486 = vst [vmem:[#allocation53_spill] sm:$0xff] %v19081_v31  ;;  %v19093_v26 = vld [vmem:[#allocation9 + $0xc0] sm:$0xff]  }
 0x382   : > { %9593 = vperm.xlu1 %16641, %v9211_v9   ;;  %v2952_v9 = vld [vmem:[#allocation2 + $0x100] sm:$0xff] }
 0x383   : > { %14799 = vmatmul.mubr.bf16.gmra.mrb[120].mxu0 %v2973_v11  ;;  %v2976_v29 = vpack.c.bf16 %v2953_v61, %v2952_v9  ;;  %v11482_v11 = vld [vmem:[%s21456_s18 + $0x80] sm:$0xff] }
 0x384   : > { %14802 = vmatprep.mubr.bf16.mxu0 %v2974_v0  ;;  %14831 = vmatpush3.bf16.msra.mxu0 %v16768_v42  ;;  %v19098_v25 = vpop.permute.xlu0 %9568  ;;  %v2956_v9 = vld [vmem:[#allocation2 + $0x140] sm:$0xff] }
 0x385   : > { %v19073_v19 = vpop.permute.xlu1 %9283  ;;  %14832 = vmatprep.subr.bf16.mxu0 %v16769_v24  ;;  %11650 = vperm.xlu0 %16640, %v11480_v20   ;;  %v2955_v20 = vld [vmem:[#allocation2 + $0x130] sm:$0xff]  ;;  %21489 = vst [vmem:[#allocation56_spill] sm:$0xff] %v19098_v25  ;;  %v9225_v25 = vld [vmem:[%s21456_s18 + $0x288] sm:$0xff] }
 0x386   : > { %21485 = vst [vmem:[#allocation52_spill] sm:$0xff] %v19073_v19  ;;  %9603 = vperm.xlu1 %16641, %v9213_v51   ;;  %v11484_v51 = vld [vmem:[%s21456_s18 + $0x90] sm:$0xff] }
 0x388   : > { %14833 = vmatpush3.bf16.msra.mxu0 %v16769_v24  ;;  %v9217_v24 = vld [vmem:[%s21456_s18 + $0x248] sm:$0xff] }
 0x389   : > { %v19083_v42 = vpop.permute.xlu1 %9293  ;;  %14834 = vmatprep.subr.bf16.mxu0 %v16770_v62  ;;  %11660 = vperm.xlu0 %16640, %v11482_v11   ;;  %v11486_v11 = vld [vmem:[%s21456_s18 + $0xa0] sm:$0xff] }
 0x38a   : > { %21487 = vst [vmem:[#allocation54_spill] sm:$0xff] %v19083_v42  ;;  %9613 = vperm.xlu1 %16641, %v9215_v32   ;;  %v2957_v32 = vld [vmem:[#allocation2 + $0x150] sm:$0xff] }
 0x38b   : > { %14803 = vmatmul.mubr.bf16.gmra.mrb[124].mxu0 %v2975_v13 }
 0x38c   : > { %14806 = vmatprep.mubr.bf16.mxu0 %v2976_v29  ;;  %14835 = vmatpush3.bf16.msra.mxu0 %v16770_v62  ;;  %v2954_v62 = vld [vmem:[#allocation2 + $0x120] sm:$0xff]  ;;  %v2978_v29 = vpack.c.bf16 %v2957_v32, %v2956_v9  ;;  %v2961_v32 = vld [vmem:[#allocation2 + $0x190] sm:$0xff] }
 0x38d   : > { %v19091_v0 = vpop.permute.xlu1 %9303  ;;  %14836 = vmatprep.subr.bf16.mxu0 %v16771_v28  ;;  %11670 = vperm.xlu0 %16640, %v11484_v51   ;;  %v2977_v13 = vpack.c.bf16 %v2955_v20, %v2954_v62  ;;  %v11488_v51 = vld [vmem:[%s21456_s18 + $0xb0] sm:$0xff]  ;;  %v2958_v62 = vld [vmem:[#allocation2 + $0x160] sm:$0xff] }
 0x38e   : > { %21488 = vst [vmem:[#allocation55_spill] sm:$0xff] %v19091_v0  ;;  %9623 = vperm.xlu1 %16641, %v9217_v24   ;;  %v9221_v24 = vld [vmem:[%s21456_s18 + $0x268] sm:$0xff]  ;;  %v2959_v20 = vld [vmem:[#allocation2 + $0x170] sm:$0xff] }
 0x38f   : > { %v2979_v9 = vpack.c.bf16 %v2959_v20, %v2958_v62  ;;  %v2963_v20 = vld [vmem:[#allocation2 + $0x1b0] sm:$0xff]  ;;  %v2962_v62 = vld [vmem:[#allocation2 + $0x1a0] sm:$0xff] }
 0x390   : > { %14837 = vmatpush3.bf16.msra.mxu0 %v16771_v28  ;;  %v19112_v28 = vpop.permute.xlu0 %9578 }
 0x391   : > { %v19103_v61 = vpop.permute.xlu1 %9313  ;;  %14870 = vmatprep.subr.bf16.mxu0 %v19093_v26  ;;  %21491 = vst [vmem:[#allocation58_spill] sm:$0xff] %v19112_v28  ;;  %11680 = vperm.xlu0 %16640, %v11486_v11   ;;  %v11490_v11 = vld [vmem:[%s21456_s18 + $0xc0] sm:$0xff] }
 0x392   : > { %21490 = vst [vmem:[#allocation57_spill] sm:$0xff] %v19103_v61  ;;  %9633 = vperm.xlu1 %16641, %v9219_v37   ;;  %v9223_v37 = vld [vmem:[%s21456_s18 + $0x278] sm:$0xff] }
 0x393   : > { %14807 = vmatmul.mubr.bf16.gmra.mrb[128].mxu0 %v2977_v13 }
 0x394   : > { %14810 = vmatprep.mubr.bf16.mxu0 %v2978_v29  ;;  %v2960_v29 = vld [vmem:[#allocation2 + $0x180] sm:$0xff] }
 0x395   : > { %v19114_v31 = vpop.permute.xlu1 %9323  ;;  %11690 = vperm.xlu0 %16640, %v11488_v51   ;;  %v2980_v28 = vpack.c.bf16 %v2961_v32, %v2960_v29  ;;  %v11492_v51 = vld [vmem:[%s21456_s18 + $0xd0] sm:$0xff] }
 0x396   : > { %21492 = vst [vmem:[#allocation59_spill] sm:$0xff] %v19114_v31  ;;  %9643 = vperm.xlu1 %16641, %v9221_v24   ;;  %v19127_v24 = vpop.permute.xlu0 %9588  ;;  %v2965_v32 = vld [vmem:[#allocation2 + $0x1d0] sm:$0xff] }
 0x397   : > { %21494 = vst [vmem:[#allocation61_spill] sm:$0xff] %v19127_v24  ;;  %v2964_v24 = vld [vmem:[#allocation2 + $0x1c0] sm:$0xff] }
 0x399   : > { %v19122_v13 = vpop.permute.xlu1 %9333  ;;  %11700 = vperm.xlu0 %16640, %v11490_v11   ;;  %v11494_v11 = vld [vmem:[%s21456_s18 + $0xe0] sm:$0xff] }
 0x39a   : > { %21493 = vst [vmem:[#allocation60_spill] sm:$0xff] %v19122_v13  ;;  %9653 = vperm.xlu1 %16641, %v9223_v37   ;;  %v9227_v37 = vld [vmem:[%s21456_s18 + $0x298] sm:$0xff] }
 0x39b   : > { %14811 = vmatmul.mubr.bf16.gmra.mrb[132].mxu0 %v2979_v9  ;;  %v19140_v9 = vpop.permute.xlu0 %9598 }
 0x39c   : > { %14814 = vmatprep.mubr.bf16.mxu0 %v2980_v28  ;;  %21496 = vst [vmem:[#allocation63_spill] sm:$0xff] %v19140_v9  ;;  %v2981_v28 = vpack.c.bf16 %v2963_v20, %v2962_v62  ;;  %v2967_v20 = vld [vmem:[#allocation2 + $0x1f0] sm:$0xff] }
 0x39d   : > { %v19132_v44 = vpop.permute.xlu1 %9343  ;;  %11710 = vperm.xlu0 %16640, %v11492_v51   ;;  %v11496_v51 = vld [vmem:[%s21456_s18 + $0xf0] sm:$0xff] }
 0x39e   : > { %21495 = vst [vmem:[#allocation62_spill] sm:$0xff] %v19132_v44  ;;  %9663 = vperm.xlu1 %16641, %v9225_v25   ;;  %v2982_v25 = vpack.c.bf16 %v2965_v32, %v2964_v24  ;;  %v3483_v32 = vld [vmem:[#allocation2 + $0x2] sm:$0xff]  ;;  %v3484_v62 = vld [vmem:[#allocation2 + $0x12] sm:$0xff] }
 0x39f   : > { %v19155_v24 = vpop.permute.xlu0 %9608 }
 0x3a0   : > { %21499 = vst [vmem:[#allocation66_spill] sm:$0xff] %v19155_v24  ;;  %v9233_v24 = vld [vmem:[%s21456_s18 + $0x2c8] sm:$0xff] }
 0x3a1   : > { %v19142_v29 = vpop.permute.xlu1 %9353  ;;  %11720 = vperm.xlu0 %16640, %v11494_v11   ;;  %v11498_v11 = vld [vmem:[%s21456_s18 + $0x100] sm:$0xff] }
 0x3a2   : > { %21497 = vst [vmem:[#allocation64_spill] sm:$0xff] %v19142_v29  ;;  %9673 = vperm.xlu1 %16641, %v9227_v37   ;;  %v9231_v37 = vld [vmem:[%s21456_s18 + $0x2b8] sm:$0xff] }
 0x3a3   : > { %14815 = vmatmul.mubr.bf16.gmra.mrb[136].mxu0 %v2981_v28  ;;  %v2966_v28 = vld [vmem:[#allocation2 + $0x1e0] sm:$0xff]  ;;  %v19168_v17 = vpop.permute.xlu0 %9618 }
 0x3a4   : > { %14818 = vmatprep.mubr.bf16.mxu0 %v2982_v25  ;;  %v2983_v25 = vpack.c.bf16 %v2967_v20, %v2966_v28  ;;  %21501 = vst [vmem:[#allocation68_spill] sm:$0xff] %v19168_v17  ;;  %v3485_v20 = vld [vmem:[#allocation2 + $0x22] sm:$0xff]  ;;  %v3488_v28 = vld [vmem:[#allocation2 + $0x52] sm:$0xff] }
 0x3a5   : > { %v19150_v3 = vpop.permute.xlu1 %9363  ;;  %11730 = vperm.xlu0 %16640, %v11496_v51   ;;  %v11500_v51 = vld [vmem:[%s21456_s18 + $0x110] sm:$0xff]  ;;  %v16773_v17 = vld [vmem:[#allocation9 + $0xc8] sm:$0xff]  }
 0x3a6   : > { %21498 = vst [vmem:[#allocation65_spill] sm:$0xff] %v19150_v3  ;;  %9683 = vperm.xlu1 %16641, %v9229_v59   ;;  %v3515_v59 = vpack.c.bf16 %v3484_v62, %v3483_v32  ;;  %v9235_v32 = vld [vmem:[%s21456_s18 + $0x2d8] sm:$0xff]  ;;  %v3487_v62 = vld [vmem:[#allocation2 + $0x42] sm:$0xff] }
 0x3a7   : > { %v19183_v43 = vpop.permute.xlu0 %9628 }
 0x3a8   : > { %21504 = vst [vmem:[#allocation71_spill] sm:$0xff] %v19183_v43 }
 0x3a9   : > { %v19160_v9 = vpop.permute.xlu1 %9373  ;;  %11740 = vperm.xlu0 %16640, %v11498_v11   ;;  %v3517_v11 = vpack.c.bf16 %v3488_v28, %v3487_v62  ;;  %v9239_v62 = vld [vmem:[%s21456_s18 + $0x2f8] sm:$0xff]  ;;  %v3491_v28 = vld [vmem:[#allocation2 + $0x82] sm:$0xff] }
 0x3aa   : > { %21500 = vst [vmem:[#allocation67_spill] sm:$0xff] %v19160_v9  ;;  %9693 = vperm.xlu1 %16641, %v9231_v37   ;;  %v3486_v37 = vld [vmem:[#allocation2 + $0x32] sm:$0xff] }
 0x3ab   : > { %14819 = vmatmul.mubr.bf16.gmra.mrb[140].mxu0 %v2983_v25 }
 0x3ac   : > { %14838 = vmatprep.mubr.bf16.mxu0 %v3515_v59  ;;  %v3516_v59 = vpack.c.bf16 %v3486_v37, %v3485_v20  ;;  %v11504_v20 = vld [vmem:[%s21456_s18 + $0x130] sm:$0xff]  ;;  %v3489_v37 = vld [vmem:[#allocation2 + $0x62] sm:$0xff] }
 0x3ad   : > { %v19170_v49 = vpop.permute.xlu1 %9383  ;;  %11750 = vperm.xlu0 %16640, %v11500_v51   ;;  %v16774_v51 = vld [vmem:[#allocation9 + $0xd0] sm:$0xff]  }
 0x3ae   : > { %21502 = vst [vmem:[#allocation69_spill] sm:$0xff] %v19170_v49  ;;  %9703 = vperm.xlu1 %16641, %v9233_v24   ;;  %v11502_v24 = vld [vmem:[%s21456_s18 + $0x120] sm:$0xff] }
 0x3af   : > { %v4711_v49 = vld [vmem:[#allocation2 + $0x46] sm:$0xff] }
 0x3b1   : > { %v19178_v25 = vpop.permute.xlu1 %9393  ;;  %11760 = vperm.xlu0 %16640, %v11502_v24  }
 0x3b2   : > { %21503 = vst [vmem:[#allocation70_spill] sm:$0xff] %v19178_v25  ;;  %9713 = vperm.xlu1 %16641, %v9235_v32   ;;  %v3490_v32 = vld [vmem:[#allocation2 + $0x72] sm:$0xff] }
 0x3b3   : > { %14839 = vmatmul.mubr.bf16.vlgmr.msra.gmra.mrb[112].mxu0 %v3516_v59  ;;  %v3492_v59 = vld [vmem:[#allocation2 + $0x92] sm:$0xff]  ;;  %v3518_v24 = vpack.c.bf16 %v3490_v32, %v3489_v37  ;;  %v3493_v32 = vld [vmem:[#allocation2 + $0xa2] sm:$0xff] }
 0x3b4   : > { %14842 = vmatprep.mubr.bf16.mxu0 %v3517_v11  ;;  %14871 = vmatpush3.bf16.msra.mxu0 %v19093_v26  ;;  %v19197_v26 = vpop.permute.xlu0 %9638  ;;  %v3519_v43 = vpack.c.bf16 %v3492_v59, %v3491_v28  ;;  %v11508_v37 = vld [vmem:[%s21456_s18 + $0x150] sm:$0xff]  ;;  %v9243_v59 = vld [vmem:[%s21456_s18 + $0x318] sm:$0xff] }
 0x3b5   : > { %v19189_v4 = vpop.permute.xlu1 %9403  ;;  %14872 = vmatprep.subr.bf16.mxu0 %v16773_v17  ;;  %21506 = vst [vmem:[#allocation73_spill] sm:$0xff] %v19197_v26  ;;  %11770 = vperm.xlu0 %16640, %v11504_v20   ;;  %v16776_v20 = vld [vmem:[#allocation9 + $0xe0] sm:$0xff]   ;;  %v4712_v25 = vld [vmem:[#allocation2 + $0x56] sm:$0xff] }
 0x3b6   : > { %21505 = vst [vmem:[#allocation72_spill] sm:$0xff] %v19189_v4  ;;  %9723 = vperm.xlu1 %16641, %v9237_v2   ;;  %v16775_v2 = vld [vmem:[#allocation9 + $0xd8] sm:$0xff]  }
 0x3b8   : > { %14873 = vmatpush3.bf16.msra.mxu0 %v16773_v17  ;;  %v19212_v28 = vpop.permute.xlu0 %9648 }
 0x3b9   : > { %v19199_v11 = vpop.permute.xlu1 %9413  ;;  %14874 = vmatprep.subr.bf16.mxu0 %v16774_v51  ;;  %11780 = vperm.xlu0 %16640, %v11506_v50   ;;  %21509 = vst [vmem:[#allocation76_spill] sm:$0xff] %v19212_v28  ;;  %v9245_v28 = vld [vmem:[%s21456_s18 + $0x328] sm:$0xff] }
 0x3ba   : > { %21507 = vst [vmem:[#allocation74_spill] sm:$0xff] %v19199_v11  ;;  %9733 = vperm.xlu1 %16641, %v9239_v62   ;;  %v3494_v62 = vld [vmem:[#allocation2 + $0xb2] sm:$0xff]  ;;  %v11519_v11 = vld [vmem:[%s21456_s18 + $0x1a8] sm:$0xff] }
 0x3bb   : > { %14843 = vmatmul.mubr.bf16.gmra.mrb[116].mxu0 %v3518_v24  ;;  %v3520_v50 = vpack.c.bf16 %v3494_v62, %v3493_v32  ;;  %v11512_v32 = vld [vmem:[%s21456_s18 + $0x170] sm:$0xff]  ;;  %v3497_v62 = vld [vmem:[#allocation2 + $0xe2] sm:$0xff] }
 0x3bc   : > { %14846 = vmatprep.mubr.bf16.mxu0 %v3519_v43  ;;  %14875 = vmatpush3.bf16.msra.mxu0 %v16774_v51  ;;  %v3495_v43 = vld [vmem:[#allocation2 + $0xc2] sm:$0xff]  ;;  %v3496_v51 = vld [vmem:[#allocation2 + $0xd2] sm:$0xff] }
 0x3bd   : > { %v19207_v17 = vpop.permute.xlu1 %9423  ;;  %14876 = vmatprep.subr.bf16.mxu0 %v16775_v2  ;;  %11790 = vperm.xlu0 %16640, %v11508_v37   ;;  %v3521_v26 = vpack.c.bf16 %v3496_v51, %v3495_v43  ;;  %v16778_v37 = vld [vmem:[#allocation9 + $0xf0] sm:$0xff]   ;;  %v9247_v43 = vld [vmem:[%s21456_s18 + $0x338] sm:$0xff] }
 0x3be   : > { %21508 = vst [vmem:[#allocation75_spill] sm:$0xff] %v19207_v17  ;;  %9743 = vperm.xlu1 %16641, %v9241_v46   ;;  %v16777_v46 = vld [vmem:[#allocation9 + $0xe8] sm:$0xff]  }
 0x3bf   : > { %v11483_v17 = vld [vmem:[%s21456_s18 + $0x88] sm:$0xff] }
 0x3c0   : > { %14877 = vmatpush3.bf16.msra.mxu0 %v16775_v2  ;;  %v19225_v2 = vpop.permute.xlu0 %9658 }
 0x3c1   : > { %v19217_v24 = vpop.permute.xlu1 %9433  ;;  %14878 = vmatprep.subr.bf16.mxu0 %v16776_v20  ;;  %21511 = vst [vmem:[#allocation78_spill] sm:$0xff] %v19225_v2  ;;  %11800 = vperm.xlu0 %16640, %v11510_v56   ;;  %v3499_v56 = vld [vmem:[#allocation2 + $0x102] sm:$0xff] }
 0x3c2   : > { %21510 = vst [vmem:[#allocation77_spill] sm:$0xff] %v19217_v24  ;;  %9753 = vperm.xlu1 %16641, %v9243_v59   ;;  %v3498_v59 = vld [vmem:[#allocation2 + $0xf2] sm:$0xff]  ;;  %v11514_v2 = vld [vmem:[%s21456_s18 + $0x180] sm:$0xff]  ;;  %v11511_v24 = vld [vmem:[%s21456_s18 + $0x168] sm:$0xff] }
 0x3c3   : > { %14847 = vmatmul.mubr.bf16.gmra.mrb[120].mxu0 %v3520_v50  ;;  %v3522_v51 = vpack.c.bf16 %v3498_v59, %v3497_v62  ;;  %v16779_v50 = vld [vmem:[#allocation9 + $0xf8] sm:$0xff]   ;;  %v19247_v62 = vld [vmem:[#allocation9 + $0x100] sm:$0xff]   ;;  %v11516_v59 = vld [vmem:[%s21456_s18 + $0x190] sm:$0xff] }
 0x3c4   : > { %14850 = vmatprep.mubr.bf16.mxu0 %v3521_v26  ;;  %14879 = vmatpush3.bf16.msra.mxu0 %v16776_v20  ;;  %v3500_v26 = vld [vmem:[#allocation2 + $0x112] sm:$0xff] }
 0x3c5   : > { %v19227_v38 = vpop.permute.xlu1 %9443  ;;  %14880 = vmatprep.subr.bf16.mxu0 %v16777_v46  ;;  %11810 = vperm.xlu0 %16640, %v11512_v32  }
 0x3c6   : > { %21512 = vst [vmem:[#allocation79_spill] sm:$0xff] %v19227_v38  ;;  %9763 = vperm.xlu1 %16641, %v9245_v28   ;;  %v3523_v28 = vpack.c.bf16 %v3500_v26, %v3499_v56  ;;  %v19240_v38 = vpop.permute.xlu0 %9668  ;;  %v9251_v26 = vld [vmem:[%s21456_s18 + $0x358] sm:$0xff]  ;;  %v3501_v56 = vld [vmem:[#allocation2 + $0x122] sm:$0xff] }
 0x3c7   : > { %21514 = vst [vmem:[#allocation81_spill] sm:$0xff] %v19240_v38  ;;  %v3503_v38 = vld [vmem:[#allocation2 + $0x142] sm:$0xff] }
 0x3c8   : > { %14881 = vmatpush3.bf16.msra.mxu0 %v16777_v46  ;;  %v9249_v46 = vld [vmem:[%s21456_s18 + $0x348] sm:$0xff] }
 0x3c9   : > { %v19235_v20 = vpop.permute.xlu1 %9453  ;;  %14882 = vmatprep.subr.bf16.mxu0 %v16778_v37  ;;  %11820 = vperm.xlu0 %16640, %v11514_v2  }
 0x3ca   : > { %21513 = vst [vmem:[#allocation80_spill] sm:$0xff] %v19235_v20  ;;  %9773 = vperm.xlu1 %16641, %v9247_v43   ;;  %v3502_v43 = vld [vmem:[#allocation2 + $0x132] sm:$0xff] }
 0x3cb   : > { %14851 = vmatmul.mubr.bf16.gmra.mrb[124].mxu0 %v3522_v51  ;;  %v3504_v51 = vld [vmem:[#allocation2 + $0x152] sm:$0xff]  ;;  %v3524_v2 = vpack.c.bf16 %v3502_v43, %v3501_v56  ;;  %v3505_v56 = vld [vmem:[#allocation2 + $0x162] sm:$0xff] }
 0x3cc   : > { %14854 = vmatprep.mubr.bf16.mxu0 %v3523_v28  ;;  %14883 = vmatpush3.bf16.msra.mxu0 %v16778_v37  ;;  %v19255_v37 = vpop.permute.xlu0 %9678  ;;  %v3506_v43 = vld [vmem:[#allocation2 + $0x172] sm:$0xff] }
 0x3cd   : > { %v19245_v32 = vpop.permute.xlu1 %9463  ;;  %14884 = vmatprep.subr.bf16.mxu0 %v16779_v50  ;;  %21516 = vst [vmem:[#allocation83_spill] sm:$0xff] %v19255_v37  ;;  %11830 = vperm.xlu0 %16640, %v11516_v59   ;;  %v11520_v59 = vld [vmem:[%s21456_s18 + $0x1b0] sm:$0xff] }
 0x3ce   : > { %21515 = vst [vmem:[#allocation82_spill] sm:$0xff] %v19245_v32  ;;  %9783 = vperm.xlu1 %16641, %v9249_v46   ;;  %v3525_v46 = vpack.c.bf16 %v3504_v51, %v3503_v38  ;;  %v11518_v32 = vld [vmem:[%s21456_s18 + $0x1a0] sm:$0xff]  ;;  %v3508_v51 = vld [vmem:[#allocation2 + $0x192] sm:$0xff] }
 0x3d0   : > { %14885 = vmatpush3.bf16.msra.mxu0 %v16779_v50  ;;  %v9253_v50 = vld [vmem:[%s21456_s18 + $0x368] sm:$0xff]  ;;  %v19271_v38 = vpop.permute.xlu0 %9688 }
 0x3d1   : > { %v19257_v28 = vpop.permute.xlu1 %9473  ;;  %14918 = vmatprep.subr.bf16.mxu0 %v19247_v62  ;;  %11840 = vperm.xlu0 %16640, %v11518_v32   ;;  %21519 = vst [vmem:[#allocation86_spill] sm:$0xff] %v19271_v38  ;;  %v11467_v38 = vld [vmem:[%s21456_s18 + $0x8] sm:$0xff] }
 0x3d2   : > { %21517 = vst [vmem:[#allocation84_spill] sm:$0xff] %v19257_v28  ;;  %9793 = vperm.xlu1 %16641, %v9251_v26   ;;  %v9255_v26 = vld [vmem:[%s21456_s18 + $0x378] sm:$0xff] }
 0x3d3   : > { %14855 = vmatmul.mubr.bf16.gmra.mrb[128].mxu0 %v3524_v2 }
 0x3d4   : > { %14858 = vmatprep.mubr.bf16.mxu0 %v3525_v46  ;;  %v3526_v46 = vpack.c.bf16 %v3506_v43, %v3505_v56  ;;  %v19284_v28 = vpop.permute.xlu0 %9698  ;;  %v11469_v43 = vld [vmem:[%s21456_s18 + $0x18] sm:$0xff] }
 0x3d5   : > { %v19266_v37 = vpop.permute.xlu1 %9483  ;;  %11850 = vperm.xlu0 %16640, %v11520_v59   ;;  %21521 = vst [vmem:[#allocation88_spill] sm:$0xff] %v19284_v28  ;;  %v3510_v59 = vld [vmem:[#allocation2 + $0x1b2] sm:$0xff] }
 0x3d6   : > { %21518 = vst [vmem:[#allocation85_spill] sm:$0xff] %v19266_v37  ;;  %9803 = vperm.xlu1 %16641, %v9253_v50   ;;  %v3507_v37 = vld [vmem:[#allocation2 + $0x182] sm:$0xff] }
 0x3d7   : > { %v3527_v32 = vpack.c.bf16 %v3508_v51, %v3507_v37  ;;  %v11522_v50 = vld [vmem:[%s21456_s18 + $0x1c0] sm:$0xff]  ;;  %v11524_v37 = vld [vmem:[%s21456_s18 + $0x1d0] sm:$0xff] }
 0x3d8   : > { %v3509_v51 = vld [vmem:[#allocation2 + $0x1a2] sm:$0xff] }
 0x3d9   : > { %v19276_v2 = vpop.permute.xlu1 %9493  ;;  %11860 = vperm.xlu0 %16640, %v11522_v50   ;;  %v19299_v50 = vpop.permute.xlu0 %9708 }
 0x3da   : > { %21520 = vst [vmem:[#allocation87_spill] sm:$0xff] %v19276_v2  ;;  %9813 = vperm.xlu1 %16641, %v9255_v26   ;;  %v3512_v26 = vld [vmem:[#allocation2 + $0x1d2] sm:$0xff]  ;;  %21524 = vst [vmem:[#allocation91_spill] sm:$0xff] %v19299_v50 }
 0x3db   : > { %14859 = vmatmul.mubr.bf16.gmra.mrb[132].mxu0 %v3526_v46  ;;  %v3528_v46 = vpack.c.bf16 %v3510_v59, %v3509_v51  ;;  %v3514_v59 = vld [vmem:[#allocation2 + $0x1f2] sm:$0xff] }
 0x3dc   : > { %14862 = vmatprep.mubr.bf16.mxu0 %v3527_v32  ;;  %v3511_v32 = vld [vmem:[#allocation2 + $0x1c2] sm:$0xff]  ;;  %v3790_v51 = vld [vmem:[#allocation2 + $0x13] sm:$0xff] }
 0x3dd   : > { %v19286_v20 = vpop.permute.xlu1 %9503  ;;  %11870 = vperm.xlu0 %16640, %v11524_v37   ;;  %v3529_v28 = vpack.c.bf16 %v3512_v26, %v3511_v32  ;;  %v11528_v37 = vld [vmem:[%s21456_s18 + $0x1f0] sm:$0xff]  ;;  %v3789_v26 = vld [vmem:[#allocation2 + $0x3] sm:$0xff]  ;;  %v19312_v32 = vpop.permute.xlu0 %9718 }
 0x3de   : > { %21522 = vst [vmem:[#allocation89_spill] sm:$0xff] %v19286_v20  ;;  %11585 = vperm.xlu1 %16641, %v11467_v38   ;;  %v11526_v38 = vld [vmem:[%s21456_s18 + $0x1e0] sm:$0xff]  ;;  %v11471_v20 = vld [vmem:[%s21456_s18 + $0x28] sm:$0xff]  ;;  %21526 = vst [vmem:[#allocation93_spill] sm:$0xff] %v19312_v32 }
 0x3e1   : > { %v19294_v56 = vpop.permute.xlu1 %9513  ;;  %11880 = vperm.xlu0 %16640, %v11526_v38   ;;  %v11530_v38 = vld [vmem:[%s21456_s18 + $0x200] sm:$0xff] }
 0x3e2   : > { %21523 = vst [vmem:[#allocation90_spill] sm:$0xff] %v19294_v56  ;;  %11595 = vperm.xlu1 %16641, %v11469_v43   ;;  %v11473_v43 = vld [vmem:[%s21456_s18 + $0x38] sm:$0xff] }
 0x3e3   : > { %14863 = vmatmul.mubr.bf16.gmra.mrb[136].mxu0 %v3528_v46  ;;  %v3513_v46 = vld [vmem:[#allocation2 + $0x1e2] sm:$0xff] }
 0x3e4   : > { %14866 = vmatprep.mubr.bf16.mxu0 %v3529_v28  ;;  %v3530_v28 = vpack.c.bf16 %v3514_v59, %v3513_v46  ;;  %v3791_v59 = vld [vmem:[#allocation2 + $0x23] sm:$0xff] }
 0x3e5   : > { %v19304_v2 = vpop.permute.xlu1 %9523  ;;  %11890 = vperm.xlu0 %16640, %v11528_v37   ;;  %v11532_v37 = vld [vmem:[%s21456_s18 + $0x210] sm:$0xff]  ;;  %v3793_v46 = vld [vmem:[#allocation2 + $0x43] sm:$0xff] }
 0x3e6   : > { %21525 = vst [vmem:[#allocation92_spill] sm:$0xff] %v19304_v2  ;;  %11605 = vperm.xlu1 %16641, %v11471_v20   ;;  %v3821_v20 = vpack.c.bf16 %v3790_v51, %v3789_v26  ;;  %v11475_v2 = vld [vmem:[%s21456_s18 + $0x48] sm:$0xff]  ;;  %v19327_v26 = vpop.permute.xlu0 %9728  ;;  %v11477_v51 = vld [vmem:[%s21456_s18 + $0x58] sm:$0xff] }
 0x3e7   : > { %21529 = vst [vmem:[#allocation96_spill] sm:$0xff] %v19327_v26  ;;  %v11479_v26 = vld [vmem:[%s21456_s18 + $0x68] sm:$0xff] }
 0x3e9   : > { %v19314_v50 = vpop.permute.xlu1 %9533  ;;  %11900 = vperm.xlu0 %16640, %v11530_v38   ;;  %v16781_v38 = vld [vmem:[#allocation9 + $0x108] sm:$0xff]  }
 0x3ea   : > { %21527 = vst [vmem:[#allocation94_spill] sm:$0xff] %v19314_v50  ;;  %11615 = vperm.xlu1 %16641, %v11473_v43   ;;  %v3792_v43 = vld [vmem:[#allocation2 + $0x33] sm:$0xff]  ;;  %v19341_v50 = vpop.permute.xlu0 %9738 }
 0x3eb   : > { %14867 = vmatmul.mubr.bf16.gmra.mrb[140].mxu0 %v3530_v28  ;;  %v3794_v28 = vld [vmem:[#allocation2 + $0x53] sm:$0xff]  ;;  %21531 = vst [vmem:[#allocation98_spill] sm:$0xff] %v19341_v50  ;;  %v11538_v50 = vld [vmem:[%s21456_s18 + $0x240] sm:$0xff] }
 0x3ec   : > { %14886 = vmatprep.mubr.bf16.mxu0 %v3821_v20  ;;  %v3822_v20 = vpack.c.bf16 %v3792_v43, %v3791_v59  ;;  %v3823_v32 = vpack.c.bf16 %v3794_v28, %v3793_v46  ;;  %v11536_v59 = vld [vmem:[%s21456_s18 + $0x230] sm:$0xff]  ;;  %v3795_v43 = vld [vmem:[#allocation2 + $0x63] sm:$0xff]  ;;  %v11481_v46 = vld [vmem:[%s21456_s18 + $0x78] sm:$0xff] }
 0x3ed   : > { %v19322_v56 = vpop.permute.xlu1 %9543  ;;  %11910 = vperm.xlu0 %16640, %v11532_v37   ;;  %v16782_v37 = vld [vmem:[#allocation9 + $0x110] sm:$0xff]   ;;  %v3797_v28 = vld [vmem:[#allocation2 + $0x83] sm:$0xff] }
 0x3ee   : > { %21528 = vst [vmem:[#allocation95_spill] sm:$0xff] %v19322_v56  ;;  %11625 = vperm.xlu1 %16641, %v11475_v2   ;;  %v11534_v2 = vld [vmem:[%s21456_s18 + $0x220] sm:$0xff] }
 0x3f1   : > { %v19338_v56 = vpop.permute.xlu1 %9553  ;;  %11920 = vperm.xlu0 %16640, %v11534_v2  }
 0x3f2   : > { %11635 = vperm.xlu1 %16641, %v11477_v51   ;;  %21530 = vst [vmem:[#allocation97_spill] sm:$0xff] %v19338_v56  ;;  %v3796_v51 = vld [vmem:[#allocation2 + $0x73] sm:$0xff]  ;;  %v19354_v56 = vpop.permute.xlu0 %9748 }
 0x3f3   : > { %14887 = vmatmul.mubr.bf16.vlgmr.msra.gmra.mrb[112].mxu0 %v3822_v20  ;;  %v16783_v20 = vld [vmem:[#allocation9 + $0x118] sm:$0xff]   ;;  %21533 = vst [vmem:[#allocation100_spill] sm:$0xff] %v19354_v56  ;;  %v11542_v56 = vld [vmem:[%s21456_s18 + $0x260] sm:$0xff] }
 0x3f4   : > { %14890 = vmatprep.mubr.bf16.mxu0 %v3823_v32  ;;  %14919 = vmatpush3.bf16.msra.mxu0 %v19247_v62  ;;  %v3798_v32 = vld [vmem:[#allocation2 + $0x93] sm:$0xff]  ;;  %v3824_v62 = vpack.c.bf16 %v3796_v51, %v3795_v43  ;;  %v3799_v43 = vld [vmem:[#allocation2 + $0xa3] sm:$0xff] }
 0x3f5   : > { %14920 = vmatprep.subr.bf16.mxu0 %v16781_v38  ;;  %11930 = vperm.xlu0 %16640, %v11536_v59   ;;  %v19349_v2 = vpop.permute.xlu1 %9563  ;;  %v11540_v59 = vld [vmem:[%s21456_s18 + $0x250] sm:$0xff] }
 0x3f6   : > { %11645 = vperm.xlu1 %16641, %v11479_v26   ;;  %21532 = vst [vmem:[#allocation99_spill] sm:$0xff] %v19349_v2  ;;  %v3825_v26 = vpack.c.bf16 %v3798_v32, %v3797_v28  ;;  %v3800_v51 = vld [vmem:[#allocation2 + $0xb3] sm:$0xff]  ;;  %v3801_v28 = vld [vmem:[#allocation2 + $0xc3] sm:$0xff] }
 0x3f7   : > { %v3802_v32 = vld [vmem:[#allocation2 + $0xd3] sm:$0xff]  ;;  %v11487_v2 = vld [vmem:[%s21456_s18 + $0xa8] sm:$0xff] }
 0x3f8   : > { %14921 = vmatpush3.bf16.msra.mxu0 %v16781_v38  ;;  %v16784_v38 = vld [vmem:[#allocation9 + $0x120] sm:$0xff]  }
 0x3f9   : > { %14922 = vmatprep.subr.bf16.mxu0 %v16782_v37  ;;  %11940 = vperm.xlu0 %16640, %v11538_v50   ;;  %v3826_v50 = vpack.c.bf16 %v3800_v51, %v3799_v43  ;;  %v11544_v43 = vld [vmem:[%s21456_s18 + $0x270] sm:$0xff]  ;;  %v3803_v51 = vld [vmem:[#allocation2 + $0xe3] sm:$0xff] }
 0x3fa   : > { %11655 = vperm.xlu1 %16641, %v11481_v46   ;;  %v11485_v46 = vld [vmem:[%s21456_s18 + $0x98] sm:$0xff] }
 0x3fb   : > { %14891 = vmatmul.mubr.bf16.gmra.mrb[116].mxu0 %v3824_v62  ;;  %v19365_v62 = vpop.permute.xlu1 %9573 }
 0x3fc   : > { %14894 = vmatprep.mubr.bf16.mxu0 %v3825_v26  ;;  %14923 = vmatpush3.bf16.msra.mxu0 %v16782_v37  ;;  %21534 = vst [vmem:[#allocation101_spill] sm:$0xff] %v19365_v62  ;;  %v19367_v37 = vpop.permute.xlu0 %9758  ;;  %v3827_v26 = vpack.c.bf16 %v3802_v32, %v3801_v28  ;;  %v11489_v32 = vld [vmem:[%s21456_s18 + $0xb8] sm:$0xff]  ;;  %v11566_v62 = vld [vmem:[%s21456_s18 + $0x320] sm:$0xff] }
 0x3fd   : > { %14924 = vmatprep.subr.bf16.mxu0 %v16783_v20  ;;  %21535 = vst [vmem:[#allocation102_spill] sm:$0xff] %v19367_v37  ;;  %11950 = vperm.xlu0 %16640, %v11540_v59   ;;  %v11546_v37 = vld [vmem:[%s21456_s18 + $0x280] sm:$0xff] }
 0x3fe   : > { %11665 = vperm.xlu1 %16641, %v11483_v17   ;;  %v16785_v17 = vld [vmem:[#allocation9 + $0x128] sm:$0xff]  }
 0x3ff   : > { %v19375_v59 = vpop.permute.xlu1 %9583 }
 0x400   : > { %14925 = vmatpush3.bf16.msra.mxu0 %v16783_v20  ;;  %v16786_v20 = vld [vmem:[#allocation9 + $0x130] sm:$0xff]   ;;  %21536 = vst [vmem:[#allocation103_spill] sm:$0xff] %v19375_v59  ;;  %v19380_v28 = vpop.permute.xlu0 %9768 }
 0x401   : > { %14926 = vmatprep.subr.bf16.mxu0 %v16784_v38  ;;  %11960 = vperm.xlu0 %16640, %v11542_v56   ;;  %21537 = vst [vmem:[#allocation104_spill] sm:$0xff] %v19380_v28  ;;  %v11491_v28 = vld [vmem:[%s21456_s18 + $0xc8] sm:$0xff] }
 0x402   : > { %11675 = vperm.xlu1 %16641, %v11485_v46   ;;  %v3804_v46 = vld [vmem:[#allocation2 + $0xf3] sm:$0xff] }
 0x403   : > { %14895 = vmatmul.mubr.bf16.gmra.mrb[120].mxu0 %v3826_v50  ;;  %v3806_v50 = vld [vmem:[#allocation2 + $0x113] sm:$0xff]  ;;  %v3828_v56 = vpack.c.bf16 %v3804_v46, %v3803_v51  ;;  %v19391_v59 = vpop.permute.xlu1 %9593 }
 0x404   : > { %14898 = vmatprep.mubr.bf16.mxu0 %v3827_v26  ;;  %14927 = vmatpush3.bf16.msra.mxu0 %v16784_v38  ;;  %v3805_v38 = vld [vmem:[#allocation2 + $0x103] sm:$0xff]  ;;  %v16787_v26 = vld [vmem:[#allocation9 + $0x138] sm:$0xff]   ;;  %21538 = vst [vmem:[#allocation105_spill] sm:$0xff] %v19391_v59  ;;  %v11548_v51 = vld [vmem:[%s21456_s18 + $0x290] sm:$0xff] }
 0x405   : > { %14928 = vmatprep.subr.bf16.mxu0 %v16785_v17  ;;  %11970 = vperm.xlu0 %16640, %v11544_v43   ;;  %v19395_v43 = vld [vmem:[#allocation9 + $0x140] sm:$0xff]   ;;  %v3808_v46 = vld [vmem:[#allocation2 + $0x133] sm:$0xff]  ;;  %v11507_v59 = vld [vmem:[%s21456_s18 + $0x148] sm:$0xff] }
 0x406   : > { %11685 = vperm.xlu1 %16641, %v11487_v2   ;;  %v3829_v2 = vpack.c.bf16 %v3806_v50, %v3805_v38  ;;  %v3810_v50 = vld [vmem:[#allocation2 + $0x153] sm:$0xff]  ;;  %v3809_v38 = vld [vmem:[#allocation2 + $0x143] sm:$0xff] }
 0x408   : > { %14929 = vmatpush3.bf16.msra.mxu0 %v16785_v17  ;;  %v19393_v17 = vpop.permute.xlu0 %9778 }
 0x409   : > { %14930 = vmatprep.subr.bf16.mxu0 %v16786_v20  ;;  %21539 = vst [vmem:[#allocation106_spill] sm:$0xff] %v19393_v17  ;;  %11980 = vperm.xlu0 %16640, %v11546_v37   ;;  %v19404_v37 = vpop.permute.xlu1 %9603 }
 0x40a   : > { %11695 = vperm.xlu1 %16641, %v11489_v32   ;;  %v11493_v32 = vld [vmem:[%s21456_s18 + $0xd8] sm:$0xff]  ;;  %21540 = vst [vmem:[#allocation107_spill] sm:$0xff] %v19404_v37  ;;  %v11499_v37 = vld [vmem:[%s21456_s18 + $0x108] sm:$0xff] }
 0x40b   : > { %14899 = vmatmul.mubr.bf16.gmra.mrb[124].mxu0 %v3828_v56  ;;  %v3807_v56 = vld [vmem:[#allocation2 + $0x123] sm:$0xff] }
 0x40c   : > { %14902 = vmatprep.mubr.bf16.mxu0 %v3829_v2  ;;  %14931 = vmatpush3.bf16.msra.mxu0 %v16786_v20  ;;  %v3830_v20 = vpack.c.bf16 %v3808_v46, %v3807_v56  ;;  %v11550_v2 = vld [vmem:[%s21456_s18 + $0x2a0] sm:$0xff]  ;;  %v19409_v17 = vpop.permute.xlu0 %9788  ;;  %v3812_v46 = vld [vmem:[#allocation2 + $0x173] sm:$0xff] }
 0x40d   : > { %14932 = vmatprep.subr.bf16.mxu0 %v16787_v26  ;;  %11990 = vperm.xlu0 %16640, %v11548_v51   ;;  %21541 = vst [vmem:[#allocation108_spill] sm:$0xff] %v19409_v17  ;;  %v11552_v51 = vld [vmem:[%s21456_s18 + $0x2b0] sm:$0xff]  ;;  %v19420_v56 = vpop.permute.xlu1 %9613 }
 0x40e   : > { %11705 = vperm.xlu1 %16641, %v11491_v28   ;;  %v3831_v28 = vpack.c.bf16 %v3810_v50, %v3809_v38  ;;  %v3814_v50 = vld [vmem:[#allocation2 + $0x193] sm:$0xff]  ;;  %21542 = vst [vmem:[#allocation109_spill] sm:$0xff] %v19420_v56 }
 0x410   : > { %14933 = vmatpush3.bf16.msra.mxu0 %v16787_v26  ;;  %v11495_v26 = vld [vmem:[%s21456_s18 + $0xe8] sm:$0xff]  ;;  %v19422_v38 = vpop.permute.xlu0 %9798 }
 0x411   : > { %14966 = vmatprep.subr.bf16.mxu0 %v19395_v43  ;;  %12000 = vperm.xlu0 %16640, %v11550_v2   ;;  %21543 = vst [vmem:[#allocation110_spill] sm:$0xff] %v19422_v38  ;;  %v19430_v56 = vpop.permute.xlu1 %9623  ;;  %v11503_v38 = vld [vmem:[%s21456_s18 + $0x128] sm:$0xff] }
 0x412   : > { %11715 = vperm.xlu1 %16641, %v11493_v32   ;;  %v11497_v32 = vld [vmem:[%s21456_s18 + $0xf8] sm:$0xff]  ;;  %21544 = vst [vmem:[#allocation111_spill] sm:$0xff] %v19430_v56 }
 0x413   : > { %14903 = vmatmul.mubr.bf16.gmra.mrb[128].mxu0 %v3830_v20  ;;  %v3811_v20 = vld [vmem:[#allocation2 + $0x163] sm:$0xff] }
 0x414   : > { %14906 = vmatprep.mubr.bf16.mxu0 %v3831_v28  ;;  %v3832_v17 = vpack.c.bf16 %v3812_v46, %v3811_v20  ;;  %v3813_v28 = vld [vmem:[#allocation2 + $0x183] sm:$0xff]  ;;  %v3816_v46 = vld [vmem:[#allocation2 + $0x1b3] sm:$0xff] }
 0x415   : > { %12010 = vperm.xlu0 %16640, %v11552_v51   ;;  %v3833_v2 = vpack.c.bf16 %v3814_v50, %v3813_v28  ;;  %v11556_v51 = vld [vmem:[%s21456_s18 + $0x2d0] sm:$0xff]  ;;  %v3815_v20 = vld [vmem:[#allocation2 + $0x1a3] sm:$0xff] }
 0x416   : > { %11725 = vperm.xlu1 %16641, %v11495_v26   ;;  %v11554_v26 = vld [vmem:[%s21456_s18 + $0x2c0] sm:$0xff]  ;;  %v3818_v50 = vld [vmem:[#allocation2 + $0x1d3] sm:$0xff]  ;;  %v3834_v28 = vpack.c.bf16 %v3816_v46, %v3815_v20 }
 0x417   : > { %v3820_v46 = vld [vmem:[#allocation2 + $0x1f3] sm:$0xff] }
 0x418   : > { %v4096_v20 = vld [vmem:[#allocation2 + $0x14] sm:$0xff] }
 0x419   : > { %12020 = vperm.xlu0 %16640, %v11554_v26  }
 0x41a   : > { %11735 = vperm.xlu1 %16641, %v11497_v32   ;;  %v19435_v32 = vpop.permute.xlu0 %9808 }
 0x41b   : > { %14907 = vmatmul.mubr.bf16.gmra.mrb[132].mxu0 %v3832_v17  ;;  %21545 = vst [vmem:[#allocation112_spill] sm:$0xff] %v19435_v32  ;;  %v11501_v17 = vld [vmem:[%s21456_s18 + $0x118] sm:$0xff]  ;;  %v19446_v32 = vpop.permute.xlu1 %9633 }
 0x41c   : > { %14910 = vmatprep.mubr.bf16.mxu0 %v3833_v2  ;;  %v3817_v2 = vld [vmem:[#allocation2 + $0x1c3] sm:$0xff]  ;;  %21546 = vst [vmem:[#allocation113_spill] sm:$0xff] %v19446_v32 }
 0x41d   : > { %12030 = vperm.xlu0 %16640, %v11556_v51   ;;  %v3835_v26 = vpack.c.bf16 %v3818_v50, %v3817_v2  ;;  %v11560_v51 = vld [vmem:[%s21456_s18 + $0x2f0] sm:$0xff]  ;;  %v4095_v50 = vld [vmem:[#allocation2 + $0x4] sm:$0xff] }
 0x41e   : > { %11745 = vperm.xlu1 %16641, %v11499_v37   ;;  %v11558_v37 = vld [vmem:[%s21456_s18 + $0x2e0] sm:$0xff]  ;;  %v19448_v56 = vpop.permute.xlu0 %11580 }
 0x41f   : > { %21547 = vst [vmem:[#allocation114_spill] sm:$0xff] %v19448_v56  ;;  %v19456_v32 = vpop.permute.xlu1 %9643 }
 0x420   : > { %21548 = vst [vmem:[#allocation115_spill] sm:$0xff] %v19456_v32 }
 0x421   : > { %12040 = vperm.xlu0 %16640, %v11558_v37  }
 0x422   : > { %11755 = vperm.xlu1 %16641, %v11501_v17   ;;  %v11505_v17 = vld [vmem:[%s21456_s18 + $0x138] sm:$0xff]  ;;  %v19461_v37 = vpop.permute.xlu0 %11590 }
 0x423   : > { %14911 = vmatmul.mubr.bf16.gmra.mrb[136].mxu0 %v3834_v28  ;;  %v3819_v28 = vld [vmem:[#allocation2 + $0x1e3] sm:$0xff]  ;;  %21549 = vst [vmem:[#allocation116_spill] sm:$0xff] %v19461_v37 }
 0x424   : > { %14914 = vmatprep.mubr.bf16.mxu0 %v3835_v26  ;;  %v3836_v2 = vpack.c.bf16 %v3820_v46, %v3819_v28  ;;  %v4127_v26 = vpack.c.bf16 %v4096_v20, %v4095_v50  ;;  %v4097_v46 = vld [vmem:[#allocation2 + $0x24] sm:$0xff]  ;;  %v11509_v50 = vld [vmem:[%s21456_s18 + $0x158] sm:$0xff] }
 0x425   : > { %12050 = vperm.xlu0 %16640, %v11560_v51   ;;  %v11564_v51 = vld [vmem:[%s21456_s18 + $0x310] sm:$0xff]  ;;  %v4099_v20 = vld [vmem:[#allocation2 + $0x44] sm:$0xff] }
 0x426   : > { %11765 = vperm.xlu1 %16641, %v11503_v38   ;;  %v11562_v38 = vld [vmem:[%s21456_s18 + $0x300] sm:$0xff]  ;;  %v4100_v28 = vld [vmem:[#allocation2 + $0x54] sm:$0xff]  ;;  %v19474_v32 = vpop.permute.xlu0 %11600 }
 0x427   : > { %21551 = vst [vmem:[#allocation118_spill] sm:$0xff] %v19474_v32 }
 0x429   : > { %12060 = vperm.xlu0 %16640, %v11562_v38   ;;  %v16789_v38 = vld [vmem:[#allocation9 + $0x148] sm:$0xff]  }
 0x42a   : > { %11775 = vperm.xlu1 %16641, %v11505_v17   ;;  %v4098_v17 = vld [vmem:[#allocation2 + $0x34] sm:$0xff] }
 0x42b   : > { %14915 = vmatmul.mubr.bf16.gmra.mrb[140].mxu0 %v3836_v2  ;;  %v19472_v2 = vpop.permute.xlu1 %9653 }
 0x42c   : > { %14934 = vmatprep.mubr.bf16.mxu0 %v4127_v26  ;;  %21550 = vst [vmem:[#allocation117_spill] sm:$0xff] %v19472_v2  ;;  %v4128_v26 = vpack.c.bf16 %v4098_v17, %v4097_v46  ;;  %v16790_v2 = vld [vmem:[#allocation9 + $0x150] sm:$0xff]   ;;  %v4101_v17 = vld [vmem:[#allocation2 + $0x64] sm:$0xff] }
 0x42d   : > { %12070 = vperm.xlu0 %16640, %v11564_v51   ;;  %v11568_v46 = vld [vmem:[%s21456_s18 + $0x330] sm:$0xff] }
 0x42e   : > { %11785 = vperm.xlu1 %16641, %v11507_v59   ;;  %v4129_v59 = vpack.c.bf16 %v4100_v28, %v4099_v20  ;;  %v19488_v20 = vpop.permute.xlu0 %11610  ;;  %v11513_v28 = vld [vmem:[%s21456_s18 + $0x178] sm:$0xff] }
 0x42f   : > { %v19483_v51 = vpop.permute.xlu1 %9663  ;;  %21553 = vst [vmem:[#allocation120_spill] sm:$0xff] %v19488_v20 }
 0x430   : > { %21552 = vst [vmem:[#allocation119_spill] sm:$0xff] %v19483_v51  ;;  %v11570_v51 = vld [vmem:[%s21456_s18 + $0x340] sm:$0xff] }
 0x431   : > { %12080 = vperm.xlu0 %16640, %v11566_v62  }
 0x432   : > { %11795 = vperm.xlu1 %16641, %v11509_v50   ;;  %v4102_v50 = vld [vmem:[#allocation2 + $0x74] sm:$0xff] }
 0x433   : > { %14935 = vmatmul.mubr.bf16.vlgmr.msra.gmra.mrb[112].mxu0 %v4128_v26  ;;  %v4103_v26 = vld [vmem:[#allocation2 + $0x84] sm:$0xff]  ;;  %v4130_v62 = vpack.c.bf16 %v4102_v50, %v4101_v17  ;;  %v19499_v34 = vpop.permute.xlu1 %9673  ;;  %v11572_v17 = vld [vmem:[%s21456_s18 + $0x350] sm:$0xff] }
 0x434   : > { %14938 = vmatprep.mubr.bf16.mxu0 %v4129_v59  ;;  %14967 = vmatpush3.bf16.msra.mxu0 %v19395_v43  ;;  %v4104_v43 = vld [vmem:[#allocation2 + $0x94] sm:$0xff]  ;;  %21554 = vst [vmem:[#allocation121_spill] sm:$0xff] %v19499_v34  ;;  %v4105_v50 = vld [vmem:[#allocation2 + $0xa4] sm:$0xff] }
 0x435   : > { %14968 = vmatprep.subr.bf16.mxu0 %v16789_v38  ;;  %12090 = vperm.xlu0 %16640, %v11568_v46   ;;  %v16791_v59 = vld [vmem:[#allocation9 + $0x158] sm:$0xff]   ;;  %v16792_v46 = vld [vmem:[#allocation9 + $0x160] sm:$0xff]  }
 0x436   : > { %11805 = vperm.xlu1 %16641, %v11511_v24   ;;  %v4131_v24 = vpack.c.bf16 %v4104_v43, %v4103_v26  ;;  %v11517_v26 = vld [vmem:[%s21456_s18 + $0x198] sm:$0xff]  ;;  %v4107_v43 = vld [vmem:[#allocation2 + $0xc4] sm:$0xff] }
 0x437   : > { %v11574_v34 = vld [vmem:[%s21456_s18 + $0x360] sm:$0xff] }
 0x438   : > { %14969 = vmatpush3.bf16.msra.mxu0 %v16789_v38  ;;  %v19501_v38 = vpop.permute.xlu0 %11620 }
 0x439   : > { %14970 = vmatprep.subr.bf16.mxu0 %v16790_v2  ;;  %21555 = vst [vmem:[#allocation122_spill] sm:$0xff] %v19501_v38  ;;  %12100 = vperm.xlu0 %16640, %v11570_v51   ;;  %v16793_v51 = vld [vmem:[#allocation9 + $0x168] sm:$0xff]   ;;  %v4720_v38 = vld [vmem:[#allocation2 + $0xd6] sm:$0xff] }
 0x43a   : > { %11815 = vperm.xlu1 %16641, %v11513_v28   ;;  %v4106_v28 = vld [vmem:[#allocation2 + $0xb4] sm:$0xff] }
 0x43b   : > { %14939 = vmatmul.mubr.bf16.gmra.mrb[116].mxu0 %v4130_v62  ;;  %v4108_v62 = vld [vmem:[#allocation2 + $0xd4] sm:$0xff] }
 0x43c   : > { %14942 = vmatprep.mubr.bf16.mxu0 %v4131_v24  ;;  %14971 = vmatpush3.bf16.msra.mxu0 %v16790_v2  ;;  %v4132_v2 = vpack.c.bf16 %v4106_v28, %v4105_v50  ;;  %v19509_v24 = vpop.permute.xlu1 %9683  ;;  %v19514_v4 = vpop.permute.xlu0 %11630  ;;  %v4109_v50 = vld [vmem:[#allocation2 + $0xe4] sm:$0xff]  ;;  %v4110_v28 = vld [vmem:[#allocation2 + $0xf4] sm:$0xff] }
 0x43d   : > { %14972 = vmatprep.subr.bf16.mxu0 %v16791_v59  ;;  %12110 = vperm.xlu0 %16640, %v11572_v17   ;;  %21556 = vst [vmem:[#allocation123_spill] sm:$0xff] %v19509_v24  ;;  %21557 = vst [vmem:[#allocation124_spill] sm:$0xff] %v19514_v4  ;;  %v11576_v17 = vld [vmem:[%s21456_s18 + $0x370] sm:$0xff]  ;;  %v11523_v24 = vld [vmem:[%s21456_s18 + $0x1c8] sm:$0xff] }
 0x43e   : > { %11825 = vperm.xlu1 %16641, %v11515_v30   ;;  %v4133_v30 = vpack.c.bf16 %v4108_v62, %v4107_v43  ;;  %v4112_v43 = vld [vmem:[#allocation2 + $0x114] sm:$0xff] }
 0x440   : > { %14973 = vmatpush3.bf16.msra.mxu0 %v16791_v59  ;;  %v16794_v59 = vld [vmem:[#allocation9 + $0x170] sm:$0xff]   ;;  %v19525_v62 = vpop.permute.xlu1 %9693 }
 0x441   : > { %14974 = vmatprep.subr.bf16.mxu0 %v16792_v46  ;;  %12120 = vperm.xlu0 %16640, %v11574_v34   ;;  %21558 = vst [vmem:[#allocation125_spill] sm:$0xff] %v19525_v62  ;;  %v4134_v34 = vpack.c.bf16 %v4110_v28, %v4109_v50  ;;  %v11525_v50 = vld [vmem:[%s21456_s18 + $0x1d8] sm:$0xff]  ;;  %v4119_v62 = vld [vmem:[#allocation2 + $0x184] sm:$0xff] }
 0x442   : > { %11835 = vperm.xlu1 %16641, %v11517_v26   ;;  %v11521_v26 = vld [vmem:[%s21456_s18 + $0x1b8] sm:$0xff] }
 0x443   : > { %14943 = vmatmul.mubr.bf16.gmra.mrb[120].mxu0 %v4132_v2  ;;  %v19527_v2 = vpop.permute.xlu0 %11640  ;;  %v4116_v28 = vld [vmem:[#allocation2 + $0x154] sm:$0xff] }
 0x444   : > { %14946 = vmatprep.mubr.bf16.mxu0 %v4133_v30  ;;  %14975 = vmatpush3.bf16.msra.mxu0 %v16792_v46  ;;  %21559 = vst [vmem:[#allocation126_spill] sm:$0xff] %v19527_v2  ;;  %v4111_v46 = vld [vmem:[#allocation2 + $0x104] sm:$0xff]  ;;  %v4406_v2 = vld [vmem:[#allocation2 + $0x55] sm:$0xff] }
 0x445   : > { %14976 = vmatprep.subr.bf16.mxu0 %v16793_v51  ;;  %12130 = vperm.xlu0 %16640, %v11576_v17   ;;  %v4135_v30 = vpack.c.bf16 %v4112_v43, %v4111_v46  ;;  %v4114_v17 = vld [vmem:[#allocation2 + $0x134] sm:$0xff]  ;;  %v11527_v46 = vld [vmem:[%s21456_s18 + $0x1e8] sm:$0xff] }
 0x446   : > { %11845 = vperm.xlu1 %16641, %v11519_v11   ;;  %v16795_v11 = vld [vmem:[#allocation9 + $0x178] sm:$0xff]  }
 0x448   : > { %14977 = vmatpush3.bf16.msra.mxu0 %v16793_v51  ;;  %v19534_v51 = vpop.permute.xlu1 %9703 }
 0x449   : > { %14978 = vmatprep.subr.bf16.mxu0 %v16794_v59  ;;  %21560 = vst [vmem:[#allocation127_spill] sm:$0xff] %v19534_v51 }
 0x44a   : > { %11855 = vperm.xlu1 %16641, %v11521_v26   ;;  %v4113_v26 = vld [vmem:[#allocation2 + $0x124] sm:$0xff] }
 0x44b   : > { %14947 = vmatmul.mubr.bf16.gmra.mrb[124].mxu0 %v4134_v34  ;;  %v4136_v43 = vpack.c.bf16 %v4114_v17, %v4113_v26  ;;  %v4115_v34 = vld [vmem:[#allocation2 + $0x144] sm:$0xff]  ;;  %v4120_v17 = vld [vmem:[#allocation2 + $0x194] sm:$0xff] }
 0x44c   : > { %14950 = vmatprep.mubr.bf16.mxu0 %v4135_v30  ;;  %14979 = vmatpush3.bf16.msra.mxu0 %v16794_v59  ;;  %v4137_v59 = vpack.c.bf16 %v4116_v28, %v4115_v34  ;;  %v4118_v30 = vld [vmem:[#allocation2 + $0x174] sm:$0xff]  ;;  %v4117_v26 = vld [vmem:[#allocation2 + $0x164] sm:$0xff]  ;;  %v4139_v28 = vpack.c.bf16 %v4120_v17, %v4119_v62 }
 0x44d   : > { %14980 = vmatprep.subr.bf16.mxu0 %v16795_v11  ;;  %v4138_v51 = vpack.c.bf16 %v4118_v30, %v4117_v26  ;;  %v4122_v34 = vld [vmem:[#allocation2 + $0x1b4] sm:$0xff]  ;;  %v4121_v30 = vld [vmem:[#allocation2 + $0x1a4] sm:$0xff] }
 0x44e   : > { %11865 = vperm.xlu1 %16641, %v11523_v24   ;;  %v19543_v24 = vpop.permute.xlu1 %9713  ;;  %v4140_v26 = vpack.c.bf16 %v4122_v34, %v4121_v30  ;;  %v4126_v17 = vld [vmem:[#allocation2 + $0x1f4] sm:$0xff]  ;;  %v4125_v34 = vld [vmem:[#allocation2 + $0x1e4] sm:$0xff] }
 0x44f   : > { %21561 = vst [vmem:[#allocation128_spill] sm:$0xff] %v19543_v24  ;;  %v4142_v30 = vpack.c.bf16 %v4126_v17, %v4125_v34  ;;  %v11543_v34 = vld [vmem:[%s21456_s18 + $0x268] sm:$0xff] }
 0x450   : > { %14981 = vmatpush3.bf16.msra.mxu0 %v16795_v11  ;;  %v11529_v11 = vld [vmem:[%s21456_s18 + $0x1f8] sm:$0xff] }
 0x451   : > { %15014 = vmatprep.subr.bf16.mxu0 %v19532_v52 }
 0x452   : > { %11875 = vperm.xlu1 %16641, %v11525_v50   ;;  %v19548_v50 = vpop.permute.xlu1 %9723 }
 0x453   : > { %14951 = vmatmul.mubr.bf16.gmra.mrb[128].mxu0 %v4136_v43  ;;  %21562 = vst [vmem:[#allocation129_spill] sm:$0xff] %v19548_v50  ;;  %v11531_v43 = vld [vmem:[%s21456_s18 + $0x208] sm:$0xff] }
 0x454   : > { %14954 = vmatprep.mubr.bf16.mxu0 %v4137_v59  ;;  %v11533_v59 = vld [vmem:[%s21456_s18 + $0x218] sm:$0xff]  ;;  %v4123_v50 = vld [vmem:[#allocation2 + $0x1c4] sm:$0xff] }
 0x456   : > { %11885 = vperm.xlu1 %16641, %v11527_v46   ;;  %v4124_v46 = vld [vmem:[#allocation2 + $0x1d4] sm:$0xff]  ;;  %v19556_v24 = vpop.permute.xlu1 %9733 }
 0x457   : > { %21563 = vst [vmem:[#allocation130_spill] sm:$0xff] %v19556_v24  ;;  %v4141_v62 = vpack.c.bf16 %v4124_v46, %v4123_v50  ;;  %v4402_v24 = vld [vmem:[#allocation2 + $0x15] sm:$0xff] }
 0x45a   : > { %11895 = vperm.xlu1 %16641, %v11529_v11   ;;  %v19561_v11 = vpop.permute.xlu1 %9743 }
 0x45b   : > { %14955 = vmatmul.mubr.bf16.gmra.mrb[132].mxu0 %v4138_v51  ;;  %v11535_v51 = vld [vmem:[%s21456_s18 + $0x228] sm:$0xff]  ;;  %21564 = vst [vmem:[#allocation131_spill] sm:$0xff] %v19561_v11 }
 0x45c   : > { %14958 = vmatprep.mubr.bf16.mxu0 %v4139_v28  ;;  %v11537_v28 = vld [vmem:[%s21456_s18 + $0x238] sm:$0xff]  ;;  %v4405_v11 = vld [vmem:[#allocation2 + $0x45] sm:$0xff] }
 0x45e   : > { %11905 = vperm.xlu1 %16641, %v11531_v43   ;;  %v4401_v43 = vld [vmem:[#allocation2 + $0x5] sm:$0xff]  ;;  %v19569_v46 = vpop.permute.xlu1 %9753 }
 0x45f   : > { %v4433_v50 = vpack.c.bf16 %v4402_v24, %v4401_v43  ;;  %21565 = vst [vmem:[#allocation132_spill] sm:$0xff] %v19569_v46  ;;  %v4435_v43 = vpack.c.bf16 %v4406_v2, %v4405_v11  ;;  %v4411_v46 = vld [vmem:[#allocation2 + $0xa5] sm:$0xff] }
 0x462   : > { %11915 = vperm.xlu1 %16641, %v11533_v59   ;;  %v11539_v59 = vld [vmem:[%s21456_s18 + $0x248] sm:$0xff]  ;;  %v19574_v24 = vpop.permute.xlu1 %9763 }
 0x463   : > { %14959 = vmatmul.mubr.bf16.gmra.mrb[136].mxu0 %v4140_v26  ;;  %v4403_v26 = vld [vmem:[#allocation2 + $0x25] sm:$0xff]  ;;  %21566 = vst [vmem:[#allocation133_spill] sm:$0xff] %v19574_v24 }
 0x464   : > { %14962 = vmatprep.mubr.bf16.mxu0 %v4141_v62  ;;  %v4404_v62 = vld [vmem:[#allocation2 + $0x35] sm:$0xff] }
 0x465   : > { %v4434_v17 = vpack.c.bf16 %v4404_v62, %v4403_v26  ;;  %v11545_v26 = vld [vmem:[%s21456_s18 + $0x278] sm:$0xff]  ;;  %v4409_v62 = vld [vmem:[#allocation2 + $0x85] sm:$0xff] }
 0x466   : > { %11925 = vperm.xlu1 %16641, %v11535_v51   ;;  %v11541_v51 = vld [vmem:[%s21456_s18 + $0x258] sm:$0xff]  ;;  %v19583_v2 = vpop.permute.xlu1 %9773 }
 0x467   : > { %21567 = vst [vmem:[#allocation134_spill] sm:$0xff] %v19583_v2  ;;  %v4412_v2 = vld [vmem:[#allocation2 + $0xb5] sm:$0xff] }
 0x46a   : > { %11935 = vperm.xlu1 %16641, %v11537_v28   ;;  %v16797_v28 = vld [vmem:[#allocation9 + $0x188] sm:$0xff]   ;;  %v19588_v24 = vpop.permute.xlu1 %9783 }
 0x46b   : > { %14963 = vmatmul.mubr.bf16.gmra.mrb[140].mxu0 %v4142_v30  ;;  %v16798_v30 = vld [vmem:[#allocation9 + $0x190] sm:$0xff]   ;;  %21568 = vst [vmem:[#allocation135_spill] sm:$0xff] %v19588_v24 }
 0x46c   : > { %14982 = vmatprep.mubr.bf16.mxu0 %v4433_v50  ;;  %v4407_v50 = vld [vmem:[#allocation2 + $0x65] sm:$0xff]  ;;  %v4416_v24 = vld [vmem:[#allocation2 + $0xf5] sm:$0xff] }
 0x46e   : > { %11945 = vperm.xlu1 %16641, %v11539_v59   ;;  %v4408_v59 = vld [vmem:[#allocation2 + $0x75] sm:$0xff] }
 0x46f   : > { %v4436_v11 = vpack.c.bf16 %v4408_v59, %v4407_v50  ;;  %v4413_v50 = vld [vmem:[#allocation2 + $0xc5] sm:$0xff]  ;;  %v4414_v59 = vld [vmem:[#allocation2 + $0xd5] sm:$0xff] }
 0x472   : > { %11955 = vperm.xlu1 %16641, %v11541_v51   ;;  %v4410_v51 = vld [vmem:[#allocation2 + $0x95] sm:$0xff] }
 0x473   : > { %14983 = vmatmul.mubr.bf16.vlgmr.msra.gmra.mrb[112].mxu0 %v4434_v17  ;;  %v16799_v17 = vld [vmem:[#allocation9 + $0x198] sm:$0xff]  }
 0x474   : > { %14986 = vmatprep.mubr.bf16.mxu0 %v4435_v43  ;;  %15015 = vmatpush3.bf16.msra.mxu0 %v19532_v52  ;;  %v4437_v43 = vpack.c.bf16 %v4410_v51, %v4409_v62  ;;  %v11547_v52 = vld [vmem:[%s21456_s18 + $0x288] sm:$0xff]  ;;  %v4439_v51 = vpack.c.bf16 %v4414_v59, %v4413_v50  ;;  %v16803_v50 = vld [vmem:[#allocation9 + $0x1b8] sm:$0xff]  }
 0x475   : > { %15016 = vmatprep.subr.bf16.mxu0 %v16797_v28  ;;  %v16801_v62 = vld [vmem:[#allocation9 + $0x1a8] sm:$0xff]  }
 0x476   : > { %11965 = vperm.xlu1 %16641, %v11543_v34   ;;  %v16800_v34 = vld [vmem:[#allocation9 + $0x1a0] sm:$0xff]  }
 0x478   : > { %15017 = vmatpush3.bf16.msra.mxu0 %v16797_v28  ;;  %v11549_v28 = vld [vmem:[%s21456_s18 + $0x298] sm:$0xff] }
 0x479   : > { %15018 = vmatprep.subr.bf16.mxu0 %v16798_v30 }
 0x47a   : > { %11975 = vperm.xlu1 %16641, %v11545_v26   ;;  %v4438_v26 = vpack.c.bf16 %v4412_v2, %v4411_v46  ;;  %v11553_v46 = vld [vmem:[%s21456_s18 + $0x2b8] sm:$0xff] }
 0x47b   : > { %14987 = vmatmul.mubr.bf16.gmra.mrb[116].mxu0 %v4436_v11  ;;  %v19596_v11 = vpop.permute.xlu1 %9793  ;;  %v4418_v2 = vld [vmem:[#allocation2 + $0x115] sm:$0xff] }
 0x47c   : > { %14990 = vmatprep.mubr.bf16.mxu0 %v4437_v43  ;;  %15019 = vmatpush3.bf16.msra.mxu0 %v16798_v30  ;;  %v11551_v30 = vld [vmem:[%s21456_s18 + $0x2a8] sm:$0xff]  ;;  %21569 = vst [vmem:[#allocation136_spill] sm:$0xff] %v19596_v11  ;;  %v16802_v43 = vld [vmem:[#allocation9 + $0x1b0] sm:$0xff]  }
 0x47d   : > { %15020 = vmatprep.subr.bf16.mxu0 %v16799_v17  ;;  %v4708_v11 = vld [vmem:[#allocation2 + $0x16] sm:$0xff] }
 0x47e   : > { %11985 = vperm.xlu1 %16641, %v11547_v52   ;;  %v4415_v52 = vld [vmem:[#allocation2 + $0xe5] sm:$0xff] }
 0x47f   : > { %v19601_v59 = vpop.permute.xlu1 %9803 }
 0x480   : > { %15021 = vmatpush3.bf16.msra.mxu0 %v16799_v17  ;;  %v4440_v17 = vpack.c.bf16 %v4416_v24, %v4415_v52  ;;  %21570 = vst [vmem:[#allocation137_spill] sm:$0xff] %v19601_v59  ;;  %v11557_v24 = vld [vmem:[%s21456_s18 + $0x2d8] sm:$0xff]  ;;  %v4419_v52 = vld [vmem:[#allocation2 + $0x125] sm:$0xff] }
 0x481   : > { %15022 = vmatprep.subr.bf16.mxu0 %v16800_v34  ;;  %v4426_v59 = vld [vmem:[#allocation2 + $0x195] sm:$0xff] }
 0x482   : > { %11995 = vperm.xlu1 %16641, %v11549_v28   ;;  %v4417_v28 = vld [vmem:[#allocation2 + $0x105] sm:$0xff] }
 0x483   : > { %14991 = vmatmul.mubr.bf16.gmra.mrb[120].mxu0 %v4438_v26  ;;  %v4441_v26 = vpack.c.bf16 %v4418_v2, %v4417_v28  ;;  %v4421_v2 = vld [vmem:[#allocation2 + $0x145] sm:$0xff] }
 0x484   : > { %14994 = vmatprep.mubr.bf16.mxu0 %v4439_v51  ;;  %15023 = vmatpush3.bf16.msra.mxu0 %v16800_v34  ;;  %v11555_v34 = vld [vmem:[%s21456_s18 + $0x2c8] sm:$0xff]  ;;  %v4420_v51 = vld [vmem:[#allocation2 + $0x135] sm:$0xff] }
 0x485   : > { %15024 = vmatprep.subr.bf16.mxu0 %v16801_v62 }
 0x486   : > { %12005 = vperm.xlu1 %16641, %v11551_v30   ;;  %v19609_v30 = vpop.permute.xlu1 %9813 }
 0x487   : > { %21571 = vst [vmem:[#allocation138_spill] sm:$0xff] %v19609_v30  ;;  %v4427_v30 = vld [vmem:[#allocation2 + $0x1a5] sm:$0xff] }
 0x488   : > { %15025 = vmatpush3.bf16.msra.mxu0 %v16801_v62  ;;  %v4422_v62 = vld [vmem:[#allocation2 + $0x155] sm:$0xff] }
 0x489   : > { %15026 = vmatprep.subr.bf16.mxu0 %v16802_v43 }
 0x48a   : > { %12015 = vperm.xlu1 %16641, %v11553_v46   ;;  %v4442_v46 = vpack.c.bf16 %v4420_v51, %v4419_v52  ;;  %v19614_v28 = vpop.permute.xlu1 %11585  ;;  %v4425_v52 = vld [vmem:[#allocation2 + $0x185] sm:$0xff] }
 0x48b   : > { %14995 = vmatmul.mubr.bf16.gmra.mrb[124].mxu0 %v4440_v17  ;;  %v4443_v17 = vpack.c.bf16 %v4422_v62, %v4421_v2  ;;  %21572 = vst [vmem:[#allocation139_spill] sm:$0xff] %v19614_v28  ;;  %v11563_v62 = vld [vmem:[%s21456_s18 + $0x308] sm:$0xff]  ;;  %v4428_v2 = vld [vmem:[#allocation2 + $0x1b5] sm:$0xff] }
 0x48c   : > { %14998 = vmatprep.mubr.bf16.mxu0 %v4441_v26  ;;  %15027 = vmatpush3.bf16.msra.mxu0 %v16802_v43  ;;  %v11559_v43 = vld [vmem:[%s21456_s18 + $0x2e8] sm:$0xff]  ;;  %v4424_v26 = vld [vmem:[#allocation2 + $0x175] sm:$0xff] }
 0x48d   : > { %15028 = vmatprep.subr.bf16.mxu0 %v16803_v50 }
 0x48e   : > { %12025 = vperm.xlu1 %16641, %v11555_v34   ;;  %v11561_v34 = vld [vmem:[%s21456_s18 + $0x2f8] sm:$0xff] }
 0x490   : > { %15029 = vmatpush3.bf16.msra.mxu0 %v16803_v50  ;;  %v4423_v50 = vld [vmem:[#allocation2 + $0x165] sm:$0xff] }
 0x491   : > { %v4444_v51 = vpack.c.bf16 %v4424_v26, %v4423_v50  ;;  %v4446_v26 = vpack.c.bf16 %v4428_v2, %v4427_v30  ;;  %v4429_v50 = vld [vmem:[#allocation2 + $0x1c5] sm:$0xff] }
 0x492   : > { %12035 = vperm.xlu1 %16641, %v11557_v24   ;;  %v4445_v24 = vpack.c.bf16 %v4426_v59, %v4425_v52  ;;  %v4432_v52 = vld [vmem:[#allocation2 + $0x1f5] sm:$0xff]  ;;  %v4431_v2 = vld [vmem:[#allocation2 + $0x1e5] sm:$0xff] }
 0x493   : > { %14999 = vmatmul.mubr.bf16.gmra.mrb[128].mxu0 %v4442_v46  ;;  %v19622_v46 = vpop.permute.xlu1 %11595  ;;  %v4448_v54 = vpack.c.bf16 %v4432_v52, %v4431_v2  ;;  %v4714_v2 = vld [vmem:[#allocation2 + $0x76] sm:$0xff] }
 0x494   : > { %15002 = vmatprep.mubr.bf16.mxu0 %v4443_v17  ;;  %21573 = vst [vmem:[#allocation140_spill] sm:$0xff] %v19622_v46  ;;  %v11565_v17 = vld [vmem:[%s21456_s18 + $0x318] sm:$0xff] }
 0x496   : > { %12045 = vperm.xlu1 %16641, %v11559_v43   ;;  %v4430_v43 = vld [vmem:[#allocation2 + $0x1d5] sm:$0xff] }
 0x497   : > { %v4447_v59 = vpack.c.bf16 %v4430_v43, %v4429_v50  ;;  %v11571_v43 = vld [vmem:[%s21456_s18 + $0x348] sm:$0xff] }
 0x498   : > { %v4709_v50 = vld [vmem:[#allocation2 + $0x26] sm:$0xff] }
 0x49a   : > { %12055 = vperm.xlu1 %16641, %v11561_v34   ;;  %v19627_v34 = vpop.permute.xlu1 %11605 }
 0x49b   : > { %15003 = vmatmul.mubr.bf16.gmra.mrb[132].mxu0 %v4444_v51  ;;  %21574 = vst [vmem:[#allocation141_spill] sm:$0xff] %v19627_v34  ;;  %v11567_v51 = vld [vmem:[%s21456_s18 + $0x328] sm:$0xff] }
 0x49c   : > { %15006 = vmatprep.mubr.bf16.mxu0 %v4445_v24  ;;  %v11569_v24 = vld [vmem:[%s21456_s18 + $0x338] sm:$0xff] }
 0x49e   : > { %12065 = vperm.xlu1 %16641, %v11563_v62   ;;  %v4707_v62 = vld [vmem:[#allocation2 + $0x6] sm:$0xff]  ;;  %v19635_v30 = vpop.permute.xlu1 %11615 }
 0x49f   : > { %21575 = vst [vmem:[#allocation142_spill] sm:$0xff] %v19635_v30 }
 0x4a2   : > { %12075 = vperm.xlu1 %16641, %v11565_v17   ;;  %v4739_v17 = vpack.c.bf16 %v4708_v11, %v4707_v62  ;;  %v4741_v11 = vpack.c.bf16 %v4712_v25, %v4711_v49  ;;  %v4713_v62 = vld [vmem:[#allocation2 + $0x66] sm:$0xff] }
 0x4a3   : > { %15007 = vmatmul.mubr.bf16.gmra.mrb[136].mxu0 %v4446_v26  ;;  %v19640_v26 = vpop.permute.xlu1 %11625  ;;  %v16805_v49 = vld [vmem:[#allocation12 + $0x48] sm:$0xff]  }
 0x4a4   : > { %15010 = vmatprep.mubr.bf16.mxu0 %v4447_v59  ;;  %21576 = vst [vmem:[#allocation143_spill] sm:$0xff] %v19640_v26  ;;  %v4710_v59 = vld [vmem:[#allocation2 + $0x36] sm:$0xff] }
 0x4a5   : > { %v4740_v52 = vpack.c.bf16 %v4710_v59, %v4709_v50  ;;  %v4716_v26 = vld [vmem:[#allocation2 + $0x96] sm:$0xff]  ;;  %v4742_v50 = vpack.c.bf16 %v4714_v2, %v4713_v62  ;;  %v16804_v59 = vld [vmem:[#allocation12 + $0x40] sm:$0xff]  }
 0x4a6   : > { %12085 = vperm.xlu1 %16641, %v11567_v51   ;;  %v11573_v51 = vld [vmem:[%s21456_s18 + $0x358] sm:$0xff]  ;;  %15062 = vmatprep.subr.bf16.mxu1 %v16804_v59 }
 0x4a7   : > { %15063 = vmatpush3.bf16.msra.mxu1 %v16804_v59  ;;  %v16807_v62 = vld [vmem:[#allocation12 + $0x58] sm:$0xff]  }
 0x4a8   : > { %15064 = vmatprep.subr.bf16.mxu1 %v16805_v49 }
 0x4aa   : > { %12095 = vperm.xlu1 %16641, %v11569_v24   ;;  %v19648_v24 = vpop.permute.xlu1 %11635 }
 0x4ab   : > { %15011 = vmatmul.mubr.bf16.gmra.mrb[140].mxu0 %v4448_v54  ;;  %v11575_v54 = vld [vmem:[%s21456_s18 + $0x368] sm:$0xff]  ;;  %21577 = vst [vmem:[#allocation144_spill] sm:$0xff] %v19648_v24  ;;  %15065 = vmatpush3.bf16.msra.mxu1 %v16805_v49  ;;  %v16810_v49 = vld [vmem:[#allocation12 + $0x70] sm:$0xff]  }
 0x4ac   : > { %15030 = vmatprep.mubr.bf16.mxu0 %v4739_v17  ;;  %v11577_v17 = vld [vmem:[%s21456_s18 + $0x378] sm:$0xff]  ;;  %v4719_v24 = vld [vmem:[#allocation2 + $0xc6] sm:$0xff] }
 0x4ad   : > { %v4745_v2 = vpack.c.bf16 %v4720_v38, %v4719_v24  ;;  %v4726_v38 = vld [vmem:[#allocation2 + $0x136] sm:$0xff]  ;;  %v4725_v24 = vld [vmem:[#allocation2 + $0x126] sm:$0xff] }
 0x4ae   : > { %12105 = vperm.xlu1 %16641, %v11571_v43   ;;  %v4715_v43 = vld [vmem:[#allocation2 + $0x86] sm:$0xff]  ;;  %v19653_v25 = vpop.permute.xlu1 %11645 }
 0x4af   : > { %21578 = vst [vmem:[#allocation145_spill] sm:$0xff] %v19653_v25  ;;  %v16809_v25 = vld [vmem:[#allocation12 + $0x68] sm:$0xff]  }
 0x4b2   : > { %12115 = vperm.xlu1 %16641, %v11573_v51   ;;  %v4743_v51 = vpack.c.bf16 %v4716_v26, %v4715_v43  ;;  %v16808_v26 = vld [vmem:[#allocation12 + $0x60] sm:$0xff]   ;;  %v4722_v43 = vld [vmem:[#allocation2 + $0xf6] sm:$0xff] }
 0x4b3   : > { %15031 = vmatmul.mubr.bf16.vlgmr.msra.gmra.mrb[112].mxu0 %v4740_v52  ;;  %v16806_v52 = vld [vmem:[#allocation12 + $0x50] sm:$0xff]  }
 0x4b4   : > { %15034 = vmatprep.mubr.bf16.mxu0 %v4741_v11  ;;  %v4717_v11 = vld [vmem:[#allocation2 + $0xa6] sm:$0xff]  ;;  %15066 = vmatprep.subr.bf16.mxu1 %v16806_v52 }
 0x4b5   : > { %15067 = vmatpush3.bf16.msra.mxu1 %v16806_v52  ;;  %v4748_v52 = vpack.c.bf16 %v4726_v38, %v4725_v24  ;;  %v4737_v24 = vld [vmem:[#allocation2 + $0x1e6] sm:$0xff] }
 0x4b6   : > { %12125 = vperm.xlu1 %16641, %v11575_v54   ;;  %v4718_v54 = vld [vmem:[#allocation2 + $0xb6] sm:$0xff]  ;;  %15068 = vmatprep.subr.bf16.mxu1 %v16807_v62 }
 0x4b7   : > { %v4744_v14 = vpack.c.bf16 %v4718_v54, %v4717_v11  ;;  %v4727_v11 = vld [vmem:[#allocation2 + $0x146] sm:$0xff] }
 0x4b9   : > { %15069 = vmatpush3.bf16.msra.mxu1 %v16807_v62  ;;  %v4730_v62 = vld [vmem:[#allocation2 + $0x176] sm:$0xff] }
 0x4ba   : > { %12135 = vperm.xlu1 %16641, %v11577_v17   ;;  %v4721_v17 = vld [vmem:[#allocation2 + $0xe6] sm:$0xff]  ;;  %15070 = vmatprep.subr.bf16.mxu1 %v16808_v26 }
 0x4bb   : > { %15035 = vmatmul.mubr.bf16.gmra.mrb[116].mxu0 %v4742_v50  ;;  %v4724_v50 = vld [vmem:[#allocation2 + $0x116] sm:$0xff]  ;;  %v4746_v59 = vpack.c.bf16 %v4722_v43, %v4721_v17  ;;  %v4729_v17 = vld [vmem:[#allocation2 + $0x166] sm:$0xff] }
 0x4bc   : > { %15038 = vmatprep.mubr.bf16.mxu0 %v4743_v51  ;;  %v4723_v51 = vld [vmem:[#allocation2 + $0x106] sm:$0xff]  ;;  %v4750_v43 = vpack.c.bf16 %v4730_v62, %v4729_v17  ;;  %v19656_v62 = vld [vmem:[#allocation10] ss:$0 sm:$0xff] }
 0x4bd   : > { %v4747_v4 = vpack.c.bf16 %v4724_v50, %v4723_v51  ;;  %15071 = vmatpush3.bf16.msra.mxu1 %v16808_v26  ;;  %v4731_v50 = vld [vmem:[#allocation2 + $0x186] sm:$0xff]  ;;  %v4734_v26 = vld [vmem:[#allocation2 + $0x1b6] sm:$0xff] }
 0x4be   : > { %15072 = vmatprep.subr.bf16.mxu1 %v16809_v25  ;;  %v4733_v51 = vld [vmem:[#allocation2 + $0x1a6] sm:$0xff] }
 0x4bf   : > { %v4752_v57 = vpack.c.bf16 %v4734_v26, %v4733_v51 }
 0x4c1   : > { %15073 = vmatpush3.bf16.msra.mxu1 %v16809_v25  ;;  %v4735_v25 = vld [vmem:[#allocation2 + $0x1c6] sm:$0xff] }
 0x4c2   : > { %15074 = vmatprep.subr.bf16.mxu1 %v16810_v49 }
 0x4c3   : > { %15039 = vmatmul.mubr.bf16.gmra.mrb[120].mxu0 %v4744_v14  ;;  %v4728_v14 = vld [vmem:[#allocation2 + $0x156] sm:$0xff] }
 0x4c4   : > { %15042 = vmatprep.mubr.bf16.mxu0 %v4745_v2  ;;  %v4749_v54 = vpack.c.bf16 %v4728_v14, %v4727_v11  ;;  %v4732_v2 = vld [vmem:[#allocation2 + $0x196] sm:$0xff]  ;;  %v21426_v11 = vmov 0.0|0.0  }
 0x4c5   : > { %15075 = vmatpush3.bf16.msra.mxu1 %v16810_v49  ;;  %v4738_v14 = vld [vmem:[#allocation2 + $0x1f6] sm:$0xff]  ;;  %15078 = vmatprep.mubr.bf16.mxu1 %v21426_v11 }
 0x4c6   : > { %v16811_v49 = vld [vmem:[#allocation12 + $0x78] sm:$0xff]  }
 0x4c7   : > { %15076 = vmatprep.subr.bf16.mxu1 %v16811_v49 }
 0x4c9   : > { %15077 = vmatpush3.bf16.msra.mxu1 %v16811_v49 }
 0x4cb   : > { %15043 = vmatmul.mubr.bf16.gmra.mrb[124].mxu0 %v4746_v59  ;;  %v4736_v59 = vld [vmem:[#allocation2 + $0x1d6] sm:$0xff] }
 0x4cc   : > { %15046 = vmatprep.mubr.bf16.mxu0 %v4747_v4  ;;  %v4751_v4 = vpack.c.bf16 %v4732_v2, %v4731_v50  ;;  %v4753_v38 = vpack.c.bf16 %v4736_v59, %v4735_v25 }
 0x4d3   : > { %15047 = vmatmul.mubr.bf16.gmra.mrb[128].mxu0 %v4748_v52  ;;  %v4754_v52 = vpack.c.bf16 %v4738_v14, %v4737_v24 }
 0x4d4   : > { %15050 = vmatprep.mubr.bf16.mxu0 %v4749_v54  ;;  %v16812_v54 = vld [vmem:[#allocation12] sm:$0xff]  }
 0x4d5   : > { %15110 = vmatprep.subr.bf16.mxu1 %v16812_v54 }
 0x4db   : > { %15051 = vmatmul.mubr.bf16.gmra.mrb[132].mxu0 %v4750_v43 }
 0x4dc   : > { %15054 = vmatprep.mubr.bf16.mxu0 %v4751_v4 }
 0x4e3   : > { %15055 = vmatmul.mubr.bf16.gmra.mrb[136].mxu0 %v4752_v57 }
 0x4e4   : > { %15058 = vmatprep.mubr.bf16.mxu0 %v4753_v38 }
 0x4eb   : > { %15059 = vmatmul.mubr.bf16.gmra.mrb[140].mxu0 %v4754_v52 }
 0x586   : > { %v15032_v2 = vpop.f32.mrb[112].mxu0 }
 0x587   : > { %v5022_v17 = vadd.f32 %v15032_v2, %v19656_v62  ;;  %v4854_v43 = vpop.f32.mrb[113].mxu0 }
 0x588   : > { %v19660_v57 = vadd.f32 %v19656_v62, %v4854_v43  ;;  %v15033_v50 = vpop.f32.mrb[114].mxu0  ;;  %v16813_v43 = vld [vmem:[#allocation12 + $0x8] sm:$0xff]  }
 0x589   : > { %v5023_v4 = vadd.f32 %v15033_v50, %v19656_v62  ;;  %v4857_v26 = vpop.f32.mrb[115].mxu0  ;;  %v5054_v51 = vmax.f32 %v5022_v17, 0.0 }
 0x58a   : > { %v5021_v59 = vadd.f32 %v19656_v62, %v4857_v26  ;;  %v21428_v38 = vmax.f32 %v19660_v57, 0.0 }
 0x58b   : > { %v5055_v25 = vmax.f32 %v5023_v4, 0.0 }
 0x58c   : > { %v5053_v14 = vmax.f32 %v5021_v59, 0.0 }
 0x58d   : > { %v19665_v24 = vpack.c.bf16 %v5055_v25, %v5054_v51 }
 0x58e   : > { %v19667_v52 = vpack.c.bf16 %v5054_v51, %v5053_v14  ;;  %v19671_v49 = vpack.c.bf16 %v5053_v14, %v21428_v38  ;;  %v15036_v2 = vpop.f32.mrb[116].mxu0  ;;  %v16814_v38 = vld [vmem:[#allocation12 + $0x10] sm:$0xff]  }
 0x58f   : > { %v5026_v50 = vadd.f32 %v15036_v2, %v19656_v62  ;;  %v4870_v11 = vpop.f32.mrb[117].mxu0 }
 0x590   : > { %v5024_v26 = vadd.f32 %v19656_v62, %v4870_v11  ;;  %v15037_v17 = vpop.f32.mrb[118].mxu0  ;;  %15079 = vmatmul.mubr.bf16.vlgmr.msra.gmra.mrb[112].mxu1 %v19671_v49 }
 0x591   : > { %v5027_v4 = vadd.f32 %v15037_v17, %v19656_v62  ;;  %v4873_v59 = vpop.f32.mrb[119].mxu0  ;;  %15082 = vmatprep.mubr.bf16.mxu1 %v19665_v24  ;;  %15111 = vmatpush3.bf16.msra.mxu1 %v16812_v54  ;;  %v5058_v34 = vmax.f32 %v5026_v50, 0.0  ;;  %v16815_v54 = vld [vmem:[#allocation12 + $0x18] sm:$0xff]  }
 0x592   : > { %v5056_v51 = vmax.f32 %v5024_v26, 0.0  ;;  %v5025_v14 = vadd.f32 %v19656_v62, %v4873_v59  ;;  %15112 = vmatprep.subr.bf16.mxu1 %v16813_v43 }
 0x593   : > { %v5059_v3 = vmax.f32 %v5027_v4, 0.0 }
 0x594   : > { %v19679_v2 = vpack.c.bf16 %v5056_v51, %v5055_v25  ;;  %v5057_v30 = vmax.f32 %v5025_v14, 0.0 }
 0x595   : > { %v19681_v11 = vpack.c.bf16 %v5059_v3, %v5058_v34  ;;  %15113 = vmatpush3.bf16.msra.mxu1 %v16813_v43  ;;  %v16816_v43 = vld [vmem:[#allocation12 + $0x20] sm:$0xff]  }
 0x596   : > { %v19683_v9 = vpack.c.bf16 %v5058_v34, %v5057_v30  ;;  %v19685_v17 = vpack.c.bf16 %v5057_v30, %v5056_v51  ;;  %v15040_v32 = vpop.f32.mrb[120].mxu0  ;;  %15114 = vmatprep.subr.bf16.mxu1 %v16814_v38 }
 0x597   : > { %v5030_v26 = vadd.f32 %v15040_v32, %v19656_v62  ;;  %v4886_v59 = vpop.f32.mrb[121].mxu0 }
 0x598   : > { %v5028_v58 = vadd.f32 %v19656_v62, %v4886_v59  ;;  %v15041_v50 = vpop.f32.mrb[122].mxu0  ;;  %15083 = vmatmul.mubr.bf16.gmra.mrb[116].mxu1 %v19685_v17 }
 0x599   : > { %v5031_v25 = vadd.f32 %v15041_v50, %v19656_v62  ;;  %v4889_v4 = vpop.f32.mrb[123].mxu0  ;;  %15086 = vmatprep.mubr.bf16.mxu1 %v19681_v11  ;;  %15115 = vmatpush3.bf16.msra.mxu1 %v16814_v38  ;;  %v5062_v51 = vmax.f32 %v5030_v26, 0.0  ;;  %v16817_v38 = vld [vmem:[#allocation12 + $0x28] sm:$0xff]  }
 0x59a   : > { %v5060_v34 = vmax.f32 %v5028_v58, 0.0  ;;  %v5029_v30 = vadd.f32 %v19656_v62, %v4889_v4  ;;  %15116 = vmatprep.subr.bf16.mxu1 %v16815_v54 }
 0x59b   : > { %v5063_v14 = vmax.f32 %v5031_v25, 0.0 }
 0x59c   : > { %v19693_v32 = vpack.c.bf16 %v5060_v34, %v5059_v3  ;;  %v5061_v20 = vmax.f32 %v5029_v30, 0.0 }
 0x59d   : > { %v19695_v59 = vpack.c.bf16 %v5063_v14, %v5062_v51  ;;  %15117 = vmatpush3.bf16.msra.mxu1 %v16815_v54 }
 0x59e   : > { %v19697_v45 = vpack.c.bf16 %v5062_v51, %v5061_v20  ;;  %v19699_v50 = vpack.c.bf16 %v5061_v20, %v5060_v34  ;;  %v15044_v28 = vpop.f32.mrb[124].mxu0  ;;  %15118 = vmatprep.subr.bf16.mxu1 %v16816_v43  ;;  %v16818_v34 = vld [vmem:[#allocation12 + $0x30] sm:$0xff]  }
 0x59f   : > { %v5034_v58 = vadd.f32 %v15044_v28, %v19656_v62  ;;  %v4902_v4 = vpop.f32.mrb[125].mxu0 }
 0x5a0   : > { %v5032_v44 = vadd.f32 %v19656_v62, %v4902_v4  ;;  %v15045_v26 = vpop.f32.mrb[126].mxu0  ;;  %15087 = vmatmul.mubr.bf16.gmra.mrb[120].mxu1 %v19699_v50 }
 0x5a1   : > { %v19705_v3 = vadd.f32 %v15045_v26, %v19656_v62  ;;  %v4905_v25 = vpop.f32.mrb[127].mxu0  ;;  %15090 = vmatprep.mubr.bf16.mxu1 %v19695_v59  ;;  %15119 = vmatpush3.bf16.msra.mxu1 %v16816_v43  ;;  %v5066_v30 = vmax.f32 %v5034_v58, 0.0  ;;  %v16819_v43 = vld [vmem:[#allocation12 + $0x38] sm:$0xff]  }
 0x5a2   : > { %v5064_v20 = vmax.f32 %v5032_v44, 0.0  ;;  %v5033_v54 = vadd.f32 %v19656_v62, %v4905_v25  ;;  %15120 = vmatprep.subr.bf16.mxu1 %v16817_v38 }
 0x5a3   : > { %v21429_v28 = vmax.f32 %v19705_v3, 0.0 }
 0x5a4   : > { %v19710_v51 = vpack.c.bf16 %v5064_v20, %v5063_v14  ;;  %v5065_v4 = vmax.f32 %v5033_v54, 0.0 }
 0x5a5   : > { %v19714_v46 = vpack.c.bf16 %v21429_v28, %v5066_v30  ;;  %15121 = vmatpush3.bf16.msra.mxu1 %v16817_v38  ;;  %v21579_v38 = vmov 0.0|0.0  }
 0x5a6   : > { %v19716_v26 = vpack.c.bf16 %v5065_v4, %v5064_v20  ;;  %v19718_v29 = vpack.c.bf16 %v5066_v30, %v5065_v4  ;;  %v15048_v44 = vpop.f32.mrb[128].mxu0  ;;  %15122 = vmatprep.subr.bf16.mxu1 %v16818_v34  ;;  %v19728_v30 = vld [vmem:[#allocation12 + $0x80] sm:$0xff]  }
 0x5a7   : > { %v5038_v25 = vadd.f32 %v15048_v44, %v19656_v62  ;;  %v4918_v58 = vpop.f32.mrb[129].mxu0 }
 0x5a8   : > { %v19722_v56 = vadd.f32 %v19656_v62, %v4918_v58  ;;  %v15049_v14 = vpop.f32.mrb[130].mxu0  ;;  %15091 = vmatmul.mubr.bf16.gmra.mrb[124].mxu1 %v19716_v26 }
 0x5a9   : > { %v5039_v54 = vadd.f32 %v15049_v14, %v19656_v62  ;;  %v4921_v28 = vpop.f32.mrb[131].mxu0  ;;  %15094 = vmatprep.mubr.bf16.mxu1 %v21579_v38  ;;  %15123 = vmatpush3.bf16.msra.mxu1 %v16818_v34  ;;  %v5070_v4 = vmax.f32 %v5038_v25, 0.0 }
 0x5aa   : > { %v5037_v20 = vadd.f32 %v19656_v62, %v4921_v28  ;;  %15124 = vmatprep.subr.bf16.mxu1 %v16819_v43  ;;  %v21430_v6 = vmax.f32 %v19722_v56, 0.0 }
 0x5ab   : > { %v5071_v44 = vmax.f32 %v5039_v54, 0.0 }
 0x5ac   : > { %v5069_v58 = vmax.f32 %v5037_v20, 0.0 }
 0x5ad   : > { %v19731_v37 = vpack.c.bf16 %v5071_v44, %v5070_v4  ;;  %15125 = vmatpush3.bf16.msra.mxu1 %v16819_v43 }
 0x5ae   : > { %v19733_v47 = vpack.c.bf16 %v5070_v4, %v5069_v58  ;;  %v19737_v14 = vpack.c.bf16 %v5069_v58, %v21430_v6  ;;  %v15052_v34 = vpop.f32.mrb[132].mxu0  ;;  %15158 = vmatprep.subr.bf16.mxu1 %v19728_v30 }
 0x5af   : > { %v5042_v28 = vadd.f32 %v15052_v34, %v19656_v62  ;;  %v4934_v31 = vpop.f32.mrb[133].mxu0 }
 0x5b0   : > { %v5040_v25 = vadd.f32 %v19656_v62, %v4934_v31  ;;  %v15053_v54 = vpop.f32.mrb[134].mxu0  ;;  %15095 = vmatmul.mubr.bf16.gmra.mrb[128].mxu1 %v19737_v14 }
 0x5b1   : > { %v5043_v20 = vadd.f32 %v15053_v54, %v19656_v62  ;;  %v4937_v43 = vpop.f32.mrb[135].mxu0  ;;  %15098 = vmatprep.mubr.bf16.mxu1 %v19731_v37  ;;  %v5074_v6 = vmax.f32 %v5042_v28, 0.0 }
 0x5b2   : > { %v5072_v4 = vmax.f32 %v5040_v25, 0.0  ;;  %v5041_v58 = vadd.f32 %v19656_v62, %v4937_v43 }
 0x5b3   : > { %v5075_v13 = vmax.f32 %v5043_v20, 0.0 }
 0x5b4   : > { %v19746_v55 = vpack.c.bf16 %v5072_v4, %v5071_v44  ;;  %v5073_v15 = vmax.f32 %v5041_v58, 0.0 }
 0x5b5   : > { %v19748_v34 = vpack.c.bf16 %v5075_v13, %v5074_v6 }
 0x5b6   : > { %v19750_v0 = vpack.c.bf16 %v5074_v6, %v5073_v15  ;;  %v19752_v31 = vpack.c.bf16 %v5073_v15, %v5072_v4  ;;  %v15056_v61 = vpop.f32.mrb[136].mxu0 }
 0x5b7   : > { %v5046_v54 = vadd.f32 %v15056_v61, %v19656_v62  ;;  %v4950_v27 = vpop.f32.mrb[137].mxu0 }
 0x5b8   : > { %v5044_v12 = vadd.f32 %v19656_v62, %v4950_v27  ;;  %v15057_v25 = vpop.f32.mrb[138].mxu0  ;;  %15099 = vmatmul.mubr.bf16.gmra.mrb[132].mxu1 %v19752_v31 }
 0x5b9   : > { %v5047_v28 = vadd.f32 %v15057_v25, %v19656_v62  ;;  %v4953_v44 = vpop.f32.mrb[139].mxu0  ;;  %15102 = vmatprep.mubr.bf16.mxu1 %v19748_v34  ;;  %v5078_v43 = vmax.f32 %v5046_v54, 0.0 }
 0x5ba   : > { %v5076_v20 = vmax.f32 %v5044_v12, 0.0  ;;  %v5045_v6 = vadd.f32 %v19656_v62, %v4953_v44 }
 0x5bb   : > { %v5079_v15 = vmax.f32 %v5047_v28, 0.0 }
 0x5bc   : > { %v19760_v4 = vpack.c.bf16 %v5076_v20, %v5075_v13  ;;  %v5077_v58 = vmax.f32 %v5045_v6, 0.0 }
 0x5bd   : > { %v19762_v61 = vpack.c.bf16 %v5079_v15, %v5078_v43 }
 0x5be   : > { %v19764_v19 = vpack.c.bf16 %v5078_v43, %v5077_v58  ;;  %v19766_v27 = vpack.c.bf16 %v5077_v58, %v5076_v20  ;;  %v15060_v42 = vpop.f32.mrb[140].mxu0 }
 0x5bf   : > { %v5050_v25 = vadd.f32 %v15060_v42, %v19656_v62  ;;  %v4966_v8 = vpop.f32.mrb[141].mxu0 }
 0x5c0   : > { %v5048_v22 = vadd.f32 %v19656_v62, %v4966_v8  ;;  %v15061_v12 = vpop.f32.mrb[142].mxu0  ;;  %15103 = vmatmul.mubr.bf16.gmra.mrb[136].mxu1 %v19766_v27 }
 0x5c1   : > { %v19772_v54 = vadd.f32 %v15061_v12, %v19656_v62  ;;  %v4969_v13 = vpop.f32.mrb[143].mxu0  ;;  %15106 = vmatprep.mubr.bf16.mxu1 %v19762_v61  ;;  %v5082_v20 = vmax.f32 %v5050_v25, 0.0 }
 0x5c2   : > { %v5080_v28 = vmax.f32 %v5048_v22, 0.0  ;;  %v5049_v44 = vadd.f32 %v19656_v62, %v4969_v13  ;;  %v21580_v22 = vmov 0.0   ;;  %v21581_v62 = vmax.f32 %v19660_v57, 0.0  ;;  %v16821_v13 = vld [vmem:[#allocation12 + $0x88] sm:$0xff]  }
 0x5c3   : > { %v5083_v6 = vmax.f32 %v19772_v54, 0.0  ;;  %v16825_v57 = vld [vmem:[#allocation12 + $0xa8] sm:$0xff]   ;;  %v16856_v54 = vld [vmem:[#allocation12 + $0x1a0] sm:$0xff]  }
 0x5c4   : > { %v19777_v43 = vpack.c.bf16 %v5080_v28, %v5079_v15  ;;  %v5081_v42 = vmax.f32 %v5049_v44, 0.0  ;;  %v5150_v25 = vpack.c.bf16 %v21581_v62, %v21580_v22  ;;  %v16822_v15 = vld [vmem:[#allocation12 + $0x90] sm:$0xff]   ;;  %v16824_v44 = vld [vmem:[#allocation12 + $0xa0] sm:$0xff]   ;;  %v21582_v62 = vmax.f32 %v19722_v56, 0.0 }
 0x5c5   : > { %v19781_v8 = vpack.c.bf16 %v5083_v6, %v5082_v20  ;;  %v16830_v56 = vld [vmem:[#allocation12 + $0xd0] sm:$0xff]  }
 0x5c6   : > { %v19783_v58 = vpack.c.bf16 %v5081_v42, %v5080_v28  ;;  %v19785_v12 = vpack.c.bf16 %v5082_v20, %v5081_v42  ;;  %v16823_v28 = vld [vmem:[#allocation12 + $0x98] sm:$0xff]   ;;  %v16828_v42 = vld [vmem:[#allocation12 + $0xc0] sm:$0xff]  }
 0x5c7   : > { %v16827_v20 = vld [vmem:[#allocation12 + $0xb8] sm:$0xff]  }
 0x5c8   : > { %15107 = vmatmul.mubr.bf16.gmra.mrb[140].mxu1 %v19783_v58 }
 0x5c9   : > { %15126 = vmatprep.mubr.bf16.mxu1 %v21579_v38 }
 0x5d0   : > { %15127 = vmatmul.mubr.bf16.vlgmr.msra.gmra.mrb[112].mxu1 %v5150_v25 }
 0x5d1   : > { %15130 = vmatprep.mubr.bf16.mxu1 %v19667_v52  ;;  %15159 = vmatpush3.bf16.msra.mxu1 %v19728_v30  ;;  %v16826_v30 = vld [vmem:[#allocation12 + $0xb0] sm:$0xff]  }
 0x5d2   : > { %15160 = vmatprep.subr.bf16.mxu1 %v16821_v13 }
 0x5d5   : > { %15161 = vmatpush3.bf16.msra.mxu1 %v16821_v13  ;;  %v5158_v13 = vpack.c.bf16 %v21582_v62, %v21580_v22  ;;  %v16838_v62 = vld [vmem:[#allocation12 + $0x110] sm:$0xff]  }
 0x5d6   : > { %15162 = vmatprep.subr.bf16.mxu1 %v16822_v15 }
 0x5d8   : > { %15131 = vmatmul.mubr.bf16.gmra.mrb[116].mxu1 %v19679_v2 }
 0x5d9   : > { %15134 = vmatprep.mubr.bf16.mxu1 %v19683_v9  ;;  %15163 = vmatpush3.bf16.msra.mxu1 %v16822_v15  ;;  %v16829_v15 = vld [vmem:[#allocation12 + $0xc8] sm:$0xff]  }
 0x5da   : > { %15164 = vmatprep.subr.bf16.mxu1 %v16823_v28 }
 0x5dd   : > { %15165 = vmatpush3.bf16.msra.mxu1 %v16823_v28  ;;  %v16831_v28 = vld [vmem:[#allocation12 + $0xd8] sm:$0xff]  }
 0x5de   : > { %15166 = vmatprep.subr.bf16.mxu1 %v16824_v44 }
 0x5e0   : > { %15135 = vmatmul.mubr.bf16.gmra.mrb[120].mxu1 %v19693_v32 }
 0x5e1   : > { %15138 = vmatprep.mubr.bf16.mxu1 %v19697_v45  ;;  %15167 = vmatpush3.bf16.msra.mxu1 %v16824_v44  ;;  %v16832_v44 = vld [vmem:[#allocation12 + $0xe0] sm:$0xff]  }
 0x5e2   : > { %15168 = vmatprep.subr.bf16.mxu1 %v16825_v57 }
 0x5e5   : > { %15169 = vmatpush3.bf16.msra.mxu1 %v16825_v57  ;;  %v16834_v57 = vld [vmem:[#allocation12 + $0xf0] sm:$0xff]  }
 0x5e6   : > { %15170 = vmatprep.subr.bf16.mxu1 %v16826_v30 }
 0x5e8   : > { %15139 = vmatmul.mubr.bf16.gmra.mrb[124].mxu1 %v19710_v51 }
 0x5e9   : > { %15142 = vmatprep.mubr.bf16.mxu1 %v21579_v38  ;;  %15171 = vmatpush3.bf16.msra.mxu1 %v16826_v30  ;;  %v16835_v30 = vld [vmem:[#allocation12 + $0xf8] sm:$0xff]  }
 0x5ea   : > { %15172 = vmatprep.subr.bf16.mxu1 %v16827_v20 }
 0x5ed   : > { %15173 = vmatpush3.bf16.msra.mxu1 %v16827_v20  ;;  %v16836_v20 = vld [vmem:[#allocation12 + $0x100] sm:$0xff]  }
 0x5ee   : > { %15206 = vmatprep.subr.bf16.mxu1 %v16828_v42 }
 0x5f0   : > { %15143 = vmatmul.mubr.bf16.gmra.mrb[128].mxu1 %v5158_v13 }
 0x5f1   : > { %15146 = vmatprep.mubr.bf16.mxu1 %v19733_v47 }
 0x5f8   : > { %15147 = vmatmul.mubr.bf16.gmra.mrb[132].mxu1 %v19746_v55 }
 0x5f9   : > { %15150 = vmatprep.mubr.bf16.mxu1 %v19750_v0 }
 0x600   : > { %15151 = vmatmul.mubr.bf16.gmra.mrb[136].mxu1 %v19760_v4 }
 0x601   : > { %15154 = vmatprep.mubr.bf16.mxu1 %v19764_v19 }
 0x608   : > { %15155 = vmatmul.mubr.bf16.gmra.mrb[140].mxu1 %v19777_v43 }
 0x609   : > { %15174 = vmatprep.mubr.bf16.mxu1 %v5150_v25  ;;  %v16833_v25 = vld [vmem:[#allocation12 + $0xe8] sm:$0xff]  }
 0x610   : > { %15175 = vmatmul.mubr.bf16.vlgmr.msra.gmra.mrb[112].mxu1 %v19667_v52 }
 0x611   : > { %15178 = vmatprep.mubr.bf16.mxu1 %v19679_v2  ;;  %15207 = vmatpush3.bf16.msra.mxu1 %v16828_v42  ;;  %v16837_v42 = vld [vmem:[#allocation12 + $0x108] sm:$0xff]  }
 0x612   : > { %15208 = vmatprep.subr.bf16.mxu1 %v16829_v15 }
 0x615   : > { %15209 = vmatpush3.bf16.msra.mxu1 %v16829_v15  ;;  %v16840_v15 = vld [vmem:[#allocation12 + $0x120] sm:$0xff]  }
 0x616   : > { %15210 = vmatprep.subr.bf16.mxu1 %v16830_v56 }
 0x618   : > { %15179 = vmatmul.mubr.bf16.gmra.mrb[116].mxu1 %v19683_v9 }
 0x619   : > { %15182 = vmatprep.mubr.bf16.mxu1 %v19693_v32  ;;  %15211 = vmatpush3.bf16.msra.mxu1 %v16830_v56  ;;  %v16842_v56 = vld [vmem:[#allocation12 + $0x130] sm:$0xff]  }
 0x61a   : > { %15212 = vmatprep.subr.bf16.mxu1 %v16831_v28 }
 0x61d   : > { %15213 = vmatpush3.bf16.msra.mxu1 %v16831_v28  ;;  %v16843_v28 = vld [vmem:[#allocation12 + $0x138] sm:$0xff]  }
 0x61e   : > { %15214 = vmatprep.subr.bf16.mxu1 %v16832_v44 }
 0x620   : > { %15183 = vmatmul.mubr.bf16.gmra.mrb[120].mxu1 %v19697_v45 }
 0x621   : > { %15186 = vmatprep.mubr.bf16.mxu1 %v19710_v51  ;;  %15215 = vmatpush3.bf16.msra.mxu1 %v16832_v44  ;;  %v16844_v44 = vld [vmem:[#allocation12 + $0x140] sm:$0xff]  }
 0x622   : > { %15216 = vmatprep.subr.bf16.mxu1 %v16833_v25 }
 0x625   : > { %15217 = vmatpush3.bf16.msra.mxu1 %v16833_v25  ;;  %v16846_v25 = vld [vmem:[#allocation12 + $0x150] sm:$0xff]  }
 0x626   : > { %15218 = vmatprep.subr.bf16.mxu1 %v16834_v57 }
 0x628   : > { %15187 = vmatmul.mubr.bf16.gmra.mrb[124].mxu1 %v19718_v29 }
 0x629   : > { %15190 = vmatprep.mubr.bf16.mxu1 %v5158_v13  ;;  %15219 = vmatpush3.bf16.msra.mxu1 %v16834_v57  ;;  %v16839_v13 = vld [vmem:[#allocation12 + $0x118] sm:$0xff]  }
 0x62a   : > { %15220 = vmatprep.subr.bf16.mxu1 %v16835_v30  ;;  %v16847_v57 = vld [vmem:[#allocation12 + $0x158] sm:$0xff]  }
 0x62d   : > { %15221 = vmatpush3.bf16.msra.mxu1 %v16835_v30  ;;  %v16848_v30 = vld [vmem:[#allocation12 + $0x160] sm:$0xff]  }
 0x62e   : > { %15254 = vmatprep.subr.bf16.mxu1 %v16836_v20 }
 0x630   : > { %15191 = vmatmul.mubr.bf16.gmra.mrb[128].mxu1 %v19733_v47 }
 0x631   : > { %15194 = vmatprep.mubr.bf16.mxu1 %v19746_v55 }
 0x638   : > { %15195 = vmatmul.mubr.bf16.gmra.mrb[132].mxu1 %v19750_v0 }
 0x639   : > { %15198 = vmatprep.mubr.bf16.mxu1 %v19760_v4 }
 0x640   : > { %15199 = vmatmul.mubr.bf16.gmra.mrb[136].mxu1 %v19764_v19 }
 0x641   : > { %15202 = vmatprep.mubr.bf16.mxu1 %v19777_v43 }
 0x648   : > { %15203 = vmatmul.mubr.bf16.gmra.mrb[140].mxu1 %v19785_v12 }
 0x649   : > { %15222 = vmatprep.mubr.bf16.mxu1 %v19671_v49  ;;  %v16841_v49 = vld [vmem:[#allocation12 + $0x128] sm:$0xff]  }
 0x650   : > { %15223 = vmatmul.mubr.bf16.vlgmr.msra.gmra.mrb[112].mxu1 %v19665_v24 }
 0x651   : > { %15226 = vmatprep.mubr.bf16.mxu1 %v19685_v17  ;;  %15255 = vmatpush3.bf16.msra.mxu1 %v16836_v20  ;;  %v16850_v20 = vld [vmem:[#allocation12 + $0x170] sm:$0xff]  }
 0x652   : > { %15256 = vmatprep.subr.bf16.mxu1 %v16837_v42 }
 0x655   : > { %15257 = vmatpush3.bf16.msra.mxu1 %v16837_v42  ;;  %v21583_v42 = vmax.f32 %v19705_v3, 0.0  ;;  %v16853_v3 = vld [vmem:[#allocation12 + $0x188] sm:$0xff]  }
 0x656   : > { %15258 = vmatprep.subr.bf16.mxu1 %v16838_v62 }
 0x658   : > { %15227 = vmatmul.mubr.bf16.gmra.mrb[116].mxu1 %v19681_v11 }
 0x659   : > { %15230 = vmatprep.mubr.bf16.mxu1 %v19699_v50  ;;  %15259 = vmatpush3.bf16.msra.mxu1 %v16838_v62  ;;  %v6318_v62 = vpack.c.bf16 %v21580_v22, %v21583_v42 }
 0x65a   : > { %15260 = vmatprep.subr.bf16.mxu1 %v16839_v13 }
 0x65d   : > { %15261 = vmatpush3.bf16.msra.mxu1 %v16839_v13  ;;  %v16851_v13 = vld [vmem:[#allocation12 + $0x178] sm:$0xff]  }
 0x65e   : > { %15262 = vmatprep.subr.bf16.mxu1 %v16840_v15 }
 0x660   : > { %15231 = vmatmul.mubr.bf16.gmra.mrb[120].mxu1 %v19695_v59 }
 0x661   : > { %15234 = vmatprep.mubr.bf16.mxu1 %v19716_v26  ;;  %15263 = vmatpush3.bf16.msra.mxu1 %v16840_v15  ;;  %v16852_v15 = vld [vmem:[#allocation12 + $0x180] sm:$0xff]  }
 0x662   : > { %15264 = vmatprep.subr.bf16.mxu1 %v16841_v49 }
 0x665   : > { %15265 = vmatpush3.bf16.msra.mxu1 %v16841_v49  ;;  %v16854_v49 = vld [vmem:[#allocation12 + $0x190] sm:$0xff]  }
 0x666   : > { %15266 = vmatprep.subr.bf16.mxu1 %v16842_v56 }
 0x668   : > { %15235 = vmatmul.mubr.bf16.gmra.mrb[124].mxu1 %v19714_v46 }
 0x669   : > { %15238 = vmatprep.mubr.bf16.mxu1 %v19737_v14  ;;  %15267 = vmatpush3.bf16.msra.mxu1 %v16842_v56  ;;  %v16845_v14 = vld [vmem:[#allocation12 + $0x148] sm:$0xff]   ;;  %v16855_v56 = vld [vmem:[#allocation12 + $0x198] sm:$0xff]  }
 0x66a   : > { %15268 = vmatprep.subr.bf16.mxu1 %v16843_v28 }
 0x66d   : > { %15269 = vmatpush3.bf16.msra.mxu1 %v16843_v28 }
 0x66e   : > { %15302 = vmatprep.subr.bf16.mxu1 %v16844_v44 }
 0x670   : > { %15239 = vmatmul.mubr.bf16.gmra.mrb[128].mxu1 %v19731_v37 }
 0x671   : > { %15242 = vmatprep.mubr.bf16.mxu1 %v19752_v31 }
 0x678   : > { %15243 = vmatmul.mubr.bf16.gmra.mrb[132].mxu1 %v19748_v34 }
 0x679   : > { %15246 = vmatprep.mubr.bf16.mxu1 %v19766_v27 }
 0x680   : > { %15247 = vmatmul.mubr.bf16.gmra.mrb[136].mxu1 %v19762_v61 }
 0x681   : > { %15250 = vmatprep.mubr.bf16.mxu1 %v19783_v58 }
 0x688   : > { %15251 = vmatmul.mubr.bf16.gmra.mrb[140].mxu1 %v19781_v8 }
 0x689   : > { %15270 = vmatprep.mubr.bf16.mxu1 %v19667_v52  ;;  %v16849_v52 = vld [vmem:[#allocation12 + $0x168] sm:$0xff]  }
 0x690   : > { %15271 = vmatmul.mubr.bf16.vlgmr.msra.gmra.mrb[112].mxu1 %v19679_v2 }
 0x691   : > { %15274 = vmatprep.mubr.bf16.mxu1 %v19683_v9  ;;  %15303 = vmatpush3.bf16.msra.mxu1 %v16844_v44 }
 0x692   : > { %15304 = vmatprep.subr.bf16.mxu1 %v16845_v14 }
 0x695   : > { %15305 = vmatpush3.bf16.msra.mxu1 %v16845_v14 }
 0x696   : > { %15306 = vmatprep.subr.bf16.mxu1 %v16846_v25 }
 0x698   : > { %15275 = vmatmul.mubr.bf16.gmra.mrb[116].mxu1 %v19693_v32 }
 0x699   : > { %15278 = vmatprep.mubr.bf16.mxu1 %v19697_v45  ;;  %15307 = vmatpush3.bf16.msra.mxu1 %v16846_v25 }
 0x69a   : > { %15308 = vmatprep.subr.bf16.mxu1 %v16847_v57 }
 0x69d   : > { %15309 = vmatpush3.bf16.msra.mxu1 %v16847_v57 }
 0x69e   : > { %15310 = vmatprep.subr.bf16.mxu1 %v16848_v30 }
 0x6a0   : > { %15279 = vmatmul.mubr.bf16.gmra.mrb[120].mxu1 %v19710_v51 }
 0x6a1   : > { %15282 = vmatprep.mubr.bf16.mxu1 %v19718_v29  ;;  %15311 = vmatpush3.bf16.msra.mxu1 %v16848_v30 }
 0x6a2   : > { %15312 = vmatprep.subr.bf16.mxu1 %v16849_v52 }
 0x6a5   : > { %15313 = vmatpush3.bf16.msra.mxu1 %v16849_v52 }
 0x6a6   : > { %15314 = vmatprep.subr.bf16.mxu1 %v16850_v20 }
 0x6a8   : > { %15283 = vmatmul.mubr.bf16.gmra.mrb[124].mxu1 %v6318_v62 }
 0x6a9   : > { %15286 = vmatprep.mubr.bf16.mxu1 %v19733_v47  ;;  %15315 = vmatpush3.bf16.msra.mxu1 %v16850_v20  ;;  %v6326_v47 = vpack.c.bf16 %v21580_v22, %v5083_v6 }
 0x6aa   : > { %15316 = vmatprep.subr.bf16.mxu1 %v16851_v13 }
 0x6ad   : > { %15317 = vmatpush3.bf16.msra.mxu1 %v16851_v13 }
 0x6ae   : > { %15350 = vmatprep.subr.bf16.mxu1 %v16852_v15 }
 0x6b0   : > { %15287 = vmatmul.mubr.bf16.gmra.mrb[128].mxu1 %v19746_v55 }
 0x6b1   : > { %15290 = vmatprep.mubr.bf16.mxu1 %v19750_v0 }
 0x6b8   : > { %15291 = vmatmul.mubr.bf16.gmra.mrb[132].mxu1 %v19760_v4 }
 0x6b9   : > { %15294 = vmatprep.mubr.bf16.mxu1 %v19764_v19 }
 0x6c0   : > { %15295 = vmatmul.mubr.bf16.gmra.mrb[136].mxu1 %v19777_v43 }
 0x6c1   : > { %15298 = vmatprep.mubr.bf16.mxu1 %v19785_v12 }
 0x6c8   : > { %15299 = vmatmul.mubr.bf16.gmra.mrb[140].mxu1 %v6326_v47 }
 0x6c9   : > { %15318 = vmatprep.mubr.bf16.mxu1 %v19665_v24  ;;  %v16857_v24 = vld [vmem:[#allocation12 + $0x1a8] sm:$0xff]  }
 0x6d0   : > { %15319 = vmatmul.mubr.bf16.vlgmr.msra.gmra.mrb[112].mxu1 %v19685_v17  ;;  %v16859_v17 = vld [vmem:[#allocation12 + $0x1b8] sm:$0xff]  }
 0x6d1   : > { %15322 = vmatprep.mubr.bf16.mxu1 %v19681_v11  ;;  %15351 = vmatpush3.bf16.msra.mxu1 %v16852_v15  ;;  %v16858_v11 = vld [vmem:[#allocation12 + $0x1b0] sm:$0xff]  }
 0x6d2   : > { %15352 = vmatprep.subr.bf16.mxu1 %v16853_v3 }
 0x6d5   : > { %15353 = vmatpush3.bf16.msra.mxu1 %v16853_v3 }
 0x6d6   : > { %15354 = vmatprep.subr.bf16.mxu1 %v16854_v49 }
 0x6d8   : > { %15323 = vmatmul.mubr.bf16.gmra.mrb[116].mxu1 %v19699_v50 }
 0x6d9   : > { %15326 = vmatprep.mubr.bf16.mxu1 %v19695_v59  ;;  %15355 = vmatpush3.bf16.msra.mxu1 %v16854_v49 }
 0x6da   : > { %15356 = vmatprep.subr.bf16.mxu1 %v16855_v56 }
 0x6dd   : > { %15357 = vmatpush3.bf16.msra.mxu1 %v16855_v56 }
 0x6de   : > { %15358 = vmatprep.subr.bf16.mxu1 %v16856_v54 }
 0x6e0   : > { %15327 = vmatmul.mubr.bf16.gmra.mrb[120].mxu1 %v19716_v26 }
 0x6e1   : > { %15330 = vmatprep.mubr.bf16.mxu1 %v19714_v46  ;;  %15359 = vmatpush3.bf16.msra.mxu1 %v16856_v54 }
 0x6e2   : > { %15360 = vmatprep.subr.bf16.mxu1 %v16857_v24 }
 0x6e5   : > { %15361 = vmatpush3.bf16.msra.mxu1 %v16857_v24 }
 0x6e6   : > { %15362 = vmatprep.subr.bf16.mxu1 %v16858_v11 }
 0x6e8   : > { %15331 = vmatmul.mubr.bf16.gmra.mrb[124].mxu1 %v21579_v38 }
 0x6e9   : > { %15334 = vmatprep.mubr.bf16.mxu1 %v19731_v37  ;;  %15363 = vmatpush3.bf16.msra.mxu1 %v16858_v11 }
 0x6ea   : > { %15364 = vmatprep.subr.bf16.mxu1 %v16859_v17 }
 0x6ed   : > { %15365 = vmatpush3.bf16.msra.mxu1 %v16859_v17 }
 0x6f0   : > { %15335 = vmatmul.mubr.bf16.gmra.mrb[128].mxu1 %v19752_v31 }
 0x6f1   : > { %15338 = vmatprep.mubr.bf16.mxu1 %v19748_v34 }
 0x6f8   : > { %15339 = vmatmul.mubr.bf16.gmra.mrb[132].mxu1 %v19766_v27 }
 0x6f9   : > { %15342 = vmatprep.mubr.bf16.mxu1 %v19762_v61 }
 0x700   : > { %15343 = vmatmul.mubr.bf16.gmra.mrb[136].mxu1 %v19783_v58 }
 0x701   : > { %15346 = vmatprep.mubr.bf16.mxu1 %v19781_v8 }
 0x708   : > { %15347 = vmatmul.mubr.bf16.gmra.mrb[140].mxu1 %v21579_v38 }
 0x709   : > { %15366 = vmatprep.mubr.bf16.mxu1 %v19679_v2 }
 0x710   : > { %15367 = vmatmul.mubr.bf16.vlgmr.msra.gmra.mrb[112].mxu1 %v19683_v9  ;;  %v19889_v9 = vld [vmem:[#allocation13] ss:$0 sm:$0xff] }
 0x711   : > { %15370 = vmatprep.mubr.bf16.mxu1 %v19693_v32 }
 0x718   : > { %15371 = vmatmul.mubr.bf16.gmra.mrb[116].mxu1 %v19697_v45  ;;  %v16860_v45 = vld [vmem:[#allocation15 + $0x4] ss:$8 sps:$4 sm:$0xff]  }
 0x719   : > { %15374 = vmatprep.mubr.bf16.mxu1 %v19710_v51  ;;  %15414 = vmatprep.mubr.bf16.mxu0 %v16860_v45 }
 0x720   : > { %15375 = vmatmul.mubr.bf16.gmra.mrb[120].mxu1 %v19718_v29 }
 0x721   : > { %15378 = vmatprep.mubr.bf16.mxu1 %v6318_v62 }
 0x728   : > { %15379 = vmatmul.mubr.bf16.gmra.mrb[124].mxu1 %v21579_v38 }
 0x729   : > { %15382 = vmatprep.mubr.bf16.mxu1 %v19746_v55 }
 0x730   : > { %15383 = vmatmul.mubr.bf16.gmra.mrb[128].mxu1 %v19750_v0 }
 0x731   : > { %15386 = vmatprep.mubr.bf16.mxu1 %v19760_v4 }
 0x738   : > { %15387 = vmatmul.mubr.bf16.gmra.mrb[132].mxu1 %v19764_v19 }
 0x739   : > { %15390 = vmatprep.mubr.bf16.mxu1 %v19777_v43 }
 0x740   : > { %15391 = vmatmul.mubr.bf16.gmra.mrb[136].mxu1 %v19785_v12 }
 0x741   : > { %15394 = vmatprep.mubr.bf16.mxu1 %v6326_v47 }
 0x748   : > { %15395 = vmatmul.mubr.bf16.gmra.mrb[140].mxu1 %v21579_v38 }
 0x749   : > { %15670 = vmatprep.mubr.bf16.mxu1 %v16860_v45 }
 0x7e3   : > { %v15368_v29 = vpop.f32.mrb[112].mxu1 }
 0x7e4   : > { %v7208_v55 = vadd.f32 %v15368_v29, %v19889_v9  ;;  %v7040_v0 = vpop.f32.mrb[113].mxu1 }
 0x7e5   : > { %v7206_v37 = vadd.f32 %v19889_v9, %v7040_v0  ;;  %v15369_v46 = vpop.f32.mrb[114].mxu1 }
 0x7e6   : > { %v7209_v19 = vadd.f32 %v15369_v46, %v19889_v9  ;;  %v7043_v2 = vpop.f32.mrb[115].mxu1  ;;  %v7240_v59 = vmax.f32 %v7208_v55, 0.0 }
 0x7e7   : > { %v7207_v32 = vadd.f32 %v19889_v9, %v7043_v2  ;;  %v7238_v51 = vmax.f32 %v7206_v37, 0.0 }
 0x7e8   : > { %v7241_v50 = vmax.f32 %v7209_v19, 0.0 }
 0x7e9   : > { %v7239_v26 = vmax.f32 %v7207_v32, 0.0 }
 0x7ea   : > { %v7503_v38 = vpack.c.bf16 %v7241_v50, %v7240_v59 }
 0x7eb   : > { %v7502_v34 = vpack.c.bf16 %v7239_v26, %v7238_v51  ;;  %v15372_v31 = vpop.f32.mrb[116].mxu1 }
 0x7ec   : > { %v7212_v4 = vadd.f32 %v15372_v31, %v19889_v9  ;;  %v7056_v61 = vpop.f32.mrb[117].mxu1 }
 0x7ed   : > { %v7210_v27 = vadd.f32 %v19889_v9, %v7056_v61  ;;  %v15373_v6 = vpop.f32.mrb[118].mxu1  ;;  %15398 = vmatprep.subr.bf16.mxu0 %v7502_v34 }
 0x7ee   : > { %v7213_v43 = vadd.f32 %v15373_v6, %v19889_v9  ;;  %v7059_v8 = vpop.f32.mrb[119].mxu1  ;;  %15399 = vmatpush3.bf16.xpose.msra.mxu0 %v7502_v34  ;;  %v7244_v12 = vmax.f32 %v7212_v4, 0.0 }
 0x7ef   : > { %v7211_v58 = vadd.f32 %v19889_v9, %v7059_v8  ;;  %15400 = vmatprep.subr.bf16.mxu0 %v7503_v38  ;;  %v7242_v28 = vmax.f32 %v7210_v27, 0.0 }
 0x7f0   : > { %v7245_v22 = vmax.f32 %v7213_v43, 0.0 }
 0x7f1   : > { %v7243_v44 = vmax.f32 %v7211_v58, 0.0 }
 0x7f2   : > { %v7505_v14 = vpack.c.bf16 %v7245_v22, %v7244_v12 }
 0x7f3   : > { %v7504_v25 = vpack.c.bf16 %v7243_v44, %v7242_v28  ;;  %v15376_v57 = vpop.f32.mrb[120].mxu1 }
 0x7f4   : > { %v7216_v30 = vadd.f32 %v15376_v57, %v19889_v9  ;;  %v7072_v52 = vpop.f32.mrb[121].mxu1 }
 0x7f5   : > { %v7214_v20 = vadd.f32 %v19889_v9, %v7072_v52  ;;  %v15377_v42 = vpop.f32.mrb[122].mxu1 }
 0x7f6   : > { %v7217_v62 = vadd.f32 %v15377_v42, %v19889_v9  ;;  %v7075_v13 = vpop.f32.mrb[123].mxu1  ;;  %15401 = vmatpush3.bf16.xpose.msra.mxu0 %v7503_v38  ;;  %v7248_v47 = vmax.f32 %v7216_v30, 0.0 }
 0x7f7   : > { %v7215_v15 = vadd.f32 %v19889_v9, %v7075_v13  ;;  %15402 = vmatprep.subr.bf16.mxu0 %v7504_v25  ;;  %v7246_v49 = vmax.f32 %v7214_v20, 0.0 }
 0x7f8   : > { %v7249_v3 = vmax.f32 %v7217_v62, 0.0 }
 0x7f9   : > { %v7247_v56 = vmax.f32 %v7215_v15, 0.0 }
 0x7fa   : > { %v7507_v54 = vpack.c.bf16 %v7249_v3, %v7248_v47 }
 0x7fb   : > { %v7506_v24 = vpack.c.bf16 %v7247_v56, %v7246_v49  ;;  %v15380_v11 = vpop.f32.mrb[124].mxu1 }
 0x7fc   : > { %v7220_v17 = vadd.f32 %v15380_v11, %v19889_v9  ;;  %v7088_v45 = vpop.f32.mrb[125].mxu1 }
 0x7fd   : > { %v7218_v29 = vadd.f32 %v19889_v9, %v7088_v45  ;;  %v15381_v55 = vpop.f32.mrb[126].mxu1 }
 0x7fe   : > { %v7221_v0 = vadd.f32 %v15381_v55, %v19889_v9  ;;  %v7091_v37 = vpop.f32.mrb[127].mxu1  ;;  %15403 = vmatpush3.bf16.xpose.msra.mxu0 %v7504_v25  ;;  %v7252_v19 = vmax.f32 %v7220_v17, 0.0 }
 0x7ff   : > { %v7219_v46 = vadd.f32 %v19889_v9, %v7091_v37  ;;  %15404 = vmatprep.subr.bf16.mxu0 %v7505_v14  ;;  %v7250_v32 = vmax.f32 %v7218_v29, 0.0 }
 0x800   : > { %v7253_v2 = vmax.f32 %v7221_v0, 0.0 }
 0x801   : > { %v7251_v59 = vmax.f32 %v7219_v46, 0.0 }
 0x802   : > { %v19907_v50 = vpack.c.bf16 %v7253_v2, %v7252_v19 }
 0x803   : > { %v7508_v51 = vpack.c.bf16 %v7251_v59, %v7250_v32  ;;  %v15384_v26 = vpop.f32.mrb[128].mxu1 }
 0x804   : > { %v7224_v38 = vadd.f32 %v15384_v26, %v19889_v9  ;;  %v7104_v34 = vpop.f32.mrb[129].mxu1 }
 0x805   : > { %v7222_v31 = vadd.f32 %v19889_v9, %v7104_v34  ;;  %v15385_v4 = vpop.f32.mrb[130].mxu1 }
 0x806   : > { %v7225_v61 = vadd.f32 %v15385_v4, %v19889_v9  ;;  %v7107_v27 = vpop.f32.mrb[131].mxu1  ;;  %15405 = vmatpush3.bf16.xpose.msra.mxu0 %v7505_v14  ;;  %v7256_v43 = vmax.f32 %v7224_v38, 0.0 }
 0x807   : > { %v7223_v6 = vadd.f32 %v19889_v9, %v7107_v27  ;;  %15406 = vmatprep.subr.bf16.mxu0 %v7506_v24  ;;  %v7254_v58 = vmax.f32 %v7222_v31, 0.0 }
 0x808   : > { %v7257_v8 = vmax.f32 %v7225_v61, 0.0 }
 0x809   : > { %v7255_v12 = vmax.f32 %v7223_v6, 0.0 }
 0x80a   : > { %v10497_v22 = vpack.c.bf16 %v7257_v8, %v7256_v43 }
 0x80b   : > { %v10496_v28 = vpack.c.bf16 %v7255_v12, %v7254_v58  ;;  %v15388_v44 = vpop.f32.mrb[132].mxu1 }
 0x80c   : > { %v7228_v25 = vadd.f32 %v15388_v44, %v19889_v9  ;;  %v7120_v57 = vpop.f32.mrb[133].mxu1  ;;  %v16866_v44 = vld [vmem:[#allocation15 + $0x64] ss:$8 sps:$4 sm:$0xff]  }
 0x80d   : > { %v7226_v30 = vadd.f32 %v19889_v9, %v7120_v57  ;;  %v15389_v52 = vpop.f32.mrb[134].mxu1  ;;  %15654 = vmatprep.subr.bf16.mxu1 %v10496_v28  ;;  %v16870_v57 = vld [vmem:[#allocation15 + $0xa4] ss:$8 sps:$4 sm:$0xff]  }
 0x80e   : > { %v7229_v20 = vadd.f32 %v15389_v52, %v19889_v9  ;;  %v7123_v14 = vpop.f32.mrb[135].mxu1  ;;  %15407 = vmatpush3.bf16.xpose.msra.mxu0 %v7506_v24  ;;  %15655 = vmatpush3.bf16.xpose.msra.mxu1 %v10496_v28  ;;  %v7260_v62 = vmax.f32 %v7228_v25, 0.0  ;;  %v16861_v28 = vld [vmem:[#allocation15 + $0x14] ss:$8 sps:$4 sm:$0xff]   ;;  %v16868_v25 = vld [vmem:[#allocation15 + $0x84] ss:$8 sps:$4 sm:$0xff]  }
 0x80f   : > { %v7227_v42 = vadd.f32 %v19889_v9, %v7123_v14  ;;  %15408 = vmatprep.subr.bf16.mxu0 %v7507_v54  ;;  %15656 = vmatprep.subr.bf16.mxu1 %v10497_v22  ;;  %v7258_v15 = vmax.f32 %v7226_v30, 0.0  ;;  %v16872_v30 = vld [vmem:[#allocation15 + $0xc4] ss:$8 sps:$4 sm:$0xff]   ;;  %v16873_v52 = vld [vmem:[#allocation15 + $0xd4] ss:$8 sps:$4 sm:$0xff]  }
 0x810   : > { %v7261_v13 = vmax.f32 %v7229_v20, 0.0  ;;  %v16880_v20 = vld [vmem:[#allocation15 + $0x144] ss:$8 sps:$4 sm:$0xff]   ;;  %v16881_v14 = vld [vmem:[#allocation15 + $0x154] ss:$8 sps:$4 sm:$0xff]  }
 0x811   : > { %v7259_v47 = vmax.f32 %v7227_v42, 0.0  ;;  %v16883_v42 = vld [vmem:[#allocation15 + $0x174] ss:$8 sps:$4 sm:$0xff]  }
 0x812   : > { %v10499_v3 = vpack.c.bf16 %v7261_v13, %v7260_v62  ;;  %v16884_v62 = vld [vmem:[#allocation15 + $0x184] ss:$8 sps:$4 sm:$0xff]  }
 0x813   : > { %v10498_v49 = vpack.c.bf16 %v7259_v47, %v7258_v15  ;;  %v15392_v56 = vpop.f32.mrb[136].mxu1  ;;  %v16886_v13 = vld [vmem:[#allocation15 + $0x1a4] ss:$8 sps:$4 sm:$0xff]   ;;  %v16887_v15 = vld [vmem:[#allocation15 + $0x1b4] ss:$8 sps:$4 sm:$0xff]  }
 0x814   : > { %v7232_v11 = vadd.f32 %v15392_v56, %v19889_v9  ;;  %v7136_v17 = vpop.f32.mrb[137].mxu1  ;;  %v16888_v47 = vld [vmem:[#allocation15 + $0x1c4] ss:$8 sps:$4 sm:$0xff]   ;;  %v16891_v56 = vld [vmem:[#allocation15 + $0x1f4] ss:$8 sps:$4 sm:$0xff]  }
 0x815   : > { %v7230_v45 = vadd.f32 %v19889_v9, %v7136_v17  ;;  %v15393_v29 = vpop.f32.mrb[138].mxu1  ;;  %v16893_v17 = vld [vmem:[#allocation15 + $0x214] ss:$8 sps:$4 sm:$0xff]  }
 0x816   : > { %v7233_v24 = vadd.f32 %v15393_v29, %v19889_v9  ;;  %v7139_v55 = vpop.f32.mrb[139].mxu1  ;;  %15409 = vmatpush3.bf16.xpose.msra.mxu0 %v7507_v54  ;;  %15657 = vmatpush3.bf16.xpose.msra.mxu1 %v10497_v22  ;;  %v7264_v37 = vmax.f32 %v7232_v11, 0.0  ;;  %v16892_v11 = vld [vmem:[#allocation15 + $0x204] ss:$8 sps:$4 sm:$0xff]   ;;  %v16895_v29 = vld [vmem:[#allocation15 + $0x234] ss:$8 sps:$4 sm:$0xff]  }
 0x817   : > { %v7231_v0 = vadd.f32 %v19889_v9, %v7139_v55  ;;  %15410 = vmatprep.subr.bf16.mxu0 %v7508_v51  ;;  %15658 = vmatprep.subr.bf16.mxu1 %v10498_v49  ;;  %v7262_v19 = vmax.f32 %v7230_v45, 0.0  ;;  %v16894_v45 = vld [vmem:[#allocation15 + $0x224] ss:$8 sps:$4 sm:$0xff]   ;;  %v16897_v55 = vld [vmem:[#allocation15 + $0x254] ss:$8 sps:$4 sm:$0xff]  }
 0x818   : > { %v7265_v46 = vmax.f32 %v7233_v24, 0.0  ;;  %v16896_v24 = vld [vmem:[#allocation15 + $0x244] ss:$8 sps:$4 sm:$0xff]  }
 0x819   : > { %v7263_v2 = vmax.f32 %v7231_v0, 0.0  ;;  %v16898_v0 = vld [vmem:[#allocation15 + $0x264] ss:$8 sps:$4 sm:$0xff]  }
 0x81a   : > { %v10501_v32 = vpack.c.bf16 %v7265_v46, %v7264_v37  ;;  %v16899_v37 = vld [vmem:[#allocation15 + $0x274] ss:$8 sps:$4 sm:$0xff]   ;;  %v16900_v46 = vld [vmem:[#allocation15 + $0x284] ss:$8 sps:$4 sm:$0xff]  }
 0x81b   : > { %v10500_v59 = vpack.c.bf16 %v7263_v2, %v7262_v19  ;;  %v15396_v26 = vpop.f32.mrb[140].mxu1  ;;  %v16901_v19 = vld [vmem:[#allocation15 + $0x294] ss:$8 sps:$4 sm:$0xff]   ;;  %v16902_v2 = vld [vmem:[#allocation15 + $0x2a4] ss:$8 sps:$4 sm:$0xff]  }
 0x81c   : > { %v7236_v38 = vadd.f32 %v15396_v26, %v19889_v9  ;;  %v7152_v34 = vpop.f32.mrb[141].mxu1  ;;  %v16905_v26 = vld [vmem:[#allocation15 + $0x2d4] ss:$8 sps:$4 sm:$0xff]  }
 0x81d   : > { %v7234_v31 = vadd.f32 %v19889_v9, %v7152_v34  ;;  %v15397_v4 = vpop.f32.mrb[142].mxu1  ;;  %v16907_v34 = vld [vmem:[#allocation15 + $0x2f4] ss:$8 sps:$4 sm:$0xff]  }
 0x81e   : > { %v7237_v54 = vadd.f32 %v15397_v4, %v19889_v9  ;;  %v7155_v61 = vpop.f32.mrb[143].mxu1  ;;  %15411 = vmatpush3.bf16.xpose.msra.mxu0 %v7508_v51  ;;  %15659 = vmatpush3.bf16.xpose.msra.mxu1 %v10498_v49  ;;  %v7268_v6 = vmax.f32 %v7236_v38, 0.0  ;;  %v16862_v51 = vld [vmem:[#allocation15 + $0x24] ss:$8 sps:$4 sm:$0xff]   ;;  %v16909_v4 = vld [vmem:[#allocation15 + $0x314] ss:$8 sps:$4 sm:$0xff]  }
 0x81f   : > { %v7235_v27 = vadd.f32 %v19889_v9, %v7155_v61  ;;  %15412 = vmatprep.subr.bf16.mxu0 %v19907_v50  ;;  %15660 = vmatprep.subr.bf16.mxu1 %v10499_v3  ;;  %v7266_v8 = vmax.f32 %v7234_v31, 0.0  ;;  %v16863_v9 = vld [vmem:[#allocation15 + $0x34] ss:$8 sps:$4 sm:$0xff]   ;;  %v16890_v49 = vld [vmem:[#allocation15 + $0x1e4] ss:$8 sps:$4 sm:$0xff]  }
 0x820   : > { %v7269_v43 = vmax.f32 %v7237_v54, 0.0  ;;  %v16906_v38 = vld [vmem:[#allocation15 + $0x2e4] ss:$8 sps:$4 sm:$0xff]   ;;  %v16911_v61 = vld [vmem:[#allocation15 + $0x334] ss:$8 sps:$4 sm:$0xff]  }
 0x821   : > { %v7267_v58 = vmax.f32 %v7235_v27, 0.0  ;;  %v16908_v31 = vld [vmem:[#allocation15 + $0x304] ss:$8 sps:$4 sm:$0xff]  }
 0x822   : > { %v10503_v12 = vpack.c.bf16 %v7269_v43, %v7268_v6  ;;  %v16910_v54 = vld [vmem:[#allocation15 + $0x324] ss:$8 sps:$4 sm:$0xff]   ;;  %v16913_v6 = vld [vmem:[#allocation15 + $0x354] ss:$8 sps:$4 sm:$0xff]  }
 0x823   : > { %v10502_v22 = vpack.c.bf16 %v7267_v58, %v7266_v8  ;;  %v16912_v27 = vld [vmem:[#allocation15 + $0x344] ss:$8 sps:$4 sm:$0xff]   ;;  %v16915_v8 = vld [vmem:[#allocation15 + $0x374] ss:$8 sps:$4 sm:$0xff]   ;;  %v16916_v58 = vld [vmem:[#allocation15] ss:$8 sps:$4 sm:$0xff]  }
 0x824   : > { %v16914_v43 = vld [vmem:[#allocation15 + $0x364] ss:$8 sps:$4 sm:$0xff]  }
 0x826   : > { %15413 = vmatpush3.bf16.xpose.msra.mxu0 %v19907_v50  ;;  %15661 = vmatpush3.bf16.xpose.msra.mxu1 %v10499_v3  ;;  %v16864_v50 = vld [vmem:[#allocation15 + $0x44] ss:$8 sps:$4 sm:$0xff]   ;;  %v16889_v3 = vld [vmem:[#allocation15 + $0x1d4] ss:$8 sps:$4 sm:$0xff]  }
 0x827   : > { %15526 = vmatprep.subr.bf16.mxu0 %v18243_v5  ;;  %15662 = vmatprep.subr.bf16.mxu1 %v10500_v59 }
 0x82d   : > { %15415 = vmatmul.mubr.bf16.vlgmr.msra.gmra.mrb[144].mxu0 %v16861_v28 }
 0x82e   : > { %15527 = vmatpush3.bf16.msra.mxu0 %v18243_v5  ;;  %15663 = vmatpush3.bf16.xpose.msra.mxu1 %v10500_v59  ;;  %v16865_v5 = vld [vmem:[#allocation15 + $0x54] ss:$8 sps:$4 sm:$0xff]   ;;  %v16904_v59 = vld [vmem:[#allocation15 + $0x2c4] ss:$8 sps:$4 sm:$0xff]  }
 0x82f   : > { %15528 = vmatprep.subr.bf16.mxu0 %v18259_v18  ;;  %15664 = vmatprep.subr.bf16.mxu1 %v10501_v32 }
 0x830   : > { %15418 = vmatprep.mubr.bf16.mxu0 %v16862_v51 }
 0x832   : > { %15529 = vmatpush3.bf16.msra.mxu0 %v18259_v18  ;;  %v16867_v18 = vld [vmem:[#allocation15 + $0x74] ss:$8 sps:$4 sm:$0xff]  }
 0x833   : > { %15530 = vmatprep.subr.bf16.mxu0 %v18282_v60 }
 0x835   : > { %15419 = vmatmul.mubr.bf16.gmra.mrb[148].mxu0 %v16863_v9 }
 0x836   : > { %15531 = vmatpush3.bf16.msra.mxu0 %v18282_v60  ;;  %15665 = vmatpush3.bf16.xpose.msra.mxu1 %v10501_v32  ;;  %v21584_v60 = vld [vmem:[#allocation22_spill] sm:$0xff]  ;;  %v16903_v32 = vld [vmem:[#allocation15 + $0x2b4] ss:$8 sps:$4 sm:$0xff]  }
 0x837   : > { %15532 = vmatprep.subr.bf16.mxu0 %v18300_v39  ;;  %15666 = vmatprep.subr.bf16.mxu1 %v10502_v22 }
 0x838   : > { %15422 = vmatprep.mubr.bf16.mxu0 %v16864_v50 }
 0x83a   : > { %15533 = vmatpush3.bf16.msra.mxu0 %v18300_v39  ;;  %v21585_v39 = vld [vmem:[#allocation23_spill] sm:$0xff] }
 0x83b   : > { %15534 = vmatprep.subr.bf16.mxu0 %v18318_v16 }
 0x83d   : > { %15423 = vmatmul.mubr.bf16.gmra.mrb[152].mxu0 %v16865_v5 }
 0x83e   : > { %15535 = vmatpush3.bf16.msra.mxu0 %v18318_v16  ;;  %15667 = vmatpush3.bf16.xpose.msra.mxu1 %v10502_v22  ;;  %v16869_v16 = vld [vmem:[#allocation15 + $0x94] ss:$8 sps:$4 sm:$0xff]   ;;  %v16918_v22 = vld [vmem:[#allocation15 + $0x20] ss:$8 sps:$4 sm:$0xff]  }
 0x83f   : > { %15536 = vmatprep.subr.bf16.mxu0 %v18338_v10  ;;  %15668 = vmatprep.subr.bf16.mxu1 %v10503_v12 }
 0x840   : > { %15426 = vmatprep.mubr.bf16.mxu0 %v16866_v44 }
 0x842   : > { %15537 = vmatpush3.bf16.msra.mxu0 %v18338_v10  ;;  %v16871_v10 = vld [vmem:[#allocation15 + $0xb4] ss:$8 sps:$4 sm:$0xff]  }
 0x843   : > { %15538 = vmatprep.subr.bf16.mxu0 %v21584_v60 }
 0x845   : > { %15427 = vmatmul.mubr.bf16.gmra.mrb[156].mxu0 %v16867_v18 }
 0x846   : > { %15539 = vmatpush3.bf16.msra.mxu0 %v21584_v60  ;;  %15669 = vmatpush3.bf16.xpose.msra.mxu1 %v10503_v12  ;;  %v16917_v12 = vld [vmem:[#allocation15 + $0x10] ss:$8 sps:$4 sm:$0xff]   ;;  %v16926_v60 = vld [vmem:[#allocation15 + $0xa0] ss:$8 sps:$4 sm:$0xff]  }
 0x847   : > { %15540 = vmatprep.subr.bf16.mxu0 %v21585_v39  ;;  %15782 = vmatprep.subr.bf16.mxu1 %v18619_v23 }
 0x848   : > { %15430 = vmatprep.mubr.bf16.mxu0 %v16868_v25 }
 0x84a   : > { %15541 = vmatpush3.bf16.msra.mxu0 %v21585_v39  ;;  %v16928_v39 = vld [vmem:[#allocation15 + $0xc0] ss:$8 sps:$4 sm:$0xff]  }
 0x84d   : > { %15431 = vmatmul.mubr.bf16.gmra.mrb[160].mxu0 %v16869_v16  ;;  %15671 = vmatmul.mubr.bf16.vlgmr.msra.gmra.mrb[144].mxu1 %v16861_v28  ;;  %v16919_v28 = vld [vmem:[#allocation15 + $0x30] ss:$8 sps:$4 sm:$0xff]  }
 0x84e   : > { %15783 = vmatpush3.bf16.msra.mxu1 %v18619_v23  ;;  %15434 = vmatprep.mubr.bf16.mxu0 %v16870_v57  ;;  %v16874_v23 = vld [vmem:[#allocation15 + $0xe4] ss:$8 sps:$4 sm:$0xff]  }
 0x84f   : > { %15784 = vmatprep.subr.bf16.mxu1 %v18612_v35  ;;  %15674 = vmatprep.mubr.bf16.mxu1 %v16862_v51  ;;  %v16920_v51 = vld [vmem:[#allocation15 + $0x40] ss:$8 sps:$4 sm:$0xff]  }
 0x852   : > { %15785 = vmatpush3.bf16.msra.mxu1 %v18612_v35  ;;  %v16875_v35 = vld [vmem:[#allocation15 + $0xf4] ss:$8 sps:$4 sm:$0xff]  }
 0x853   : > { %15786 = vmatprep.subr.bf16.mxu1 %v18660_v7 }
 0x855   : > { %15435 = vmatmul.mubr.bf16.gmra.mrb[164].mxu0 %v16871_v10  ;;  %15675 = vmatmul.mubr.bf16.gmra.mrb[148].mxu1 %v16863_v9  ;;  %v16921_v9 = vld [vmem:[#allocation15 + $0x50] ss:$8 sps:$4 sm:$0xff]  }
 0x856   : > { %15787 = vmatpush3.bf16.msra.mxu1 %v18660_v7  ;;  %15438 = vmatprep.mubr.bf16.mxu0 %v16872_v30  ;;  %v16876_v7 = vld [vmem:[#allocation15 + $0x104] ss:$8 sps:$4 sm:$0xff]  }
 0x857   : > { %15788 = vmatprep.subr.bf16.mxu1 %v18651_v40  ;;  %15678 = vmatprep.mubr.bf16.mxu1 %v16864_v50  ;;  %v16922_v50 = vld [vmem:[#allocation15 + $0x60] ss:$8 sps:$4 sm:$0xff]  }
 0x85a   : > { %15789 = vmatpush3.bf16.msra.mxu1 %v18651_v40  ;;  %v16877_v40 = vld [vmem:[#allocation15 + $0x114] ss:$8 sps:$4 sm:$0xff]  }
 0x85b   : > { %15790 = vmatprep.subr.bf16.mxu1 %v18701_v33 }
 0x85d   : > { %15439 = vmatmul.mubr.bf16.gmra.mrb[168].mxu0 %v16873_v52  ;;  %15679 = vmatmul.mubr.bf16.gmra.mrb[152].mxu1 %v16865_v5  ;;  %v16923_v5 = vld [vmem:[#allocation15 + $0x70] ss:$8 sps:$4 sm:$0xff]  }
 0x85e   : > { %15791 = vmatpush3.bf16.msra.mxu1 %v18701_v33  ;;  %15442 = vmatprep.mubr.bf16.mxu0 %v16874_v23  ;;  %v16878_v33 = vld [vmem:[#allocation15 + $0x124] ss:$8 sps:$4 sm:$0xff]  }
 0x85f   : > { %15792 = vmatprep.subr.bf16.mxu1 %v18691_v1  ;;  %15682 = vmatprep.mubr.bf16.mxu1 %v16866_v44  ;;  %v16924_v44 = vld [vmem:[#allocation15 + $0x80] ss:$8 sps:$4 sm:$0xff]  }
 0x862   : > { %15793 = vmatpush3.bf16.msra.mxu1 %v18691_v1  ;;  %v16879_v1 = vld [vmem:[#allocation15 + $0x134] ss:$8 sps:$4 sm:$0xff]  }
 0x863   : > { %15794 = vmatprep.subr.bf16.mxu1 %v18729_v21 }
 0x865   : > { %15443 = vmatmul.mubr.bf16.gmra.mrb[172].mxu0 %v16875_v35  ;;  %15683 = vmatmul.mubr.bf16.gmra.mrb[156].mxu1 %v16867_v18  ;;  %v16925_v18 = vld [vmem:[#allocation15 + $0x90] ss:$8 sps:$4 sm:$0xff]  }
 0x866   : > { %15795 = vmatpush3.bf16.msra.mxu1 %v18729_v21  ;;  %15446 = vmatprep.mubr.bf16.mxu0 %v16876_v7  ;;  %v16882_v21 = vld [vmem:[#allocation15 + $0x164] ss:$8 sps:$4 sm:$0xff]  }
 0x867   : > { %15796 = vmatprep.subr.bf16.mxu1 %v18742_v63  ;;  %15686 = vmatprep.mubr.bf16.mxu1 %v16868_v25  ;;  %v16927_v25 = vld [vmem:[#allocation15 + $0xb0] ss:$8 sps:$4 sm:$0xff]  }
 0x86a   : > { %15797 = vmatpush3.bf16.msra.mxu1 %v18742_v63  ;;  %v16885_v63 = vld [vmem:[#allocation15 + $0x194] ss:$8 sps:$4 sm:$0xff]  }
 0x86d   : > { %15447 = vmatmul.mubr.bf16.gmra.mrb[176].mxu0 %v16877_v40  ;;  %15687 = vmatmul.mubr.bf16.gmra.mrb[160].mxu1 %v16869_v16  ;;  %v16929_v16 = vld [vmem:[#allocation15 + $0xd0] ss:$8 sps:$4 sm:$0xff]  }
 0x86e   : > { %15450 = vmatprep.mubr.bf16.mxu0 %v16878_v33  ;;  %15690 = vmatprep.mubr.bf16.mxu1 %v16870_v57  ;;  %v16930_v57 = vld [vmem:[#allocation15 + $0xe0] ss:$8 sps:$4 sm:$0xff]  }
 0x875   : > { %15451 = vmatmul.mubr.bf16.gmra.mrb[180].mxu0 %v16879_v1  ;;  %15691 = vmatmul.mubr.bf16.gmra.mrb[164].mxu1 %v16871_v10  ;;  %v16931_v10 = vld [vmem:[#allocation15 + $0xf0] ss:$8 sps:$4 sm:$0xff]  }
 0x876   : > { %15454 = vmatprep.mubr.bf16.mxu0 %v16880_v20  ;;  %15694 = vmatprep.mubr.bf16.mxu1 %v16872_v30  ;;  %v16932_v30 = vld [vmem:[#allocation15 + $0x100] ss:$8 sps:$4 sm:$0xff]  }
 0x87d   : > { %15455 = vmatmul.mubr.bf16.gmra.mrb[184].mxu0 %v16881_v14  ;;  %15695 = vmatmul.mubr.bf16.gmra.mrb[168].mxu1 %v16873_v52  ;;  %v16933_v52 = vld [vmem:[#allocation15 + $0x110] ss:$8 sps:$4 sm:$0xff]  }
 0x87e   : > { %15458 = vmatprep.mubr.bf16.mxu0 %v16882_v21  ;;  %15698 = vmatprep.mubr.bf16.mxu1 %v16874_v23  ;;  %v16934_v23 = vld [vmem:[#allocation15 + $0x120] ss:$8 sps:$4 sm:$0xff]  }
 0x885   : > { %15459 = vmatmul.mubr.bf16.gmra.mrb[188].mxu0 %v16883_v42  ;;  %15699 = vmatmul.mubr.bf16.gmra.mrb[172].mxu1 %v16875_v35  ;;  %v16935_v35 = vld [vmem:[#allocation15 + $0x130] ss:$8 sps:$4 sm:$0xff]  }
 0x886   : > { %15462 = vmatprep.mubr.bf16.mxu0 %v16884_v62  ;;  %15702 = vmatprep.mubr.bf16.mxu1 %v16876_v7  ;;  %v16936_v7 = vld [vmem:[#allocation15 + $0x140] ss:$8 sps:$4 sm:$0xff]  }
 0x88d   : > { %15463 = vmatmul.mubr.bf16.gmra.mrb[192].mxu0 %v16885_v63  ;;  %15703 = vmatmul.mubr.bf16.gmra.mrb[176].mxu1 %v16877_v40  ;;  %v16937_v40 = vld [vmem:[#allocation15 + $0x150] ss:$8 sps:$4 sm:$0xff]  }
 0x88e   : > { %15466 = vmatprep.mubr.bf16.mxu0 %v16886_v13  ;;  %15706 = vmatprep.mubr.bf16.mxu1 %v16878_v33  ;;  %v16938_v33 = vld [vmem:[#allocation15 + $0x160] ss:$8 sps:$4 sm:$0xff]  }
 0x895   : > { %15467 = vmatmul.mubr.bf16.gmra.mrb[196].mxu0 %v16887_v15  ;;  %15707 = vmatmul.mubr.bf16.gmra.mrb[180].mxu1 %v16879_v1  ;;  %v16939_v1 = vld [vmem:[#allocation15 + $0x170] ss:$8 sps:$4 sm:$0xff]  }
 0x896   : > { %15470 = vmatprep.mubr.bf16.mxu0 %v16888_v47  ;;  %15710 = vmatprep.mubr.bf16.mxu1 %v16880_v20  ;;  %v16940_v20 = vld [vmem:[#allocation15 + $0x180] ss:$8 sps:$4 sm:$0xff]  }
 0x89d   : > { %15471 = vmatmul.mubr.bf16.gmra.mrb[200].mxu0 %v16889_v3  ;;  %15711 = vmatmul.mubr.bf16.gmra.mrb[184].mxu1 %v16881_v14  ;;  %v16941_v14 = vld [vmem:[#allocation15 + $0x190] ss:$8 sps:$4 sm:$0xff]  }
 0x89e   : > { %15474 = vmatprep.mubr.bf16.mxu0 %v16890_v49  ;;  %15714 = vmatprep.mubr.bf16.mxu1 %v16882_v21  ;;  %v16942_v21 = vld [vmem:[#allocation15 + $0x1a0] ss:$8 sps:$4 sm:$0xff]  }
 0x8a5   : > { %15475 = vmatmul.mubr.bf16.gmra.mrb[204].mxu0 %v16891_v56  ;;  %15715 = vmatmul.mubr.bf16.gmra.mrb[188].mxu1 %v16883_v42  ;;  %v16943_v42 = vld [vmem:[#allocation15 + $0x1b0] ss:$8 sps:$4 sm:$0xff]  }
 0x8a6   : > { %15478 = vmatprep.mubr.bf16.mxu0 %v16892_v11  ;;  %15718 = vmatprep.mubr.bf16.mxu1 %v16884_v62  ;;  %v16944_v62 = vld [vmem:[#allocation15 + $0x1c0] ss:$8 sps:$4 sm:$0xff]  }
 0x8ad   : > { %15479 = vmatmul.mubr.bf16.gmra.mrb[208].mxu0 %v16893_v17  ;;  %15719 = vmatmul.mubr.bf16.gmra.mrb[192].mxu1 %v16885_v63  ;;  %v16945_v63 = vld [vmem:[#allocation15 + $0x1d0] ss:$8 sps:$4 sm:$0xff]  }
 0x8ae   : > { %15482 = vmatprep.mubr.bf16.mxu0 %v16894_v45  ;;  %15722 = vmatprep.mubr.bf16.mxu1 %v16886_v13  ;;  %v16946_v13 = vld [vmem:[#allocation15 + $0x1e0] ss:$8 sps:$4 sm:$0xff]  }
 0x8b5   : > { %15483 = vmatmul.mubr.bf16.gmra.mrb[212].mxu0 %v16895_v29  ;;  %15723 = vmatmul.mubr.bf16.gmra.mrb[196].mxu1 %v16887_v15  ;;  %v16947_v15 = vld [vmem:[#allocation15 + $0x1f0] ss:$8 sps:$4 sm:$0xff]  }
 0x8b6   : > { %15486 = vmatprep.mubr.bf16.mxu0 %v16896_v24  ;;  %15726 = vmatprep.mubr.bf16.mxu1 %v16888_v47  ;;  %v16948_v47 = vld [vmem:[#allocation15 + $0x200] ss:$8 sps:$4 sm:$0xff]  }
 0x8bd   : > { %15487 = vmatmul.mubr.bf16.gmra.mrb[216].mxu0 %v16897_v55  ;;  %15727 = vmatmul.mubr.bf16.gmra.mrb[200].mxu1 %v16889_v3  ;;  %v19959_v3 = vpop.permute.xlu0 %11650 }
 0x8be   : > { %15490 = vmatprep.mubr.bf16.mxu0 %v16898_v0  ;;  %15730 = vmatprep.mubr.bf16.mxu1 %v16890_v49  ;;  %v16949_v49 = vld [vmem:[#allocation15 + $0x210] ss:$8 sps:$4 sm:$0xff]  }
 0x8c5   : > { %15491 = vmatmul.mubr.bf16.gmra.mrb[220].mxu0 %v16899_v37  ;;  %15731 = vmatmul.mubr.bf16.gmra.mrb[204].mxu1 %v16891_v56  ;;  %v16950_v56 = vld [vmem:[#allocation15 + $0x220] ss:$8 sps:$4 sm:$0xff]  }
 0x8c6   : > { %15494 = vmatprep.mubr.bf16.mxu0 %v16900_v46  ;;  %15734 = vmatprep.mubr.bf16.mxu1 %v16892_v11  ;;  %v19961_v11 = vpop.permute.xlu0 %11660 }
 0x8cd   : > { %15495 = vmatmul.mubr.bf16.gmra.mrb[224].mxu0 %v16901_v19  ;;  %15735 = vmatmul.mubr.bf16.gmra.mrb[208].mxu1 %v16893_v17  ;;  %v19963_v17 = vpop.permute.xlu1 %11655 }
 0x8ce   : > { %15498 = vmatprep.mubr.bf16.mxu0 %v16902_v2  ;;  %15738 = vmatprep.mubr.bf16.mxu1 %v16894_v45  ;;  %v16951_v45 = vld [vmem:[#allocation15 + $0x230] ss:$8 sps:$4 sm:$0xff]  }
 0x8d5   : > { %15499 = vmatmul.mubr.bf16.gmra.mrb[228].mxu0 %v16903_v32  ;;  %15739 = vmatmul.mubr.bf16.gmra.mrb[212].mxu1 %v16895_v29  ;;  %v19965_v29 = vpop.permute.xlu0 %11670 }
 0x8d6   : > { %15502 = vmatprep.mubr.bf16.mxu0 %v16904_v59  ;;  %15742 = vmatprep.mubr.bf16.mxu1 %v16896_v24  ;;  %v16952_v24 = vld [vmem:[#allocation15 + $0x240] ss:$8 sps:$4 sm:$0xff]  }
 0x8dd   : > { %15503 = vmatmul.mubr.bf16.gmra.mrb[232].mxu0 %v16905_v26  ;;  %15743 = vmatmul.mubr.bf16.gmra.mrb[216].mxu1 %v16897_v55  ;;  %v19967_v55 = vpop.permute.xlu1 %11665 }
 0x8de   : > { %15506 = vmatprep.mubr.bf16.mxu0 %v16906_v38  ;;  %15746 = vmatprep.mubr.bf16.mxu1 %v16898_v0  ;;  %21586 = vst [vmem:[#allocation22_spill] sm:$0xff] %v19967_v55  ;;  %v19969_v0 = vpop.permute.xlu0 %11680  ;;  %v9961_v55 = vld [vmem:[%s17614_s22 + $0x108] sm:$0xff] }
 0x8df   : > { %21587 = vst [vmem:[#allocation23_spill] sm:$0xff] %v19969_v0  ;;  %v13444_v0 = vld [vmem:[%s17614_s22 + $0x418] sm:$0xff] }
 0x8e5   : > { %15507 = vmatmul.mubr.bf16.gmra.mrb[236].mxu0 %v16907_v34  ;;  %15747 = vmatmul.mubr.bf16.gmra.mrb[220].mxu1 %v16899_v37  ;;  %v19971_v37 = vpop.permute.xlu1 %11675 }
 0x8e6   : > { %15510 = vmatprep.mubr.bf16.mxu0 %v16908_v31  ;;  %15750 = vmatprep.mubr.bf16.mxu1 %v16900_v46  ;;  %21588 = vst [vmem:[#allocation146_spill] sm:$0xff] %v19971_v37  ;;  %v16953_v46 = vld [vmem:[#allocation15 + $0x250] ss:$8 sps:$4 sm:$0xff]  }
 0x8ed   : > { %15511 = vmatmul.mubr.bf16.gmra.mrb[240].mxu0 %v16909_v4  ;;  %15751 = vmatmul.mubr.bf16.gmra.mrb[224].mxu1 %v16901_v19  ;;  %v16954_v19 = vld [vmem:[#allocation15 + $0x260] ss:$8 sps:$4 sm:$0xff]  }
 0x8ee   : > { %15514 = vmatprep.mubr.bf16.mxu0 %v16910_v54  ;;  %15754 = vmatprep.mubr.bf16.mxu1 %v16902_v2  ;;  %v19973_v2 = vpop.permute.xlu0 %11690 }
 0x8ef   : > { %21589 = vst [vmem:[#allocation147_spill] sm:$0xff] %v19973_v2 }
 0x8f5   : > { %15515 = vmatmul.mubr.bf16.gmra.mrb[244].mxu0 %v16911_v61  ;;  %15755 = vmatmul.mubr.bf16.gmra.mrb[228].mxu1 %v16903_v32  ;;  %v19975_v32 = vpop.permute.xlu1 %11685 }
 0x8f6   : > { %15518 = vmatprep.mubr.bf16.mxu0 %v16912_v27  ;;  %15758 = vmatprep.mubr.bf16.mxu1 %v16904_v59  ;;  %21590 = vst [vmem:[#allocation148_spill] sm:$0xff] %v19975_v32  ;;  %v16955_v59 = vld [vmem:[#allocation15 + $0x270] ss:$8 sps:$4 sm:$0xff]  }
 0x8fd   : > { %15519 = vmatmul.mubr.bf16.gmra.mrb[248].mxu0 %v16913_v6  ;;  %15759 = vmatmul.mubr.bf16.gmra.mrb[232].mxu1 %v16905_v26  ;;  %v16956_v26 = vld [vmem:[#allocation15 + $0x280] ss:$8 sps:$4 sm:$0xff]  }
 0x8fe   : > { %15522 = vmatprep.mubr.bf16.mxu0 %v16914_v43  ;;  %15762 = vmatprep.mubr.bf16.mxu1 %v16906_v38  ;;  %v19977_v38 = vpop.permute.xlu0 %11700 }
 0x8ff   : > { %21591 = vst [vmem:[#allocation149_spill] sm:$0xff] %v19977_v38 }
 0x905   : > { %15523 = vmatmul.mubr.bf16.gmra.mrb[252].mxu0 %v16915_v8  ;;  %15763 = vmatmul.mubr.bf16.gmra.mrb[236].mxu1 %v16907_v34  ;;  %v19979_v34 = vpop.permute.xlu1 %11695 }
 0x906   : > { %15542 = vmatprep.mubr.bf16.mxu0 %v16916_v58  ;;  %15766 = vmatprep.mubr.bf16.mxu1 %v16908_v31  ;;  %21592 = vst [vmem:[#allocation150_spill] sm:$0xff] %v19979_v34  ;;  %v16957_v31 = vld [vmem:[#allocation15 + $0x290] ss:$8 sps:$4 sm:$0xff]  }
 0x907   : > { %v9963_v34 = vld [vmem:[%s17614_s22 + $0x118] sm:$0xff] }
 0x90d   : > { %15543 = vmatmul.mubr.bf16.vlgmr.msra.gmra.mrb[144].mxu0 %v16917_v12  ;;  %15767 = vmatmul.mubr.bf16.gmra.mrb[240].mxu1 %v16909_v4  ;;  %v19981_v4 = vpop.permute.xlu0 %11710 }
 0x90e   : > { %15546 = vmatprep.mubr.bf16.mxu0 %v16918_v22  ;;  %15770 = vmatprep.mubr.bf16.mxu1 %v16910_v54  ;;  %21593 = vst [vmem:[#allocation151_spill] sm:$0xff] %v19981_v4  ;;  %v16958_v54 = vld [vmem:[#allocation15 + $0x2a0] ss:$8 sps:$4 sm:$0xff]  }
 0x915   : > { %15547 = vmatmul.mubr.bf16.gmra.mrb[148].mxu0 %v16919_v28  ;;  %15771 = vmatmul.mubr.bf16.gmra.mrb[244].mxu1 %v16911_v61  ;;  %v19983_v61 = vpop.permute.xlu1 %11705 }
 0x916   : > { %15550 = vmatprep.mubr.bf16.mxu0 %v16920_v51  ;;  %15774 = vmatprep.mubr.bf16.mxu1 %v16912_v27  ;;  %21594 = vst [vmem:[#allocation152_spill] sm:$0xff] %v19983_v61  ;;  %v19985_v27 = vpop.permute.xlu0 %11720 }
 0x917   : > { %21595 = vst [vmem:[#allocation153_spill] sm:$0xff] %v19985_v27  ;;  %v9958_v27 = vld [vmem:[%s17614_s22 + $0xf0] sm:$0xff] }
 0x91d   : > { %15551 = vmatmul.mubr.bf16.gmra.mrb[152].mxu0 %v16921_v9  ;;  %15775 = vmatmul.mubr.bf16.gmra.mrb[248].mxu1 %v16913_v6  ;;  %v19987_v6 = vpop.permute.xlu1 %11715 }
 0x91e   : > { %15554 = vmatprep.mubr.bf16.mxu0 %v16922_v50  ;;  %15778 = vmatprep.mubr.bf16.mxu1 %v16914_v43  ;;  %21596 = vst [vmem:[#allocation154_spill] sm:$0xff] %v19987_v6  ;;  %v16959_v43 = vld [vmem:[#allocation15 + $0x2b0] ss:$8 sps:$4 sm:$0xff]  }
 0x925   : > { %15555 = vmatmul.mubr.bf16.gmra.mrb[156].mxu0 %v16923_v5  ;;  %15779 = vmatmul.mubr.bf16.gmra.mrb[252].mxu1 %v16915_v8  ;;  %v16960_v8 = vld [vmem:[#allocation15 + $0x2c0] ss:$8 sps:$4 sm:$0xff]  }
 0x926   : > { %15558 = vmatprep.mubr.bf16.mxu0 %v16924_v44  ;;  %15798 = vmatprep.mubr.bf16.mxu1 %v16916_v58  ;;  %v19989_v58 = vpop.permute.xlu0 %11730 }
 0x927   : > { %21597 = vst [vmem:[#allocation155_spill] sm:$0xff] %v19989_v58 }
 0x92d   : > { %15559 = vmatmul.mubr.bf16.gmra.mrb[160].mxu0 %v16925_v18  ;;  %15799 = vmatmul.mubr.bf16.vlgmr.msra.gmra.mrb[144].mxu1 %v16917_v12  ;;  %v19991_v12 = vpop.permute.xlu1 %11725 }
 0x92e   : > { %15562 = vmatprep.mubr.bf16.mxu0 %v16926_v60  ;;  %15802 = vmatprep.mubr.bf16.mxu1 %v16918_v22  ;;  %21598 = vst [vmem:[#allocation156_spill] sm:$0xff] %v19991_v12  ;;  %v16961_v22 = vld [vmem:[#allocation15 + $0x2d0] ss:$8 sps:$4 sm:$0xff]  }
 0x935   : > { %15563 = vmatmul.mubr.bf16.gmra.mrb[164].mxu0 %v16927_v25  ;;  %15803 = vmatmul.mubr.bf16.gmra.mrb[148].mxu1 %v16919_v28  ;;  %v16962_v28 = vld [vmem:[#allocation15 + $0x2e0] ss:$8 sps:$4 sm:$0xff]  }
 0x936   : > { %15566 = vmatprep.mubr.bf16.mxu0 %v16928_v39  ;;  %15806 = vmatprep.mubr.bf16.mxu1 %v16920_v51  ;;  %v19993_v51 = vpop.permute.xlu0 %11740 }
 0x937   : > { %21599 = vst [vmem:[#allocation157_spill] sm:$0xff] %v19993_v51 }
 0x93d   : > { %15567 = vmatmul.mubr.bf16.gmra.mrb[168].mxu0 %v16929_v16  ;;  %15807 = vmatmul.mubr.bf16.gmra.mrb[152].mxu1 %v16921_v9  ;;  %v19995_v9 = vpop.permute.xlu1 %11735 }
 0x93e   : > { %15570 = vmatprep.mubr.bf16.mxu0 %v16930_v57  ;;  %15810 = vmatprep.mubr.bf16.mxu1 %v16922_v50  ;;  %21600 = vst [vmem:[#allocation158_spill] sm:$0xff] %v19995_v9  ;;  %v19997_v50 = vld [vmem:[#allocation15 + $0x2f0] ss:$8 sps:$4 sm:$0xff]  }
 0x945   : > { %15571 = vmatmul.mubr.bf16.gmra.mrb[172].mxu0 %v16931_v10  ;;  %15811 = vmatmul.mubr.bf16.gmra.mrb[156].mxu1 %v16923_v5  ;;  %v19999_v5 = vpop.permute.xlu0 %11750 }
 0x946   : > { %15574 = vmatprep.mubr.bf16.mxu0 %v16932_v30  ;;  %15814 = vmatprep.mubr.bf16.mxu1 %v16924_v44  ;;  %21601 = vst [vmem:[#allocation159_spill] sm:$0xff] %v19999_v5  ;;  %v20001_v44 = vld [vmem:[#allocation15 + $0x300] ss:$8 sps:$4 sm:$0xff]  }
 0x947   : > { %v9949_v5 = vld [vmem:[%s17614_s22 + $0xa8] sm:$0xff] }
 0x94d   : > { %15575 = vmatmul.mubr.bf16.gmra.mrb[176].mxu0 %v16933_v52  ;;  %15815 = vmatmul.mubr.bf16.gmra.mrb[160].mxu1 %v16925_v18  ;;  %v20003_v18 = vpop.permute.xlu1 %11745 }
 0x94e   : > { %15578 = vmatprep.mubr.bf16.mxu0 %v16934_v23  ;;  %15818 = vmatprep.mubr.bf16.mxu1 %v16926_v60  ;;  %21602 = vst [vmem:[#allocation160_spill] sm:$0xff] %v20003_v18  ;;  %v20007_v60 = vpop.permute.xlu0 %11760 }
 0x94f   : > { %21603 = vst [vmem:[#allocation161_spill] sm:$0xff] %v20007_v60 }
 0x955   : > { %15579 = vmatmul.mubr.bf16.gmra.mrb[180].mxu0 %v16935_v35  ;;  %15819 = vmatmul.mubr.bf16.gmra.mrb[164].mxu1 %v16927_v25  ;;  %v20009_v25 = vpop.permute.xlu1 %11755 }
 0x956   : > { %15582 = vmatprep.mubr.bf16.mxu0 %v16936_v7  ;;  %15822 = vmatprep.mubr.bf16.mxu1 %v16928_v39  ;;  %21604 = vst [vmem:[#allocation162_spill] sm:$0xff] %v20009_v25  ;;  %v20011_v39 = vld [vmem:[#allocation15 + $0x310] ss:$8 sps:$4 sm:$0xff]   ;;  %v21617_v25 = vld [vmem:[#allocation54_spill] sm:$0xff] }
 0x95d   : > { %15583 = vmatmul.mubr.bf16.gmra.mrb[184].mxu0 %v16937_v40  ;;  %15823 = vmatmul.mubr.bf16.gmra.mrb[168].mxu1 %v16929_v16  ;;  %v20013_v16 = vld [vmem:[#allocation15 + $0x320] ss:$8 sps:$4 sm:$0xff]  }
 0x95e   : > { %15586 = vmatprep.mubr.bf16.mxu0 %v16938_v33  ;;  %15826 = vmatprep.mubr.bf16.mxu1 %v16930_v57  ;;  %v20016_v57 = vpop.permute.xlu0 %11770 }
 0x95f   : > { %21605 = vst [vmem:[#allocation163_spill] sm:$0xff] %v20016_v57 }
 0x965   : > { %15587 = vmatmul.mubr.bf16.gmra.mrb[188].mxu0 %v16939_v1  ;;  %15827 = vmatmul.mubr.bf16.gmra.mrb[172].mxu1 %v16931_v10  ;;  %v20019_v10 = vpop.permute.xlu1 %11765 }
 0x966   : > { %15590 = vmatprep.mubr.bf16.mxu0 %v16940_v20  ;;  %15830 = vmatprep.mubr.bf16.mxu1 %v16932_v30  ;;  %21606 = vst [vmem:[#allocation164_spill] sm:$0xff] %v20019_v10  ;;  %v20021_v30 = vld [vmem:[#allocation15 + $0x330] ss:$8 sps:$4 sm:$0xff]  }
 0x96d   : > { %15591 = vmatmul.mubr.bf16.gmra.mrb[192].mxu0 %v16941_v14  ;;  %15831 = vmatmul.mubr.bf16.gmra.mrb[176].mxu1 %v16933_v52  ;;  %v20023_v52 = vld [vmem:[#allocation15 + $0x340] ss:$8 sps:$4 sm:$0xff]  }
 0x96e   : > { %15594 = vmatprep.mubr.bf16.mxu0 %v16942_v21  ;;  %15834 = vmatprep.mubr.bf16.mxu1 %v16934_v23  ;;  %v20025_v23 = vpop.permute.xlu0 %11780 }
 0x96f   : > { %21607 = vst [vmem:[#allocation165_spill] sm:$0xff] %v20025_v23 }
 0x975   : > { %15595 = vmatmul.mubr.bf16.gmra.mrb[196].mxu0 %v16943_v42  ;;  %15835 = vmatmul.mubr.bf16.gmra.mrb[180].mxu1 %v16935_v35  ;;  %v20027_v35 = vpop.permute.xlu1 %11775 }
 0x976   : > { %15598 = vmatprep.mubr.bf16.mxu0 %v16944_v62  ;;  %15838 = vmatprep.mubr.bf16.mxu1 %v16936_v7  ;;  %21608 = vst [vmem:[#allocation166_spill] sm:$0xff] %v20027_v35  ;;  %v20031_v7 = vld [vmem:[#allocation15 + $0x350] ss:$8 sps:$4 sm:$0xff]  }
 0x97d   : > { %15599 = vmatmul.mubr.bf16.gmra.mrb[200].mxu0 %v16945_v63  ;;  %15839 = vmatmul.mubr.bf16.gmra.mrb[184].mxu1 %v16937_v40  ;;  %v9930_v40 = vld [vmem:[%s17614_s22 + $0x10] sm:$0xff] }
 0x97e   : > { %15602 = vmatprep.mubr.bf16.mxu0 %v16946_v13  ;;  %15842 = vmatprep.mubr.bf16.mxu1 %v16938_v33  ;;  %v9928_v33 = vld [vmem:[%s17614_s22] sm:$0xff] }
 0x985   : > { %15603 = vmatmul.mubr.bf16.gmra.mrb[204].mxu0 %v16947_v15  ;;  %15843 = vmatmul.mubr.bf16.gmra.mrb[188].mxu1 %v16939_v1  ;;  %v20035_v1 = vpop.permute.xlu0 %11790 }
 0x986   : > { %15606 = vmatprep.mubr.bf16.mxu0 %v16948_v47  ;;  %15846 = vmatprep.mubr.bf16.mxu1 %v16940_v20  ;;  %21609 = vst [vmem:[#allocation167_spill] sm:$0xff] %v20035_v1  ;;  %v9931_v20 = vld [vmem:[%s17614_s22 + $0x18] sm:$0xff]  ;;  %v9946_v1 = vld [vmem:[%s17614_s22 + $0x90] sm:$0xff] }
 0x98d   : > { %15607 = vmatmul.mubr.bf16.gmra.mrb[208].mxu0 %v16949_v49  ;;  %15847 = vmatmul.mubr.bf16.gmra.mrb[192].mxu1 %v16941_v14  ;;  %v9929_v14 = vld [vmem:[%s17614_s22 + $0x8] sm:$0xff] }
 0x98e   : > { %15610 = vmatprep.mubr.bf16.mxu0 %v16950_v56  ;;  %15850 = vmatprep.mubr.bf16.mxu1 %v16942_v21  ;;  %v20039_v21 = vld [vmem:[#allocation15 + $0x360] ss:$8 sps:$4 sm:$0xff]  }
 0x995   : > { %15611 = vmatmul.mubr.bf16.gmra.mrb[212].mxu0 %v16951_v45  ;;  %15851 = vmatmul.mubr.bf16.gmra.mrb[196].mxu1 %v16943_v42  ;;  %v20041_v42 = vpop.permute.xlu1 %11785 }
 0x996   : > { %15614 = vmatprep.mubr.bf16.mxu0 %v16952_v24  ;;  %15854 = vmatprep.mubr.bf16.mxu1 %v16944_v62  ;;  %21610 = vst [vmem:[#allocation168_spill] sm:$0xff] %v20041_v42  ;;  %v9934_v62 = vld [vmem:[%s17614_s22 + $0x30] sm:$0xff]  ;;  %v9943_v42 = vld [vmem:[%s17614_s22 + $0x78] sm:$0xff] }
 0x99d   : > { %15615 = vmatmul.mubr.bf16.gmra.mrb[216].mxu0 %v16953_v46  ;;  %15855 = vmatmul.mubr.bf16.gmra.mrb[200].mxu1 %v16945_v63  ;;  %v9932_v63 = vld [vmem:[%s17614_s22 + $0x20] sm:$0xff] }
 0x99e   : > { %15618 = vmatprep.mubr.bf16.mxu0 %v16954_v19  ;;  %15858 = vmatprep.mubr.bf16.mxu1 %v16946_v13  ;;  %v10042_v13 = vmul.f32 0.3, %v9930_v40 }
 0x9a5   : > { %15619 = vmatmul.mubr.bf16.gmra.mrb[220].mxu0 %v16955_v59  ;;  %15859 = vmatmul.mubr.bf16.gmra.mrb[204].mxu1 %v16947_v15  ;;  %v10040_v15 = vmul.f32 0.3, %v9928_v33 }
 0x9a6   : > { %15622 = vmatprep.mubr.bf16.mxu0 %v16956_v26  ;;  %15862 = vmatprep.mubr.bf16.mxu1 %v16948_v47  ;;  %v9935_v47 = vld [vmem:[%s17614_s22 + $0x38] sm:$0xff] }
 0x9ad   : > { %15623 = vmatmul.mubr.bf16.gmra.mrb[224].mxu0 %v16957_v31  ;;  %15863 = vmatmul.mubr.bf16.gmra.mrb[208].mxu1 %v16949_v49  ;;  %v9933_v49 = vld [vmem:[%s17614_s22 + $0x28] sm:$0xff] }
 0x9ae   : > { %15626 = vmatprep.mubr.bf16.mxu0 %v16958_v54  ;;  %15866 = vmatprep.mubr.bf16.mxu1 %v16950_v56  ;;  %v10043_v56 = vmul.f32 0.3, %v9931_v20  ;;  %v9942_v20 = vld [vmem:[%s17614_s22 + $0x70] sm:$0xff] }
 0x9b5   : > { %15627 = vmatmul.mubr.bf16.gmra.mrb[228].mxu0 %v16959_v43  ;;  %15867 = vmatmul.mubr.bf16.gmra.mrb[212].mxu1 %v16951_v45  ;;  %v10041_v45 = vmul.f32 0.3, %v9929_v14  ;;  %v20070_v14 = vpop.permute.xlu1 %11795 }
 0x9b6   : > { %15630 = vmatprep.mubr.bf16.mxu0 %v16960_v8  ;;  %15870 = vmatprep.mubr.bf16.mxu1 %v16952_v24  ;;  %v9938_v24 = vld [vmem:[%s17614_s22 + $0x50] sm:$0xff]  ;;  %21612 = vst [vmem:[#allocation170_spill] sm:$0xff] %v20070_v14 }
 0x9bd   : > { %15631 = vmatmul.mubr.bf16.gmra.mrb[232].mxu0 %v16961_v22  ;;  %15871 = vmatmul.mubr.bf16.gmra.mrb[216].mxu1 %v16953_v46  ;;  %v9936_v46 = vld [vmem:[%s17614_s22 + $0x40] sm:$0xff] }
 0x9be   : > { %15634 = vmatprep.mubr.bf16.mxu0 %v16962_v28  ;;  %15874 = vmatprep.mubr.bf16.mxu1 %v16954_v19  ;;  %v20051_v19 = vmul.f32 0.3, %v9934_v62  ;;  %v20067_v33 = vmul.f32 0.3, %v9936_v46  ;;  %v9941_v46 = vld [vmem:[%s17614_s22 + $0x68] sm:$0xff] }
 0x9c5   : > { %15635 = vmatmul.mubr.bf16.gmra.mrb[236].mxu0 %v19997_v50  ;;  %15875 = vmatmul.mubr.bf16.gmra.mrb[220].mxu1 %v16955_v59  ;;  %v20053_v59 = vmul.f32 0.3, %v9932_v63 }
 0x9c6   : > { %15638 = vmatprep.mubr.bf16.mxu0 %v20001_v44  ;;  %15878 = vmatprep.mubr.bf16.mxu1 %v16956_v26  ;;  %v9939_v26 = vld [vmem:[%s17614_s22 + $0x58] sm:$0xff] }
 0x9cd   : > { %15639 = vmatmul.mubr.bf16.gmra.mrb[240].mxu0 %v20011_v39  ;;  %15879 = vmatmul.mubr.bf16.gmra.mrb[224].mxu1 %v16957_v31  ;;  %v20056_v31 = vld [vmem:[#allocation15 + $0x370] ss:$8 sps:$4 sm:$0xff]  }
 0x9ce   : > { %15642 = vmatprep.mubr.bf16.mxu0 %v20013_v16  ;;  %15882 = vmatprep.mubr.bf16.mxu1 %v16958_v54  ;;  %v20058_v54 = vmul.f32 0.3, %v9935_v47  ;;  %v20073_v47 = vmul.f32 0.3, %v9939_v26  ;;  %v13427_v26 = vld [vmem:[%s17614_s22 + $0x390] sm:$0xff] }
 0x9d5   : > { %15643 = vmatmul.mubr.bf16.gmra.mrb[244].mxu0 %v20021_v30  ;;  %15883 = vmatmul.mubr.bf16.gmra.mrb[228].mxu1 %v16959_v43  ;;  %v20060_v43 = vmul.f32 0.3, %v9933_v49  ;;  %v9940_v49 = vld [vmem:[%s17614_s22 + $0x60] sm:$0xff] }
 0x9d6   : > { %15646 = vmatprep.mubr.bf16.mxu0 %v20023_v52  ;;  %15886 = vmatprep.mubr.bf16.mxu1 %v16960_v8  ;;  %v9937_v8 = vld [vmem:[%s17614_s22 + $0x48] sm:$0xff]  ;;  %v20088_v18 = vmul.f32 0.3, %v9940_v49 }
 0x9d7   : > { %v20078_v23 = vmul.f32 0.3, %v9937_v8  ;;  %v13425_v8 = vld [vmem:[%s17614_s22 + $0x380] sm:$0xff] }
 0x9dd   : > { %15647 = vmatmul.mubr.bf16.gmra.mrb[248].mxu0 %v20031_v7  ;;  %15887 = vmatmul.mubr.bf16.gmra.mrb[232].mxu1 %v16961_v22  ;;  %v20063_v22 = vpop.permute.xlu0 %11800 }
 0x9de   : > { %15650 = vmatprep.mubr.bf16.mxu0 %v20039_v21  ;;  %15890 = vmatprep.mubr.bf16.mxu1 %v16962_v28  ;;  %21611 = vst [vmem:[#allocation169_spill] sm:$0xff] %v20063_v22  ;;  %v20065_v28 = vmul.f32 0.3, %v9938_v24 }
 0x9e0   : > { %v15544_v40 = vpop.f32.mrb[144].mxu0 }
 0x9e1   : > { %v9818_v62 = vadd.f32 %v15544_v40, %v18836_v36  ;;  %v8697_v63 = vpop.f32.mrb[145].mxu0  ;;  %v20083_v36 = vmul.f32 0.3, %v9942_v20  ;;  %v9944_v40 = vld [vmem:[%s17614_s22 + $0x80] sm:$0xff]  ;;  %v20104_v20 = vmul.f32 0.3, %v13427_v26 }
 0x9e2   : > { %v9816_v22 = vadd.f32 %v18828_v41, %v8697_v63  ;;  %v15545_v24 = vpop.f32.mrb[146].mxu0  ;;  %v20090_v41 = vmul.f32 0.3, %v9943_v42  ;;  %v9947_v63 = vld [vmem:[%s17614_s22 + $0x98] sm:$0xff] }
 0x9e3   : > { %v10154_v10 = vadd.f32 %v10042_v13, %v9818_v62  ;;  %v9819_v14 = vadd.f32 %v15545_v24, %v19063_v53  ;;  %v8700_v35 = vpop.f32.mrb[147].mxu0  ;;  %v20096_v53 = vmul.f32 0.3, %v9941_v46  ;;  %v9950_v24 = vld [vmem:[%s17614_s22 + $0xb0] sm:$0xff]  ;;  %v21615_v46 = vld [vmem:[#allocation25_spill] sm:$0xff] }
 0x9e4   : > { %v10152_v60 = vadd.f32 %v10040_v15, %v9816_v22  ;;  %v9817_v57 = vadd.f32 %v19055_v48, %v8700_v35  ;;  %v20098_v15 = vmul.f32 0.3, %v9946_v1  ;;  %v13428_v48 = vld [vmem:[%s17614_s22 + $0x398] sm:$0xff]  ;;  %v20101_v35 = vpop.permute.xlu0 %11810  ;;  %v20139_v51 = vmul.f32 0.3, %v9950_v24 }
 0x9e5   : > { %v10266_v13 = vmax.f32 %v10154_v10, 0.0  ;;  %v10155_v62 = vadd.f32 %v10043_v56, %v9819_v14  ;;  %15651 = vmatmul.mubr.bf16.gmra.mrb[252].mxu0 %v20056_v31  ;;  %15891 = vmatmul.mubr.bf16.gmra.mrb[236].mxu1 %v19997_v50  ;;  %21613 = vst [vmem:[#allocation171_spill] sm:$0xff] %v20101_v35  ;;  %v20106_v10 = vmul.f32 0.3, %v9944_v40  ;;  %v9945_v56 = vld [vmem:[%s17614_s22 + $0x88] sm:$0xff]  ;;  %v20109_v14 = vpop.permute.xlu1 %11805  ;;  %v9951_v35 = vld [vmem:[%s17614_s22 + $0xb8] sm:$0xff] }
 0x9e6   : > { %v10264_v42 = vmax.f32 %v10152_v60, 0.0  ;;  %v10153_v22 = vadd.f32 %v10041_v45, %v9817_v57  ;;  %15894 = vmatprep.mubr.bf16.mxu1 %v20001_v44  ;;  %21614 = vst [vmem:[#allocation172_spill] sm:$0xff] %v20109_v14  ;;  %v20116_v60 = vmul.f32 0.3, %v13425_v8  ;;  %v20118_v44 = vmul.f32 0.3, %v9947_v63 }
 0x9e7   : > { %10378 = vst [vmem:[%s20113_s21 + $0x10] sm:$0xff] %v10266_v13  ;;  %v10267_v50 = vmax.f32 %v10155_v62, 0.0  ;;  %v13426_v57 = vld [vmem:[%s17614_s22 + $0x388] sm:$0xff]  ;;  %v20122_v49 = vmul.f32 0.3, %v13428_v48  ;;  %v13431_v8 = vld [vmem:[%s17614_s22 + $0x3b0] sm:$0xff] }
 0x9e8   : > { %10376 = vst [vmem:[%s20113_s21] sm:$0xff] %v10264_v42  ;;  %v10265_v1 = vmax.f32 %v10153_v22, 0.0  ;;  %v15548_v45 = vpop.f32.mrb[148].mxu0  ;;  %v20127_v13 = vmul.f32 0.3, %v9945_v56  ;;  %v9948_v63 = vld [vmem:[%s17614_s22 + $0xa0] sm:$0xff]  ;;  %v21616_v62 = vld [vmem:[#allocation24_spill] sm:$0xff] }
 0x9e9   : > { %10379 = vst [vmem:[%s20113_s21 + $0x18] sm:$0xff] %v10267_v50  ;;  %v9822_v26 = vadd.f32 %v15548_v45, %v21615_v46  ;;  %v8713_v40 = vpop.f32.mrb[149].mxu0  ;;  %v20133_v22 = vmul.f32 0.3, %v13426_v57  ;;  %v13429_v48 = vld [vmem:[%s17614_s22 + $0x3a0] sm:$0xff]  ;;  %v13432_v56 = vld [vmem:[%s17614_s22 + $0x3b8] sm:$0xff] }
 0x9ea   : > { %10377 = vst [vmem:[%s20113_s21 + $0x8] sm:$0xff] %v10265_v1  ;;  %v9820_v14 = vadd.f32 %v21616_v62, %v8713_v40  ;;  %v15549_v42 = vpop.f32.mrb[150].mxu0  ;;  %v20143_v1 = vpop.permute.xlu0 %11820  ;;  %v21619_v62 = vld [vmem:[#allocation52_spill] sm:$0xff]  ;;  %v20147_v57 = vmul.f32 0.3, %v13431_v8 }
 0x9eb   : > { %v10158_v50 = vadd.f32 %v20051_v19, %v9822_v26  ;;  %v9823_v45 = vadd.f32 %v15549_v42, %v21617_v25  ;;  %v8716_v46 = vpop.f32.mrb[151].mxu0  ;;  %21618 = vst [vmem:[#allocation25_spill] sm:$0xff] %v20143_v1  ;;  %v20149_v9 = vmul.f32 0.3, %v9948_v63  ;;  %v13430_v19 = vld [vmem:[%s17614_s22 + $0x3a8] sm:$0xff]  ;;  %v9954_v25 = vld [vmem:[%s17614_s22 + $0xd0] sm:$0xff]  ;;  %v20153_v26 = vpop.permute.xlu1 %11815 }
 0x9ec   : > { %v10156_v40 = vadd.f32 %v20053_v59, %v9820_v14  ;;  %v9821_v12 = vadd.f32 %v21619_v62, %v8716_v46  ;;  %21620 = vst [vmem:[#allocation24_spill] sm:$0xff] %v20153_v26  ;;  %v20157_v59 = vmul.f32 0.3, %v13429_v48  ;;  %v20159_v14 = vmul.f32 0.3, %v9951_v35  ;;  %v13435_v8 = vld [vmem:[%s17614_s22 + $0x3d0] sm:$0xff] }
 0x9ed   : > { %v10270_v24 = vmax.f32 %v10158_v50, 0.0  ;;  %v10159_v42 = vadd.f32 %v20058_v54, %v9823_v45  ;;  %15895 = vmatmul.mubr.bf16.gmra.mrb[240].mxu1 %v20011_v39  ;;  %v20164_v62 = vmul.f32 0.3, %v13432_v56  ;;  %v20166_v50 = vmul.f32 0.3, %v9949_v5  ;;  %v9952_v54 = vld [vmem:[%s17614_s22 + $0xc0] sm:$0xff] }
 0x9ee   : > { %v10268_v63 = vmax.f32 %v10156_v40, 0.0  ;;  %v10157_v46 = vadd.f32 %v20060_v43, %v9821_v12  ;;  %15898 = vmatprep.mubr.bf16.mxu1 %v20013_v16  ;;  %v20170_v35 = vmul.f32 0.3, %v13430_v19  ;;  %v20172_v48 = vmul.f32 0.3, %v9954_v25  ;;  %v13433_v45 = vld [vmem:[%s17614_s22 + $0x3c0] sm:$0xff] }
 0x9ef   : > { %10382 = vst [vmem:[%s20113_s21 + $0x30] sm:$0xff] %v10270_v24  ;;  %v10271_v39 = vmax.f32 %v10159_v42, 0.0  ;;  %v20176_v43 = vmul.f32 0.3, %v13435_v8  ;;  %v9955_v5 = vld [vmem:[%s17614_s22 + $0xd8] sm:$0xff]  ;;  %v21621_v56 = vld [vmem:[#allocation27_spill] sm:$0xff]  ;;  %v20185_v42 = vpop.permute.xlu0 %11830 }
 0x9f0   : > { %10380 = vst [vmem:[%s20113_s21 + $0x20] sm:$0xff] %v10268_v63  ;;  %v10269_v12 = vmax.f32 %v10157_v46, 0.0  ;;  %v15552_v16 = vpop.f32.mrb[152].mxu0  ;;  %v20181_v24 = vmul.f32 0.3, %v9952_v54  ;;  %v13436_v19 = vld [vmem:[%s17614_s22 + $0x3d8] sm:$0xff] }
 0x9f1   : > { %10383 = vst [vmem:[%s20113_s21 + $0x38] sm:$0xff] %v10271_v39  ;;  %v9826_v40 = vadd.f32 %v15552_v16, %v21621_v56  ;;  %v8729_v1 = vpop.f32.mrb[153].mxu0  ;;  %v9953_v25 = vld [vmem:[%s17614_s22 + $0xc8] sm:$0xff]  ;;  %21622 = vst [vmem:[#allocation54_spill] sm:$0xff] %v20185_v42  ;;  %v20189_v8 = vmul.f32 0.3, %v13433_v45  ;;  %v20193_v16 = vpop.permute.xlu1 %11825 }
 0x9f2   : > { %10381 = vst [vmem:[%s20113_s21 + $0x28] sm:$0xff] %v10269_v12  ;;  %v21623_v63 = vld [vmem:[#allocation26_spill] sm:$0xff]  ;;  %v15553_v26 = vpop.f32.mrb[154].mxu0  ;;  %21624 = vst [vmem:[#allocation52_spill] sm:$0xff] %v20193_v16  ;;  %v21625_v56 = vld [vmem:[#allocation57_spill] sm:$0xff] }
 0x9f3   : > { %v9824_v46 = vadd.f32 %v21623_v63, %v8729_v1  ;;  %v13434_v39 = vld [vmem:[%s17614_s22 + $0x3c8] sm:$0xff]  ;;  %v10162_v54 = vadd.f32 %v20065_v28, %v9826_v40  ;;  %v9827_v58 = vadd.f32 %v15553_v26, %v21625_v56  ;;  %v8732_v61 = vpop.f32.mrb[155].mxu0  ;;  %v20197_v6 = vmul.f32 0.3, %v9955_v5  ;;  %v13439_v12 = vld [vmem:[%s17614_s22 + $0x3f0] sm:$0xff]  ;;  %v9956_v42 = vld [vmem:[%s17614_s22 + $0xe0] sm:$0xff] }
 0x9f4   : > { %v21626_v63 = vld [vmem:[#allocation55_spill] sm:$0xff]  ;;  %v20203_v45 = vmul.f32 0.3, %v13436_v19  ;;  %v20205_v4 = vmul.f32 0.3, %v9953_v25  ;;  %v13437_v16 = vld [vmem:[%s17614_s22 + $0x3e0] sm:$0xff] }
 0x9f5   : > { %v10160_v1 = vadd.f32 %v20067_v33, %v9824_v46  ;;  %v9825_v38 = vadd.f32 %v21626_v63, %v8732_v61  ;;  %v9959_v28 = vld [vmem:[%s17614_s22 + $0xf8] sm:$0xff]  ;;  %v10274_v40 = vmax.f32 %v10162_v54, 0.0  ;;  %v10163_v26 = vadd.f32 %v20073_v47, %v9827_v58  ;;  %15899 = vmatmul.mubr.bf16.gmra.mrb[244].mxu1 %v20021_v30  ;;  %v9957_v58 = vld [vmem:[%s17614_s22 + $0xe8] sm:$0xff]  ;;  %v9962_v56 = vld [vmem:[%s17614_s22 + $0x110] sm:$0xff] }
 0x9f6   : > { %v20211_v5 = vmul.f32 0.3, %v13434_v39  ;;  %v20213_v33 = vmul.f32 0.3, %v9958_v27  ;;  %v13440_v61 = vld [vmem:[%s17614_s22 + $0x3f8] sm:$0xff]  ;;  %15902 = vmatprep.mubr.bf16.mxu1 %v20023_v52  ;;  %v13438_v39 = vld [vmem:[%s17614_s22 + $0x3e8] sm:$0xff] }
 0x9f7   : > { %v10272_v46 = vmax.f32 %v10160_v1, 0.0  ;;  %v10161_v19 = vadd.f32 %v20078_v23, %v9825_v38  ;;  %v20218_v25 = vmul.f32 0.3, %v13439_v12  ;;  %v20220_v54 = vmul.f32 0.3, %v9956_v42  ;;  %10386 = vst [vmem:[%s20113_s21 + $0x50] sm:$0xff] %v10274_v40  ;;  %v20229_v38 = vpop.permute.xlu0 %11840  ;;  %v20236_v1 = vpop.permute.xlu1 %11835 }
 0x9f8   : > { %v10275_v30 = vmax.f32 %v10163_v26, 0.0  ;;  %v20224_v47 = vmul.f32 0.3, %v13437_v16  ;;  %v20226_v27 = vmul.f32 0.3, %v9959_v28  ;;  %21627 = vst [vmem:[#allocation27_spill] sm:$0xff] %v20229_v38 }
 0x9f9   : > { %10384 = vst [vmem:[%s20113_s21 + $0x40] sm:$0xff] %v10272_v46  ;;  %v10273_v52 = vmax.f32 %v10161_v19, 0.0  ;;  %v15556_v23 = vpop.f32.mrb[156].mxu0  ;;  %v20232_v42 = vmul.f32 0.3, %v13440_v61  ;;  %v13443_v12 = vld [vmem:[%s17614_s22 + $0x410] sm:$0xff] }
 0x9fa   : > { %21628 = vst [vmem:[#allocation26_spill] sm:$0xff] %v20236_v1  ;;  %10387 = vst [vmem:[%s20113_s21 + $0x58] sm:$0xff] %v10275_v30  ;;  %v21629_v16 = vld [vmem:[#allocation29_spill] sm:$0xff]  ;;  %v8745_v28 = vpop.f32.mrb[157].mxu0  ;;  %v20240_v40 = vmul.f32 0.3, %v9957_v58 }
 0x9fb   : > { %v9830_v63 = vadd.f32 %v15556_v23, %v21629_v16  ;;  %v9960_v26 = vld [vmem:[%s17614_s22 + $0x100] sm:$0xff]  ;;  %10385 = vst [vmem:[%s20113_s21 + $0x48] sm:$0xff] %v10273_v52  ;;  %v21630_v46 = vld [vmem:[#allocation28_spill] sm:$0xff]  ;;  %v15557_v32 = vpop.f32.mrb[158].mxu0  ;;  %v20246_v61 = vmul.f32 0.3, %v13438_v39 }
 0x9fc   : > { %v13441_v38 = vld [vmem:[%s17614_s22 + $0x400] sm:$0xff]  ;;  %v9828_v19 = vadd.f32 %v21630_v46, %v8745_v28  ;;  %v21631_v30 = vld [vmem:[#allocation60_spill] sm:$0xff]  ;;  %v8748_v16 = vpop.f32.mrb[159].mxu0  ;;  %v20252_v2 = vmul.f32 0.3, %v9962_v56  ;;  %v21632_v28 = vld [vmem:[#allocation59_spill] sm:$0xff] }
 0x9fd   : > { %v10166_v1 = vadd.f32 %v20083_v36, %v9830_v63  ;;  %v9831_v23 = vadd.f32 %v15557_v32, %v21631_v30  ;;  %v20254_v58 = vmul.f32 0.3, %v13443_v12  ;;  %v9829_v39 = vadd.f32 %v21632_v28, %v8748_v16  ;;  %v13442_v36 = vld [vmem:[%s17614_s22 + $0x408] sm:$0xff]  ;;  %15903 = vmatmul.mubr.bf16.gmra.mrb[248].mxu1 %v20031_v7  ;;  %v9966_v12 = vld [vmem:[%s17614_s22 + $0x130] sm:$0xff]  ;;  %v20277_v30 = vpop.permute.xlu0 %11850  ;;  %v20279_v7 = vpop.permute.xlu1 %11845  ;;  %v9967_v16 = vld [vmem:[%s17614_s22 + $0x138] sm:$0xff] }
 0x9fe   : > { %v10164_v52 = vadd.f32 %v20088_v18, %v9828_v19  ;;  %v20259_v46 = vmul.f32 0.3, %v9960_v26  ;;  %v20261_v37 = vmul.f32 0.3, %v13441_v38  ;;  %v20266_v56 = vmul.f32 0.3, %v9963_v34  ;;  %15906 = vmatprep.mubr.bf16.mxu1 %v20039_v21 }
 0x9ff   : > { %v10278_v63 = vmax.f32 %v10166_v1, 0.0  ;;  %v10167_v32 = vadd.f32 %v20090_v41, %v9831_v23  ;;  %v20268_v18 = vmul.f32 0.3, %v13444_v0  ;;  %v10165_v26 = vadd.f32 %v20096_v53, %v9829_v39  ;;  %v13447_v1 = vld [vmem:[%s17614_s22 + $0x430] sm:$0xff]  ;;  %v9964_v41 = vld [vmem:[%s17614_s22 + $0x120] sm:$0xff]  ;;  %21636 = vst [vmem:[#allocation28_spill] sm:$0xff] %v20277_v30 }
 0xa00   : > { %21633 = vst [vmem:[#allocation57_spill] sm:$0xff] %v20266_v56  ;;  %v10276_v19 = vmax.f32 %v10164_v52, 0.0  ;;  %v20273_v38 = vmul.f32 0.3, %v9961_v55  ;;  %21637 = vst [vmem:[#allocation60_spill] sm:$0xff] %v20279_v7  ;;  %v13445_v23 = vld [vmem:[%s17614_s22 + $0x420] sm:$0xff] }
 0xa01   : > { %21634 = vst [vmem:[#allocation55_spill] sm:$0xff] %v20268_v18  ;;  %10390 = vst [vmem:[%s20113_s21 + $0x70] sm:$0xff] %v10278_v63  ;;  %v10279_v34 = vmax.f32 %v10167_v32, 0.0  ;;  %v20282_v0 = vmul.f32 0.3, %v13442_v36  ;;  %v10277_v53 = vmax.f32 %v10165_v26, 0.0 }
 0xa02   : > { %21635 = vst [vmem:[#allocation29_spill] sm:$0xff] %v20273_v38  ;;  %10388 = vst [vmem:[%s20113_s21 + $0x60] sm:$0xff] %v10276_v19  ;;  %v15560_v52 = vpop.f32.mrb[160].mxu0  ;;  %v15800_v21 = vpop.f32.mrb[144].mxu1  ;;  %v20287_v28 = vmul.f32 0.3, %v9966_v12 }
 0xa03   : > { %21638 = vst [vmem:[#allocation59_spill] sm:$0xff] %v20282_v0  ;;  %10391 = vst [vmem:[%s20113_s21 + $0x78] sm:$0xff] %v10279_v34  ;;  %v21640_v55 = vld [vmem:[#allocation31_spill] sm:$0xff]  ;;  %v21641_v38 = vld [vmem:[#allocation116_spill] sm:$0xff]  ;;  %v8761_v18 = vpop.f32.mrb[161].mxu0  ;;  %v11019_v7 = vpop.f32.mrb[145].mxu1 }
 0xa04   : > { %21639 = vst [vmem:[#allocation173_spill] sm:$0xff] %v20287_v28  ;;  %v9834_v39 = vadd.f32 %v15560_v52, %v21640_v55  ;;  %v12140_v30 = vadd.f32 %v15800_v21, %v21641_v38  ;;  %v20292_v63 = vmul.f32 0.3, %v13447_v1  ;;  %v20294_v32 = vmul.f32 0.3, %v9964_v41  ;;  %10389 = vst [vmem:[%s20113_s21 + $0x68] sm:$0xff] %v10277_v53 }
 0xa05   : > { %v21642_v36 = vld [vmem:[#allocation30_spill] sm:$0xff]  ;;  %v15561_v56 = vpop.f32.mrb[162].mxu0  ;;  %v15801_v12 = vpop.f32.mrb[146].mxu1  ;;  %v20299_v28 = vmul.f32 0.3, %v13445_v23  ;;  %v21645_v52 = vld [vmem:[#allocation64_spill] sm:$0xff]  ;;  %15907 = vmatmul.mubr.bf16.gmra.mrb[252].mxu1 %v20056_v31 }
 0xa06   : > { %v9832_v0 = vadd.f32 %v21642_v36, %v8761_v18  ;;  %v21643_v19 = vld [vmem:[#allocation114_spill] sm:$0xff]  ;;  %v20301_v34 = vmul.f32 0.3, %v9967_v16  ;;  %v10170_v38 = vadd.f32 %v20098_v15, %v9834_v39  ;;  %v12476_v1 = vadd.f32 %v20104_v20, %v12140_v30  ;;  %v21646_v21 = vld [vmem:[#allocation140_spill] sm:$0xff]  ;;  %v8764_v55 = vpop.f32.mrb[163].mxu0  ;;  %v11022_v18 = vpop.f32.mrb[147].mxu1 }
 0xa07   : > { %v12138_v26 = vadd.f32 %v21643_v19, %v11019_v7  ;;  %v9835_v41 = vadd.f32 %v15561_v56, %v21645_v52  ;;  %v12141_v53 = vadd.f32 %v15801_v12, %v21646_v21  ;;  %v21647_v36 = vld [vmem:[#allocation62_spill] sm:$0xff]  ;;  %v21648_v19 = vld [vmem:[#allocation139_spill] sm:$0xff]  ;;  %v13448_v15 = vld [vmem:[%s17614_s22 + $0x438] sm:$0xff] }
 0xa08   : > { %21644 = vst [vmem:[#allocation31_spill] sm:$0xff] %v20301_v34  ;;  %v10168_v7 = vadd.f32 %v20106_v10, %v9832_v0  ;;  %v9833_v16 = vadd.f32 %v21647_v36, %v8764_v55  ;;  %v12139_v34 = vadd.f32 %v21648_v19, %v11022_v18  ;;  %v10282_v20 = vmax.f32 %v10170_v38, 0.0  ;;  %v9965_v10 = vld [vmem:[%s17614_s22 + $0x128] sm:$0xff]  ;;  %v9970_v38 = vld [vmem:[%s17614_s22 + $0x150] sm:$0xff]  ;;  %v15804_v55 = vpop.f32.mrb[148].mxu1 }
 0xa09   : > { %v12474_v23 = vadd.f32 %v20116_v60, %v12138_v26  ;;  %v12588_v30 = vmax.f32 %v12476_v1, 0.0  ;;  %v10171_v56 = vadd.f32 %v20118_v44, %v9835_v41  ;;  %v12477_v39 = vadd.f32 %v20122_v49, %v12141_v53  ;;  %v13446_v52 = vld [vmem:[%s17614_s22 + $0x428] sm:$0xff]  ;;  %v20320_v1 = vpop.permute.xlu0 %11860  ;;  %v20322_v44 = vpop.permute.xlu1 %11855  ;;  %v13451_v21 = vld [vmem:[%s17614_s22 + $0x450] sm:$0xff]  ;;  %v9968_v53 = vld [vmem:[%s17614_s22 + $0x140] sm:$0xff] }
 0xa0a   : > { %v10280_v60 = vmax.f32 %v10168_v7, 0.0  ;;  %v10169_v26 = vadd.f32 %v20127_v13, %v9833_v16  ;;  %v12475_v12 = vadd.f32 %v20133_v22, %v12139_v34  ;;  %10394 = vst [vmem:[%s20113_s21 + $0x90] sm:$0xff] %v10282_v20  ;;  %v20326_v41 = vmul.f32 0.3, %v13448_v15  ;;  %v15564_v34 = vpop.f32.mrb[164].mxu0  ;;  %v21649_v7 = vld [vmem:[#allocation33_spill] sm:$0xff] }
 0xa0b   : > { %v12586_v0 = vmax.f32 %v12474_v23, 0.0  ;;  %13539 = vst [vmem:[%s20113_s21 + $0x390] sm:$0xff] %v12588_v30  ;;  %v10283_v31 = vmax.f32 %v10171_v56, 0.0  ;;  %v12589_v49 = vmax.f32 %v12477_v39, 0.0  ;;  %v20332_v18 = vmul.f32 0.3, %v9965_v10 }
 0xa0c   : > { %10392 = vst [vmem:[%s20113_s21 + $0x80] sm:$0xff] %v10280_v60  ;;  %v10281_v13 = vmax.f32 %v10169_v26, 0.0  ;;  %v12587_v22 = vmax.f32 %v12475_v12, 0.0  ;;  %v9838_v23 = vadd.f32 %v15564_v34, %v21649_v7  ;;  %v21650_v36 = vld [vmem:[#allocation120_spill] sm:$0xff]  ;;  %v8777_v19 = vpop.f32.mrb[165].mxu0  ;;  %v11035_v15 = vpop.f32.mrb[149].mxu1 }
 0xa0d   : > { %13537 = vst [vmem:[%s20113_s21 + $0x380] sm:$0xff] %v12586_v0  ;;  %10395 = vst [vmem:[%s20113_s21 + $0x98] sm:$0xff] %v10283_v31  ;;  %v12144_v16 = vadd.f32 %v15804_v55, %v21650_v36  ;;  %v20338_v20 = vmul.f32 0.3, %v13446_v52  ;;  %v20340_v30 = vmul.f32 0.3, %v9970_v38 }
 0xa0e   : > { %13540 = vst [vmem:[%s20113_s21 + $0x398] sm:$0xff] %v12589_v49  ;;  %10393 = vst [vmem:[%s20113_s21 + $0x88] sm:$0xff] %v10281_v13  ;;  %v21651_v56 = vld [vmem:[#allocation32_spill] sm:$0xff]  ;;  %v21652_v60 = vld [vmem:[#allocation118_spill] sm:$0xff]  ;;  %v15565_v0 = vpop.f32.mrb[166].mxu0  ;;  %v15805_v26 = vpop.f32.mrb[150].mxu1  ;;  %v10174_v49 = vadd.f32 %v20139_v51, %v9838_v23 }
 0xa0f   : > { %13538 = vst [vmem:[%s20113_s21 + $0x388] sm:$0xff] %v12587_v22  ;;  %v9836_v39 = vadd.f32 %v21651_v56, %v8777_v19  ;;  %v12142_v10 = vadd.f32 %v21652_v60, %v11035_v15  ;;  %v20346_v12 = vmul.f32 0.3, %v13451_v21  ;;  %v20348_v31 = vmul.f32 0.3, %v9968_v53  ;;  %v21653_v38 = vld [vmem:[#allocation67_spill] sm:$0xff] }
 0xa10   : > { %v12480_v52 = vadd.f32 %v20147_v57, %v12144_v16  ;;  %v9839_v34 = vadd.f32 %v15565_v0, %v21653_v38  ;;  %v21654_v13 = vld [vmem:[#allocation142_spill] sm:$0xff]  ;;  %v8780_v55 = vpop.f32.mrb[167].mxu0  ;;  %v11038_v7 = vpop.f32.mrb[151].mxu1  ;;  %v21655_v19 = vld [vmem:[#allocation65_spill] sm:$0xff]  ;;  %v10286_v57 = vmax.f32 %v10174_v49, 0.0 }
 0xa11   : > { %v12145_v22 = vadd.f32 %v15805_v26, %v21654_v13  ;;  %v10172_v36 = vadd.f32 %v20149_v9, %v9836_v39  ;;  %v12478_v21 = vadd.f32 %v20157_v59, %v12142_v10  ;;  %v9837_v53 = vadd.f32 %v21655_v19, %v8780_v55  ;;  %v21656_v15 = vld [vmem:[#allocation141_spill] sm:$0xff]  ;;  %v9969_v38 = vld [vmem:[%s17614_s22 + $0x148] sm:$0xff]  ;;  %v20366_v13 = vpop.permute.xlu0 %11870  ;;  %v20368_v49 = vpop.permute.xlu1 %11865 }
 0xa12   : > { %v12143_v56 = vadd.f32 %v21656_v15, %v11038_v7  ;;  %v13449_v51 = vld [vmem:[%s17614_s22 + $0x440] sm:$0xff]  ;;  %v12592_v23 = vmax.f32 %v12480_v52, 0.0  ;;  %v10175_v16 = vadd.f32 %v20159_v14, %v9839_v34  ;;  %v9971_v0 = vld [vmem:[%s17614_s22 + $0x158] sm:$0xff]  ;;  %10398 = vst [vmem:[%s20113_s21 + $0xb0] sm:$0xff] %v10286_v57  ;;  %v13450_v34 = vld [vmem:[%s17614_s22 + $0x448] sm:$0xff]  ;;  %v15568_v55 = vpop.f32.mrb[168].mxu0 }
 0xa13   : > { %v12481_v60 = vadd.f32 %v20164_v62, %v12145_v22  ;;  %v10284_v9 = vmax.f32 %v10172_v36, 0.0  ;;  %v12590_v59 = vmax.f32 %v12478_v21, 0.0  ;;  %v10173_v39 = vadd.f32 %v20166_v50, %v9837_v53  ;;  %v13452_v26 = vld [vmem:[%s17614_s22 + $0x458] sm:$0xff]  ;;  %v9974_v22 = vld [vmem:[%s17614_s22 + $0x170] sm:$0xff]  ;;  %v15808_v7 = vpop.f32.mrb[152].mxu1 }
 0xa14   : > { %v12479_v10 = vadd.f32 %v20170_v35, %v12143_v56  ;;  %13543 = vst [vmem:[%s20113_s21 + $0x3b0] sm:$0xff] %v12592_v23  ;;  %v10287_v14 = vmax.f32 %v10175_v16, 0.0  ;;  %v20372_v52 = vmul.f32 0.3, %v13449_v51  ;;  %v20378_v36 = vmul.f32 0.3, %v9971_v0 }
 0xa15   : > { %v12593_v62 = vmax.f32 %v12481_v60, 0.0  ;;  %10396 = vst [vmem:[%s20113_s21 + $0xa0] sm:$0xff] %v10284_v9  ;;  %13541 = vst [vmem:[%s20113_s21 + $0x3a0] sm:$0xff] %v12590_v59  ;;  %v10285_v50 = vmax.f32 %v10173_v39, 0.0  ;;  %v21657_v21 = vld [vmem:[#allocation35_spill] sm:$0xff]  ;;  %v21658_v53 = vld [vmem:[#allocation124_spill] sm:$0xff] }
 0xa16   : > { %v12591_v35 = vmax.f32 %v12479_v10, 0.0  ;;  %10399 = vst [vmem:[%s20113_s21 + $0xb8] sm:$0xff] %v10287_v14  ;;  %v9842_v19 = vadd.f32 %v15568_v55, %v21657_v21  ;;  %v12148_v15 = vadd.f32 %v15808_v7, %v21658_v53  ;;  %v8793_v56 = vpop.f32.mrb[169].mxu0  ;;  %v11051_v51 = vpop.f32.mrb[153].mxu1  ;;  %v20384_v57 = vmul.f32 0.3, %v13452_v26 }
 0xa17   : > { %13544 = vst [vmem:[%s20113_s21 + $0x3b8] sm:$0xff] %v12593_v62  ;;  %v20386_v23 = vmul.f32 0.3, %v9969_v38  ;;  %10397 = vst [vmem:[%s20113_s21 + $0xa8] sm:$0xff] %v10285_v50  ;;  %v21659_v16 = vld [vmem:[#allocation34_spill] sm:$0xff]  ;;  %v15569_v59 = vpop.f32.mrb[170].mxu0 }
 0xa18   : > { %13542 = vst [vmem:[%s20113_s21 + $0x3a8] sm:$0xff] %v12591_v35  ;;  %v9840_v60 = vadd.f32 %v21659_v16, %v8793_v56  ;;  %v21660_v9 = vld [vmem:[#allocation122_spill] sm:$0xff]  ;;  %v15809_v39 = vpop.f32.mrb[154].mxu1  ;;  %v20392_v10 = vmul.f32 0.3, %v13450_v34  ;;  %v10178_v62 = vadd.f32 %v20172_v48, %v9842_v19  ;;  %v12484_v26 = vadd.f32 %v20176_v43, %v12148_v15  ;;  %v21662_v50 = vld [vmem:[#allocation144_spill] sm:$0xff] }
 0xa19   : > { %v12146_v0 = vadd.f32 %v21660_v9, %v11051_v51  ;;  %v20394_v14 = vmul.f32 0.3, %v9974_v22  ;;  %v21661_v38 = vld [vmem:[#allocation70_spill] sm:$0xff]  ;;  %v12149_v35 = vadd.f32 %v15809_v39, %v21662_v50  ;;  %v8796_v7 = vpop.f32.mrb[171].mxu0  ;;  %v11054_v21 = vpop.f32.mrb[155].mxu1  ;;  %v21663_v56 = vld [vmem:[#allocation69_spill] sm:$0xff] }
 0xa1a   : > { %v9843_v55 = vadd.f32 %v15569_v59, %v21661_v38  ;;  %v10176_v53 = vadd.f32 %v20181_v24, %v9840_v60  ;;  %v9841_v22 = vadd.f32 %v21663_v56, %v8796_v7  ;;  %v21664_v51 = vld [vmem:[#allocation143_spill] sm:$0xff]  ;;  %v10290_v43 = vmax.f32 %v10178_v62, 0.0  ;;  %v9972_v59 = vld [vmem:[%s17614_s22 + $0x160] sm:$0xff]  ;;  %v9975_v38 = vld [vmem:[%s17614_s22 + $0x178] sm:$0xff]  ;;  %v20412_v50 = vpop.permute.xlu0 %11880  ;;  %v20414_v62 = vpop.permute.xlu1 %11875 }
 0xa1b   : > { %v12482_v34 = vadd.f32 %v20189_v8, %v12146_v0  ;;  %v12147_v16 = vadd.f32 %v21664_v51, %v11054_v21  ;;  %v13455_v48 = vld [vmem:[%s17614_s22 + $0x470] sm:$0xff]  ;;  %v12596_v19 = vmax.f32 %v12484_v26, 0.0  ;;  %v12485_v9 = vadd.f32 %v20203_v45, %v12149_v35  ;;  %v13453_v39 = vld [vmem:[%s17614_s22 + $0x460] sm:$0xff]  ;;  %v9973_v35 = vld [vmem:[%s17614_s22 + $0x168] sm:$0xff]  ;;  %v15572_v7 = vpop.f32.mrb[172].mxu0  ;;  %v15812_v21 = vpop.f32.mrb[156].mxu1 }
 0xa1c   : > { %v10179_v15 = vadd.f32 %v20197_v6, %v9843_v55  ;;  %v10288_v24 = vmax.f32 %v10176_v53, 0.0  ;;  %v10177_v60 = vadd.f32 %v20205_v4, %v9841_v22  ;;  %10402 = vst [vmem:[%s20113_s21 + $0xd0] sm:$0xff] %v10290_v43  ;;  %v20418_v26 = vmul.f32 0.3, %v13455_v48  ;;  %v13456_v55 = vld [vmem:[%s17614_s22 + $0x478] sm:$0xff]  ;;  %v8809_v51 = vpop.f32.mrb[173].mxu0 }
 0xa1d   : > { %v12594_v8 = vmax.f32 %v12482_v34, 0.0  ;;  %v12483_v0 = vadd.f32 %v20211_v5, %v12147_v16  ;;  %13547 = vst [vmem:[%s20113_s21 + $0x3d0] sm:$0xff] %v12596_v19  ;;  %v12597_v45 = vmax.f32 %v12485_v9, 0.0  ;;  %v20424_v53 = vmul.f32 0.3, %v9972_v59  ;;  %v21665_v34 = vld [vmem:[#allocation37_spill] sm:$0xff] }
 0xa1e   : > { %v10291_v6 = vmax.f32 %v10179_v15, 0.0  ;;  %10400 = vst [vmem:[%s20113_s21 + $0xc0] sm:$0xff] %v10288_v24  ;;  %v10289_v4 = vmax.f32 %v10177_v60, 0.0  ;;  %v9846_v56 = vadd.f32 %v15572_v7, %v21665_v34  ;;  %v12152_v22 = vadd.f32 %v15812_v21, %v19959_v3  ;;  %v11067_v16 = vpop.f32.mrb[157].mxu1  ;;  %v21666_v19 = vld [vmem:[#allocation36_spill] sm:$0xff]  ;;  %v21667_v9 = vld [vmem:[#allocation126_spill] sm:$0xff] }
 0xa1f   : > { %13545 = vst [vmem:[%s20113_s21 + $0x3c0] sm:$0xff] %v12594_v8  ;;  %v12595_v5 = vmax.f32 %v12483_v0, 0.0  ;;  %13548 = vst [vmem:[%s20113_s21 + $0x3d8] sm:$0xff] %v12597_v45  ;;  %v20430_v48 = vmul.f32 0.3, %v13453_v39  ;;  %v9844_v15 = vadd.f32 %v21666_v19, %v8809_v51  ;;  %v12150_v59 = vadd.f32 %v21667_v9, %v11067_v16  ;;  %v15573_v24 = vpop.f32.mrb[174].mxu0 }
 0xa20   : > { %10403 = vst [vmem:[%s20113_s21 + $0xd8] sm:$0xff] %v10291_v6  ;;  %v20432_v43 = vmul.f32 0.3, %v9975_v38  ;;  %10401 = vst [vmem:[%s20113_s21 + $0xc8] sm:$0xff] %v10289_v4  ;;  %v15813_v8 = vpop.f32.mrb[158].mxu1  ;;  %v10182_v3 = vadd.f32 %v20213_v33, %v9846_v56  ;;  %v12488_v39 = vadd.f32 %v20218_v25, %v12152_v22  ;;  %v21668_v38 = vld [vmem:[#allocation74_spill] sm:$0xff] }
 0xa21   : > { %13546 = vst [vmem:[%s20113_s21 + $0x3c8] sm:$0xff] %v12595_v5  ;;  %v20438_v60 = vmul.f32 0.3, %v13456_v55  ;;  %v20440_v0 = vmul.f32 0.3, %v9973_v35  ;;  %v9847_v6 = vadd.f32 %v15573_v24, %v21668_v38  ;;  %v12153_v45 = vadd.f32 %v15813_v8, %v19963_v17  ;;  %v8812_v4 = vpop.f32.mrb[175].mxu0  ;;  %v20458_v24 = vpop.permute.xlu0 %11890 }
 0xa22   : > { %v11070_v5 = vpop.f32.mrb[159].mxu1  ;;  %v10180_v7 = vadd.f32 %v20220_v54, %v9844_v15  ;;  %v12486_v55 = vadd.f32 %v20224_v47, %v12150_v59  ;;  %v21669_v21 = vld [vmem:[#allocation72_spill] sm:$0xff]  ;;  %v21670_v34 = vld [vmem:[#allocation145_spill] sm:$0xff]  ;;  %v13454_v33 = vld [vmem:[%s17614_s22 + $0x468] sm:$0xff]  ;;  %v10294_v25 = vmax.f32 %v10182_v3, 0.0  ;;  %v12600_v56 = vmax.f32 %v12488_v39, 0.0  ;;  %v20460_v8 = vpop.permute.xlu1 %11885 }
 0xa23   : > { %v9845_v35 = vadd.f32 %v21669_v21, %v8812_v4  ;;  %v12151_v51 = vadd.f32 %v21670_v34, %v11070_v5  ;;  %v10183_v22 = vadd.f32 %v20226_v27, %v9847_v6  ;;  %v12489_v17 = vadd.f32 %v20232_v42, %v12153_v45  ;;  %v9978_v16 = vld [vmem:[%s17614_s22 + $0x190] sm:$0xff]  ;;  %v9976_v59 = vld [vmem:[%s17614_s22 + $0x180] sm:$0xff]  ;;  %v9979_v38 = vld [vmem:[%s17614_s22 + $0x198] sm:$0xff]  ;;  %v15576_v6 = vpop.f32.mrb[176].mxu0  ;;  %v15816_v45 = vpop.f32.mrb[160].mxu1 }
 0xa24   : > { %v10292_v54 = vmax.f32 %v10180_v7, 0.0  ;;  %v12598_v47 = vmax.f32 %v12486_v55, 0.0  ;;  %v13459_v9 = vld [vmem:[%s17614_s22 + $0x490] sm:$0xff]  ;;  %10406 = vst [vmem:[%s20113_s21 + $0xf0] sm:$0xff] %v10294_v25  ;;  %13551 = vst [vmem:[%s20113_s21 + $0x3f0] sm:$0xff] %v12600_v56  ;;  %v13457_v39 = vld [vmem:[%s17614_s22 + $0x480] sm:$0xff]  ;;  %v12156_v55 = vadd.f32 %v15816_v45, %v19965_v29 }
 0xa25   : > { %v10181_v19 = vadd.f32 %v20240_v40, %v9845_v35  ;;  %v12487_v15 = vadd.f32 %v20246_v61, %v12151_v51  ;;  %v10295_v27 = vmax.f32 %v10183_v22, 0.0  ;;  %v12601_v42 = vmax.f32 %v12489_v17, 0.0  ;;  %v21671_v5 = vld [vmem:[#allocation39_spill] sm:$0xff]  ;;  %v8825_v21 = vpop.f32.mrb[177].mxu0  ;;  %v11083_v35 = vpop.f32.mrb[161].mxu1 }
 0xa26   : > { %v20464_v3 = vmul.f32 0.3, %v13454_v33  ;;  %10404 = vst [vmem:[%s20113_s21 + $0xe0] sm:$0xff] %v10292_v54  ;;  %13549 = vst [vmem:[%s20113_s21 + $0x3e0] sm:$0xff] %v12598_v47  ;;  %v20470_v4 = vmul.f32 0.3, %v9978_v16  ;;  %v9850_v7 = vadd.f32 %v15576_v6, %v21671_v5  ;;  %v12154_v56 = vadd.f32 %v19961_v11, %v11083_v35 }
 0xa27   : > { %v10293_v40 = vmax.f32 %v10181_v19, 0.0  ;;  %v12599_v61 = vmax.f32 %v12487_v15, 0.0  ;;  %10407 = vst [vmem:[%s20113_s21 + $0xf8] sm:$0xff] %v10295_v27  ;;  %13552 = vst [vmem:[%s20113_s21 + $0x3f8] sm:$0xff] %v12601_v42  ;;  %v20476_v34 = vmul.f32 0.3, %v13459_v9  ;;  %v12492_v47 = vadd.f32 %v20254_v58, %v12156_v55 }
 0xa28   : > { %v20478_v51 = vmul.f32 0.3, %v9976_v59  ;;  %v21672_v33 = vld [vmem:[#allocation38_spill] sm:$0xff]  ;;  %v15577_v22 = vpop.f32.mrb[178].mxu0  ;;  %v15817_v17 = vpop.f32.mrb[162].mxu1  ;;  %v10186_v29 = vadd.f32 %v20252_v2, %v9850_v7  ;;  %v21673_v19 = vld [vmem:[#allocation77_spill] sm:$0xff] }
 0xa29   : > { %10405 = vst [vmem:[%s20113_s21 + $0xe8] sm:$0xff] %v10293_v40  ;;  %13550 = vst [vmem:[%s20113_s21 + $0x3e8] sm:$0xff] %v12599_v61  ;;  %v9848_v25 = vadd.f32 %v21672_v33, %v8825_v21  ;;  %v20484_v16 = vmul.f32 0.3, %v13457_v39  ;;  %v20486_v54 = vmul.f32 0.3, %v9979_v38  ;;  %v9851_v15 = vadd.f32 %v15577_v22, %v21673_v19 }
 0xa2a   : > { %v21674_v9 = vld [vmem:[#allocation146_spill] sm:$0xff]  ;;  %v8828_v27 = vpop.f32.mrb[179].mxu0  ;;  %v11086_v42 = vpop.f32.mrb[163].mxu1  ;;  %v12490_v39 = vadd.f32 %v20261_v37, %v12154_v56  ;;  %v21675_v40 = vld [vmem:[#allocation75_spill] sm:$0xff]  ;;  %v13460_v2 = vld [vmem:[%s17614_s22 + $0x498] sm:$0xff]  ;;  %v10298_v58 = vmax.f32 %v10186_v29, 0.0 }
 0xa2b   : > { %v12157_v59 = vadd.f32 %v15817_v17, %v21674_v9  ;;  %v10184_v11 = vadd.f32 %v20259_v46, %v9848_v25  ;;  %v9849_v38 = vadd.f32 %v21675_v40, %v8828_v27  ;;  %v21676_v61 = vld [vmem:[#allocation22_spill] sm:$0xff]  ;;  %v12604_v45 = vmax.f32 %v12492_v47, 0.0  ;;  %v21677_v5 = vld [vmem:[#allocation57_spill] sm:$0xff]  ;;  %v21678_v55 = vld [vmem:[#allocation55_spill] sm:$0xff]  ;;  %v20504_v9 = vpop.permute.xlu0 %11900  ;;  %v20506_v29 = vpop.permute.xlu1 %11895 }
 0xa2c   : > { %v12155_v6 = vadd.f32 %v21676_v61, %v11086_v42  ;;  %v10187_v7 = vadd.f32 %v21677_v5, %v9851_v15  ;;  %v9977_v35 = vld [vmem:[%s17614_s22 + $0x188] sm:$0xff]  ;;  %v12602_v37 = vmax.f32 %v12490_v39, 0.0  ;;  %v21679_v33 = vld [vmem:[#allocation29_spill] sm:$0xff]  ;;  %v9982_v19 = vld [vmem:[%s17614_s22 + $0x1b0] sm:$0xff]  ;;  %10410 = vst [vmem:[%s20113_s21 + $0x110] sm:$0xff] %v10298_v58  ;;  %v15580_v40 = vpop.f32.mrb[180].mxu0 }
 0xa2d   : > { %v12493_v21 = vadd.f32 %v21678_v55, %v12157_v59  ;;  %v10296_v46 = vmax.f32 %v10184_v11, 0.0  ;;  %v10185_v25 = vadd.f32 %v21679_v33, %v9849_v38  ;;  %v21680_v56 = vld [vmem:[#allocation59_spill] sm:$0xff]  ;;  %13555 = vst [vmem:[%s20113_s21 + $0x410] sm:$0xff] %v12604_v45  ;;  %v20510_v59 = vmul.f32 0.3, %v13460_v2  ;;  %v9980_v42 = vld [vmem:[%s17614_s22 + $0x1a0] sm:$0xff] }
 0xa2e   : > { %v12491_v22 = vadd.f32 %v21680_v56, %v12155_v6  ;;  %v13458_v17 = vld [vmem:[%s17614_s22 + $0x488] sm:$0xff]  ;;  %v10299_v47 = vmax.f32 %v10187_v7, 0.0  ;;  %v13463_v27 = vld [vmem:[%s17614_s22 + $0x4b0] sm:$0xff]  ;;  %13553 = vst [vmem:[%s20113_s21 + $0x400] sm:$0xff] %v12602_v37  ;;  %v15820_v38 = vpop.f32.mrb[164].mxu1  ;;  %v21681_v6 = vld [vmem:[#allocation41_spill] sm:$0xff] }
 0xa2f   : > { %v12605_v15 = vmax.f32 %v12493_v21, 0.0  ;;  %10408 = vst [vmem:[%s20113_s21 + $0x100] sm:$0xff] %v10296_v46  ;;  %v10297_v11 = vmax.f32 %v10185_v25, 0.0  ;;  %v20516_v61 = vmul.f32 0.3, %v9977_v35  ;;  %v9854_v58 = vadd.f32 %v15580_v40, %v21681_v6  ;;  %v21682_v45 = vld [vmem:[#allocation147_spill] sm:$0xff] }
 0xa30   : > { %v12603_v39 = vmax.f32 %v12491_v22, 0.0  ;;  %10411 = vst [vmem:[%s20113_s21 + $0x118] sm:$0xff] %v10299_v47  ;;  %v12160_v5 = vadd.f32 %v15820_v38, %v21682_v45  ;;  %v8841_v2 = vpop.f32.mrb[181].mxu0  ;;  %v11099_v7 = vpop.f32.mrb[165].mxu1  ;;  %v20522_v55 = vmul.f32 0.3, %v13458_v17 }
 0xa31   : > { %13556 = vst [vmem:[%s20113_s21 + $0x418] sm:$0xff] %v12605_v15  ;;  %v20524_v21 = vmul.f32 0.3, %v9982_v19  ;;  %10409 = vst [vmem:[%s20113_s21 + $0x108] sm:$0xff] %v10297_v11  ;;  %v21683_v46 = vld [vmem:[#allocation40_spill] sm:$0xff]  ;;  %v21684_v33 = vld [vmem:[#allocation23_spill] sm:$0xff] }
 0xa32   : > { %13554 = vst [vmem:[%s20113_s21 + $0x408] sm:$0xff] %v12603_v39  ;;  %v9852_v37 = vadd.f32 %v21683_v46, %v8841_v2  ;;  %v12158_v35 = vadd.f32 %v21684_v33, %v11099_v7  ;;  %v15581_v25 = vpop.f32.mrb[182].mxu0  ;;  %v15821_v56 = vpop.f32.mrb[166].mxu1  ;;  %v20530_v22 = vmul.f32 0.3, %v13463_v27  ;;  %v21685_v15 = vld [vmem:[#allocation173_spill] sm:$0xff]  ;;  %v12496_v17 = vadd.f32 %v20292_v63, %v12160_v5 }
 0xa33   : > { %v20532_v47 = vmul.f32 0.3, %v9980_v42  ;;  %v10190_v40 = vadd.f32 %v21685_v15, %v9854_v58  ;;  %v21686_v19 = vld [vmem:[#allocation80_spill] sm:$0xff]  ;;  %v21687_v11 = vld [vmem:[#allocation150_spill] sm:$0xff]  ;;  %v8844_v6 = vpop.f32.mrb[183].mxu0  ;;  %v11102_v45 = vpop.f32.mrb[167].mxu1 }
 0xa34   : > { %v9855_v38 = vadd.f32 %v15581_v25, %v21686_v19  ;;  %v12161_v39 = vadd.f32 %v15821_v56, %v21687_v11  ;;  %v10188_v2 = vadd.f32 %v20294_v32, %v9852_v37  ;;  %v12494_v27 = vadd.f32 %v20299_v28, %v12158_v35  ;;  %v21688_v7 = vld [vmem:[#allocation79_spill] sm:$0xff]  ;;  %v21689_v46 = vld [vmem:[#allocation148_spill] sm:$0xff]  ;;  %v13461_v58 = vld [vmem:[%s17614_s22 + $0x4a0] sm:$0xff] }
 0xa35   : > { %v9853_v42 = vadd.f32 %v21688_v7, %v8844_v6  ;;  %v12159_v33 = vadd.f32 %v21689_v46, %v11102_v45  ;;  %v10302_v63 = vmax.f32 %v10190_v40, 0.0  ;;  %v12608_v5 = vmax.f32 %v12496_v17, 0.0  ;;  %v21690_v25 = vld [vmem:[#allocation31_spill] sm:$0xff]  ;;  %v9983_v19 = vld [vmem:[%s17614_s22 + $0x1b8] sm:$0xff]  ;;  %v20550_v45 = vpop.permute.xlu0 %11910  ;;  %v20552_v40 = vpop.permute.xlu1 %11905 }
 0xa36   : > { %v10191_v15 = vadd.f32 %v21690_v25, %v9855_v38  ;;  %v12497_v56 = vadd.f32 %v20326_v41, %v12161_v39  ;;  %v10300_v32 = vmax.f32 %v10188_v2, 0.0  ;;  %v12606_v28 = vmax.f32 %v12494_v27, 0.0  ;;  %v13464_v11 = vld [vmem:[%s17614_s22 + $0x4b8] sm:$0xff]  ;;  %v9981_v6 = vld [vmem:[%s17614_s22 + $0x1a8] sm:$0xff]  ;;  %21691 = vst [vmem:[#allocation116_spill] sm:$0xff] %v20552_v40  ;;  %v9986_v2 = vld [vmem:[%s17614_s22 + $0x1d0] sm:$0xff] }
 0xa37   : > { %v10189_v37 = vadd.f32 %v20332_v18, %v9853_v42  ;;  %v12495_v35 = vadd.f32 %v20338_v20, %v12159_v33  ;;  %10414 = vst [vmem:[%s20113_s21 + $0x130] sm:$0xff] %v10302_v63  ;;  %13559 = vst [vmem:[%s20113_s21 + $0x430] sm:$0xff] %v12608_v5  ;;  %v20556_v38 = vmul.f32 0.3, %v13461_v58  ;;  %v13462_v39 = vld [vmem:[%s17614_s22 + $0x4a8] sm:$0xff]  ;;  %v15584_v27 = vpop.f32.mrb[184].mxu0 }
 0xa38   : > { %v10303_v41 = vmax.f32 %v10191_v15, 0.0  ;;  %v12609_v17 = vmax.f32 %v12497_v56, 0.0  ;;  %10412 = vst [vmem:[%s20113_s21 + $0x120] sm:$0xff] %v10300_v32  ;;  %13557 = vst [vmem:[%s20113_s21 + $0x420] sm:$0xff] %v12606_v28  ;;  %v15824_v7 = vpop.f32.mrb[168].mxu1  ;;  %v21692_v46 = vld [vmem:[#allocation43_spill] sm:$0xff] }
 0xa39   : > { %v10301_v18 = vmax.f32 %v10189_v37, 0.0  ;;  %v12607_v20 = vmax.f32 %v12495_v35, 0.0  ;;  %v20562_v42 = vmul.f32 0.3, %v9983_v19  ;;  %v9858_v33 = vadd.f32 %v15584_v27, %v21692_v46  ;;  %v21693_v63 = vld [vmem:[#allocation151_spill] sm:$0xff]  ;;  %v8857_v58 = vpop.f32.mrb[185].mxu0 }
 0xa3a   : > { %10415 = vst [vmem:[%s20113_s21 + $0x138] sm:$0xff] %v10303_v41  ;;  %13560 = vst [vmem:[%s20113_s21 + $0x438] sm:$0xff] %v12609_v17  ;;  %v12164_v5 = vadd.f32 %v15824_v7, %v21693_v63  ;;  %v11115_v25 = vpop.f32.mrb[169].mxu1  ;;  %v20568_v15 = vmul.f32 0.3, %v13464_v11  ;;  %v21694_v32 = vld [vmem:[#allocation42_spill] sm:$0xff] }
 0xa3b   : > { %v20570_v56 = vmul.f32 0.3, %v9981_v6  ;;  %10413 = vst [vmem:[%s20113_s21 + $0x128] sm:$0xff] %v10301_v18  ;;  %13558 = vst [vmem:[%s20113_s21 + $0x428] sm:$0xff] %v12607_v20  ;;  %v9856_v28 = vadd.f32 %v21694_v32, %v8857_v58  ;;  %v21695_v37 = vld [vmem:[#allocation149_spill] sm:$0xff]  ;;  %v15585_v35 = vpop.f32.mrb[186].mxu0  ;;  %v10194_v7 = vadd.f32 %v20340_v30, %v9858_v33 }
 0xa3c   : > { %v12162_v19 = vadd.f32 %v21695_v37, %v11115_v25  ;;  %v15825_v41 = vpop.f32.mrb[170].mxu1  ;;  %v20576_v17 = vmul.f32 0.3, %v13462_v39  ;;  %v20578_v27 = vmul.f32 0.3, %v9986_v2  ;;  %v12500_v11 = vadd.f32 %v20346_v12, %v12164_v5  ;;  %v21696_v6 = vld [vmem:[#allocation84_spill] sm:$0xff] }
 0xa3d   : > { %v9859_v46 = vadd.f32 %v15585_v35, %v21696_v6  ;;  %v21697_v18 = vld [vmem:[#allocation154_spill] sm:$0xff]  ;;  %v8860_v63 = vpop.f32.mrb[187].mxu0  ;;  %v11118_v58 = vpop.f32.mrb[171].mxu1  ;;  %v10192_v25 = vadd.f32 %v20348_v31, %v9856_v28  ;;  %v21699_v37 = vld [vmem:[#allocation152_spill] sm:$0xff]  ;;  %v10306_v12 = vmax.f32 %v10194_v7, 0.0 }
 0xa3e   : > { %v12165_v20 = vadd.f32 %v15825_v41, %v21697_v18  ;;  %v12498_v39 = vadd.f32 %v20372_v52, %v12162_v19  ;;  %v21698_v32 = vld [vmem:[#allocation82_spill] sm:$0xff]  ;;  %v12163_v40 = vadd.f32 %v21699_v37, %v11118_v58  ;;  %v13467_v30 = vld [vmem:[%s17614_s22 + $0x4d0] sm:$0xff]  ;;  %v12612_v33 = vmax.f32 %v12500_v11, 0.0  ;;  %v9987_v18 = vld [vmem:[%s17614_s22 + $0x1d8] sm:$0xff]  ;;  %v20598_v7 = vpop.permute.xlu1 %11915  ;;  %v15828_v58 = vpop.f32.mrb[172].mxu1 }
 0xa3f   : > { %v9857_v2 = vadd.f32 %v21698_v32, %v8860_v63  ;;  %v10195_v5 = vadd.f32 %v20378_v36, %v9859_v46  ;;  %v9984_v41 = vld [vmem:[%s17614_s22 + $0x1c0] sm:$0xff]  ;;  %v10304_v31 = vmax.f32 %v10192_v25, 0.0  ;;  %v20596_v63 = vpop.permute.xlu0 %11920  ;;  %10418 = vst [vmem:[%s20113_s21 + $0x150] sm:$0xff] %v10306_v12  ;;  %v20602_v11 = vmul.f32 0.3, %v13467_v30  ;;  %v13468_v46 = vld [vmem:[%s17614_s22 + $0x4d8] sm:$0xff] }
 0xa40   : > { %v12501_v35 = vadd.f32 %v20384_v57, %v12165_v20  ;;  %v12610_v52 = vmax.f32 %v12498_v39, 0.0  ;;  %v12499_v19 = vadd.f32 %v20392_v10, %v12163_v40  ;;  %v13465_v6 = vld [vmem:[%s17614_s22 + $0x4c0] sm:$0xff]  ;;  %13563 = vst [vmem:[%s20113_s21 + $0x450] sm:$0xff] %v12612_v33  ;;  %v9985_v20 = vld [vmem:[%s17614_s22 + $0x1c8] sm:$0xff]  ;;  %v15588_v40 = vpop.f32.mrb[188].mxu0  ;;  %v11131_v12 = vpop.f32.mrb[173].mxu1 }
 0xa41   : > { %v10193_v28 = vadd.f32 %v20386_v23, %v9857_v2  ;;  %v10307_v36 = vmax.f32 %v10195_v5, 0.0  ;;  %10416 = vst [vmem:[%s20113_s21 + $0x140] sm:$0xff] %v10304_v31  ;;  %v20608_v25 = vmul.f32 0.3, %v9984_v41  ;;  %v21700_v39 = vld [vmem:[#allocation45_spill] sm:$0xff]  ;;  %v21701_v2 = vld [vmem:[#allocation155_spill] sm:$0xff] }
 0xa42   : > { %v12613_v57 = vmax.f32 %v12501_v35, 0.0  ;;  %13561 = vst [vmem:[%s20113_s21 + $0x440] sm:$0xff] %v12610_v52  ;;  %v12611_v10 = vmax.f32 %v12499_v19, 0.0  ;;  %v9862_v32 = vadd.f32 %v15588_v40, %v21700_v39  ;;  %v12168_v37 = vadd.f32 %v15828_v58, %v21701_v2  ;;  %v8873_v30 = vpop.f32.mrb[189].mxu0  ;;  %v21702_v35 = vld [vmem:[#allocation44_spill] sm:$0xff]  ;;  %v21703_v52 = vld [vmem:[#allocation153_spill] sm:$0xff] }
 0xa43   : > { %v10305_v23 = vmax.f32 %v10193_v28, 0.0  ;;  %10419 = vst [vmem:[%s20113_s21 + $0x158] sm:$0xff] %v10307_v36  ;;  %v20614_v33 = vmul.f32 0.3, %v13465_v6  ;;  %v20616_v5 = vmul.f32 0.3, %v9987_v18  ;;  %v9860_v31 = vadd.f32 %v21702_v35, %v8873_v30 }
 0xa44   : > { %13564 = vst [vmem:[%s20113_s21 + $0x458] sm:$0xff] %v12613_v57  ;;  %13562 = vst [vmem:[%s20113_s21 + $0x448] sm:$0xff] %v12611_v10  ;;  %v12166_v41 = vadd.f32 %v21703_v52, %v11131_v12  ;;  %v15589_v28 = vpop.f32.mrb[190].mxu0  ;;  %v15829_v19 = vpop.f32.mrb[174].mxu1  ;;  %v20622_v36 = vmul.f32 0.3, %v13468_v46  ;;  %v10198_v40 = vadd.f32 %v20394_v14, %v9862_v32  ;;  %v12504_v6 = vadd.f32 %v20418_v26, %v12168_v37 }
 0xa45   : > { %10417 = vst [vmem:[%s20113_s21 + $0x148] sm:$0xff] %v10305_v23  ;;  %v20624_v57 = vmul.f32 0.3, %v9985_v20  ;;  %v21704_v18 = vld [vmem:[#allocation87_spill] sm:$0xff]  ;;  %v21705_v23 = vld [vmem:[#allocation158_spill] sm:$0xff]  ;;  %v8876_v39 = vpop.f32.mrb[191].mxu0  ;;  %v10196_v30 = vadd.f32 %v20424_v53, %v9860_v31 }
 0xa46   : > { %v9863_v58 = vadd.f32 %v15589_v28, %v21704_v18  ;;  %v12169_v10 = vadd.f32 %v15829_v19, %v21705_v23  ;;  %v11134_v2 = vpop.f32.mrb[175].mxu1  ;;  %v12502_v46 = vadd.f32 %v20430_v48, %v12166_v41  ;;  %v21706_v12 = vld [vmem:[#allocation85_spill] sm:$0xff]  ;;  %v21707_v35 = vld [vmem:[#allocation156_spill] sm:$0xff]  ;;  %v13466_v14 = vld [vmem:[%s17614_s22 + $0x4c8] sm:$0xff]  ;;  %v10310_v26 = vmax.f32 %v10198_v40, 0.0  ;;  %v20644_v40 = vpop.permute.xlu1 %11925 }
 0xa47   : > { %v9861_v20 = vadd.f32 %v21706_v12, %v8876_v39  ;;  %v12167_v52 = vadd.f32 %v21707_v35, %v11134_v2  ;;  %v12616_v32 = vmax.f32 %v12504_v6, 0.0  ;;  %v9990_v19 = vld [vmem:[%s17614_s22 + $0x1f0] sm:$0xff]  ;;  %v10308_v53 = vmax.f32 %v10196_v30, 0.0  ;;  %v9988_v23 = vld [vmem:[%s17614_s22 + $0x1e0] sm:$0xff]  ;;  %v20642_v39 = vpop.permute.xlu0 %11930  ;;  %v15592_v2 = vpop.f32.mrb[192].mxu0 }
 0xa48   : > { %v10199_v37 = vadd.f32 %v20432_v43, %v9863_v58  ;;  %v12505_v28 = vadd.f32 %v20438_v60, %v12169_v10  ;;  %v12614_v48 = vmax.f32 %v12502_v46, 0.0  ;;  %v13471_v18 = vld [vmem:[%s17614_s22 + $0x4f0] sm:$0xff]  ;;  %10422 = vst [vmem:[%s20113_s21 + $0x170] sm:$0xff] %v10310_v26  ;;  %v20648_v6 = vmul.f32 0.3, %v13466_v14  ;;  %v13469_v58 = vld [vmem:[%s17614_s22 + $0x4e0] sm:$0xff] }
 0xa49   : > { %v10197_v31 = vadd.f32 %v20440_v0, %v9861_v20  ;;  %v12503_v41 = vadd.f32 %v20464_v3, %v12167_v52  ;;  %13567 = vst [vmem:[%s20113_s21 + $0x470] sm:$0xff] %v12616_v32  ;;  %v9991_v10 = vld [vmem:[%s17614_s22 + $0x1f8] sm:$0xff]  ;;  %10420 = vst [vmem:[%s20113_s21 + $0x160] sm:$0xff] %v10308_v53  ;;  %v15832_v30 = vpop.f32.mrb[176].mxu1  ;;  %v20654_v46 = vmul.f32 0.3, %v9990_v19 }
 0xa4a   : > { %v10311_v43 = vmax.f32 %v10199_v37, 0.0  ;;  %v12617_v60 = vmax.f32 %v12505_v28, 0.0  ;;  %13565 = vst [vmem:[%s20113_s21 + $0x460] sm:$0xff] %v12614_v48  ;;  %v21708_v12 = vld [vmem:[#allocation47_spill] sm:$0xff]  ;;  %v8889_v14 = vpop.f32.mrb[193].mxu0  ;;  %v11147_v26 = vpop.f32.mrb[177].mxu1 }
 0xa4b   : > { %v10309_v0 = vmax.f32 %v10197_v31, 0.0  ;;  %v12615_v3 = vmax.f32 %v12503_v41, 0.0  ;;  %v9866_v20 = vadd.f32 %v15592_v2, %v21708_v12  ;;  %v21709_v35 = vld [vmem:[#allocation159_spill] sm:$0xff]  ;;  %v20660_v32 = vmul.f32 0.3, %v13471_v18  ;;  %v21710_v28 = vld [vmem:[#allocation46_spill] sm:$0xff] }
 0xa4c   : > { %10423 = vst [vmem:[%s20113_s21 + $0x178] sm:$0xff] %v10311_v43  ;;  %13568 = vst [vmem:[%s20113_s21 + $0x478] sm:$0xff] %v12617_v60  ;;  %v12172_v52 = vadd.f32 %v15832_v30, %v21709_v35  ;;  %v20662_v37 = vmul.f32 0.3, %v9988_v23  ;;  %v9864_v53 = vadd.f32 %v21710_v28, %v8889_v14  ;;  %v21711_v48 = vld [vmem:[#allocation157_spill] sm:$0xff]  ;;  %v15593_v31 = vpop.f32.mrb[194].mxu0 }
 0xa4d   : > { %10421 = vst [vmem:[%s20113_s21 + $0x168] sm:$0xff] %v10309_v0  ;;  %13566 = vst [vmem:[%s20113_s21 + $0x468] sm:$0xff] %v12615_v3  ;;  %v12170_v19 = vadd.f32 %v21711_v48, %v11147_v26  ;;  %v15833_v41 = vpop.f32.mrb[178].mxu1  ;;  %v20668_v43 = vmul.f32 0.3, %v13469_v58  ;;  %v10202_v2 = vadd.f32 %v20470_v4, %v9866_v20  ;;  %v21712_v23 = vld [vmem:[#allocation90_spill] sm:$0xff] }
 0xa4e   : > { %v20670_v60 = vmul.f32 0.3, %v9991_v10  ;;  %v12508_v18 = vadd.f32 %v20476_v34, %v12172_v52  ;;  %v9867_v30 = vadd.f32 %v15593_v31, %v21712_v23  ;;  %v21713_v0 = vld [vmem:[#allocation162_spill] sm:$0xff]  ;;  %v8892_v12 = vpop.f32.mrb[195].mxu0  ;;  %v11150_v35 = vpop.f32.mrb[179].mxu1  ;;  %v10200_v14 = vadd.f32 %v20478_v51, %v9864_v53  ;;  %v21714_v26 = vld [vmem:[#allocation89_spill] sm:$0xff] }
 0xa4f   : > { %v12173_v3 = vadd.f32 %v15833_v41, %v21713_v0  ;;  %v12506_v58 = vadd.f32 %v20484_v16, %v12170_v19  ;;  %v9865_v10 = vadd.f32 %v21714_v26, %v8892_v12  ;;  %v21715_v28 = vld [vmem:[#allocation160_spill] sm:$0xff]  ;;  %v10314_v34 = vmax.f32 %v10202_v2, 0.0  ;;  %v9989_v41 = vld [vmem:[%s17614_s22 + $0x1e8] sm:$0xff]  ;;  %v20688_v12 = vpop.permute.xlu0 %11940  ;;  %v20690_v2 = vpop.permute.xlu1 %11935  ;;  %v21716_v26 = vld [vmem:[#allocation49_spill] sm:$0xff] }
 0xa50   : > { %v12171_v48 = vadd.f32 %v21715_v28, %v11150_v35  ;;  %v13472_v4 = vld [vmem:[%s17614_s22 + $0x4f8] sm:$0xff]  ;;  %v12620_v20 = vmax.f32 %v12508_v18, 0.0  ;;  %v10203_v52 = vadd.f32 %v20486_v54, %v9867_v30  ;;  %v10312_v51 = vmax.f32 %v10200_v14, 0.0  ;;  %v13470_v23 = vld [vmem:[%s17614_s22 + $0x4e8] sm:$0xff]  ;;  %v9994_v0 = vld [vmem:[%s17614_s22 + $0x210] sm:$0xff]  ;;  %v15596_v35 = vpop.f32.mrb[196].mxu0 }
 0xa51   : > { %v12509_v31 = vadd.f32 %v20510_v59, %v12173_v3  ;;  %v12618_v16 = vmax.f32 %v12506_v58, 0.0  ;;  %v10201_v53 = vadd.f32 %v20516_v61, %v9865_v10  ;;  %10426 = vst [vmem:[%s20113_s21 + $0x190] sm:$0xff] %v10314_v34  ;;  %v20694_v18 = vmul.f32 0.3, %v13472_v4  ;;  %v13475_v30 = vld [vmem:[%s17614_s22 + $0x510] sm:$0xff]  ;;  %v9992_v3 = vld [vmem:[%s17614_s22 + $0x200] sm:$0xff] }
 0xa52   : > { %v12507_v19 = vadd.f32 %v20522_v55, %v12171_v48  ;;  %13571 = vst [vmem:[%s20113_s21 + $0x490] sm:$0xff] %v12620_v20  ;;  %v10315_v54 = vmax.f32 %v10203_v52, 0.0  ;;  %10424 = vst [vmem:[%s20113_s21 + $0x180] sm:$0xff] %v10312_v51  ;;  %v15836_v14 = vpop.f32.mrb[180].mxu1  ;;  %v20700_v58 = vmul.f32 0.3, %v9989_v41  ;;  %v9870_v10 = vadd.f32 %v15596_v35, %v21716_v26 }
 0xa53   : > { %v12621_v59 = vmax.f32 %v12509_v31, 0.0  ;;  %13569 = vst [vmem:[%s20113_s21 + $0x480] sm:$0xff] %v12618_v16  ;;  %v10313_v61 = vmax.f32 %v10201_v53, 0.0  ;;  %v21717_v28 = vld [vmem:[#allocation163_spill] sm:$0xff]  ;;  %v8905_v4 = vpop.f32.mrb[197].mxu0  ;;  %v11163_v34 = vpop.f32.mrb[181].mxu1 }
 0xa54   : > { %v12619_v55 = vmax.f32 %v12507_v19, 0.0  ;;  %10427 = vst [vmem:[%s20113_s21 + $0x198] sm:$0xff] %v10315_v54  ;;  %v12176_v48 = vadd.f32 %v15836_v14, %v21717_v28  ;;  %v20706_v20 = vmul.f32 0.3, %v13470_v23  ;;  %v20708_v52 = vmul.f32 0.3, %v9994_v0 }
 0xa55   : > { %13572 = vst [vmem:[%s20113_s21 + $0x498] sm:$0xff] %v12621_v59  ;;  %10425 = vst [vmem:[%s20113_s21 + $0x188] sm:$0xff] %v10313_v61  ;;  %v21718_v31 = vld [vmem:[#allocation48_spill] sm:$0xff]  ;;  %v21719_v16 = vld [vmem:[#allocation161_spill] sm:$0xff]  ;;  %v15597_v53 = vpop.f32.mrb[198].mxu0  ;;  %v15837_v19 = vpop.f32.mrb[182].mxu1  ;;  %v10206_v35 = vadd.f32 %v20524_v21, %v9870_v10 }
 0xa56   : > { %13570 = vst [vmem:[%s20113_s21 + $0x488] sm:$0xff] %v12619_v55  ;;  %v9868_v51 = vadd.f32 %v21718_v31, %v8905_v4  ;;  %v12174_v41 = vadd.f32 %v21719_v16, %v11163_v34  ;;  %v20714_v54 = vmul.f32 0.3, %v13475_v30  ;;  %v20716_v59 = vmul.f32 0.3, %v9992_v3  ;;  %v21720_v0 = vld [vmem:[#allocation94_spill] sm:$0xff] }
 0xa57   : > { %v12512_v23 = vadd.f32 %v20530_v22, %v12176_v48  ;;  %v9871_v14 = vadd.f32 %v15597_v53, %v21720_v0  ;;  %v21721_v61 = vld [vmem:[#allocation166_spill] sm:$0xff]  ;;  %v8908_v26 = vpop.f32.mrb[199].mxu0  ;;  %v11166_v28 = vpop.f32.mrb[183].mxu1  ;;  %v21722_v34 = vld [vmem:[#allocation92_spill] sm:$0xff]  ;;  %v10318_v22 = vmax.f32 %v10206_v35, 0.0 }
 0xa58   : > { %v12177_v55 = vadd.f32 %v15837_v19, %v21721_v61  ;;  %v10204_v4 = vadd.f32 %v20532_v47, %v9868_v51  ;;  %v12510_v30 = vadd.f32 %v20556_v38, %v12174_v41  ;;  %v9869_v3 = vadd.f32 %v21722_v34, %v8908_v26  ;;  %v21723_v31 = vld [vmem:[#allocation164_spill] sm:$0xff]  ;;  %v13473_v21 = vld [vmem:[%s17614_s22 + $0x500] sm:$0xff]  ;;  %v9993_v61 = vld [vmem:[%s17614_s22 + $0x208] sm:$0xff]  ;;  %v20734_v26 = vpop.permute.xlu0 %11950  ;;  %v20736_v35 = vpop.permute.xlu1 %11945 }
 0xa59   : > { %v12175_v16 = vadd.f32 %v21723_v31, %v11166_v28  ;;  %v12624_v10 = vmax.f32 %v12512_v23, 0.0  ;;  %v10207_v48 = vadd.f32 %v20562_v42, %v9871_v14  ;;  %v9995_v19 = vld [vmem:[%s17614_s22 + $0x218] sm:$0xff]  ;;  %10430 = vst [vmem:[%s20113_s21 + $0x1b0] sm:$0xff] %v10318_v22  ;;  %v20740_v23 = vmul.f32 0.3, %v13473_v21  ;;  %v13474_v14 = vld [vmem:[%s17614_s22 + $0x508] sm:$0xff] }
 0xa5a   : > { %v12513_v53 = vadd.f32 %v20568_v15, %v12177_v55  ;;  %v10316_v47 = vmax.f32 %v10204_v4, 0.0  ;;  %v12622_v38 = vmax.f32 %v12510_v30, 0.0  ;;  %v10205_v51 = vadd.f32 %v20570_v56, %v9869_v3  ;;  %v13476_v0 = vld [vmem:[%s17614_s22 + $0x518] sm:$0xff]  ;;  %v9998_v55 = vld [vmem:[%s17614_s22 + $0x230] sm:$0xff]  ;;  %v15600_v28 = vpop.f32.mrb[200].mxu0  ;;  %v15840_v4 = vpop.f32.mrb[184].mxu1 }
 0xa5b   : > { %v12511_v41 = vadd.f32 %v20576_v17, %v12175_v16  ;;  %13575 = vst [vmem:[%s20113_s21 + $0x4b0] sm:$0xff] %v12624_v10  ;;  %v10319_v42 = vmax.f32 %v10207_v48, 0.0  ;;  %v20746_v30 = vmul.f32 0.3, %v9995_v19  ;;  %v21724_v34 = vld [vmem:[#allocation51_spill] sm:$0xff]  ;;  %v8921_v21 = vpop.f32.mrb[201].mxu0 }
 0xa5c   : > { %v12625_v15 = vmax.f32 %v12513_v53, 0.0  ;;  %10428 = vst [vmem:[%s20113_s21 + $0x1a0] sm:$0xff] %v10316_v47  ;;  %13573 = vst [vmem:[%s20113_s21 + $0x4a0] sm:$0xff] %v12622_v38  ;;  %v10317_v56 = vmax.f32 %v10205_v51, 0.0  ;;  %v9874_v3 = vadd.f32 %v15600_v28, %v21724_v34  ;;  %v21725_v31 = vld [vmem:[#allocation167_spill] sm:$0xff]  ;;  %v11179_v22 = vpop.f32.mrb[185].mxu1 }
 0xa5d   : > { %v12623_v17 = vmax.f32 %v12511_v41, 0.0  ;;  %10431 = vst [vmem:[%s20113_s21 + $0x1b8] sm:$0xff] %v10319_v42  ;;  %v12180_v16 = vadd.f32 %v15840_v4, %v21725_v31  ;;  %v20752_v10 = vmul.f32 0.3, %v13476_v0  ;;  %v20754_v48 = vmul.f32 0.3, %v9993_v61 }
 0xa5e   : > { %13576 = vst [vmem:[%s20113_s21 + $0x4b8] sm:$0xff] %v12625_v15  ;;  %10429 = vst [vmem:[%s20113_s21 + $0x1a8] sm:$0xff] %v10317_v56  ;;  %v21726_v53 = vld [vmem:[#allocation50_spill] sm:$0xff]  ;;  %v21727_v38 = vld [vmem:[#allocation165_spill] sm:$0xff]  ;;  %v15601_v51 = vpop.f32.mrb[202].mxu0  ;;  %v15841_v41 = vpop.f32.mrb[186].mxu1  ;;  %v10210_v28 = vadd.f32 %v20578_v27, %v9874_v3 }
 0xa5f   : > { %13574 = vst [vmem:[%s20113_s21 + $0x4a8] sm:$0xff] %v12623_v17  ;;  %v9872_v47 = vadd.f32 %v21726_v53, %v8921_v21  ;;  %v12178_v19 = vadd.f32 %v21727_v38, %v11179_v22  ;;  %v20760_v42 = vmul.f32 0.3, %v13474_v14  ;;  %v20762_v15 = vmul.f32 0.3, %v9998_v55  ;;  %v21728_v61 = vld [vmem:[#allocation97_spill] sm:$0xff] }
 0xa60   : > { %v12516_v0 = vadd.f32 %v20602_v11, %v12180_v16  ;;  %v9875_v4 = vadd.f32 %v15601_v51, %v21728_v61  ;;  %v21729_v56 = vld [vmem:[#allocation170_spill] sm:$0xff]  ;;  %v8924_v34 = vpop.f32.mrb[203].mxu0  ;;  %v11182_v31 = vpop.f32.mrb[187].mxu1  ;;  %v21730_v22 = vld [vmem:[#allocation95_spill] sm:$0xff]  ;;  %v21731_v53 = vld [vmem:[#allocation168_spill] sm:$0xff]  ;;  %v10322_v11 = vmax.f32 %v10210_v28, 0.0 }
 0xa61   : > { %v12181_v17 = vadd.f32 %v15841_v41, %v21729_v56  ;;  %v10208_v21 = vadd.f32 %v20608_v25, %v9872_v47  ;;  %v12514_v14 = vadd.f32 %v20614_v33, %v12178_v19  ;;  %v9873_v55 = vadd.f32 %v21730_v22, %v8924_v34  ;;  %v13479_v27 = vld [vmem:[%s17614_s22 + $0x530] sm:$0xff]  ;;  %v9996_v41 = vld [vmem:[%s17614_s22 + $0x220] sm:$0xff]  ;;  %v9999_v56 = vld [vmem:[%s17614_s22 + $0x238] sm:$0xff]  ;;  %v20780_v34 = vpop.permute.xlu0 %11960  ;;  %v20782_v28 = vpop.permute.xlu1 %11955 }
 0xa62   : > { %v12179_v38 = vadd.f32 %v21731_v53, %v11182_v31  ;;  %v12628_v3 = vmax.f32 %v12516_v0, 0.0  ;;  %v10211_v16 = vadd.f32 %v20616_v5, %v9875_v4  ;;  %v13477_v61 = vld [vmem:[%s17614_s22 + $0x520] sm:$0xff]  ;;  %10434 = vst [vmem:[%s20113_s21 + $0x1d0] sm:$0xff] %v10322_v11  ;;  %v20786_v0 = vmul.f32 0.3, %v13479_v27  ;;  %v13480_v4 = vld [vmem:[%s17614_s22 + $0x538] sm:$0xff] }
 0xa63   : > { %v12517_v51 = vadd.f32 %v20622_v36, %v12181_v17  ;;  %v10320_v25 = vmax.f32 %v10208_v21, 0.0  ;;  %v12626_v33 = vmax.f32 %v12514_v14, 0.0  ;;  %v10209_v47 = vadd.f32 %v20624_v57, %v9873_v55  ;;  %v9997_v17 = vld [vmem:[%s17614_s22 + $0x228] sm:$0xff]  ;;  %v15604_v31 = vpop.f32.mrb[204].mxu0  ;;  %v15844_v21 = vpop.f32.mrb[188].mxu1  ;;  %v21732_v22 = vld [vmem:[#allocation56_spill] sm:$0xff] }
 0xa64   : > { %v12515_v19 = vadd.f32 %v20648_v6, %v12179_v38  ;;  %13579 = vst [vmem:[%s20113_s21 + $0x4d0] sm:$0xff] %v12628_v3  ;;  %v10323_v5 = vmax.f32 %v10211_v16, 0.0  ;;  %v20792_v14 = vmul.f32 0.3, %v9996_v41  ;;  %v9878_v55 = vadd.f32 %v15604_v31, %v21732_v22  ;;  %v21733_v53 = vld [vmem:[#allocation171_spill] sm:$0xff]  ;;  %v8937_v27 = vpop.f32.mrb[205].mxu0 }
 0xa65   : > { %v12629_v36 = vmax.f32 %v12517_v51, 0.0  ;;  %10432 = vst [vmem:[%s20113_s21 + $0x1c0] sm:$0xff] %v10320_v25  ;;  %13577 = vst [vmem:[%s20113_s21 + $0x4c0] sm:$0xff] %v12626_v33  ;;  %v10321_v57 = vmax.f32 %v10209_v47, 0.0  ;;  %v12184_v38 = vadd.f32 %v15844_v21, %v21733_v53  ;;  %v11195_v11 = vpop.f32.mrb[189].mxu1  ;;  %v21734_v51 = vld [vmem:[#allocation53_spill] sm:$0xff] }
 0xa66   : > { %v12627_v6 = vmax.f32 %v12515_v19, 0.0  ;;  %10435 = vst [vmem:[%s20113_s21 + $0x1d8] sm:$0xff] %v10323_v5  ;;  %v20798_v3 = vmul.f32 0.3, %v13477_v61  ;;  %v20800_v16 = vmul.f32 0.3, %v9999_v56  ;;  %v9876_v25 = vadd.f32 %v21734_v51, %v8937_v27 }
 0xa67   : > { %13580 = vst [vmem:[%s20113_s21 + $0x4d8] sm:$0xff] %v12629_v36  ;;  %10433 = vst [vmem:[%s20113_s21 + $0x1c8] sm:$0xff] %v10321_v57  ;;  %v21735_v33 = vld [vmem:[#allocation169_spill] sm:$0xff]  ;;  %v15605_v47 = vpop.f32.mrb[206].mxu0  ;;  %v15845_v19 = vpop.f32.mrb[190].mxu1  ;;  %v10214_v31 = vadd.f32 %v20654_v46, %v9878_v55  ;;  %v12520_v61 = vadd.f32 %v20660_v32, %v12184_v38  ;;  %v21737_v57 = vld [vmem:[#allocation24_spill] sm:$0xff] }
 0xa68   : > { %13578 = vst [vmem:[%s20113_s21 + $0x4c8] sm:$0xff] %v12627_v6  ;;  %v12182_v41 = vadd.f32 %v21735_v33, %v11195_v11  ;;  %v20806_v5 = vmul.f32 0.3, %v13480_v4  ;;  %v20808_v36 = vmul.f32 0.3, %v9997_v17  ;;  %v21736_v56 = vld [vmem:[#allocation101_spill] sm:$0xff]  ;;  %v12185_v6 = vadd.f32 %v15845_v19, %v21737_v57 }
 0xa69   : > { %v9879_v21 = vadd.f32 %v15605_v47, %v21736_v56  ;;  %v8940_v22 = vpop.f32.mrb[207].mxu0  ;;  %v11198_v53 = vpop.f32.mrb[191].mxu1  ;;  %v10212_v27 = vadd.f32 %v20662_v37, %v9876_v25  ;;  %v21738_v11 = vld [vmem:[#allocation99_spill] sm:$0xff]  ;;  %v21739_v51 = vld [vmem:[#allocation172_spill] sm:$0xff]  ;;  %v10326_v32 = vmax.f32 %v10214_v31, 0.0  ;;  %v12632_v55 = vmax.f32 %v12520_v61, 0.0 }
 0xa6a   : > { %v12518_v4 = vadd.f32 %v20668_v43, %v12182_v41  ;;  %v9877_v17 = vadd.f32 %v21738_v11, %v8940_v22  ;;  %v12183_v33 = vadd.f32 %v21739_v51, %v11198_v53  ;;  %v13478_v46 = vld [vmem:[%s17614_s22 + $0x528] sm:$0xff]  ;;  %v12521_v47 = vadd.f32 %v20694_v18, %v12185_v6  ;;  %v10002_v19 = vld [vmem:[%s17614_s22 + $0x250] sm:$0xff]  ;;  %v10000_v57 = vld [vmem:[%s17614_s22 + $0x240] sm:$0xff]  ;;  %v20826_v22 = vpop.permute.xlu0 %11970  ;;  %v20828_v31 = vpop.permute.xlu1 %11965 }
 0xa6b   : > { %v10215_v38 = vadd.f32 %v20670_v60, %v9879_v21  ;;  %v10324_v37 = vmax.f32 %v10212_v27, 0.0  ;;  %v13483_v56 = vld [vmem:[%s17614_s22 + $0x550] sm:$0xff]  ;;  %10438 = vst [vmem:[%s20113_s21 + $0x1f0] sm:$0xff] %v10326_v32  ;;  %13583 = vst [vmem:[%s20113_s21 + $0x4f0] sm:$0xff] %v12632_v55  ;;  %v20832_v61 = vmul.f32 0.3, %v13478_v46 }
 0xa6c   : > { %v12630_v43 = vmax.f32 %v12518_v4, 0.0  ;;  %v10213_v25 = vadd.f32 %v20700_v58, %v9877_v17  ;;  %v12519_v41 = vadd.f32 %v20706_v20, %v12183_v33  ;;  %v12633_v18 = vmax.f32 %v12521_v47, 0.0  ;;  %v13481_v21 = vld [vmem:[%s17614_s22 + $0x540] sm:$0xff]  ;;  %v10003_v6 = vld [vmem:[%s17614_s22 + $0x258] sm:$0xff]  ;;  %v15608_v53 = vpop.f32.mrb[208].mxu0  ;;  %v15848_v27 = vpop.f32.mrb[192].mxu1 }
 0xa6d   : > { %v10327_v60 = vmax.f32 %v10215_v38, 0.0  ;;  %10436 = vst [vmem:[%s20113_s21 + $0x1e0] sm:$0xff] %v10324_v37  ;;  %v20838_v4 = vmul.f32 0.3, %v10002_v19  ;;  %v21740_v11 = vld [vmem:[#allocation61_spill] sm:$0xff]  ;;  %v21741_v51 = vld [vmem:[#allocation54_spill] sm:$0xff] }
 0xa6e   : > { %13581 = vst [vmem:[%s20113_s21 + $0x4e0] sm:$0xff] %v12630_v43  ;;  %v10325_v58 = vmax.f32 %v10213_v25, 0.0  ;;  %v12631_v20 = vmax.f32 %v12519_v41, 0.0  ;;  %13584 = vst [vmem:[%s20113_s21 + $0x4f8] sm:$0xff] %v12633_v18  ;;  %v9882_v17 = vadd.f32 %v15608_v53, %v21740_v11  ;;  %v12188_v33 = vadd.f32 %v15848_v27, %v21741_v51  ;;  %v8953_v46 = vpop.f32.mrb[209].mxu0  ;;  %v11211_v32 = vpop.f32.mrb[193].mxu1 }
 0xa6f   : > { %10439 = vst [vmem:[%s20113_s21 + $0x1f8] sm:$0xff] %v10327_v60  ;;  %v20844_v55 = vmul.f32 0.3, %v13483_v56  ;;  %v20846_v38 = vmul.f32 0.3, %v10000_v57  ;;  %v21742_v47 = vld [vmem:[#allocation58_spill] sm:$0xff] }
 0xa70   : > { %10437 = vst [vmem:[%s20113_s21 + $0x1e8] sm:$0xff] %v10325_v58  ;;  %13582 = vst [vmem:[%s20113_s21 + $0x4e8] sm:$0xff] %v12631_v20  ;;  %v9880_v37 = vadd.f32 %v21742_v47, %v8953_v46  ;;  %v21743_v43 = vld [vmem:[#allocation25_spill] sm:$0xff]  ;;  %v15609_v25 = vpop.f32.mrb[210].mxu0  ;;  %v15849_v41 = vpop.f32.mrb[194].mxu1  ;;  %v10218_v53 = vadd.f32 %v20708_v52, %v9882_v17  ;;  %v12524_v56 = vadd.f32 %v20714_v54, %v12188_v33  ;;  %v21745_v58 = vld [vmem:[#allocation26_spill] sm:$0xff] }
 0xa71   : > { %v12186_v19 = vadd.f32 %v21743_v43, %v11211_v32  ;;  %v20852_v60 = vmul.f32 0.3, %v13481_v21  ;;  %v20854_v18 = vmul.f32 0.3, %v10003_v6  ;;  %v21744_v57 = vld [vmem:[#allocation105_spill] sm:$0xff]  ;;  %v12189_v20 = vadd.f32 %v15849_v41, %v21745_v58  ;;  %v8956_v11 = vpop.f32.mrb[211].mxu0 }
 0xa72   : > { %v9883_v27 = vadd.f32 %v15609_v25, %v21744_v57  ;;  %v11214_v51 = vpop.f32.mrb[195].mxu1  ;;  %v10216_v46 = vadd.f32 %v20716_v59, %v9880_v37  ;;  %v21746_v32 = vld [vmem:[#allocation103_spill] sm:$0xff]  ;;  %v21747_v47 = vld [vmem:[#allocation52_spill] sm:$0xff]  ;;  %v10330_v54 = vmax.f32 %v10218_v53, 0.0  ;;  %v12636_v17 = vmax.f32 %v12524_v56, 0.0  ;;  %v20874_v53 = vpop.permute.xlu1 %11975 }
 0xa73   : > { %v12522_v21 = vadd.f32 %v20740_v23, %v12186_v19  ;;  %v9881_v6 = vadd.f32 %v21746_v32, %v8956_v11  ;;  %v12187_v43 = vadd.f32 %v21747_v47, %v11214_v51  ;;  %v13484_v52 = vld [vmem:[%s17614_s22 + $0x558] sm:$0xff]  ;;  %v12525_v25 = vadd.f32 %v20752_v10, %v12189_v20  ;;  %v10001_v41 = vld [vmem:[%s17614_s22 + $0x248] sm:$0xff]  ;;  %v10006_v58 = vld [vmem:[%s17614_s22 + $0x270] sm:$0xff]  ;;  %v20872_v11 = vpop.permute.xlu0 %11980  ;;  %v15612_v51 = vpop.f32.mrb[212].mxu0 }
 0xa74   : > { %v10219_v33 = vadd.f32 %v20746_v30, %v9883_v27  ;;  %v10328_v59 = vmax.f32 %v10216_v46, 0.0  ;;  %v13482_v57 = vld [vmem:[%s17614_s22 + $0x548] sm:$0xff]  ;;  %10442 = vst [vmem:[%s20113_s21 + $0x210] sm:$0xff] %v10330_v54  ;;  %13587 = vst [vmem:[%s20113_s21 + $0x510] sm:$0xff] %v12636_v17  ;;  %v20878_v56 = vmul.f32 0.3, %v13484_v52 }
 0xa75   : > { %v12634_v23 = vmax.f32 %v12522_v21, 0.0  ;;  %v10217_v37 = vadd.f32 %v20754_v48, %v9881_v6  ;;  %v12523_v19 = vadd.f32 %v20760_v42, %v12187_v43  ;;  %v12637_v10 = vmax.f32 %v12525_v25, 0.0  ;;  %v13487_v27 = vld [vmem:[%s17614_s22 + $0x570] sm:$0xff]  ;;  %v10004_v20 = vld [vmem:[%s17614_s22 + $0x260] sm:$0xff]  ;;  %v15852_v46 = vpop.f32.mrb[196].mxu1  ;;  %v8969_v52 = vpop.f32.mrb[213].mxu0 }
 0xa76   : > { %v10331_v30 = vmax.f32 %v10219_v33, 0.0  ;;  %10440 = vst [vmem:[%s20113_s21 + $0x200] sm:$0xff] %v10328_v59  ;;  %v20884_v21 = vmul.f32 0.3, %v10001_v41  ;;  %v21748_v32 = vld [vmem:[#allocation66_spill] sm:$0xff]  ;;  %v21749_v47 = vld [vmem:[#allocation28_spill] sm:$0xff] }
 0xa77   : > { %13585 = vst [vmem:[%s20113_s21 + $0x500] sm:$0xff] %v12634_v23  ;;  %v10329_v48 = vmax.f32 %v10217_v37, 0.0  ;;  %v12635_v42 = vmax.f32 %v12523_v19, 0.0  ;;  %13588 = vst [vmem:[%s20113_s21 + $0x518] sm:$0xff] %v12637_v10  ;;  %v9886_v6 = vadd.f32 %v15612_v51, %v21748_v32  ;;  %v12192_v43 = vadd.f32 %v15852_v46, %v21749_v47  ;;  %v11227_v54 = vpop.f32.mrb[197].mxu1  ;;  %v21750_v25 = vld [vmem:[#allocation63_spill] sm:$0xff] }
 0xa78   : > { %10443 = vst [vmem:[%s20113_s21 + $0x218] sm:$0xff] %v10331_v30  ;;  %v20890_v17 = vmul.f32 0.3, %v13482_v57  ;;  %v20892_v33 = vmul.f32 0.3, %v10006_v58  ;;  %v9884_v59 = vadd.f32 %v21750_v25, %v8969_v52  ;;  %v21751_v23 = vld [vmem:[#allocation27_spill] sm:$0xff] }
 0xa79   : > { %10441 = vst [vmem:[%s20113_s21 + $0x208] sm:$0xff] %v10329_v48  ;;  %13586 = vst [vmem:[%s20113_s21 + $0x508] sm:$0xff] %v12635_v42  ;;  %v12190_v41 = vadd.f32 %v21751_v23, %v11227_v54  ;;  %v15613_v37 = vpop.f32.mrb[214].mxu0  ;;  %v15853_v19 = vpop.f32.mrb[198].mxu1  ;;  %v20898_v30 = vmul.f32 0.3, %v13487_v27  ;;  %v10222_v51 = vadd.f32 %v20762_v15, %v9886_v6  ;;  %v12528_v57 = vadd.f32 %v20786_v0, %v12192_v43 }
 0xa7a   : > { %v20900_v10 = vmul.f32 0.3, %v10004_v20  ;;  %v21752_v58 = vld [vmem:[#allocation109_spill] sm:$0xff]  ;;  %v12193_v48 = vadd.f32 %v15853_v19, %v20322_v44  ;;  %v8972_v42 = vpop.f32.mrb[215].mxu0  ;;  %v11230_v32 = vpop.f32.mrb[199].mxu1  ;;  %v10220_v47 = vadd.f32 %v20792_v14, %v9884_v59  ;;  %v21753_v52 = vld [vmem:[#allocation107_spill] sm:$0xff] }
 0xa7b   : > { %v9887_v46 = vadd.f32 %v15613_v37, %v21752_v58  ;;  %v12526_v27 = vadd.f32 %v20798_v3, %v12190_v41  ;;  %v9885_v20 = vadd.f32 %v21753_v52, %v8972_v42  ;;  %v21754_v54 = vld [vmem:[#allocation60_spill] sm:$0xff]  ;;  %v13485_v15 = vld [vmem:[%s17614_s22 + $0x560] sm:$0xff]  ;;  %v10334_v0 = vmax.f32 %v10222_v51, 0.0  ;;  %v10005_v19 = vld [vmem:[%s17614_s22 + $0x268] sm:$0xff]  ;;  %v20918_v58 = vpop.permute.xlu0 %11990  ;;  %v20920_v51 = vpop.permute.xlu1 %11985 }
 0xa7c   : > { %v12191_v25 = vadd.f32 %v21754_v54, %v11230_v32  ;;  %v12640_v6 = vmax.f32 %v12528_v57, 0.0  ;;  %v12529_v44 = vadd.f32 %v20806_v5, %v12193_v48  ;;  %v10007_v23 = vld [vmem:[%s17614_s22 + $0x278] sm:$0xff]  ;;  %v10332_v14 = vmax.f32 %v10220_v47, 0.0  ;;  %v10010_v48 = vld [vmem:[%s17614_s22 + $0x290] sm:$0xff]  ;;  %v15616_v42 = vpop.f32.mrb[216].mxu0  ;;  %v15856_v32 = vpop.f32.mrb[200].mxu1 }
 0xa7d   : > { %v10223_v43 = vadd.f32 %v20800_v16, %v9887_v46  ;;  %v12638_v3 = vmax.f32 %v12526_v27, 0.0  ;;  %v10221_v59 = vadd.f32 %v20808_v36, %v9885_v20  ;;  %v13488_v37 = vld [vmem:[%s17614_s22 + $0x578] sm:$0xff]  ;;  %10446 = vst [vmem:[%s20113_s21 + $0x230] sm:$0xff] %v10334_v0  ;;  %v20924_v57 = vmul.f32 0.3, %v13485_v15  ;;  %v13486_v46 = vld [vmem:[%s17614_s22 + $0x568] sm:$0xff] }
 0xa7e   : > { %v12527_v41 = vadd.f32 %v20832_v61, %v12191_v25  ;;  %13591 = vst [vmem:[%s20113_s21 + $0x530] sm:$0xff] %v12640_v6  ;;  %v12641_v5 = vmax.f32 %v12529_v44, 0.0  ;;  %10444 = vst [vmem:[%s20113_s21 + $0x220] sm:$0xff] %v10332_v14  ;;  %v20930_v47 = vmul.f32 0.3, %v10007_v23  ;;  %v21755_v27 = vld [vmem:[#allocation71_spill] sm:$0xff]  ;;  %v12196_v20 = vadd.f32 %v15856_v32, %v20366_v13 }
 0xa7f   : > { %v10335_v16 = vmax.f32 %v10223_v43, 0.0  ;;  %13589 = vst [vmem:[%s20113_s21 + $0x520] sm:$0xff] %v12638_v3  ;;  %v10333_v36 = vmax.f32 %v10221_v59, 0.0  ;;  %v9890_v52 = vadd.f32 %v15616_v42, %v21755_v27  ;;  %v8985_v54 = vpop.f32.mrb[217].mxu0  ;;  %v11243_v25 = vpop.f32.mrb[201].mxu1  ;;  %v21756_v6 = vld [vmem:[#allocation68_spill] sm:$0xff] }
 0xa80   : > { %v12639_v61 = vmax.f32 %v12527_v41, 0.0  ;;  %13592 = vst [vmem:[%s20113_s21 + $0x538] sm:$0xff] %v12641_v5  ;;  %v20936_v15 = vmul.f32 0.3, %v13488_v37  ;;  %v20938_v0 = vmul.f32 0.3, %v10005_v19  ;;  %v9888_v43 = vadd.f32 %v21756_v6, %v8985_v54 }
 0xa81   : > { %10447 = vst [vmem:[%s20113_s21 + $0x238] sm:$0xff] %v10335_v16  ;;  %10445 = vst [vmem:[%s20113_s21 + $0x228] sm:$0xff] %v10333_v36  ;;  %v12194_v44 = vadd.f32 %v20320_v1, %v11243_v25  ;;  %v15617_v23 = vpop.f32.mrb[218].mxu0  ;;  %v15857_v14 = vpop.f32.mrb[202].mxu1  ;;  %v20944_v3 = vmul.f32 0.3, %v13486_v46  ;;  %v10226_v13 = vadd.f32 %v20838_v4, %v9890_v52  ;;  %v12532_v41 = vadd.f32 %v20844_v55, %v12196_v20 }
 0xa82   : > { %13590 = vst [vmem:[%s20113_s21 + $0x528] sm:$0xff] %v12639_v61  ;;  %v20946_v59 = vmul.f32 0.3, %v10010_v48  ;;  %v21757_v37 = vld [vmem:[#allocation113_spill] sm:$0xff]  ;;  %v12197_v16 = vadd.f32 %v15857_v14, %v20414_v62  ;;  %v8988_v5 = vpop.f32.mrb[219].mxu0  ;;  %v11246_v36 = vpop.f32.mrb[203].mxu1  ;;  %v10224_v1 = vadd.f32 %v20846_v38, %v9888_v43 }
 0xa83   : > { %v9891_v19 = vadd.f32 %v15617_v23, %v21757_v37  ;;  %v12530_v46 = vadd.f32 %v20852_v60, %v12194_v44  ;;  %v21758_v61 = vld [vmem:[#allocation111_spill] sm:$0xff]  ;;  %v12195_v4 = vadd.f32 %v20368_v49, %v11246_v36  ;;  %v10008_v55 = vld [vmem:[%s17614_s22 + $0x280] sm:$0xff]  ;;  %v10338_v32 = vmax.f32 %v10226_v13, 0.0  ;;  %v10011_v20 = vld [vmem:[%s17614_s22 + $0x298] sm:$0xff]  ;;  %v20967_v23 = vpop.permute.xlu0 %12000  ;;  %v15620_v37 = vpop.f32.mrb[220].mxu0 }
 0xa84   : > { %v9889_v48 = vadd.f32 %v21758_v61, %v8988_v5  ;;  %v13491_v42 = vld [vmem:[%s17614_s22 + $0x590] sm:$0xff]  ;;  %v12644_v27 = vmax.f32 %v12532_v41, 0.0  ;;  %v12533_v52 = vadd.f32 %v20878_v56, %v12197_v16  ;;  %v13489_v38 = vld [vmem:[%s17614_s22 + $0x580] sm:$0xff]  ;;  %v10336_v60 = vmax.f32 %v10224_v1, 0.0  ;;  %v13492_v6 = vld [vmem:[%s17614_s22 + $0x598] sm:$0xff] }
 0xa85   : > { %v10227_v62 = vadd.f32 %v20854_v18, %v9891_v19  ;;  %v12642_v54 = vmax.f32 %v12530_v46, 0.0  ;;  %v12531_v49 = vadd.f32 %v20890_v17, %v12195_v4  ;;  %v10009_v43 = vld [vmem:[%s17614_s22 + $0x288] sm:$0xff]  ;;  %v20969_v18 = vpop.permute.xlu1 %11995  ;;  %10450 = vst [vmem:[%s20113_s21 + $0x250] sm:$0xff] %v10338_v32  ;;  %v20973_v13 = vmul.f32 0.3, %v13491_v42  ;;  %v15860_v19 = vpop.f32.mrb[204].mxu1 }
 0xa86   : > { %v10225_v25 = vadd.f32 %v20884_v21, %v9889_v48  ;;  %v13490_v44 = vld [vmem:[%s17614_s22 + $0x588] sm:$0xff]  ;;  %13595 = vst [vmem:[%s20113_s21 + $0x550] sm:$0xff] %v12644_v27  ;;  %v12645_v14 = vmax.f32 %v12533_v52, 0.0  ;;  %v20975_v41 = vmul.f32 0.3, %v10008_v55  ;;  %10448 = vst [vmem:[%s20113_s21 + $0x240] sm:$0xff] %v10336_v60  ;;  %v12200_v1 = vadd.f32 %v15860_v19, %v20458_v24 }
 0xa87   : > { %v10339_v56 = vmax.f32 %v10227_v62, 0.0  ;;  %13593 = vst [vmem:[%s20113_s21 + $0x540] sm:$0xff] %v12642_v54  ;;  %v12643_v17 = vmax.f32 %v12531_v49, 0.0  ;;  %v20979_v16 = vmul.f32 0.3, %v13489_v38  ;;  %v21759_v5 = vld [vmem:[#allocation76_spill] sm:$0xff] }
 0xa88   : > { %v10337_v21 = vmax.f32 %v10225_v25, 0.0  ;;  %13596 = vst [vmem:[%s20113_s21 + $0x558] sm:$0xff] %v12645_v14  ;;  %v9894_v36 = vadd.f32 %v15620_v37, %v21759_v5  ;;  %v9001_v46 = vpop.f32.mrb[221].mxu0  ;;  %v11259_v61 = vpop.f32.mrb[205].mxu1  ;;  %v20985_v48 = vmul.f32 0.3, %v10011_v20  ;;  %v12536_v20 = vadd.f32 %v20898_v30, %v12200_v1 }
 0xa89   : > { %10451 = vst [vmem:[%s20113_s21 + $0x258] sm:$0xff] %v10339_v56  ;;  %v20987_v4 = vmul.f32 0.3, %v13492_v6  ;;  %13594 = vst [vmem:[%s20113_s21 + $0x548] sm:$0xff] %v12643_v17  ;;  %v21760_v42 = vld [vmem:[#allocation73_spill] sm:$0xff]  ;;  %v12198_v32 = vadd.f32 %v20412_v50, %v11259_v61  ;;  %v15621_v27 = vpop.f32.mrb[222].mxu0 }
 0xa8a   : > { %10449 = vst [vmem:[%s20113_s21 + $0x248] sm:$0xff] %v10337_v21  ;;  %v9892_v55 = vadd.f32 %v21760_v42, %v9001_v46  ;;  %v15861_v62 = vpop.f32.mrb[206].mxu1  ;;  %v20993_v52 = vmul.f32 0.3, %v10009_v43  ;;  %v20995_v38 = vmul.f32 0.3, %v13490_v44  ;;  %v10230_v24 = vadd.f32 %v20892_v33, %v9894_v36  ;;  %v21016_v42 = vpop.permute.xlu0 %12010 }
 0xa8b   : > { %v21761_v60 = vld [vmem:[#allocation117_spill] sm:$0xff]  ;;  %v12201_v25 = vadd.f32 %v15861_v62, %v20506_v29  ;;  %v9004_v49 = vpop.f32.mrb[223].mxu0  ;;  %v11262_v6 = vpop.f32.mrb[207].mxu1  ;;  %v12534_v43 = vadd.f32 %v20924_v57, %v12198_v32  ;;  %v21762_v56 = vld [vmem:[#allocation115_spill] sm:$0xff]  ;;  %v12648_v17 = vmax.f32 %v12536_v20, 0.0 }
 0xa8c   : > { %v9895_v54 = vadd.f32 %v15621_v27, %v21761_v60  ;;  %v10228_v50 = vadd.f32 %v20900_v10, %v9892_v55  ;;  %v9893_v44 = vadd.f32 %v21762_v56, %v9004_v49  ;;  %v12199_v33 = vadd.f32 %v20460_v8, %v11262_v6  ;;  %v10014_v14 = vld [vmem:[%s17614_s22 + $0x2b0] sm:$0xff]  ;;  %v10012_v10 = vld [vmem:[%s17614_s22 + $0x2a0] sm:$0xff]  ;;  %v10015_v1 = vld [vmem:[%s17614_s22 + $0x2b8] sm:$0xff]  ;;  %v15624_v62 = vpop.f32.mrb[224].mxu0 }
 0xa8d   : > { %v13495_v30 = vld [vmem:[%s17614_s22 + $0x5b0] sm:$0xff]  ;;  %v10342_v21 = vmax.f32 %v10230_v24, 0.0  ;;  %v12537_v37 = vadd.f32 %v20936_v15, %v12201_v25  ;;  %v13493_v19 = vld [vmem:[%s17614_s22 + $0x5a0] sm:$0xff]  ;;  %v12646_v5 = vmax.f32 %v12534_v43, 0.0  ;;  %v13496_v46 = vld [vmem:[%s17614_s22 + $0x5b8] sm:$0xff]  ;;  %13599 = vst [vmem:[%s20113_s21 + $0x570] sm:$0xff] %v12648_v17 }
 0xa8e   : > { %v10231_v29 = vadd.f32 %v20930_v47, %v9895_v54  ;;  %v10340_v57 = vmax.f32 %v10228_v50, 0.0  ;;  %v10229_v36 = vadd.f32 %v20938_v0, %v9893_v44  ;;  %v12535_v8 = vadd.f32 %v20944_v3, %v12199_v33  ;;  %v10013_v61 = vld [vmem:[%s17614_s22 + $0x2a8] sm:$0xff]  ;;  %v21018_v47 = vpop.permute.xlu1 %12005  ;;  %v15864_v24 = vpop.f32.mrb[208].mxu1  ;;  %v21763_v60 = vld [vmem:[#allocation81_spill] sm:$0xff] }
 0xa8f   : > { %10454 = vst [vmem:[%s20113_s21 + $0x270] sm:$0xff] %v10342_v21  ;;  %v12649_v55 = vmax.f32 %v12537_v37, 0.0  ;;  %v21022_v32 = vmul.f32 0.3, %v10014_v14  ;;  %v21024_v27 = vmul.f32 0.3, %v13495_v30  ;;  %v9898_v54 = vadd.f32 %v15624_v62, %v21763_v60 }
 0xa90   : > { %v10343_v15 = vmax.f32 %v10231_v29, 0.0  ;;  %10452 = vst [vmem:[%s20113_s21 + $0x260] sm:$0xff] %v10340_v57  ;;  %13597 = vst [vmem:[%s20113_s21 + $0x560] sm:$0xff] %v12646_v5  ;;  %v10341_v0 = vmax.f32 %v10229_v36, 0.0  ;;  %v12647_v3 = vmax.f32 %v12535_v8, 0.0  ;;  %v12204_v25 = vadd.f32 %v15864_v24, %v20550_v45  ;;  %v9017_v49 = vpop.f32.mrb[225].mxu0 }
 0xa91   : > { %v21028_v20 = vmul.f32 0.3, %v10012_v10  ;;  %13600 = vst [vmem:[%s20113_s21 + $0x578] sm:$0xff] %v12649_v55  ;;  %v11275_v6 = vpop.f32.mrb[209].mxu1  ;;  %v21034_v50 = vmul.f32 0.3, %v13493_v19  ;;  %v10234_v45 = vadd.f32 %v20946_v59, %v9898_v54 }
 0xa92   : > { %10455 = vst [vmem:[%s20113_s21 + $0x278] sm:$0xff] %v10343_v15  ;;  %v21036_v43 = vmul.f32 0.3, %v10015_v1  ;;  %10453 = vst [vmem:[%s20113_s21 + $0x268] sm:$0xff] %v10341_v0  ;;  %v21764_v56 = vld [vmem:[#allocation78_spill] sm:$0xff]  ;;  %v12202_v33 = vadd.f32 %v20504_v9, %v11275_v6  ;;  %v15625_v14 = vpop.f32.mrb[226].mxu0  ;;  %v12540_v29 = vadd.f32 %v20973_v13, %v12204_v25  ;;  %v21065_v6 = vpop.permute.xlu0 %12020 }
 0xa93   : > { %13598 = vst [vmem:[%s20113_s21 + $0x568] sm:$0xff] %v12647_v3  ;;  %v9896_v44 = vadd.f32 %v21764_v56, %v9017_v49  ;;  %v15865_v30 = vpop.f32.mrb[210].mxu1  ;;  %v21042_v21 = vmul.f32 0.3, %v13496_v46  ;;  %v21044_v17 = vmul.f32 0.3, %v10013_v61 }
 0xa94   : > { %v21765_v37 = vld [vmem:[#allocation121_spill] sm:$0xff]  ;;  %v12205_v19 = vadd.f32 %v15865_v30, %v20598_v7  ;;  %v9020_v57 = vpop.f32.mrb[227].mxu0  ;;  %v11278_v5 = vpop.f32.mrb[211].mxu1  ;;  %v12538_v36 = vadd.f32 %v20979_v16, %v12202_v33  ;;  %v21766_v8 = vld [vmem:[#allocation119_spill] sm:$0xff]  ;;  %v21767_v46 = vld [vmem:[#allocation116_spill] sm:$0xff]  ;;  %v10346_v15 = vmax.f32 %v10234_v45, 0.0 }
 0xa95   : > { %v9899_v10 = vadd.f32 %v15625_v14, %v21765_v37  ;;  %v10232_v9 = vadd.f32 %v20975_v41, %v9896_v44  ;;  %v9897_v1 = vadd.f32 %v21766_v8, %v9020_v57  ;;  %v12203_v59 = vadd.f32 %v21767_v46, %v11278_v5  ;;  %v13494_v61 = vld [vmem:[%s17614_s22 + $0x5a8] sm:$0xff]  ;;  %v10018_v13 = vld [vmem:[%s17614_s22 + $0x2d0] sm:$0xff]  ;;  %v10016_v3 = vld [vmem:[%s17614_s22 + $0x2c0] sm:$0xff]  ;;  %v15628_v14 = vpop.f32.mrb[228].mxu0  ;;  %v15868_v30 = vpop.f32.mrb[212].mxu1 }
 0xa96   : > { %v12652_v55 = vmax.f32 %v12540_v29, 0.0  ;;  %v12541_v0 = vadd.f32 %v20987_v4, %v12205_v19  ;;  %v13499_v41 = vld [vmem:[%s17614_s22 + $0x5d0] sm:$0xff]  ;;  %v12650_v62 = vmax.f32 %v12538_v36, 0.0  ;;  %v13497_v54 = vld [vmem:[%s17614_s22 + $0x5c0] sm:$0xff]  ;;  %v10019_v25 = vld [vmem:[%s17614_s22 + $0x2d8] sm:$0xff]  ;;  %10458 = vst [vmem:[%s20113_s21 + $0x290] sm:$0xff] %v10346_v15 }
 0xa97   : > { %v10235_v7 = vadd.f32 %v20985_v48, %v9899_v10  ;;  %v10344_v16 = vmax.f32 %v10232_v9, 0.0  ;;  %v10233_v24 = vadd.f32 %v20993_v52, %v9897_v1  ;;  %v12539_v60 = vadd.f32 %v20995_v38, %v12203_v59  ;;  %v13500_v49 = vld [vmem:[%s17614_s22 + $0x5d8] sm:$0xff]  ;;  %v21067_v48 = vpop.permute.xlu1 %12015  ;;  %v21768_v29 = vld [vmem:[#allocation86_spill] sm:$0xff]  ;;  %v9033_v19 = vpop.f32.mrb[229].mxu0  ;;  %v21769_v36 = vld [vmem:[#allocation83_spill] sm:$0xff] }
 0xa98   : > { %13603 = vst [vmem:[%s20113_s21 + $0x590] sm:$0xff] %v12652_v55  ;;  %v12653_v56 = vmax.f32 %v12541_v0, 0.0  ;;  %v12431_v44 = vmul.f32 0.3, %v13494_v61  ;;  %v21071_v33 = vmul.f32 0.3, %v10018_v13  ;;  %v9902_v37 = vadd.f32 %v15628_v14, %v21768_v29  ;;  %v21111_v29 = vpop.permute.xlu0 %12030 }
 0xa99   : > { %v10347_v4 = vmax.f32 %v10235_v7, 0.0  ;;  %10456 = vst [vmem:[%s20113_s21 + $0x280] sm:$0xff] %v10344_v16  ;;  %13601 = vst [vmem:[%s20113_s21 + $0x580] sm:$0xff] %v12650_v62  ;;  %v10345_v52 = vmax.f32 %v10233_v24, 0.0  ;;  %v12651_v38 = vmax.f32 %v12539_v60, 0.0  ;;  %v12208_v10 = vadd.f32 %v15868_v30, %v20642_v39  ;;  %v11291_v57 = vpop.f32.mrb[213].mxu1 }
 0xa9a   : > { %v21075_v45 = vmul.f32 0.3, %v13499_v41  ;;  %13604 = vst [vmem:[%s20113_s21 + $0x598] sm:$0xff] %v12653_v56  ;;  %v21081_v5 = vmul.f32 0.3, %v10016_v3  ;;  %v9900_v8 = vadd.f32 %v21769_v36, %v9033_v19  ;;  %v12206_v1 = vadd.f32 %v20596_v63, %v11291_v57  ;;  %v15629_v46 = vpop.f32.mrb[230].mxu0 }
 0xa9b   : > { %10459 = vst [vmem:[%s20113_s21 + $0x298] sm:$0xff] %v10347_v4  ;;  %v21083_v9 = vmul.f32 0.3, %v13497_v54  ;;  %10457 = vst [vmem:[%s20113_s21 + $0x288] sm:$0xff] %v10345_v52  ;;  %v15869_v59 = vpop.f32.mrb[214].mxu1  ;;  %v10238_v39 = vadd.f32 %v21022_v32, %v9902_v37  ;;  %v12544_v15 = vadd.f32 %v21024_v27, %v12208_v10  ;;  %v21770_v55 = vld [vmem:[#allocation125_spill] sm:$0xff]  ;;  %v21113_v37 = vpop.permute.xlu1 %12025 }
 0xa9c   : > { %13602 = vst [vmem:[%s20113_s21 + $0x588] sm:$0xff] %v12651_v38  ;;  %v21089_v61 = vmul.f32 0.3, %v10019_v25  ;;  %v21091_v13 = vmul.f32 0.3, %v13500_v49  ;;  %v9903_v7 = vadd.f32 %v15629_v46, %v21770_v55  ;;  %v12209_v0 = vadd.f32 %v15869_v59, %v20690_v2  ;;  %v9036_v41 = vpop.f32.mrb[231].mxu0 }
 0xa9d   : > { %v11294_v3 = vpop.f32.mrb[215].mxu1  ;;  %v10236_v63 = vadd.f32 %v21028_v20, %v9900_v8  ;;  %v12542_v16 = vadd.f32 %v21034_v50, %v12206_v1  ;;  %v21771_v62 = vld [vmem:[#allocation123_spill] sm:$0xff]  ;;  %v10350_v54 = vmax.f32 %v10238_v39, 0.0  ;;  %v12656_v25 = vmax.f32 %v12544_v15, 0.0  ;;  %v13501_v14 = vld [vmem:[%s17614_s22 + $0x5e0] sm:$0xff]  ;;  %v10023_v30 = vld [vmem:[%s17614_s22 + $0x2f8] sm:$0xff] }
 0xa9e   : > { %v9901_v24 = vadd.f32 %v21771_v62, %v9036_v41  ;;  %v12207_v32 = vadd.f32 %v20644_v40, %v11294_v3  ;;  %v10017_v60 = vld [vmem:[%s17614_s22 + $0x2c8] sm:$0xff]  ;;  %v10239_v2 = vadd.f32 %v21036_v43, %v9903_v7  ;;  %v12545_v49 = vadd.f32 %v21042_v21, %v12209_v0  ;;  %v10022_v20 = vld [vmem:[%s17614_s22 + $0x2f0] sm:$0xff]  ;;  %v10020_v40 = vld [vmem:[%s17614_s22 + $0x2e0] sm:$0xff]  ;;  %v15632_v57 = vpop.f32.mrb[232].mxu0  ;;  %v15872_v36 = vpop.f32.mrb[216].mxu1 }
 0xa9f   : > { %v13498_v27 = vld [vmem:[%s17614_s22 + $0x5c8] sm:$0xff]  ;;  %v13503_v4 = vld [vmem:[%s17614_s22 + $0x5f0] sm:$0xff]  ;;  %v10348_v50 = vmax.f32 %v10236_v63, 0.0  ;;  %v12654_v56 = vmax.f32 %v12542_v16, 0.0  ;;  %10462 = vst [vmem:[%s20113_s21 + $0x2b0] sm:$0xff] %v10350_v54  ;;  %13607 = vst [vmem:[%s20113_s21 + $0x5b0] sm:$0xff] %v12656_v25  ;;  %v12212_v59 = vadd.f32 %v15872_v36, %v20734_v26 }
 0xaa0   : > { %v10237_v52 = vadd.f32 %v21044_v17, %v9901_v24  ;;  %v12543_v38 = vadd.f32 %v12431_v44, %v12207_v32  ;;  %v10351_v43 = vmax.f32 %v10239_v2, 0.0  ;;  %v12657_v21 = vmax.f32 %v12545_v49, 0.0  ;;  %v21772_v1 = vld [vmem:[#allocation91_spill] sm:$0xff]  ;;  %v9049_v39 = vpop.f32.mrb[233].mxu0  ;;  %v11307_v15 = vpop.f32.mrb[217].mxu1  ;;  %v21773_v0 = vld [vmem:[#allocation88_spill] sm:$0xff] }
 0xaa1   : > { %v10129_v10 = vmul.f32 0.3, %v10017_v60  ;;  %v12435_v19 = vmul.f32 0.3, %v13498_v27  ;;  %10460 = vst [vmem:[%s20113_s21 + $0x2a0] sm:$0xff] %v10348_v50  ;;  %13605 = vst [vmem:[%s20113_s21 + $0x5a0] sm:$0xff] %v12654_v56  ;;  %v9906_v46 = vadd.f32 %v15632_v57, %v21772_v1  ;;  %v9904_v41 = vadd.f32 %v21773_v0, %v9049_v39  ;;  %v21156_v57 = vpop.permute.xlu1 %12035 }
 0xaa2   : > { %v10349_v17 = vmax.f32 %v10237_v52, 0.0  ;;  %v12655_v44 = vmax.f32 %v12543_v38, 0.0  ;;  %v21119_v8 = vmul.f32 0.3, %v10022_v20  ;;  %10463 = vst [vmem:[%s20113_s21 + $0x2b8] sm:$0xff] %v10351_v43  ;;  %13608 = vst [vmem:[%s20113_s21 + $0x5b8] sm:$0xff] %v12657_v21  ;;  %v12210_v3 = vadd.f32 %v20688_v12, %v11307_v15 }
 0xaa3   : > { %v21125_v55 = vmul.f32 0.3, %v13503_v4  ;;  %v21127_v7 = vmul.f32 0.3, %v10020_v40  ;;  %v15633_v63 = vpop.f32.mrb[234].mxu0  ;;  %v15873_v16 = vpop.f32.mrb[218].mxu1  ;;  %v10242_v26 = vadd.f32 %v21071_v33, %v9906_v46  ;;  %v12548_v32 = vadd.f32 %v21075_v45, %v12212_v59 }
 0xaa4   : > { %10461 = vst [vmem:[%s20113_s21 + $0x2a8] sm:$0xff] %v10349_v17  ;;  %13606 = vst [vmem:[%s20113_s21 + $0x5a8] sm:$0xff] %v12655_v44  ;;  %v21133_v62 = vmul.f32 0.3, %v13501_v14  ;;  %v21135_v24 = vmul.f32 0.3, %v10023_v30  ;;  %v12213_v54 = vadd.f32 %v15873_v16, %v20782_v28  ;;  %v10240_v12 = vadd.f32 %v21081_v5, %v9904_v41  ;;  %v21154_v44 = vpop.permute.xlu0 %12040 }
 0xaa5   : > { %v21774_v60 = vld [vmem:[#allocation128_spill] sm:$0xff]  ;;  %v9052_v25 = vpop.f32.mrb[235].mxu0  ;;  %v11310_v2 = vpop.f32.mrb[219].mxu1  ;;  %v12546_v49 = vadd.f32 %v21083_v9, %v12210_v3  ;;  %v21775_v20 = vld [vmem:[#allocation127_spill] sm:$0xff]  ;;  %v10354_v56 = vmax.f32 %v10242_v26, 0.0  ;;  %v12660_v52 = vmax.f32 %v12548_v32, 0.0 }
 0xaa6   : > { %v9907_v27 = vadd.f32 %v15633_v63, %v21774_v60  ;;  %v9905_v4 = vadd.f32 %v21775_v20, %v9052_v25  ;;  %v12211_v33 = vadd.f32 %v20736_v35, %v11310_v2  ;;  %v13504_v50 = vld [vmem:[%s17614_s22 + $0x5f8] sm:$0xff]  ;;  %v10021_v45 = vld [vmem:[%s17614_s22 + $0x2e8] sm:$0xff]  ;;  %v12549_v38 = vadd.f32 %v21091_v13, %v12213_v54  ;;  %v10026_v40 = vld [vmem:[%s17614_s22 + $0x310] sm:$0xff]  ;;  %v15636_v46 = vpop.f32.mrb[236].mxu0  ;;  %v15876_v59 = vpop.f32.mrb[220].mxu1 }
 0xaa7   : > { %v13502_v5 = vld [vmem:[%s17614_s22 + $0x5e8] sm:$0xff]  ;;  %v10352_v9 = vmax.f32 %v10240_v12, 0.0  ;;  %v12658_v14 = vmax.f32 %v12546_v49, 0.0  ;;  %v13507_v21 = vld [vmem:[%s17614_s22 + $0x610] sm:$0xff]  ;;  %v10024_v35 = vld [vmem:[%s17614_s22 + $0x300] sm:$0xff]  ;;  %10466 = vst [vmem:[%s20113_s21 + $0x2d0] sm:$0xff] %v10354_v56  ;;  %v12216_v41 = vadd.f32 %v15876_v59, %v20826_v22 }
 0xaa8   : > { %v10243_v28 = vadd.f32 %v21089_v61, %v9907_v27  ;;  %v10241_v30 = vadd.f32 %v10129_v10, %v9905_v4  ;;  %v12547_v43 = vadd.f32 %v12435_v19, %v12211_v33  ;;  %v13505_v17 = vld [vmem:[%s17614_s22 + $0x600] sm:$0xff]  ;;  %13611 = vst [vmem:[%s20113_s21 + $0x5d0] sm:$0xff] %v12660_v52  ;;  %v12661_v13 = vmax.f32 %v12549_v38, 0.0  ;;  %v21776_v15 = vld [vmem:[#allocation96_spill] sm:$0xff]  ;;  %v9065_v3 = vpop.f32.mrb[237].mxu0  ;;  %v11323_v63 = vpop.f32.mrb[221].mxu1 }
 0xaa9   : > { %v12441_v36 = vmul.f32 0.3, %v13504_v50  ;;  %v10133_v1 = vmul.f32 0.3, %v10021_v45  ;;  %10464 = vst [vmem:[%s20113_s21 + $0x2c0] sm:$0xff] %v10352_v9  ;;  %13609 = vst [vmem:[%s20113_s21 + $0x5c0] sm:$0xff] %v12658_v14  ;;  %v9910_v0 = vadd.f32 %v15636_v46, %v21776_v15  ;;  %v12214_v27 = vadd.f32 %v20780_v34, %v11323_v63 }
 0xaaa   : > { %v10355_v61 = vmax.f32 %v10243_v28, 0.0  ;;  %v10353_v10 = vmax.f32 %v10241_v30, 0.0  ;;  %v12659_v19 = vmax.f32 %v12547_v43, 0.0  ;;  %v12439_v39 = vmul.f32 0.3, %v13502_v5  ;;  %13612 = vst [vmem:[%s20113_s21 + $0x5d8] sm:$0xff] %v12661_v13  ;;  %v21196_v13 = vpop.permute.xlu1 %12045 }
 0xaab   : > { %v21166_v16 = vmul.f32 0.3, %v10026_v40  ;;  %v21168_v26 = vmul.f32 0.3, %v13507_v21  ;;  %v21777_v32 = vld [vmem:[#allocation93_spill] sm:$0xff]  ;;  %v15637_v54 = vpop.f32.mrb[238].mxu0  ;;  %v10246_v22 = vadd.f32 %v21119_v8, %v9910_v0  ;;  %v12552_v49 = vadd.f32 %v21125_v55, %v12216_v41 }
 0xaac   : > { %10467 = vst [vmem:[%s20113_s21 + $0x2d8] sm:$0xff] %v10355_v61  ;;  %10465 = vst [vmem:[%s20113_s21 + $0x2c8] sm:$0xff] %v10353_v10  ;;  %v9908_v60 = vadd.f32 %v21777_v32, %v9065_v3  ;;  %v15877_v25 = vpop.f32.mrb[222].mxu1  ;;  %v21174_v2 = vmul.f32 0.3, %v10024_v35  ;;  %v21778_v20 = vld [vmem:[#allocation130_spill] sm:$0xff]  ;;  %v12550_v56 = vadd.f32 %v21133_v62, %v12214_v27  ;;  %v21194_v61 = vpop.permute.xlu0 %12050 }
 0xaad   : > { %13610 = vst [vmem:[%s20113_s21 + $0x5c8] sm:$0xff] %v12659_v19  ;;  %v21176_v12 = vmul.f32 0.3, %v13505_v17  ;;  %v9911_v4 = vadd.f32 %v15637_v54, %v21778_v20  ;;  %v12217_v33 = vadd.f32 %v15877_v25, %v20874_v53  ;;  %v9068_v50 = vpop.f32.mrb[239].mxu0  ;;  %v11326_v45 = vpop.f32.mrb[223].mxu1  ;;  %v21779_v52 = vld [vmem:[#allocation129_spill] sm:$0xff] }
 0xaae   : > { %v10244_v34 = vadd.f32 %v21127_v7, %v9908_v60  ;;  %v9909_v28 = vadd.f32 %v21779_v52, %v9068_v50  ;;  %v12215_v8 = vadd.f32 %v20828_v31, %v11326_v45  ;;  %v10027_v38 = vld [vmem:[%s17614_s22 + $0x318] sm:$0xff]  ;;  %v10358_v5 = vmax.f32 %v10246_v22, 0.0  ;;  %v10025_v14 = vld [vmem:[%s17614_s22 + $0x308] sm:$0xff]  ;;  %v10030_v35 = vld [vmem:[%s17614_s22 + $0x330] sm:$0xff]  ;;  %v15640_v59 = vpop.f32.mrb[240].mxu0 }
 0xaaf   : > { %v13508_v55 = vld [vmem:[%s17614_s22 + $0x618] sm:$0xff]  ;;  %v12664_v40 = vmax.f32 %v12552_v49, 0.0  ;;  %v10247_v53 = vadd.f32 %v21135_v24, %v9911_v4  ;;  %v12553_v9 = vadd.f32 %v12441_v36, %v12217_v33  ;;  %v13506_v7 = vld [vmem:[%s17614_s22 + $0x608] sm:$0xff]  ;;  %v12662_v62 = vmax.f32 %v12550_v56, 0.0  ;;  %v13511_v17 = vld [vmem:[%s17614_s22 + $0x630] sm:$0xff]  ;;  %v9081_v63 = vpop.f32.mrb[241].mxu0 }
 0xab0   : > { %v10356_v30 = vmax.f32 %v10244_v34, 0.0  ;;  %v10245_v43 = vadd.f32 %v10133_v1, %v9909_v28  ;;  %v12551_v21 = vadd.f32 %v12439_v39, %v12215_v8  ;;  %v10028_v31 = vld [vmem:[%s17614_s22 + $0x320] sm:$0xff]  ;;  %10470 = vst [vmem:[%s20113_s21 + $0x2f0] sm:$0xff] %v10358_v5  ;;  %v10139_v10 = vmul.f32 0.3, %v10027_v38  ;;  %v15880_v39 = vpop.f32.mrb[224].mxu1 }
 0xab1   : > { %13615 = vst [vmem:[%s20113_s21 + $0x5f0] sm:$0xff] %v12664_v40  ;;  %v10359_v24 = vmax.f32 %v10247_v53, 0.0  ;;  %v12665_v36 = vmax.f32 %v12553_v9, 0.0  ;;  %v12445_v19 = vmul.f32 0.3, %v13508_v55  ;;  %13613 = vst [vmem:[%s20113_s21 + $0x5e0] sm:$0xff] %v12662_v62  ;;  %v12220_v3 = vadd.f32 %v15880_v39, %v20918_v58 }
 0xab2   : > { %10468 = vst [vmem:[%s20113_s21 + $0x2e0] sm:$0xff] %v10356_v30  ;;  %v10357_v1 = vmax.f32 %v10245_v43, 0.0  ;;  %v12663_v46 = vmax.f32 %v12551_v21, 0.0  ;;  %v10137_v15 = vmul.f32 0.3, %v10025_v14  ;;  %v21780_v0 = vld [vmem:[#allocation100_spill] sm:$0xff] }
 0xab3   : > { %10471 = vst [vmem:[%s20113_s21 + $0x2f8] sm:$0xff] %v10359_v24  ;;  %13616 = vst [vmem:[%s20113_s21 + $0x5f8] sm:$0xff] %v12665_v36  ;;  %v9914_v41 = vadd.f32 %v15640_v59, %v21780_v0  ;;  %v11339_v32 = vpop.f32.mrb[225].mxu1  ;;  %v12443_v60 = vmul.f32 0.3, %v13506_v7  ;;  %v21781_v54 = vld [vmem:[#allocation98_spill] sm:$0xff]  ;;  %v12556_v50 = vadd.f32 %v21168_v26, %v12220_v3 }
 0xab4   : > { %v21206_v27 = vmul.f32 0.3, %v10030_v35  ;;  %10469 = vst [vmem:[%s20113_s21 + $0x2e8] sm:$0xff] %v10357_v1  ;;  %13614 = vst [vmem:[%s20113_s21 + $0x5e8] sm:$0xff] %v12663_v46  ;;  %v9912_v25 = vadd.f32 %v21781_v54, %v9081_v63  ;;  %v12218_v22 = vadd.f32 %v20872_v11, %v11339_v32  ;;  %v15641_v49 = vpop.f32.mrb[242].mxu0  ;;  %v15881_v20 = vpop.f32.mrb[226].mxu1 }
 0xab5   : > { %v12448_v4 = vmul.f32 0.3, %v13511_v17  ;;  %v21212_v33 = vmul.f32 0.3, %v10028_v31  ;;  %v10250_v58 = vadd.f32 %v21166_v16, %v9914_v41  ;;  %v21782_v45 = vld [vmem:[#allocation132_spill] sm:$0xff]  ;;  %v12221_v56 = vadd.f32 %v15881_v20, %v20969_v18  ;;  %v9084_v52 = vpop.f32.mrb[243].mxu0  ;;  %v21231_v17 = vpop.permute.xlu1 %12055 }
 0xab6   : > { %v9915_v34 = vadd.f32 %v15641_v49, %v21782_v45  ;;  %v11342_v28 = vpop.f32.mrb[227].mxu1  ;;  %v10248_v11 = vadd.f32 %v21174_v2, %v9912_v25  ;;  %v12554_v8 = vadd.f32 %v21176_v12, %v12218_v22  ;;  %v21783_v38 = vld [vmem:[#allocation131_spill] sm:$0xff]  ;;  %v13509_v5 = vld [vmem:[%s17614_s22 + $0x620] sm:$0xff]  ;;  %v10031_v26 = vld [vmem:[%s17614_s22 + $0x338] sm:$0xff]  ;;  %v12668_v53 = vmax.f32 %v12556_v50, 0.0  ;;  %v15644_v46 = vpop.f32.mrb[244].mxu0 }
 0xab7   : > { %v9913_v55 = vadd.f32 %v21783_v38, %v9084_v52  ;;  %v12219_v16 = vadd.f32 %v20920_v51, %v11342_v28  ;;  %v10362_v40 = vmax.f32 %v10250_v58, 0.0  ;;  %v12557_v9 = vadd.f32 %v12445_v19, %v12221_v56  ;;  %v13512_v14 = vld [vmem:[%s17614_s22 + $0x638] sm:$0xff]  ;;  %v10029_v7 = vld [vmem:[%s17614_s22 + $0x328] sm:$0xff]  ;;  %v10034_v21 = vld [vmem:[%s17614_s22 + $0x350] sm:$0xff]  ;;  %v21229_v51 = vpop.permute.xlu0 %12060  ;;  %v15884_v59 = vpop.f32.mrb[228].mxu1 }
 0xab8   : > { %v10251_v18 = vadd.f32 %v10139_v10, %v9915_v34  ;;  %v10360_v2 = vmax.f32 %v10248_v11, 0.0  ;;  %v12666_v12 = vmax.f32 %v12554_v8, 0.0  ;;  %v13510_v43 = vld [vmem:[%s17614_s22 + $0x628] sm:$0xff]  ;;  %v13515_v35 = vld [vmem:[%s17614_s22 + $0x650] sm:$0xff]  ;;  %13619 = vst [vmem:[%s20113_s21 + $0x610] sm:$0xff] %v12668_v53  ;;  %v12224_v41 = vadd.f32 %v15884_v59, %v21016_v42  ;;  %v9097_v3 = vpop.f32.mrb[245].mxu0 }
 0xab9   : > { %v10249_v30 = vadd.f32 %v10137_v15, %v9913_v55  ;;  %v12555_v62 = vadd.f32 %v12443_v60, %v12219_v16  ;;  %10474 = vst [vmem:[%s20113_s21 + $0x310] sm:$0xff] %v10362_v40  ;;  %v12669_v24 = vmax.f32 %v12557_v9, 0.0  ;;  %v12446_v36 = vmul.f32 0.3, %v13509_v5  ;;  %v21784_v15 = vld [vmem:[#allocation104_spill] sm:$0xff]  ;;  %v11355_v63 = vpop.f32.mrb[229].mxu1 }
 0xaba   : > { %v10363_v31 = vmax.f32 %v10251_v18, 0.0  ;;  %v10143_v10 = vmul.f32 0.3, %v10031_v26  ;;  %10472 = vst [vmem:[%s20113_s21 + $0x300] sm:$0xff] %v10360_v2  ;;  %13617 = vst [vmem:[%s20113_s21 + $0x600] sm:$0xff] %v12666_v12  ;;  %v9918_v0 = vadd.f32 %v15644_v46, %v21784_v15  ;;  %v21785_v54 = vld [vmem:[#allocation102_spill] sm:$0xff]  ;;  %v12222_v22 = vadd.f32 %v20967_v23, %v11355_v63 }
 0xabb   : > { %v10361_v19 = vmax.f32 %v10249_v30, 0.0  ;;  %v12667_v1 = vmax.f32 %v12555_v62, 0.0  ;;  %v12449_v39 = vmul.f32 0.3, %v13512_v14  ;;  %13620 = vst [vmem:[%s20113_s21 + $0x618] sm:$0xff] %v12669_v24  ;;  %v9916_v25 = vadd.f32 %v21785_v54, %v9097_v3  ;;  %v15645_v49 = vpop.f32.mrb[246].mxu0  ;;  %v21260_v62 = vpop.permute.xlu1 %12065 }
 0xabc   : > { %10475 = vst [vmem:[%s20113_s21 + $0x318] sm:$0xff] %v10363_v31  ;;  %v10141_v32 = vmul.f32 0.3, %v10029_v7  ;;  %v12447_v60 = vmul.f32 0.3, %v13510_v43  ;;  %v15885_v20 = vpop.f32.mrb[230].mxu1  ;;  %v10254_v45 = vadd.f32 %v21206_v27, %v9918_v0  ;;  %v12560_v42 = vadd.f32 %v12448_v4, %v12224_v41 }
 0xabd   : > { %10473 = vst [vmem:[%s20113_s21 + $0x308] sm:$0xff] %v10361_v19  ;;  %13618 = vst [vmem:[%s20113_s21 + $0x608] sm:$0xff] %v12667_v1  ;;  %v10146_v58 = vmul.f32 0.3, %v10034_v21  ;;  %v12452_v50 = vmul.f32 0.3, %v13515_v35  ;;  %v12225_v52 = vadd.f32 %v15885_v20, %v21067_v48  ;;  %v10252_v8 = vadd.f32 %v21212_v33, %v9916_v25 }
 0xabe   : > { %v21786_v34 = vld [vmem:[#allocation134_spill] sm:$0xff]  ;;  %v9100_v28 = vpop.f32.mrb[247].mxu0  ;;  %v11358_v11 = vpop.f32.mrb[231].mxu1  ;;  %v12558_v23 = vadd.f32 %v12446_v36, %v12222_v22  ;;  %v21787_v38 = vld [vmem:[#allocation133_spill] sm:$0xff]  ;;  %v10366_v4 = vmax.f32 %v10254_v45, 0.0  ;;  %v12672_v26 = vmax.f32 %v12560_v42, 0.0 }
 0xabf   : > { %v9919_v56 = vadd.f32 %v15645_v49, %v21786_v34  ;;  %v9917_v55 = vadd.f32 %v21787_v38, %v9100_v28  ;;  %v12223_v16 = vadd.f32 %v21018_v47, %v11358_v11  ;;  %v10032_v27 = vld [vmem:[%s17614_s22 + $0x340] sm:$0xff]  ;;  %v12561_v48 = vadd.f32 %v12449_v39, %v12225_v52  ;;  %v10035_v53 = vld [vmem:[%s17614_s22 + $0x358] sm:$0xff]  ;;  %v10033_v2 = vld [vmem:[%s17614_s22 + $0x348] sm:$0xff]  ;;  %v21258_v47 = vpop.permute.xlu0 %12070  ;;  %v15888_v19 = vpop.f32.mrb[232].mxu1 }
 0xac0   : > { %v13513_v5 = vld [vmem:[%s17614_s22 + $0x640] sm:$0xff]  ;;  %v13516_v18 = vld [vmem:[%s17614_s22 + $0x658] sm:$0xff]  ;;  %v10364_v33 = vmax.f32 %v10252_v8, 0.0  ;;  %v12670_v9 = vmax.f32 %v12558_v23, 0.0  ;;  %v13514_v12 = vld [vmem:[%s17614_s22 + $0x648] sm:$0xff]  ;;  %10478 = vst [vmem:[%s20113_s21 + $0x330] sm:$0xff] %v10366_v4  ;;  %v12228_v39 = vadd.f32 %v15888_v19, %v21111_v29  ;;  %v21282_v4 = vpop.permute.xlu1 %12075 }
 0xac1   : > { %v10255_v40 = vadd.f32 %v10143_v10, %v9919_v56  ;;  %v10253_v14 = vadd.f32 %v10141_v32, %v9917_v55  ;;  %v12559_v7 = vadd.f32 %v12447_v60, %v12223_v16  ;;  %v10038_v30 = vld [vmem:[%s17614_s22 + $0x370] sm:$0xff]  ;;  %13623 = vst [vmem:[%s20113_s21 + $0x630] sm:$0xff] %v12672_v26  ;;  %v12673_v21 = vmax.f32 %v12561_v48, 0.0  ;;  %v15648_v10 = vpop.f32.mrb[248].mxu0  ;;  %v11371_v0 = vpop.f32.mrb[233].mxu1  ;;  %v21789_v63 = vld [vmem:[#allocation106_spill] sm:$0xff] }
 0xac2   : > { %v10144_v35 = vmul.f32 0.3, %v10032_v27  ;;  %v12450_v31 = vmul.f32 0.3, %v13513_v5  ;;  %10476 = vst [vmem:[%s20113_s21 + $0x320] sm:$0xff] %v10364_v33  ;;  %13621 = vst [vmem:[%s20113_s21 + $0x620] sm:$0xff] %v12670_v9  ;;  %v12226_v60 = vadd.f32 %v21065_v6, %v11371_v0  ;;  %v12564_v45 = vadd.f32 %v12452_v50, %v12228_v39 }
 0xac3   : > { %v10367_v43 = vmax.f32 %v10255_v40, 0.0  ;;  %v10365_v24 = vmax.f32 %v10253_v14, 0.0  ;;  %v12671_v36 = vmax.f32 %v12559_v7, 0.0  ;;  %v10147_v1 = vmul.f32 0.3, %v10035_v53  ;;  %13624 = vst [vmem:[%s20113_s21 + $0x638] sm:$0xff] %v12673_v21  ;;  %v21287_v9 = vpop.permute.xlu0 %12080 }
 0xac4   : > { %v21788_v46 = vld [vmem:[#allocation108_spill] sm:$0xff]  ;;  %v9113_v15 = vpop.f32.mrb[249].mxu0  ;;  %v12453_v41 = vmul.f32 0.3, %v13516_v18  ;;  %v10145_v3 = vmul.f32 0.3, %v10033_v2  ;;  %v12562_v11 = vadd.f32 %v12450_v31, %v12226_v60 }
 0xac5   : > { %10479 = vst [vmem:[%s20113_s21 + $0x338] sm:$0xff] %v10367_v43  ;;  %v9922_v59 = vadd.f32 %v15648_v10, %v21788_v46  ;;  %10477 = vst [vmem:[%s20113_s21 + $0x328] sm:$0xff] %v10365_v24  ;;  %v9920_v32 = vadd.f32 %v21789_v63, %v9113_v15  ;;  %v15649_v54 = vpop.f32.mrb[250].mxu0  ;;  %v15889_v25 = vpop.f32.mrb[234].mxu1  ;;  %v12451_v22 = vmul.f32 0.3, %v13514_v12 }
 0xac6   : > { %13622 = vst [vmem:[%s20113_s21 + $0x628] sm:$0xff] %v12671_v36  ;;  %v10150_v49 = vmul.f32 0.3, %v10038_v30  ;;  %v21790_v29 = vld [vmem:[#allocation136_spill] sm:$0xff]  ;;  %v12229_v34 = vadd.f32 %v15889_v25, %v21156_v57  ;;  %v9116_v56 = vpop.f32.mrb[251].mxu0  ;;  %v11374_v52 = vpop.f32.mrb[235].mxu1 }
 0xac7   : > { %v10258_v20 = vadd.f32 %v10146_v58, %v9922_v59  ;;  %v9923_v42 = vadd.f32 %v15649_v54, %v21790_v29  ;;  %v10256_v28 = vadd.f32 %v10144_v35, %v9920_v32  ;;  %v21791_v8 = vld [vmem:[#allocation135_spill] sm:$0xff]  ;;  %v12227_v23 = vadd.f32 %v21113_v37, %v11374_v52  ;;  %v10036_v58 = vld [vmem:[%s17614_s22 + $0x360] sm:$0xff]  ;;  %v10039_v5 = vld [vmem:[%s17614_s22 + $0x378] sm:$0xff]  ;;  %v15652_v21 = vpop.f32.mrb[252].mxu0  ;;  %v15892_v35 = vpop.f32.mrb[236].mxu1 }
 0xac8   : > { %v9921_v6 = vadd.f32 %v21791_v8, %v9116_v56  ;;  %v13519_v38 = vld [vmem:[%s17614_s22 + $0x670] sm:$0xff]  ;;  %v12676_v55 = vmax.f32 %v12564_v45, 0.0  ;;  %v12565_v27 = vadd.f32 %v12453_v41, %v12229_v34  ;;  %v13517_v57 = vld [vmem:[%s17614_s22 + $0x660] sm:$0xff]  ;;  %v12674_v40 = vmax.f32 %v12562_v11, 0.0  ;;  %v13520_v37 = vld [vmem:[%s17614_s22 + $0x678] sm:$0xff]  ;;  %v9129_v19 = vpop.f32.mrb[253].mxu0  ;;  %v21303_v29 = vpop.permute.xlu1 %12085 }
 0xac9   : > { %v10370_v50 = vmax.f32 %v10258_v20, 0.0  ;;  %v10259_v16 = vadd.f32 %v10147_v1, %v9923_v42  ;;  %v10368_v26 = vmax.f32 %v10256_v28, 0.0  ;;  %v12563_v53 = vadd.f32 %v12451_v22, %v12227_v23  ;;  %v10037_v18 = vld [vmem:[%s17614_s22 + $0x368] sm:$0xff]  ;;  %v21792_v24 = vld [vmem:[#allocation112_spill] sm:$0xff]  ;;  %v11387_v1 = vpop.f32.mrb[237].mxu1  ;;  %v15653_v41 = vpop.f32.mrb[254].mxu0 }
 0xaca   : > { %v10257_v48 = vadd.f32 %v10145_v3, %v9921_v6  ;;  %v13518_v33 = vld [vmem:[%s17614_s22 + $0x668] sm:$0xff]  ;;  %13627 = vst [vmem:[%s20113_s21 + $0x650] sm:$0xff] %v12676_v55  ;;  %v12677_v7 = vmax.f32 %v12565_v27, 0.0  ;;  %v12456_v2 = vmul.f32 0.3, %v13519_v38  ;;  %13625 = vst [vmem:[%s20113_s21 + $0x640] sm:$0xff] %v12674_v40  ;;  %v9926_v36 = vadd.f32 %v15652_v21, %v21792_v24 }
 0xacb   : > { %10482 = vst [vmem:[%s20113_s21 + $0x350] sm:$0xff] %v10370_v50  ;;  %v10371_v14 = vmax.f32 %v10259_v16, 0.0  ;;  %v10148_v12 = vmul.f32 0.3, %v10036_v58  ;;  %10480 = vst [vmem:[%s20113_s21 + $0x340] sm:$0xff] %v10368_v26  ;;  %v12675_v43 = vmax.f32 %v12563_v53, 0.0  ;;  %v12232_v10 = vadd.f32 %v15892_v35, %v21194_v61 }
 0xacc   : > { %v10369_v30 = vmax.f32 %v10257_v48, 0.0  ;;  %v12454_v31 = vmul.f32 0.3, %v13517_v57  ;;  %13628 = vst [vmem:[%s20113_s21 + $0x658] sm:$0xff] %v12677_v7  ;;  %v10151_v46 = vmul.f32 0.3, %v10039_v5  ;;  %v12230_v0 = vadd.f32 %v21154_v44, %v11387_v1  ;;  %v12091_v5 = vpop.permute.xlu0 %12090 }
 0xacd   : > { %10483 = vst [vmem:[%s20113_s21 + $0x358] sm:$0xff] %v10371_v14  ;;  %v12457_v59 = vmul.f32 0.3, %v13520_v37  ;;  %13626 = vst [vmem:[%s20113_s21 + $0x648] sm:$0xff] %v12675_v43  ;;  %v21793_v39 = vld [vmem:[#allocation110_spill] sm:$0xff]  ;;  %v15893_v3 = vpop.f32.mrb[238].mxu1  ;;  %v10262_v60 = vadd.f32 %v10150_v49, %v9926_v36  ;;  %v12568_v54 = vadd.f32 %v12456_v2, %v12232_v10  ;;  %v12096_v14 = vpop.permute.xlu1 %12095 }
 0xace   : > { %10481 = vst [vmem:[%s20113_s21 + $0x348] sm:$0xff] %v10369_v30  ;;  %v9924_v15 = vadd.f32 %v21793_v39, %v9129_v19  ;;  %v10149_v63 = vmul.f32 0.3, %v10037_v18  ;;  %v12455_v32 = vmul.f32 0.3, %v13518_v33  ;;  %v21794_v25 = vld [vmem:[#allocation138_spill] sm:$0xff]  ;;  %v12233_v22 = vadd.f32 %v15893_v3, %v21231_v17 }
 0xacf   : > { %v9927_v61 = vadd.f32 %v15653_v41, %v21794_v25  ;;  %v9132_v20 = vpop.f32.mrb[255].mxu0  ;;  %v11390_v45 = vpop.f32.mrb[239].mxu1  ;;  %v12566_v44 = vadd.f32 %v12454_v31, %v12230_v0  ;;  %v21795_v34 = vld [vmem:[#allocation137_spill] sm:$0xff]  ;;  %v13523_v49 = vld [vmem:[%s17614_s22 + $0x690] sm:$0xff]  ;;  %v10374_v28 = vmax.f32 %v10262_v60, 0.0  ;;  %v12680_v11 = vmax.f32 %v12568_v54, 0.0 }
 0xad0   : > { %v10260_v42 = vadd.f32 %v10148_v12, %v9924_v15  ;;  %v9925_v56 = vadd.f32 %v21795_v34, %v9132_v20  ;;  %v12231_v52 = vadd.f32 %v21196_v13, %v11390_v45  ;;  %v12569_v17 = vadd.f32 %v12457_v59, %v12233_v22  ;;  %v13521_v6 = vld [vmem:[%s17614_s22 + $0x680] sm:$0xff]  ;;  %v13524_v55 = vld [vmem:[%s17614_s22 + $0x698] sm:$0xff]  ;;  %v13522_v57 = vld [vmem:[%s17614_s22 + $0x688] sm:$0xff]  ;;  %v15896_v48 = vpop.f32.mrb[240].mxu1  ;;  %v12101_v19 = vpop.permute.xlu0 %12100 }
 0xad1   : > { %v10263_v8 = vadd.f32 %v10151_v46, %v9927_v61  ;;  %v12678_v38 = vmax.f32 %v12566_v44, 0.0  ;;  %10486 = vst [vmem:[%s20113_s21 + $0x370] sm:$0xff] %v10374_v28  ;;  %13631 = vst [vmem:[%s20113_s21 + $0x670] sm:$0xff] %v12680_v11  ;;  %v12460_v27 = vmul.f32 0.3, %v13523_v49  ;;  %v12236_v37 = vadd.f32 %v15896_v48, %v21258_v47  ;;  %v11403_v18 = vpop.f32.mrb[241].mxu1 }
 0xad2   : > { %v10372_v23 = vmax.f32 %v10260_v42, 0.0  ;;  %v10261_v58 = vadd.f32 %v10149_v63, %v9925_v56  ;;  %v12567_v50 = vadd.f32 %v12455_v32, %v12231_v52  ;;  %v12681_v13 = vmax.f32 %v12569_v17, 0.0  ;;  %v15897_v2 = vpop.f32.mrb[242].mxu1  ;;  %v13527_v31 = vld [vmem:[%s17614_s22 + $0x6b0] sm:$0xff]  ;;  %v13525_v10 = vld [vmem:[%s17614_s22 + $0x6a0] sm:$0xff]  ;;  %v13528_v46 = vld [vmem:[%s17614_s22 + $0x6b8] sm:$0xff] }
 0xad3   : > { %v10375_v16 = vmax.f32 %v10263_v8, 0.0  ;;  %13629 = vst [vmem:[%s20113_s21 + $0x660] sm:$0xff] %v12678_v38  ;;  %v12458_v53 = vmul.f32 0.3, %v13521_v6  ;;  %v12461_v33 = vmul.f32 0.3, %v13524_v55  ;;  %v12234_v7 = vadd.f32 %v21229_v51, %v11403_v18 }
 0xad4   : > { %10484 = vst [vmem:[%s20113_s21 + $0x360] sm:$0xff] %v10372_v23  ;;  %v10373_v26 = vmax.f32 %v10261_v58, 0.0  ;;  %v12679_v40 = vmax.f32 %v12567_v50, 0.0  ;;  %13632 = vst [vmem:[%s20113_s21 + $0x678] sm:$0xff] %v12681_v13  ;;  %v12459_v12 = vmul.f32 0.3, %v13522_v57  ;;  %v12572_v30 = vadd.f32 %v12460_v27, %v12236_v37  ;;  %v12111_v45 = vpop.permute.xlu0 %12110 }
 0xad5   : > { %10487 = vst [vmem:[%s20113_s21 + $0x378] sm:$0xff] %v10375_v16  ;;  %v12237_v43 = vadd.f32 %v15897_v2, %v21282_v4  ;;  %v11406_v21 = vpop.f32.mrb[243].mxu1  ;;  %v12570_v35 = vadd.f32 %v12458_v53, %v12234_v7  ;;  %v12464_v39 = vmul.f32 0.3, %v13527_v31  ;;  %v13526_v15 = vld [vmem:[%s17614_s22 + $0x6a8] sm:$0xff]  ;;  %v12106_v4 = vpop.permute.xlu1 %12105  ;;  %v13531_v34 = vld [vmem:[%s17614_s22 + $0x6d0] sm:$0xff] }
 0xad6   : > { %10485 = vst [vmem:[%s20113_s21 + $0x368] sm:$0xff] %v10373_v26  ;;  %13630 = vst [vmem:[%s20113_s21 + $0x668] sm:$0xff] %v12679_v40  ;;  %v12235_v47 = vadd.f32 %v21260_v62, %v11406_v21  ;;  %v12684_v24 = vmax.f32 %v12572_v30, 0.0  ;;  %v15900_v41 = vpop.f32.mrb[244].mxu1  ;;  %v12462_v62 = vmul.f32 0.3, %v13525_v10 }
 0xad7   : > { %v12573_v36 = vadd.f32 %v12461_v33, %v12237_v43  ;;  %v12682_v1 = vmax.f32 %v12570_v35, 0.0  ;;  %v12240_v3 = vadd.f32 %v15900_v41, %v12091_v5  ;;  %v11419_v63 = vpop.f32.mrb[245].mxu1  ;;  %v12465_v32 = vmul.f32 0.3, %v13528_v46  ;;  %v13529_v49 = vld [vmem:[%s17614_s22 + $0x6c0] sm:$0xff]  ;;  %v13532_v8 = vld [vmem:[%s17614_s22 + $0x6d8] sm:$0xff] }
 0xad8   : > { %v12571_v51 = vadd.f32 %v12459_v12, %v12235_v47  ;;  %13635 = vst [vmem:[%s20113_s21 + $0x690] sm:$0xff] %v12684_v24  ;;  %v12238_v60 = vadd.f32 %v21287_v9, %v11419_v63  ;;  %v15901_v54 = vpop.f32.mrb[246].mxu1  ;;  %v12463_v25 = vmul.f32 0.3, %v13526_v15  ;;  %v12468_v6 = vmul.f32 0.3, %v13531_v34  ;;  %v12121_v13 = vpop.permute.xlu0 %12120 }
 0xad9   : > { %v12685_v59 = vmax.f32 %v12573_v36, 0.0  ;;  %13633 = vst [vmem:[%s20113_s21 + $0x680] sm:$0xff] %v12682_v1  ;;  %v12576_v61 = vadd.f32 %v12464_v39, %v12240_v3  ;;  %v12241_v22 = vadd.f32 %v15901_v54, %v12096_v14  ;;  %v11422_v20 = vpop.f32.mrb[247].mxu1  ;;  %v12116_v28 = vpop.permute.xlu1 %12115  ;;  %v13530_v23 = vld [vmem:[%s17614_s22 + $0x6c8] sm:$0xff]  ;;  %v12466_v50 = vmul.f32 0.3, %v13529_v49 }
 0xada   : > { %v12683_v0 = vmax.f32 %v12571_v51, 0.0  ;;  %v12574_v42 = vadd.f32 %v12462_v62, %v12238_v60  ;;  %v12239_v44 = vadd.f32 %v21303_v29, %v11422_v20  ;;  %v15904_v58 = vpop.f32.mrb[248].mxu1  ;;  %v12469_v16 = vmul.f32 0.3, %v13532_v8  ;;  %v13535_v33 = vld [vmem:[%s17614_s22 + $0x6f0] sm:$0xff]  ;;  %v13533_v2 = vld [vmem:[%s17614_s22 + $0x6e0] sm:$0xff] }
 0xadb   : > { %13636 = vst [vmem:[%s20113_s21 + $0x698] sm:$0xff] %v12685_v59  ;;  %v12688_v56 = vmax.f32 %v12576_v61, 0.0  ;;  %v12577_v52 = vadd.f32 %v12465_v32, %v12241_v22  ;;  %v12244_v29 = vadd.f32 %v15904_v58, %v12111_v45  ;;  %v11435_v55 = vpop.f32.mrb[249].mxu1  ;;  %v12467_v5 = vmul.f32 0.3, %v13530_v23  ;;  %v13536_v43 = vld [vmem:[%s17614_s22 + $0x6f8] sm:$0xff] }
 0xadc   : > { %13634 = vst [vmem:[%s20113_s21 + $0x688] sm:$0xff] %v12683_v0  ;;  %v12686_v9 = vmax.f32 %v12574_v42, 0.0  ;;  %v12575_v11 = vadd.f32 %v12463_v25, %v12239_v44  ;;  %v12242_v27 = vadd.f32 %v12101_v19, %v11435_v55  ;;  %v15905_v57 = vpop.f32.mrb[250].mxu1  ;;  %v12472_v35 = vmul.f32 0.3, %v13535_v33  ;;  %v13534_v47 = vld [vmem:[%s17614_s22 + $0x6e8] sm:$0xff]  ;;  %v12131_v31 = vpop.permute.xlu0 %12130 }
 0xadd   : > { %13639 = vst [vmem:[%s20113_s21 + $0x6b0] sm:$0xff] %v12688_v56  ;;  %v12689_v17 = vmax.f32 %v12577_v52, 0.0  ;;  %v12580_v26 = vadd.f32 %v12468_v6, %v12244_v29  ;;  %v12245_v40 = vadd.f32 %v15905_v57, %v12116_v28  ;;  %v11438_v48 = vpop.f32.mrb[251].mxu1  ;;  %v12126_v53 = vpop.permute.xlu1 %12125  ;;  %v12470_v10 = vmul.f32 0.3, %v13533_v2  ;;  %s12826_s22 = sshll.u32 %s20113_s21, 4  ;;  %s21358_s22 = int_to_ptr.vmem [resolvable:$true] %s12826_s22 }
 0xade   : > { %13637 = vst [vmem:[%s20113_s21 + $0x6a0] sm:$0xff] %v12686_v9  ;;  %v12687_v38 = vmax.f32 %v12575_v11, 0.0  ;;  %v12578_v37 = vadd.f32 %v12466_v50, %v12242_v27  ;;  %v12243_v18 = vadd.f32 %v12106_v4, %v11438_v48  ;;  %v15908_v36 = vpop.f32.mrb[252].mxu1  ;;  %v12473_v51 = vmul.f32 0.3, %v13536_v43  ;;  %s17190_s29 = scalar_lea.vmem %s21358_s22, 28672  ;;  %p17197_p13 = scmp.lt.s32.totalorder %s21358_s22, %s17195_s4 }
 0xadf   : > { %13640 = vst [vmem:[%s20113_s21 + $0x6b8] sm:$0xff] %v12689_v17  ;;  %v12692_v14 = vmax.f32 %v12580_v26, 0.0  ;;  %v12581_v7 = vadd.f32 %v12469_v16, %v12245_v40  ;;  %v12248_v19 = vadd.f32 %v15908_v36, %v12131_v31  ;;  %v11451_v1 = vpop.f32.mrb[253].mxu1  ;;  %v12471_v15 = vmul.f32 0.3, %v13534_v47  ;;  %p17191_p5 = scmp.ne.s32.totalorder %s21358_s22, %s17190_s29  ;;  %p17198_p0 = scmp.lt.s32.totalorder %s17196_s11, %s17190_s29 }
 0xae0   : > { %13638 = vst [vmem:[%s20113_s21 + $0x6a8] sm:$0xff] %v12687_v38  ;;  %v12690_v12 = vmax.f32 %v12578_v37, 0.0  ;;  %v12579_v30 = vadd.f32 %v12467_v5, %v12243_v18  ;;  %v12246_v59 = vadd.f32 %v12121_v13, %v11451_v1  ;;  %v15909_v39 = vpop.f32.mrb[254].mxu1 }
 0xae1   : > { %13643 = vst [vmem:[%s20113_s21 + $0x6d0] sm:$0xff] %v12692_v14  ;;  %v12693_v21 = vmax.f32 %v12581_v7, 0.0  ;;  %v12136_v46 = vpop.permute.xlu1 %12135  ;;  %v12584_v4 = vadd.f32 %v12472_v35, %v12248_v19  ;;  %v11454_v41 = vpop.f32.mrb[255].mxu1  ;;  %p17192_p12 = pnand %p17191_p5, %p21797_p9  ;;  %p17199_p2 = por %p17198_p0, %p17197_p13 }
 0xae2   : > { %13641 = vst [vmem:[%s20113_s21 + $0x6c0] sm:$0xff] %v12690_v12  ;;  %v12691_v24 = vmax.f32 %v12579_v30, 0.0  ;;  %v12249_v0 = vadd.f32 %v15909_v39, %v12136_v46  ;;  %v12582_v62 = vadd.f32 %v12470_v10, %v12246_v59  ;;  %v12247_v3 = vadd.f32 %v12126_v53, %v11454_v41 }
 0xae3   : > { %13644 = vst [vmem:[%s20113_s21 + $0x6d8] sm:$0xff] %v12693_v21  ;;  %v12696_v63 = vmax.f32 %v12584_v4, 0.0  ;;  %p17193_p1 = pneg %p17192_p12 }
 0xae4   : > { %13642 = vst [vmem:[%s20113_s21 + $0x6c8] sm:$0xff] %v12691_v24  ;;  %v12585_v32 = vadd.f32 %v12473_v51, %v12249_v0  ;;  %v12694_v60 = vmax.f32 %v12582_v62, 0.0  ;;  %v12583_v54 = vadd.f32 %v12471_v15, %v12247_v3 }
 0xae5   : > { %13647 = vst [vmem:[%s20113_s21 + $0x6f0] sm:$0xff] %v12696_v63  ;;  %p17200_p8 = pnand %p17199_p2, %p17193_p1 }
 0xae6   : > { %v12697_v25 = vmax.f32 %v12585_v32, 0.0  ;;  %13645 = vst [vmem:[%s20113_s21 + $0x6e0] sm:$0xff] %v12694_v60  ;;  %v12695_v61 = vmax.f32 %v12583_v54, 0.0 }
 0xae8   : > { %13648 = vst [vmem:[%s20113_s21 + $0x6f8] sm:$0xff] %v12697_v25  ;;  %13646 = vst [vmem:[%s20113_s21 + $0x6e8] sm:$0xff] %v12695_v61 }
 0xae9   : > { %17203 = shalt.err (!%p17200_p8)
}
 0xaea   : > { %s17204_s10 = scalar_lea.hbm %s21355_s28, 28672  ;;  %s17208_s26 = scalar_lea.hbm %s21796_s30, 57344 }
 0xaeb   : > { %p17205_p4 = scmp.ne.s32.totalorder %s21355_s28, %s17204_s10  ;;  %p17209_p3 = scmp.lt.u32.totalorder %s21355_s28, %s21796_s30 }
 0xaec   : > { %p17210_p6 = scmp.lt.u32.totalorder %s17208_s26, %s17204_s10  ;;  %p17212_p5 = scmp.lt.u32.totalorder %s17204_s10, %s21355_s28 }
 0xaed   : > { %p17206_p10 = pnand %p17205_p4, %p21797_p9 }
 0xaee   : > { %p17211_p7 = por %p17210_p6, %p17209_p3 }
 0xaef   : > { %p17207_p11 = pneg %p17206_p10 }
 0xaf0   : > { %p17213_p12 = por %p17212_p5, %p17211_p7 }
 0xaf2   : > { %p17214_p1 = pnand %p17213_p12, %p17207_p11 }
 0xaf4   : > { %17217 = shalt.err (!%p17214_p1)
}
 0xaf5   : > { %s17287_s29 = smov 128   ;;  %s17288_s1 = smov 8  }
 0xaf6   : > { %16548 = dma.vmem_to_hbm [thread:$0]  (%p21797_p9), %s21358_s22, 28672, %s21355_s28, %s12812_s19, %s17287_s29, %s17287_s29, %s17288_s1  }
 0xaf7 PF: > { %s12841_s4 = sand.u32 1, %s17256_s13   ;;  %p21798_p13 = scmp.ne.s32.totalorder %s21443_s25, 0 }
 0xaf8   : > { %p21799_p0 = scmp.ge.s32.totalorder %s17268_s16, 2  ;;  %s12842_s11 = scalar_lea.sflag [#allocation6], %s12841_s4 }
 0xafa   : > { %p16574_p2 = pnand %p21799_p0, %p21798_p13 }
 0xafc   : > { %17251 = dma.done.wait (!%p16574_p2), %s12842_s11, 28672  }
 0xafd   : > { %17253 = vsyncadd (!%p16574_p2), %s12842_s11, 4294938624  ;;  %p26_p8 = scmp.ge.s32.totalorder %s17532_s27, 4   ;;  %s21800_s13 = smov %s17260_s14 }
 0xafe   : > { %s21801_s14 = smov %s17264_s15  ;;  %s21802_s15 = smov %s17543_s23 }
 0xaff   : > { %s21803_s16 = smov %s17532_s27  ;;  %28 = sbr.rel (!%p26_p8) target bundleno = 13 (0xd), region = 151 }
 0xb06   :  { %12847 = vsyncpa [#allocation5], 1 }
 0xb07   :  { %12849 = vsyncpa [#allocation5 + $0x1], 1 }
 0xb08   :  { %12850 = vsyncpa [#allocation8], 1 }
 0xb09   :  { %12851 = vsyncpa [#allocation11], 1 }
 0xb0a   :  { %12852 = vsyncpa [#allocation14], 1 }
 0xb0b   :  { %12853 = vsyncpa [#allocation6], 1 }
 0xb0c   :  { %12855 = vsyncpa [#allocation6 + $0x1], 1 }

</bundles_post_ra>
